<compile_context>
chip_gen: v7x
topology: tpu7x:2x2x1
jax: 0.10.0
libtpu: 0.0.40
codegen_flags: <defaults>
</compile_context>

<pallas_src>
import functools

import jax
import jax.numpy as jnp
from jax import lax
from jax.experimental import pallas as pl
from jax.experimental.pallas import tpu as pltpu

EPS = 1e-5


# ------------------------------- small helpers -------------------------------
def _ceil_to(a, m):
    return -(-a // m) * m


def _fold_bn(bn):
    gamma, beta, mean, var = bn
    s = gamma / jnp.sqrt(var + EPS)
    return s, beta - mean * s


def _pad_axis(a, axis, n):
    pad = [(0, 0)] * a.ndim
    pad[axis] = (0, n - a.shape[axis])
    return jnp.pad(a, pad)


def _tpu_generation():
    try:
        kind = jax.devices()[0].device_kind.lower()
    except Exception:
        return 6
    for g in (7, 6, 5, 4, 3, 2):
        if f"v{g}" in kind or f"tpu{g}" in kind:
            return g
    return 6


def _vmem_capacity_bytes():
    try:
        info = pltpu.get_tpu_info()
        cap = getattr(info, "vmem_capacity_bytes", None)
        if cap:
            return int(cap)
    except Exception:
        pass
    return 64 * 2 ** 20          # conservative fallback (v7x per-TC VMEM)


def _estimate_vmem(tile_h, d, W, Cinp, Coutp, BCp, mm_bytes, part, fat_k):
    ht = tile_h + 2 * d
    wl = _ceil_to(max(d, 1), 8)
    wp = wl + W + d
    k3 = BCp + (Cinp if part == 'body' else 0)
    xbuf = ht * W * Cinp * 4
    pad = ht * wp * BCp * mm_bytes
    outb = 2 * tile_h * W * Coutp * 4                      # double-buffered out
    wts = (Cinp * BCp + 9 * BCp * BCp + k3 * Coutp) * mm_bytes \
        + (2 * Cinp + 2 * BCp + Coutp) * 4
    cat = ht * W * (3 * BCp if fat_k else BCp) * mm_bytes
    tmp = ht * W * (Cinp + BCp) * 4 + cat \
        + tile_h * W * (2 * BCp + Coutp) * 4 + tile_h * W * k3 * mm_bytes
    return xbuf + pad + outb + wts + tmp


def _pick_tile_h(H, d, W, Cinp, Coutp, BCp, mm_bytes, part, fat_k, budget):
    for th in range(H, 0, -1):
        if H % th == 0 and _estimate_vmem(th, d, W, Cinp, Coutp, BCp,
                                          mm_bytes, part, fat_k) <= budget:
            return th
    return 1


# ----------------------------- Pallas kernel --------------------------------
def _bottleneck_kernel(x_hbm, s1_ref, t1_ref, w1_ref, t2_ref, w2_ref,
                       t3_ref, w3_ref, b3_ref, o_ref,
                       x_buf, pad_ref, sem, *,
                       tile_h, dilation, part, fat_k, bn1_bf16):
    d = dilation
    n = pl.program_id(0)
    t = pl.program_id(1)
    n_tiles = pl.num_programs(1)
    _, H, W, Cinp = x_hbm.shape
    ht = tile_h + 2 * d
    Coutp = o_ref.shape[3]
    BCp = w1_ref.shape[1]
    wp = pad_ref.shape[1]
    wl = wp - W - d                       # sublane-aligned left pad offset
    mm_dtype = w1_ref.dtype               # bf16 on the fast path, f32 otherwise

    # ---- manual halo DMA of the x row tile (BlockSpec can't express overlap) --
    row0 = t * tile_h
    top_start = jnp.maximum(row0 - d, 0)              # clamped (only used if t>0)
    bot_start = jnp.minimum(row0 + tile_h, H - d)     # clamped (only used if t<last)
    cp_mid = pltpu.make_async_copy(x_hbm.at[n, pl.ds(row0, tile_h)],
                                   x_buf.at[d:d + tile_h], sem.at[0])
    cp_top = pltpu.make_async_copy(x_hbm.at[n, pl.ds(top_start, d)],
                                   x_buf.at[0:d], sem.at[1])
    cp_bot = pltpu.make_async_copy(x_hbm.at[n, pl.ds(bot_start, d)],
                                   x_buf.at[d + tile_h:ht], sem.at[2])
    cp_mid.start()

    @pl.when(t > 0)
    def _():
        cp_top.start()

    @pl.when(t < n_tiles - 1)
    def _():
        cp_bot.start()

    # Zero the W-axis zero-padding strips of the conv2 scratch while the DMAs
    # are in flight (they never overlap the h1 store region).  The scratch
    # persists across grid steps, so this is done every step (megacore-safe).
    pad_ref[:, 0:wl, :] = jnp.zeros((ht, wl, BCp), pad_ref.dtype)
    pad_ref[:, wl + W:wp, :] = jnp.zeros((ht, d, BCp), pad_ref.dtype)

    cp_mid.wait()

    @pl.when(t > 0)
    def _():
        cp_top.wait()

    @pl.when(t < n_tiles - 1)
    def _():
        cp_bot.wait()

    # Halo rows beyond the image have no source data: zero them.
    @pl.when(t == 0)
    def _():
        x_buf[0:d] = jnp.zeros((d, W, Cinp), x_buf.dtype)

    @pl.when(t == n_tiles - 1)
    def _():
        x_buf[d + tile_h:ht] = jnp.zeros((d, W, Cinp), x_buf.dtype)

    xin = x_buf[...]                                   # (ht, W, Cinp) f32

    # ---- bn1 + relu (bf16 on v6e/v7x fast path; f32 on v5e / f32 path) -------
    if bn1_bf16:
        xb = xin.astype(jnp.bfloat16).reshape(ht * W, Cinp)
        h = jnp.maximum(xb * s1_ref[0].astype(jnp.bfloat16)
                        + t1_ref[0].astype(jnp.bfloat16), 0.0)
    else:
        h = jnp.maximum(xin.reshape(ht * W, Cinp) * s1_ref[0] + t1_ref[0], 0.0)

    # ---- conv1 (1x1); bn2 scale folded into w1, (b1, bn2 shift) in t2 --------
    h1 = jnp.maximum(
        jnp.dot(h.astype(mm_dtype), w1_ref[...],
                preferred_element_type=jnp.float32) + t2_ref[0], 0.0)

    # ---- conv2 input (h1, incl. halo rows) into zero-bordered scratch --------
    pad_ref[:, wl:wl + W, :] = h1.reshape(ht, W, BCp).astype(pad_ref.dtype)

    # conv2's vertical zero padding at the image top / bottom (edge tiles only);
    # must come after the h1 store so it overrides it.
    @pl.when(t == 0)
    def _():
        pad_ref[0:d, :, :] = jnp.zeros((d, wp, BCp), pad_ref.dtype)

    @pl.when(t == n_tiles - 1)
    def _():
        pad_ref[ht - d:ht, :, :] = jnp.zeros((d, wp, BCp), pad_ref.dtype)

    # ---- conv2 (3x3, dilated); bn3 scale folded into w2, shift in t3 ---------
    acc = jnp.zeros((tile_h * W, BCp), jnp.float32)
    if fat_k:
        # v6e/v7x: hoist the kw-concat out of the kh loop; 3 fat K=3*BCp matmuls.
        cols = [pad_ref[:, wl - d + kw * d: wl - d + kw * d + W, :]
                for kw in range(3)]
        cat = jnp.concatenate(cols, axis=-1)           # (ht, W, 3*BCp)
        for kh in range(3):
            lhs = cat[kh * d: kh * d + tile_h].reshape(tile_h * W, 3 * BCp)
            acc = acc + jnp.dot(lhs, w2_ref[kh],
                                preferred_element_type=jnp.float32)
    else:
        # v5e: 128-wide MXU -> 9 skinny K=BCp matmuls, no concat/relayout.
        for kh in range(3):
            for kw in range(3):
                tap = pad_ref[kh * d: kh * d + tile_h,
                              wl - d + kw * d: wl - d + kw * d + W, :]
                acc = acc + jnp.dot(tap.reshape(tile_h * W, BCp),
                                    w2_ref[kh * 3 + kw],
                                    preferred_element_type=jnp.float32)
    h2 = jnp.maximum(acc + t3_ref[0], 0.0)             # bn3 + relu (f32)

    # ---- conv3 (1x1) + bias, residual fused / added ---------------------------
    x_center = xin[d:d + tile_h].reshape(tile_h * W, Cinp)   # this tile's x rows
    if part == 'body':
        # residual = x @ g (channel-group sum) fused into conv3: K = BCp + Cinp.
        lhs3 = jnp.concatenate([h2.astype(mm_dtype), x_center.astype(mm_dtype)],
                               axis=-1)
        out = jnp.dot(lhs3, w3_ref[...],
                      preferred_element_type=jnp.float32) + b3_ref[0]
    else:
        out = jnp.dot(h2.astype(mm_dtype), w3_ref[...],
                      preferred_element_type=jnp.float32) + b3_ref[0]
        out = out + x_center                            # identity residual (f32)

    o_ref[0] = out.reshape(tile_h, W, Coutp).astype(o_ref.dtype)


# ------------------------------ wrapper --------------------------------------
def bottleneck_forward(x_nchw, params, *, stride=1, dilation=1, k=1, part=None,
                       use_bf16=True, out_dtype=jnp.float32, tile_h=None,
                       fat_k=None):
    assert stride == 1, \
        "stride > 1 requires the part='tail' projection shortcut (not implemented)"
    assert dilation >= 1
    x_nchw = x_nchw.astype(jnp.float32)
    N, Cin, H, W = x_nchw.shape
    Cout = params['w3'].shape[0]
    assert Cout % 4 == 0
    BC = Cout // 4
    Cinp, Coutp, BCp = _ceil_to(Cin, 128), _ceil_to(Cout, 128), _ceil_to(BC, 128)
    d = dilation

    # Residual-path shape checks (mirror what PyTorch would require).
    if part == 'body':
        assert Cin % k == 0 and Cin // k == Cout, \
            "part='body' residual requires Cin // k == Cout"
    elif part == 'tail' and Cin != Cout:
        # TODO(synk): part='tail' projection shortcut (BN+ReLU+1x1 conv).
        raise NotImplementedError("part='tail' projection shortcut not implemented")
    else:
        assert Cin == Cout, "identity residual requires Cin == Cout"

    gen = _tpu_generation()
    if fat_k is None:
        fat_k = gen >= 6                 # v5e: skinny K=BCp matmuls instead
    bn1_bf16 = bool(use_bf16) and gen >= 6
    mm_dtype = jnp.bfloat16 if use_bf16 else jnp.float32
    mm_bytes = 2 if use_bf16 else 4

    # NCHW -> NHWC; lane-pad channels to multiples of 128 (lane-dense I/O).
    x = jnp.transpose(x_nchw, (0, 2, 3, 1))
    if Cinp != Cin:
        x = _pad_axis(x, 3, Cinp)

    # Fold BN (inference) into per-channel scale/shift; fold bn2/bn3 scales into
    # the preceding conv weights and conv biases into the following shifts.
    s1, t1 = _fold_bn(params['bn1'])
    s2, t2 = _fold_bn(params['bn2'])
    s3, t3 = _fold_bn(params['bn3'])

    s1p = _pad_axis(s1[None, :], 1, Cinp)
    t1p = _pad_axis(t1[None, :], 1, Cinp)

    w1 = params['w1'][:, :, 0, 0].T * s2[None, :]                    # (Cin, BC)
    w1p = jnp.zeros((Cinp, BCp), jnp.float32).at[:Cin, :BC].set(w1).astype(mm_dtype)
    t2p = _pad_axis((t2 + params['b1'] * s2)[None, :], 1, BCp)       # f32 (1, BCp)

    w2 = jnp.transpose(params['w2'], (2, 3, 1, 0)) * s3[None, None, None, :]
    w2p = jnp.zeros((3, 3, BCp, BCp), jnp.float32).at[:, :, :BC, :BC].set(w2)
    if fat_k:
        w2r = w2p.reshape(3, 3 * BCp, BCp).astype(mm_dtype)          # kw along K
    else:
        w2r = w2p.reshape(9, BCp, BCp).astype(mm_dtype)
    t3p = _pad_axis((t3 + params['b2'] * s3)[None, :], 1, BCp)       # f32 (1, BCp)

    w3 = params['w3'][:, :, 0, 0].T                                  # (BC, Cout)
    w3p = jnp.zeros((BCp, Coutp), jnp.float32).at[:BC, :Cout].set(w3)
    if part == 'body':
        # 0/1 channel-group-sum matrix folded under w3 (no dense g DMA, no
        # separate f32 residual matmul).
        g = (jnp.arange(Cin)[:, None] // k == jnp.arange(Cout)[None, :]
             ).astype(jnp.float32)
        gp = jnp.zeros((Cinp, Coutp), jnp.float32).at[:Cin, :Cout].set(g)
        w3f = jnp.concatenate([w3p, gp], axis=0).astype(mm_dtype)
    else:
        w3f = w3p.astype(mm_dtype)
    b3p = _pad_axis(params['b3'][None, :], 1, Coutp)                 # f32 (1, Coutp)

    consts = [s1p, t1p, w1p, t2p, w2r, t3p, w3f, b3p]

    # Row-tile selection from the generation-aware VMEM budget.
    cap = _vmem_capacity_bytes()
    if tile_h is None:
        tile_h = _pick_tile_h(H, d, W, Cinp, Coutp, BCp, mm_bytes, part, fat_k,
                              budget=int(0.45 * cap))
    assert H % tile_h == 0, "tile_h must divide H"
    n_tiles = H // tile_h
    ht = tile_h + 2 * d
    wl = _ceil_to(d, 8)                  # sublane-aligned left pad of conv2 scratch
    wp = wl + W + d
    est = _estimate_vmem(tile_h, d, W, Cinp, Coutp, BCp, mm_bytes, part, fat_k)
    vmem_limit = int(min(0.9 * cap, max(32 * 2 ** 20, 2 * est)))

    kernel = functools.partial(_bottleneck_kernel, tile_h=tile_h, dilation=d,
                               part=part, fat_k=fat_k, bn1_bf16=bn1_bf16)

    def _const_spec(shape, single_buffer):
        nd = len(shape)

        def idx(n, t, _nd=nd):
            return (0,) * _nd

        if single_buffer:
            return pl.BlockSpec(shape, idx, pipeline_mode=pl.Buffered(1))
        return pl.BlockSpec(shape, idx)

    def _run(single_buffer_consts):
        in_specs = [pl.BlockSpec(memory_space=pl.ANY)]      # x stays in HBM
        in_specs += [_const_spec(a.shape, single_buffer_consts) for a in consts]
        return pl.pallas_call(
            kernel,
            out_shape=jax.ShapeDtypeStruct((N, H, W, Coutp), out_dtype),
            grid_spec=pltpu.PrefetchScalarGridSpec(
                num_scalar_prefetch=0,
                grid=(N, n_tiles),
                in_specs=in_specs,
                out_specs=pl.BlockSpec((1, tile_h, W, Coutp),
                                       lambda n, t: (n, t, 0, 0)),
                scratch_shapes=[
                    pltpu.VMEM((ht, W, Cinp), jnp.float32),   # x row tile (+halo)
                    pltpu.VMEM((ht, wp, BCp), mm_dtype),      # conv2 padded input
                    pltpu.SemaphoreType.DMA((3,)),
                ]),
            compiler_params=pltpu.CompilerParams(
                dimension_semantics=("parallel", "parallel"),
                vmem_limit_bytes=vmem_limit),
        )(x, *consts)

    try:
        out = _run(True)      # single-buffer grid-invariant operands
    except Exception:
        out = _run(False)     # fallback if pl.Buffered(1) is unsupported

    out = out[..., :Cout]     # drop lane padding
    return jnp.transpose(out, (0, 3, 1, 2))                 # NHWC -> NCHW


# ------------------------ deterministic parameter init -----------------------
def init_params(key, in_channel, out_channel):
    bc = out_channel // 4
    ks = jax.random.split(key, 16)

    def bn(k1, k2, k3, k4, c):
        gamma = jax.random.uniform(k1, (c,), jnp.float32, 0.5, 1.5)
        beta = 0.1 * jax.random.normal(k2, (c,), jnp.float32)
        mean = 0.1 * jax.random.normal(k3, (c,), jnp.float32)
        var = jax.random.uniform(k4, (c,), jnp.float32, 0.5, 1.5)
        return (gamma, beta, mean, var)

    return {
        'bn1': bn(ks[0], ks[1], ks[2], ks[3], in_channel),
        'w1': 0.1 * jax.random.normal(ks[4], (bc, in_channel, 1, 1), jnp.float32),
        'b1': 0.1 * jax.random.normal(ks[5], (bc,), jnp.float32),
        'bn2': bn(ks[6], ks[7], ks[8], ks[9], bc),
        'w2': 0.1 * jax.random.normal(ks[10], (bc, bc, 3, 3), jnp.float32),
        'b2': 0.1 * jax.random.normal(ks[11], (bc,), jnp.float32),
        'bn3': bn(ks[12], ks[13], ks[14], ks[15], bc),
        'w3': 0.1 * jax.random.normal(ks[4], (out_channel, bc, 1, 1), jnp.float32),
        'b3': 0.1 * jax.random.normal(ks[5], (out_channel,), jnp.float32),
    }


# ------------------------------ pure-JAX reference ---------------------------
def ref_forward(x, params, *, stride=1, dilation=1, k=1, part=None):
    def bn(x, p):
        g, b, m, v = p
        inv = g / jnp.sqrt(v + EPS)
        return (x - m[None, :, None, None]) * inv[None, :, None, None] \
            + b[None, :, None, None]

    def conv(x, w, b, stride=1, dilation=1, padding=0):
        y = lax.conv_general_dilated(
            x, w, (stride, stride), [(padding, padding)] * 2,
            rhs_dilation=(dilation, dilation),
            dimension_numbers=('NCHW', 'OIHW', 'NCHW'))
        return y + b[None, :, None, None]

    residual = x
    out = jax.nn.relu(bn(x, params['bn1']))
    out = conv(out, params['w1'], params['b1'])
    out = jax.nn.relu(bn(out, params['bn2']))
    out = conv(out, params['w2'], params['b2'],
               stride=stride, dilation=dilation, padding=dilation)
    out = jax.nn.relu(bn(out, params['bn3']))
    out = conv(out, params['w3'], params['b3'])
    if part == 'body':
        n, c, h, w = residual.shape
        residual = residual.reshape(n, c // k, k, h, w).sum(2)
    return out + residual


# ---------------------------------- main --------------------------------------
if __name__ == "__main__":
    key = jax.random.PRNGKey(0)
    kx, kp, kx2, kp2 = jax.random.split(key, 4)

    # ---- config 1: identity residual (part=None), Cin == Cout ----------------
    N, C, H, W = 2, 16, 16, 16
    x = jax.random.normal(kx, (N, C, H, W), jnp.float32)
    params = init_params(kp, C, C)
    ref = ref_forward(x, params)

    out32 = jax.block_until_ready(bottleneck_forward(x, params, use_bf16=False))
    assert out32.shape == ref.shape == (N, C, H, W)
    assert jnp.allclose(out32, ref, rtol=5e-4, atol=5e-4), \
        f"f32 max err {float(jnp.max(jnp.abs(out32 - ref)))}"

    # bf16 fast path, forced row tiling (2 row tiles per image, d=1 halo).
    # Looser tolerance: bf16 ulp at |x|~4 is ~0.03 (bn1/bf16 inputs).
    out16 = jax.block_until_ready(
        bottleneck_forward(x, params, use_bf16=True, tile_h=8))
    assert jnp.allclose(out16, ref, rtol=5e-2, atol=5e-2), \
        f"bf16 max err {float(jnp.max(jnp.abs(out16 - ref)))}"

    # ---- config 2: dilation = 2, 4 row tiles (halo = 2 rows), exact f32 ------
    ref_d = ref_forward(x, params, dilation=2)
    out_d = jax.block_until_ready(
        bottleneck_forward(x, params, dilation=2, use_bf16=False, tile_h=4))
    assert jnp.allclose(out_d, ref_d, rtol=5e-4, atol=5e-4), \
        f"dilated max err {float(jnp.max(jnp.abs(out_d - ref_d)))}"

    # ---- config 3: part='body' (group-summed residual fused into conv3), k=2 -
    Cin2, Cout2 = 32, 16
    x2 = jax.random.normal(kx2, (N, Cin2, H, W), jnp.float32)
    params2 = init_params(kp2, Cin2, Cout2)
    ref_b = ref_forward(x2, params2, k=2, part='body')
    out_b = jax.block_until_ready(
        bottleneck_forward(x2, params2, k=2, part='body', use_bf16=False))
    assert out_b.shape == ref_b.shape == (N, Cout2, H, W)
    assert jnp.allclose(out_b, ref_b, rtol=5e-4, atol=5e-4), \
        f"body f32 max err {float(jnp.max(jnp.abs(out_b - ref_b)))}"

    out_b16 = jax.block_until_ready(
        bottleneck_forward(x2, params2, k=2, part='body', use_bf16=True, tile_h=8))
    assert jnp.allclose(out_b16, ref_b, rtol=5e-2, atol=5e-2), \
        f"body bf16 max err {float(jnp.max(jnp.abs(out_b16 - ref_b)))}"

    print("KERNEL_OK")
</pallas_src>

<mosaic_0001>
module attributes {stable_mosaic.version = 11 : i64} {
  func.func @_bottleneck_kernel(%arg0: i32, %arg1: i32, %arg2: memref<2x16x16x128xf32, #tpu.memory_space<any>>, %arg3: memref<1x128xf32, #tpu.memory_space<vmem>>, %arg4: memref<1x128xf32, #tpu.memory_space<vmem>>, %arg5: memref<128x128xf32, #tpu.memory_space<vmem>>, %arg6: memref<1x128xf32, #tpu.memory_space<vmem>>, %arg7: memref<3x384x128xf32, #tpu.memory_space<vmem>>, %arg8: memref<1x128xf32, #tpu.memory_space<vmem>>, %arg9: memref<128x128xf32, #tpu.memory_space<vmem>>, %arg10: memref<1x128xf32, #tpu.memory_space<vmem>>, %arg11: memref<1x16x16x128xf32, #tpu.memory_space<vmem>>, %arg12: memref<18x16x128xf32, #tpu.memory_space<vmem>>, %arg13: memref<18x25x128xf32, #tpu.memory_space<vmem>>, %arg14: memref<3x!tpu.dma_semaphore, #tpu.memory_space<semaphore_mem>>) attributes {dimension_semantics = [#tpu.dimension_semantics<parallel>, #tpu.dimension_semantics<parallel>], iteration_bounds = array<i64: 2, 1>, scalar_prefetch = 0 : i64, scratch_operands = 3 : i64, tpu.core_type = #tpu.core_type<tc>, window_params = [{}, {pipeline_mode = #tpu.pipeline_mode<synchronous>, transform_indices = @transform_1, window_bounds = array<i64: 1, 128>}, {pipeline_mode = #tpu.pipeline_mode<synchronous>, transform_indices = @transform_2, window_bounds = array<i64: 1, 128>}, {pipeline_mode = #tpu.pipeline_mode<synchronous>, transform_indices = @transform_3, window_bounds = array<i64: 128, 128>}, {pipeline_mode = #tpu.pipeline_mode<synchronous>, transform_indices = @transform_4, window_bounds = array<i64: 1, 128>}, {pipeline_mode = #tpu.pipeline_mode<synchronous>, transform_indices = @transform_5, window_bounds = array<i64: 3, 384, 128>}, {pipeline_mode = #tpu.pipeline_mode<synchronous>, transform_indices = @transform_6, window_bounds = array<i64: 1, 128>}, {pipeline_mode = #tpu.pipeline_mode<synchronous>, transform_indices = @transform_7, window_bounds = array<i64: 128, 128>}, {pipeline_mode = #tpu.pipeline_mode<synchronous>, transform_indices = @transform_8, window_bounds = array<i64: 1, 128>}, {transform_indices = @transform_9, window_bounds = array<i64: 1, 16, 16, 128>}]} {
    %c16_i32 = arith.constant 16 : i32
    %0 = arith.muli %arg1, %c16_i32 : i32
    %c1_i32 = arith.constant 1 : i32
    %1 = arith.subi %0, %c1_i32 : i32
    %c0_i32 = arith.constant 0 : i32
    %2 = arith.maxsi %1, %c0_i32 : i32
    %c16_i32_0 = arith.constant 16 : i32
    %3 = arith.addi %0, %c16_i32_0 : i32
    %c15_i32 = arith.constant 15 : i32
    %4 = arith.minsi %3, %c15_i32 : i32
    %c0_i32_1 = arith.constant 0 : i32
    %c0_i32_2 = arith.constant 0 : i32
    %c0_i32_3 = arith.constant 0 : i32
    %5 = tpu.memref_slice %arg2[%arg0, %0, %c0_i32_2, %c0_i32_3] : memref<2x16x16x128xf32, #tpu.memory_space<any>> -> memref<1x16x16x128xf32, #tpu.memory_space<any>>
    %6 = tpu.memref_squeeze %5 : memref<1x16x16x128xf32, #tpu.memory_space<any>> -> memref<16x16x128xf32, #tpu.memory_space<any>>
    %c1_i32_4 = arith.constant 1 : i32
    %c0_i32_5 = arith.constant 0 : i32
    %c0_i32_6 = arith.constant 0 : i32
    %7 = tpu.memref_slice %arg12[%c1_i32_4, %c0_i32_5, %c0_i32_6] : memref<18x16x128xf32, #tpu.memory_space<vmem>> -> memref<16x16x128xf32, #tpu.memory_space<vmem>>
    %8 = tpu.memref_slice %arg14[%c0_i32_1] : memref<3x!tpu.dma_semaphore, #tpu.memory_space<semaphore_mem>> -> memref<1x!tpu.dma_semaphore, #tpu.memory_space<semaphore_mem>>
    %9 = tpu.memref_squeeze %8 : memref<1x!tpu.dma_semaphore, #tpu.memory_space<semaphore_mem>> -> memref<!tpu.dma_semaphore, #tpu.memory_space<semaphore_mem>>
    tpu.enqueue_dma source(%6 : memref<16x16x128xf32, #tpu.memory_space<any>>) target(%7 : memref<16x16x128xf32, #tpu.memory_space<vmem>>) target_semaphore(%9 : memref<!tpu.dma_semaphore, #tpu.memory_space<semaphore_mem>>)
    %c0_i32_7 = arith.constant 0 : i32
    %10 = arith.cmpi sgt, %arg1, %c0_i32_7 : i32
    %11 = arith.extui %10 : i1 to i32
    %c1_i32_8 = arith.constant 1 : i32
    %c0_i32_9 = arith.constant 0 : i32
    %12 = arith.cmpi ne, %11, %c0_i32_9 : i32
    scf.if %12 {
      %c0_i32_83 = arith.constant 0 : i32
      %c0_i32_84 = arith.constant 0 : i32
      %112 = tpu.memref_slice %arg2[%arg0, %2, %c0_i32_83, %c0_i32_84] : memref<2x16x16x128xf32, #tpu.memory_space<any>> -> memref<1x1x16x128xf32, #tpu.memory_space<any>>
      %113 = tpu.memref_squeeze %112 : memref<1x1x16x128xf32, #tpu.memory_space<any>> -> memref<1x16x128xf32, #tpu.memory_space<any>>
      %c0_i32_85 = arith.constant 0 : i32
      %c0_i32_86 = arith.constant 0 : i32
      %c0_i32_87 = arith.constant 0 : i32
      %114 = tpu.memref_slice %arg12[%c0_i32_85, %c0_i32_86, %c0_i32_87] : memref<18x16x128xf32, #tpu.memory_space<vmem>> -> memref<1x16x128xf32, #tpu.memory_space<vmem>>
      %115 = tpu.memref_slice %arg14[%c1_i32_8] : memref<3x!tpu.dma_semaphore, #tpu.memory_space<semaphore_mem>> -> memref<1x!tpu.dma_semaphore, #tpu.memory_space<semaphore_mem>>
      %116 = tpu.memref_squeeze %115 : memref<1x!tpu.dma_semaphore, #tpu.memory_space<semaphore_mem>> -> memref<!tpu.dma_semaphore, #tpu.memory_space<semaphore_mem>>
      tpu.enqueue_dma source(%113 : memref<1x16x128xf32, #tpu.memory_space<any>>) target(%114 : memref<1x16x128xf32, #tpu.memory_space<vmem>>) target_semaphore(%116 : memref<!tpu.dma_semaphore, #tpu.memory_space<semaphore_mem>>)
    } else {
    }
    %c0_i32_10 = arith.constant 0 : i32
    %13 = arith.cmpi slt, %arg1, %c0_i32_10 : i32
    %14 = arith.extui %13 : i1 to i32
    %c2_i32 = arith.constant 2 : i32
    %c0_i32_11 = arith.constant 0 : i32
    %15 = arith.cmpi ne, %14, %c0_i32_11 : i32
    scf.if %15 {
      %c0_i32_83 = arith.constant 0 : i32
      %c0_i32_84 = arith.constant 0 : i32
      %112 = tpu.memref_slice %arg2[%arg0, %4, %c0_i32_83, %c0_i32_84] : memref<2x16x16x128xf32, #tpu.memory_space<any>> -> memref<1x1x16x128xf32, #tpu.memory_space<any>>
      %113 = tpu.memref_squeeze %112 : memref<1x1x16x128xf32, #tpu.memory_space<any>> -> memref<1x16x128xf32, #tpu.memory_space<any>>
      %c17_i32 = arith.constant 17 : i32
      %c0_i32_85 = arith.constant 0 : i32
      %c0_i32_86 = arith.constant 0 : i32
      %114 = tpu.memref_slice %arg12[%c17_i32, %c0_i32_85, %c0_i32_86] : memref<18x16x128xf32, #tpu.memory_space<vmem>> -> memref<1x16x128xf32, #tpu.memory_space<vmem>>
      %115 = tpu.memref_slice %arg14[%c2_i32] : memref<3x!tpu.dma_semaphore, #tpu.memory_space<semaphore_mem>> -> memref<1x!tpu.dma_semaphore, #tpu.memory_space<semaphore_mem>>
      %116 = tpu.memref_squeeze %115 : memref<1x!tpu.dma_semaphore, #tpu.memory_space<semaphore_mem>> -> memref<!tpu.dma_semaphore, #tpu.memory_space<semaphore_mem>>
      tpu.enqueue_dma source(%113 : memref<1x16x128xf32, #tpu.memory_space<any>>) target(%114 : memref<1x16x128xf32, #tpu.memory_space<vmem>>) target_semaphore(%116 : memref<!tpu.dma_semaphore, #tpu.memory_space<semaphore_mem>>)
    } else {
    }
    %cst = arith.constant 0.000000e+00 : f32
    %16 = vector.broadcast %cst : f32 to vector<18x8x128xf32>
    %c0 = arith.constant 0 : index
    %c0_12 = arith.constant 0 : index
    %c0_13 = arith.constant 0 : index
    %17 = vector.load %arg13[%c0, %c0_12, %c0_13] : memref<18x25x128xf32, #tpu.memory_space<vmem>>, vector<18x8x128xf32>
    tpu.vector_store %arg13[%c0, %c0_12, %c0_13], %16 {strides = array<i32>} : memref<18x25x128xf32, #tpu.memory_space<vmem>>, vector<18x8x128xf32>,
    %cst_14 = arith.constant 0.000000e+00 : f32
    %18 = vector.broadcast %cst_14 : f32 to vector<18x1x128xf32>
    %c0_15 = arith.constant 0 : index
    %c24 = arith.constant 24 : index
    %c0_16 = arith.constant 0 : index
    %19 = vector.load %arg13[%c0_15, %c24, %c0_16] : memref<18x25x128xf32, #tpu.memory_space<vmem>>, vector<18x1x128xf32>
    tpu.vector_store %arg13[%c0_15, %c24, %c0_16], %18 {strides = array<i32>} : memref<18x25x128xf32, #tpu.memory_space<vmem>>, vector<18x1x128xf32>,
    %c0_i32_17 = arith.constant 0 : i32
    %c0_i32_18 = arith.constant 0 : i32
    %c0_i32_19 = arith.constant 0 : i32
    %20 = tpu.memref_slice %arg2[%arg0, %0, %c0_i32_18, %c0_i32_19] : memref<2x16x16x128xf32, #tpu.memory_space<any>> -> memref<1x16x16x128xf32, #tpu.memory_space<any>>
    %21 = tpu.memref_squeeze %20 : memref<1x16x16x128xf32, #tpu.memory_space<any>> -> memref<16x16x128xf32, #tpu.memory_space<any>>
    %c1_i32_20 = arith.constant 1 : i32
    %c0_i32_21 = arith.constant 0 : i32
    %c0_i32_22 = arith.constant 0 : i32
    %22 = tpu.memref_slice %arg12[%c1_i32_20, %c0_i32_21, %c0_i32_22] : memref<18x16x128xf32, #tpu.memory_space<vmem>> -> memref<16x16x128xf32, #tpu.memory_space<vmem>>
    %23 = tpu.memref_slice %arg14[%c0_i32_17] : memref<3x!tpu.dma_semaphore, #tpu.memory_space<semaphore_mem>> -> memref<1x!tpu.dma_semaphore, #tpu.memory_space<semaphore_mem>>
    %24 = tpu.memref_squeeze %23 : memref<1x!tpu.dma_semaphore, #tpu.memory_space<semaphore_mem>> -> memref<!tpu.dma_semaphore, #tpu.memory_space<semaphore_mem>>
    tpu.wait_dma2 semaphore(%24 : memref<!tpu.dma_semaphore, #tpu.memory_space<semaphore_mem>>) src(%21 : memref<16x16x128xf32, #tpu.memory_space<any>>) dst(%22 : memref<16x16x128xf32, #tpu.memory_space<vmem>>)
    %c0_i32_23 = arith.constant 0 : i32
    %25 = arith.cmpi sgt, %arg1, %c0_i32_23 : i32
    %26 = arith.extui %25 : i1 to i32
    %c1_i32_24 = arith.constant 1 : i32
    %c0_i32_25 = arith.constant 0 : i32
    %27 = arith.cmpi ne, %26, %c0_i32_25 : i32
    scf.if %27 {
      %c0_i32_83 = arith.constant 0 : i32
      %c0_i32_84 = arith.constant 0 : i32
      %112 = tpu.memref_slice %arg2[%arg0, %2, %c0_i32_83, %c0_i32_84] : memref<2x16x16x128xf32, #tpu.memory_space<any>> -> memref<1x1x16x128xf32, #tpu.memory_space<any>>
      %113 = tpu.memref_squeeze %112 : memref<1x1x16x128xf32, #tpu.memory_space<any>> -> memref<1x16x128xf32, #tpu.memory_space<any>>
      %c0_i32_85 = arith.constant 0 : i32
      %c0_i32_86 = arith.constant 0 : i32
      %c0_i32_87 = arith.constant 0 : i32
      %114 = tpu.memref_slice %arg12[%c0_i32_85, %c0_i32_86, %c0_i32_87] : memref<18x16x128xf32, #tpu.memory_space<vmem>> -> memref<1x16x128xf32, #tpu.memory_space<vmem>>
      %115 = tpu.memref_slice %arg14[%c1_i32_24] : memref<3x!tpu.dma_semaphore, #tpu.memory_space<semaphore_mem>> -> memref<1x!tpu.dma_semaphore, #tpu.memory_space<semaphore_mem>>
      %116 = tpu.memref_squeeze %115 : memref<1x!tpu.dma_semaphore, #tpu.memory_space<semaphore_mem>> -> memref<!tpu.dma_semaphore, #tpu.memory_space<semaphore_mem>>
      tpu.wait_dma2 semaphore(%116 : memref<!tpu.dma_semaphore, #tpu.memory_space<semaphore_mem>>) src(%113 : memref<1x16x128xf32, #tpu.memory_space<any>>) dst(%114 : memref<1x16x128xf32, #tpu.memory_space<vmem>>)
    } else {
    }
    %c0_i32_26 = arith.constant 0 : i32
    %28 = arith.cmpi slt, %arg1, %c0_i32_26 : i32
    %29 = arith.extui %28 : i1 to i32
    %c2_i32_27 = arith.constant 2 : i32
    %c0_i32_28 = arith.constant 0 : i32
    %30 = arith.cmpi ne, %29, %c0_i32_28 : i32
    scf.if %30 {
      %c0_i32_83 = arith.constant 0 : i32
      %c0_i32_84 = arith.constant 0 : i32
      %112 = tpu.memref_slice %arg2[%arg0, %4, %c0_i32_83, %c0_i32_84] : memref<2x16x16x128xf32, #tpu.memory_space<any>> -> memref<1x1x16x128xf32, #tpu.memory_space<any>>
      %113 = tpu.memref_squeeze %112 : memref<1x1x16x128xf32, #tpu.memory_space<any>> -> memref<1x16x128xf32, #tpu.memory_space<any>>
      %c17_i32 = arith.constant 17 : i32
      %c0_i32_85 = arith.constant 0 : i32
      %c0_i32_86 = arith.constant 0 : i32
      %114 = tpu.memref_slice %arg12[%c17_i32, %c0_i32_85, %c0_i32_86] : memref<18x16x128xf32, #tpu.memory_space<vmem>> -> memref<1x16x128xf32, #tpu.memory_space<vmem>>
      %115 = tpu.memref_slice %arg14[%c2_i32_27] : memref<3x!tpu.dma_semaphore, #tpu.memory_space<semaphore_mem>> -> memref<1x!tpu.dma_semaphore, #tpu.memory_space<semaphore_mem>>
      %116 = tpu.memref_squeeze %115 : memref<1x!tpu.dma_semaphore, #tpu.memory_space<semaphore_mem>> -> memref<!tpu.dma_semaphore, #tpu.memory_space<semaphore_mem>>
      tpu.wait_dma2 semaphore(%116 : memref<!tpu.dma_semaphore, #tpu.memory_space<semaphore_mem>>) src(%113 : memref<1x16x128xf32, #tpu.memory_space<any>>) dst(%114 : memref<1x16x128xf32, #tpu.memory_space<vmem>>)
    } else {
    }
    %c0_i32_29 = arith.constant 0 : i32
    %31 = arith.cmpi eq, %arg1, %c0_i32_29 : i32
    %32 = arith.extui %31 : i1 to i32
    %c0_i32_30 = arith.constant 0 : i32
    %33 = arith.cmpi ne, %32, %c0_i32_30 : i32
    scf.if %33 {
      %cst_83 = arith.constant 0.000000e+00 : f32
      %112 = vector.broadcast %cst_83 : f32 to vector<1x16x128xf32>
      %c0_84 = arith.constant 0 : index
      %c0_85 = arith.constant 0 : index
      %c0_86 = arith.constant 0 : index
      %113 = vector.load %arg12[%c0_84, %c0_85, %c0_86] : memref<18x16x128xf32, #tpu.memory_space<vmem>>, vector<1x16x128xf32>
      tpu.vector_store %arg12[%c0_84, %c0_85, %c0_86], %112 {strides = array<i32>} : memref<18x16x128xf32, #tpu.memory_space<vmem>>, vector<1x16x128xf32>,
    } else {
    }
    %c0_i32_31 = arith.constant 0 : i32
    %34 = arith.cmpi eq, %arg1, %c0_i32_31 : i32
    %35 = arith.extui %34 : i1 to i32
    %c0_i32_32 = arith.constant 0 : i32
    %36 = arith.cmpi ne, %35, %c0_i32_32 : i32
    scf.if %36 {
      %cst_83 = arith.constant 0.000000e+00 : f32
      %112 = vector.broadcast %cst_83 : f32 to vector<1x16x128xf32>
      %c17 = arith.constant 17 : index
      %c0_84 = arith.constant 0 : index
      %c0_85 = arith.constant 0 : index
      %113 = vector.load %arg12[%c17, %c0_84, %c0_85] : memref<18x16x128xf32, #tpu.memory_space<vmem>>, vector<1x16x128xf32>
      tpu.vector_store %arg12[%c17, %c0_84, %c0_85], %112 {strides = array<i32>} : memref<18x16x128xf32, #tpu.memory_space<vmem>>, vector<1x16x128xf32>,
    } else {
    }
    %c0_33 = arith.constant 0 : index
    %c0_34 = arith.constant 0 : index
    %c0_35 = arith.constant 0 : index
    %37 = vector.load %arg12[%c0_33, %c0_34, %c0_35] : memref<18x16x128xf32, #tpu.memory_space<vmem>>, vector<18x16x128xf32>
    %38 = vector.shape_cast %37 : vector<18x16x128xf32> to vector<288x128xf32>
    %c0_36 = arith.constant 0 : index
    %c0_37 = arith.constant 0 : index
    %39 = vector.load %arg3[%c0_36, %c0_37] : memref<1x128xf32, #tpu.memory_space<vmem>>, vector<1x128xf32>
    %40 = vector.shape_cast %39 : vector<1x128xf32> to vector<128xf32>
    %41 = vector.shape_cast %40 : vector<128xf32> to vector<1x128xf32>
    %42 = vector.broadcast %41 : vector<1x128xf32> to vector<288x128xf32>
    %43 = arith.mulf %38, %42 : vector<288x128xf32>
    %c0_38 = arith.constant 0 : index
    %c0_39 = arith.constant 0 : index
    %44 = vector.load %arg4[%c0_38, %c0_39] : memref<1x128xf32, #tpu.memory_space<vmem>>, vector<1x128xf32>
    %45 = vector.shape_cast %44 : vector<1x128xf32> to vector<128xf32>
    %46 = vector.shape_cast %45 : vector<128xf32> to vector<1x128xf32>
    %47 = vector.broadcast %46 : vector<1x128xf32> to vector<288x128xf32>
    %48 = arith.addf %43, %47 : vector<288x128xf32>
    %cst_40 = arith.constant 0.000000e+00 : f32
    %49 = vector.broadcast %cst_40 : f32 to vector<288x128xf32>
    %50 = arith.maximumf %48, %49 : vector<288x128xf32>
    %c0_41 = arith.constant 0 : index
    %c0_42 = arith.constant 0 : index
    %51 = vector.load %arg5[%c0_41, %c0_42] : memref<128x128xf32, #tpu.memory_space<vmem>>, vector<128x128xf32>
    %cst_43 = arith.constant dense<0.000000e+00> : vector<288x128xf32>
    %52 = tpu.matmul %50, %51, %cst_43 {dimension_numbers = #tpu.dot_dimension_numbers<[1], [0], [0], [1], [0, 0, 1, 1], [], []>} : vector<288x128xf32>, vector<128x128xf32>, vector<288x128xf32> -> vector<288x128xf32>
    %c0_44 = arith.constant 0 : index
    %c0_45 = arith.constant 0 : index
    %53 = vector.load %arg6[%c0_44, %c0_45] : memref<1x128xf32, #tpu.memory_space<vmem>>, vector<1x128xf32>
    %54 = vector.shape_cast %53 : vector<1x128xf32> to vector<128xf32>
    %55 = vector.shape_cast %54 : vector<128xf32> to vector<1x128xf32>
    %56 = vector.broadcast %55 : vector<1x128xf32> to vector<288x128xf32>
    %57 = arith.addf %52, %56 : vector<288x128xf32>
    %cst_46 = arith.constant 0.000000e+00 : f32
    %58 = vector.broadcast %cst_46 : f32 to vector<288x128xf32>
    %59 = arith.maximumf %57, %58 : vector<288x128xf32>
    %60 = vector.shape_cast %59 : vector<288x128xf32> to vector<18x16x128xf32>
    %c0_47 = arith.constant 0 : index
    %c8 = arith.constant 8 : index
    %c0_48 = arith.constant 0 : index
    %61 = vector.load %arg13[%c0_47, %c8, %c0_48] : memref<18x25x128xf32, #tpu.memory_space<vmem>>, vector<18x16x128xf32>
    tpu.vector_store %arg13[%c0_47, %c8, %c0_48], %60 {strides = array<i32>} : memref<18x25x128xf32, #tpu.memory_space<vmem>>, vector<18x16x128xf32>,
    %c0_i32_49 = arith.constant 0 : i32
    %62 = arith.cmpi eq, %arg1, %c0_i32_49 : i32
    %63 = arith.extui %62 : i1 to i32
    %c0_i32_50 = arith.constant 0 : i32
    %64 = arith.cmpi ne, %63, %c0_i32_50 : i32
    scf.if %64 {
      %cst_83 = arith.constant 0.000000e+00 : f32
      %112 = vector.broadcast %cst_83 : f32 to vector<1x25x128xf32>
      %c0_84 = arith.constant 0 : index
      %c0_85 = arith.constant 0 : index
      %c0_86 = arith.constant 0 : index
      %113 = vector.load %arg13[%c0_84, %c0_85, %c0_86] : memref<18x25x128xf32, #tpu.memory_space<vmem>>, vector<1x25x128xf32>
      tpu.vector_store %arg13[%c0_84, %c0_85, %c0_86], %112 {strides = array<i32>} : memref<18x25x128xf32, #tpu.memory_space<vmem>>, vector<1x25x128xf32>,
    } else {
    }
    %c0_i32_51 = arith.constant 0 : i32
    %65 = arith.cmpi eq, %arg1, %c0_i32_51 : i32
    %66 = arith.extui %65 : i1 to i32
    %c0_i32_52 = arith.constant 0 : i32
    %67 = arith.cmpi ne, %66, %c0_i32_52 : i32
    scf.if %67 {
      %cst_83 = arith.constant 0.000000e+00 : f32
      %112 = vector.broadcast %cst_83 : f32 to vector<1x25x128xf32>
      %c17 = arith.constant 17 : index
      %c0_84 = arith.constant 0 : index
      %c0_85 = arith.constant 0 : index
      %113 = vector.load %arg13[%c17, %c0_84, %c0_85] : memref<18x25x128xf32, #tpu.memory_space<vmem>>, vector<1x25x128xf32>
      tpu.vector_store %arg13[%c17, %c0_84, %c0_85], %112 {strides = array<i32>} : memref<18x25x128xf32, #tpu.memory_space<vmem>>, vector<1x25x128xf32>,
    } else {
    }
    %cst_53 = arith.constant 0.000000e+00 : f32
    %68 = vector.broadcast %cst_53 : f32 to vector<256x128xf32>
    %c0_54 = arith.constant 0 : index
    %c7 = arith.constant 7 : index
    %c0_55 = arith.constant 0 : index
    %69 = vector.load %arg13[%c0_54, %c7, %c0_55] : memref<18x25x128xf32, #tpu.memory_space<vmem>>, vector<18x16x128xf32>
    %c0_56 = arith.constant 0 : index
    %c8_57 = arith.constant 8 : index
    %c0_58 = arith.constant 0 : index
    %70 = vector.load %arg13[%c0_56, %c8_57, %c0_58] : memref<18x25x128xf32, #tpu.memory_space<vmem>>, vector<18x16x128xf32>
    %c0_59 = arith.constant 0 : index
    %c9 = arith.constant 9 : index
    %c0_60 = arith.constant 0 : index
    %71 = vector.load %arg13[%c0_59, %c9, %c0_60] : memref<18x25x128xf32, #tpu.memory_space<vmem>>, vector<18x16x128xf32>
    %72 = tpu.concatenate %69, %70, %71 in 2 : vector<18x16x128xf32>, vector<18x16x128xf32>, vector<18x16x128xf32> -> vector<18x16x384xf32>
    %73 = vector.extract_strided_slice %72 {offsets = [0, 0, 0], sizes = [16, 16, 384], strides = [1, 1, 1]} : vector<18x16x384xf32> to vector<16x16x384xf32>
    %74 = vector.shape_cast %73 : vector<16x16x384xf32> to vector<256x384xf32>
    %c0_61 = arith.constant 0 : index
    %c0_62 = arith.constant 0 : index
    %c0_63 = arith.constant 0 : index
    %75 = vector.load %arg7[%c0_61, %c0_62, %c0_63] : memref<3x384x128xf32, #tpu.memory_space<vmem>>, vector<1x384x128xf32>
    %76 = vector.shape_cast %75 : vector<1x384x128xf32> to vector<384x128xf32>
    %cst_64 = arith.constant dense<0.000000e+00> : vector<256x128xf32>
    %77 = tpu.matmul %74, %76, %cst_64 {dimension_numbers = #tpu.dot_dimension_numbers<[1], [0], [0], [1], [0, 0, 1, 1], [], []>} : vector<256x384xf32>, vector<384x128xf32>, vector<256x128xf32> -> vector<256x128xf32>
    %78 = arith.addf %68, %77 : vector<256x128xf32>
    %79 = vector.extract_strided_slice %72 {offsets = [1, 0, 0], sizes = [16, 16, 384], strides = [1, 1, 1]} : vector<18x16x384xf32> to vector<16x16x384xf32>
    %80 = vector.shape_cast %79 : vector<16x16x384xf32> to vector<256x384xf32>
    %c1 = arith.constant 1 : index
    %c0_65 = arith.constant 0 : index
    %c0_66 = arith.constant 0 : index
    %81 = vector.load %arg7[%c1, %c0_65, %c0_66] : memref<3x384x128xf32, #tpu.memory_space<vmem>>, vector<1x384x128xf32>
    %82 = vector.shape_cast %81 : vector<1x384x128xf32> to vector<384x128xf32>
    %cst_67 = arith.constant dense<0.000000e+00> : vector<256x128xf32>
    %83 = tpu.matmul %80, %82, %cst_67 {dimension_numbers = #tpu.dot_dimension_numbers<[1], [0], [0], [1], [0, 0, 1, 1], [], []>} : vector<256x384xf32>, vector<384x128xf32>, vector<256x128xf32> -> vector<256x128xf32>
    %84 = arith.addf %78, %83 : vector<256x128xf32>
    %85 = vector.extract_strided_slice %72 {offsets = [2, 0, 0], sizes = [16, 16, 384], strides = [1, 1, 1]} : vector<18x16x384xf32> to vector<16x16x384xf32>
    %86 = vector.shape_cast %85 : vector<16x16x384xf32> to vector<256x384xf32>
    %c2 = arith.constant 2 : index
    %c0_68 = arith.constant 0 : index
    %c0_69 = arith.constant 0 : index
    %87 = vector.load %arg7[%c2, %c0_68, %c0_69] : memref<3x384x128xf32, #tpu.memory_space<vmem>>, vector<1x384x128xf32>
    %88 = vector.shape_cast %87 : vector<1x384x128xf32> to vector<384x128xf32>
    %cst_70 = arith.constant dense<0.000000e+00> : vector<256x128xf32>
    %89 = tpu.matmul %86, %88, %cst_70 {dimension_numbers = #tpu.dot_dimension_numbers<[1], [0], [0], [1], [0, 0, 1, 1], [], []>} : vector<256x384xf32>, vector<384x128xf32>, vector<256x128xf32> -> vector<256x128xf32>
    %90 = arith.addf %84, %89 : vector<256x128xf32>
    %c0_71 = arith.constant 0 : index
    %c0_72 = arith.constant 0 : index
    %91 = vector.load %arg8[%c0_71, %c0_72] : memref<1x128xf32, #tpu.memory_space<vmem>>, vector<1x128xf32>
    %92 = vector.shape_cast %91 : vector<1x128xf32> to vector<128xf32>
    %93 = vector.shape_cast %92 : vector<128xf32> to vector<1x128xf32>
    %94 = vector.broadcast %93 : vector<1x128xf32> to vector<256x128xf32>
    %95 = arith.addf %90, %94 : vector<256x128xf32>
    %cst_73 = arith.constant 0.000000e+00 : f32
    %96 = vector.broadcast %cst_73 : f32 to vector<256x128xf32>
    %97 = arith.maximumf %95, %96 : vector<256x128xf32>
    %98 = vector.extract_strided_slice %37 {offsets = [1, 0, 0], sizes = [16, 16, 128], strides = [1, 1, 1]} : vector<18x16x128xf32> to vector<16x16x128xf32>
    %99 = vector.shape_cast %98 : vector<16x16x128xf32> to vector<256x128xf32>
    %c0_74 = arith.constant 0 : index
    %c0_75 = arith.constant 0 : index
    %100 = vector.load %arg9[%c0_74, %c0_75] : memref<128x128xf32, #tpu.memory_space<vmem>>, vector<128x128xf32>
    %cst_76 = arith.constant dense<0.000000e+00> : vector<256x128xf32>
    %101 = tpu.matmul %97, %100, %cst_76 {dimension_numbers = #tpu.dot_dimension_numbers<[1], [0], [0], [1], [0, 0, 1, 1], [], []>} : vector<256x128xf32>, vector<128x128xf32>, vector<256x128xf32> -> vector<256x128xf32>
    %c0_77 = arith.constant 0 : index
    %c0_78 = arith.constant 0 : index
    %102 = vector.load %arg10[%c0_77, %c0_78] : memref<1x128xf32, #tpu.memory_space<vmem>>, vector<1x128xf32>
    %103 = vector.shape_cast %102 : vector<1x128xf32> to vector<128xf32>
    %104 = vector.shape_cast %103 : vector<128xf32> to vector<1x128xf32>
    %105 = vector.broadcast %104 : vector<1x128xf32> to vector<256x128xf32>
    %106 = arith.addf %101, %105 : vector<256x128xf32>
    %107 = arith.addf %106, %99 : vector<256x128xf32>
    %108 = vector.shape_cast %107 : vector<256x128xf32> to vector<16x16x128xf32>
    %c0_79 = arith.constant 0 : index
    %c0_80 = arith.constant 0 : index
    %c0_81 = arith.constant 0 : index
    %c0_82 = arith.constant 0 : index
    %109 = vector.load %arg11[%c0_79, %c0_80, %c0_81, %c0_82] : memref<1x16x16x128xf32, #tpu.memory_space<vmem>>, vector<1x16x16x128xf32>
    %110 = vector.shape_cast %109 : vector<1x16x16x128xf32> to vector<16x16x128xf32>
    %111 = vector.shape_cast %108 : vector<16x16x128xf32> to vector<1x16x16x128xf32>
    tpu.vector_store %arg11[%c0_79, %c0_80, %c0_81, %c0_82], %111 {strides = array<i32>} : memref<1x16x16x128xf32, #tpu.memory_space<vmem>>, vector<1x16x16x128xf32>,
    return
  }
  func.func @transform_1(%arg0: i32, %arg1: i32) -> (i32, i32) {
    %c0_i32 = arith.constant 0 : i32
    %c0_i32_0 = arith.constant 0 : i32
    %c0_i32_1 = arith.constant 0 : i32
    return %c0_i32, %c0_i32_0 : i32, i32
  }
  func.func @transform_2(%arg0: i32, %arg1: i32) -> (i32, i32) {
    %c0_i32 = arith.constant 0 : i32
    %c0_i32_0 = arith.constant 0 : i32
    %c0_i32_1 = arith.constant 0 : i32
    return %c0_i32, %c0_i32_0 : i32, i32
  }
  func.func @transform_3(%arg0: i32, %arg1: i32) -> (i32, i32) {
    %c0_i32 = arith.constant 0 : i32
    %c0_i32_0 = arith.constant 0 : i32
    %c0_i32_1 = arith.constant 0 : i32
    return %c0_i32, %c0_i32_0 : i32, i32
  }
  func.func @transform_4(%arg0: i32, %arg1: i32) -> (i32, i32) {
    %c0_i32 = arith.constant 0 : i32
    %c0_i32_0 = arith.constant 0 : i32
    %c0_i32_1 = arith.constant 0 : i32
    return %c0_i32, %c0_i32_0 : i32, i32
  }
  func.func @transform_5(%arg0: i32, %arg1: i32) -> (i32, i32, i32) {
    %c0_i32 = arith.constant 0 : i32
    %c0_i32_0 = arith.constant 0 : i32
    %c0_i32_1 = arith.constant 0 : i32
    %c0_i32_2 = arith.constant 0 : i32
    return %c0_i32, %c0_i32_0, %c0_i32_1 : i32, i32, i32
  }
  func.func @transform_6(%arg0: i32, %arg1: i32) -> (i32, i32) {
    %c0_i32 = arith.constant 0 : i32
    %c0_i32_0 = arith.constant 0 : i32
    %c0_i32_1 = arith.constant 0 : i32
    return %c0_i32, %c0_i32_0 : i32, i32
  }
  func.func @transform_7(%arg0: i32, %arg1: i32) -> (i32, i32) {
    %c0_i32 = arith.constant 0 : i32
    %c0_i32_0 = arith.constant 0 : i32
    %c0_i32_1 = arith.constant 0 : i32
    return %c0_i32, %c0_i32_0 : i32, i32
  }
  func.func @transform_8(%arg0: i32, %arg1: i32) -> (i32, i32) {
    %c0_i32 = arith.constant 0 : i32
    %c0_i32_0 = arith.constant 0 : i32
    %c0_i32_1 = arith.constant 0 : i32
    return %c0_i32, %c0_i32_0 : i32, i32
  }
  func.func @transform_9(%arg0: i32, %arg1: i32) -> (i32, i32, i32, i32) {
    %c0_i32 = arith.constant 0 : i32
    %c0_i32_0 = arith.constant 0 : i32
    %c0_i32_1 = arith.constant 0 : i32
    return %arg0, %arg1, %c0_i32, %c0_i32_0 : i32, i32, i32, i32
  }
}

module attributes {stable_mosaic.version = 11 : i64} {
  func.func @_bottleneck_kernel(%arg0: i32, %arg1: i32, %arg2: memref<2x16x16x128xf32, #tpu.memory_space<any>>, %arg3: memref<1x128xf32, #tpu.memory_space<vmem>>, %arg4: memref<1x128xf32, #tpu.memory_space<vmem>>, %arg5: memref<128x128xf32, #tpu.memory_space<vmem>>, %arg6: memref<1x128xf32, #tpu.memory_space<vmem>>, %arg7: memref<3x384x128xf32, #tpu.memory_space<vmem>>, %arg8: memref<1x128xf32, #tpu.memory_space<vmem>>, %arg9: memref<128x128xf32, #tpu.memory_space<vmem>>, %arg10: memref<1x128xf32, #tpu.memory_space<vmem>>, %arg11: memref<1x16x16x128xf32, #tpu.memory_space<vmem>>, %arg12: memref<18x16x128xf32, #tpu.memory_space<vmem>>, %arg13: memref<18x25x128xf32, #tpu.memory_space<vmem>>, %arg14: memref<3x!tpu.dma_semaphore, #tpu.memory_space<semaphore_mem>>) attributes {dimension_semantics = [#tpu.dimension_semantics<parallel>, #tpu.dimension_semantics<parallel>], iteration_bounds = array<i64: 2, 1>, scalar_prefetch = 0 : i64, scratch_operands = 3 : i64, tpu.core_type = #tpu.core_type<tc>, window_params = [{}, {pipeline_mode = #tpu.pipeline_mode<synchronous>, transform_indices = @transform_1, window_bounds = array<i64: 1, 128>}, {pipeline_mode = #tpu.pipeline_mode<synchronous>, transform_indices = @transform_2, window_bounds = array<i64: 1, 128>}, {pipeline_mode = #tpu.pipeline_mode<synchronous>, transform_indices = @transform_3, window_bounds = array<i64: 128, 128>}, {pipeline_mode = #tpu.pipeline_mode<synchronous>, transform_indices = @transform_4, window_bounds = array<i64: 1, 128>}, {pipeline_mode = #tpu.pipeline_mode<synchronous>, transform_indices = @transform_5, window_bounds = array<i64: 3, 384, 128>}, {pipeline_mode = #tpu.pipeline_mode<synchronous>, transform_indices = @transform_6, window_bounds = array<i64: 1, 128>}, {pipeline_mode = #tpu.pipeline_mode<synchronous>, transform_indices = @transform_7, window_bounds = array<i64: 128, 128>}, {pipeline_mode = #tpu.pipeline_mode<synchronous>, transform_indices = @transform_8, window_bounds = array<i64: 1, 128>}, {transform_indices = @transform_9, window_bounds = array<i64: 1, 16, 16, 128>}]} {
    %c16_i32 = arith.constant 16 : i32
    %0 = arith.muli %arg1, %c16_i32 : i32
    %c1_i32 = arith.constant 1 : i32
    %1 = arith.subi %0, %c1_i32 : i32
    %c0_i32 = arith.constant 0 : i32
    %2 = arith.maxsi %1, %c0_i32 : i32
    %c16_i32_0 = arith.constant 16 : i32
    %3 = arith.addi %0, %c16_i32_0 : i32
    %c15_i32 = arith.constant 15 : i32
    %4 = arith.minsi %3, %c15_i32 : i32
    %c0_i32_1 = arith.constant 0 : i32
    %c0_i32_2 = arith.constant 0 : i32
    %c0_i32_3 = arith.constant 0 : i32
    %5 = tpu.memref_slice %arg2[%arg0, %0, %c0_i32_2, %c0_i32_3] : memref<2x16x16x128xf32, #tpu.memory_space<any>> -> memref<1x16x16x128xf32, #tpu.memory_space<any>>
    %6 = tpu.memref_squeeze %5 : memref<1x16x16x128xf32, #tpu.memory_space<any>> -> memref<16x16x128xf32, #tpu.memory_space<any>>
    %c1_i32_4 = arith.constant 1 : i32
    %c0_i32_5 = arith.constant 0 : i32
    %c0_i32_6 = arith.constant 0 : i32
    %7 = tpu.memref_slice %arg12[%c1_i32_4, %c0_i32_5, %c0_i32_6] : memref<18x16x128xf32, #tpu.memory_space<vmem>> -> memref<16x16x128xf32, #tpu.memory_space<vmem>>
    %8 = tpu.memref_slice %arg14[%c0_i32_1] : memref<3x!tpu.dma_semaphore, #tpu.memory_space<semaphore_mem>> -> memref<1x!tpu.dma_semaphore, #tpu.memory_space<semaphore_mem>>
    %9 = tpu.memref_squeeze %8 : memref<1x!tpu.dma_semaphore, #tpu.memory_space<semaphore_mem>> -> memref<!tpu.dma_semaphore, #tpu.memory_space<semaphore_mem>>
    tpu.enqueue_dma source(%6 : memref<16x16x128xf32, #tpu.memory_space<any>>) target(%7 : memref<16x16x128xf32, #tpu.memory_space<vmem>>) target_semaphore(%9 : memref<!tpu.dma_semaphore, #tpu.memory_space<semaphore_mem>>)
    %c0_i32_7 = arith.constant 0 : i32
    %10 = arith.cmpi sgt, %arg1, %c0_i32_7 : i32
    %11 = arith.extui %10 : i1 to i32
    %c1_i32_8 = arith.constant 1 : i32
    %c0_i32_9 = arith.constant 0 : i32
    %12 = arith.cmpi ne, %11, %c0_i32_9 : i32
    scf.if %12 {
      %c0_i32_83 = arith.constant 0 : i32
      %c0_i32_84 = arith.constant 0 : i32
      %112 = tpu.memref_slice %arg2[%arg0, %2, %c0_i32_83, %c0_i32_84] : memref<2x16x16x128xf32, #tpu.memory_space<any>> -> memref<1x1x16x128xf32, #tpu.memory_space<any>>
      %113 = tpu.memref_squeeze %112 : memref<1x1x16x128xf32, #tpu.memory_space<any>> -> memref<1x16x128xf32, #tpu.memory_space<any>>
      %c0_i32_85 = arith.constant 0 : i32
      %c0_i32_86 = arith.constant 0 : i32
      %c0_i32_87 = arith.constant 0 : i32
      %114 = tpu.memref_slice %arg12[%c0_i32_85, %c0_i32_86, %c0_i32_87] : memref<18x16x128xf32, #tpu.memory_space<vmem>> -> memref<1x16x128xf32, #tpu.memory_space<vmem>>
      %115 = tpu.memref_slice %arg14[%c1_i32_8] : memref<3x!tpu.dma_semaphore, #tpu.memory_space<semaphore_mem>> -> memref<1x!tpu.dma_semaphore, #tpu.memory_space<semaphore_mem>>
      %116 = tpu.memref_squeeze %115 : memref<1x!tpu.dma_semaphore, #tpu.memory_space<semaphore_mem>> -> memref<!tpu.dma_semaphore, #tpu.memory_space<semaphore_mem>>
      tpu.enqueue_dma source(%113 : memref<1x16x128xf32, #tpu.memory_space<any>>) target(%114 : memref<1x16x128xf32, #tpu.memory_space<vmem>>) target_semaphore(%116 : memref<!tpu.dma_semaphore, #tpu.memory_space<semaphore_mem>>)
    } else {
    }
    %c0_i32_10 = arith.constant 0 : i32
    %13 = arith.cmpi slt, %arg1, %c0_i32_10 : i32
    %14 = arith.extui %13 : i1 to i32
    %c2_i32 = arith.constant 2 : i32
    %c0_i32_11 = arith.constant 0 : i32
    %15 = arith.cmpi ne, %14, %c0_i32_11 : i32
    scf.if %15 {
      %c0_i32_83 = arith.constant 0 : i32
      %c0_i32_84 = arith.constant 0 : i32
      %112 = tpu.memref_slice %arg2[%arg0, %4, %c0_i32_83, %c0_i32_84] : memref<2x16x16x128xf32, #tpu.memory_space<any>> -> memref<1x1x16x128xf32, #tpu.memory_space<any>>
      %113 = tpu.memref_squeeze %112 : memref<1x1x16x128xf32, #tpu.memory_space<any>> -> memref<1x16x128xf32, #tpu.memory_space<any>>
      %c17_i32 = arith.constant 17 : i32
      %c0_i32_85 = arith.constant 0 : i32
      %c0_i32_86 = arith.constant 0 : i32
      %114 = tpu.memref_slice %arg12[%c17_i32, %c0_i32_85, %c0_i32_86] : memref<18x16x128xf32, #tpu.memory_space<vmem>> -> memref<1x16x128xf32, #tpu.memory_space<vmem>>
      %115 = tpu.memref_slice %arg14[%c2_i32] : memref<3x!tpu.dma_semaphore, #tpu.memory_space<semaphore_mem>> -> memref<1x!tpu.dma_semaphore, #tpu.memory_space<semaphore_mem>>
      %116 = tpu.memref_squeeze %115 : memref<1x!tpu.dma_semaphore, #tpu.memory_space<semaphore_mem>> -> memref<!tpu.dma_semaphore, #tpu.memory_space<semaphore_mem>>
      tpu.enqueue_dma source(%113 : memref<1x16x128xf32, #tpu.memory_space<any>>) target(%114 : memref<1x16x128xf32, #tpu.memory_space<vmem>>) target_semaphore(%116 : memref<!tpu.dma_semaphore, #tpu.memory_space<semaphore_mem>>)
    } else {
    }
    %cst = arith.constant 0.000000e+00 : f32
    %16 = vector.broadcast %cst : f32 to vector<18x8x128xf32>
    %c0 = arith.constant 0 : index
    %c0_12 = arith.constant 0 : index
    %c0_13 = arith.constant 0 : index
    %17 = vector.load %arg13[%c0, %c0_12, %c0_13] : memref<18x25x128xf32, #tpu.memory_space<vmem>>, vector<18x8x128xf32>
    tpu.vector_store %arg13[%c0, %c0_12, %c0_13], %16 {strides = array<i32>} : memref<18x25x128xf32, #tpu.memory_space<vmem>>, vector<18x8x128xf32>,
    %cst_14 = arith.constant 0.000000e+00 : f32
    %18 = vector.broadcast %cst_14 : f32 to vector<18x1x128xf32>
    %c0_15 = arith.constant 0 : index
    %c24 = arith.constant 24 : index
    %c0_16 = arith.constant 0 : index
    %19 = vector.load %arg13[%c0_15, %c24, %c0_16] : memref<18x25x128xf32, #tpu.memory_space<vmem>>, vector<18x1x128xf32>
    tpu.vector_store %arg13[%c0_15, %c24, %c0_16], %18 {strides = array<i32>} : memref<18x25x128xf32, #tpu.memory_space<vmem>>, vector<18x1x128xf32>,
    %c0_i32_17 = arith.constant 0 : i32
    %c0_i32_18 = arith.constant 0 : i32
    %c0_i32_19 = arith.constant 0 : i32
    %20 = tpu.memref_slice %arg2[%arg0, %0, %c0_i32_18, %c0_i32_19] : memref<2x16x16x128xf32, #tpu.memory_space<any>> -> memref<1x16x16x128xf32, #tpu.memory_space<any>>
    %21 = tpu.memref_squeeze %20 : memref<1x16x16x128xf32, #tpu.memory_space<any>> -> memref<16x16x128xf32, #tpu.memory_space<any>>
    %c1_i32_20 = arith.constant 1 : i32
    %c0_i32_21 = arith.constant 0 : i32
    %c0_i32_22 = arith.constant 0 : i32
    %22 = tpu.memref_slice %arg12[%c1_i32_20, %c0_i32_21, %c0_i32_22] : memref<18x16x128xf32, #tpu.memory_space<vmem>> -> memref<16x16x128xf32, #tpu.memory_space<vmem>>
    %23 = tpu.memref_slice %arg14[%c0_i32_17] : memref<3x!tpu.dma_semaphore, #tpu.memory_space<semaphore_mem>> -> memref<1x!tpu.dma_semaphore, #tpu.memory_space<semaphore_mem>>
    %24 = tpu.memref_squeeze %23 : memref<1x!tpu.dma_semaphore, #tpu.memory_space<semaphore_mem>> -> memref<!tpu.dma_semaphore, #tpu.memory_space<semaphore_mem>>
    tpu.wait_dma2 semaphore(%24 : memref<!tpu.dma_semaphore, #tpu.memory_space<semaphore_mem>>) src(%21 : memref<16x16x128xf32, #tpu.memory_space<any>>) dst(%22 : memref<16x16x128xf32, #tpu.memory_space<vmem>>)
    %c0_i32_23 = arith.constant 0 : i32
    %25 = arith.cmpi sgt, %arg1, %c0_i32_23 : i32
    %26 = arith.extui %25 : i1 to i32
    %c1_i32_24 = arith.constant 1 : i32
    %c0_i32_25 = arith.constant 0 : i32
    %27 = arith.cmpi ne, %26, %c0_i32_25 : i32
    scf.if %27 {
      %c0_i32_83 = arith.constant 0 : i32
      %c0_i32_84 = arith.constant 0 : i32
      %112 = tpu.memref_slice %arg2[%arg0, %2, %c0_i32_83, %c0_i32_84] : memref<2x16x16x128xf32, #tpu.memory_space<any>> -> memref<1x1x16x128xf32, #tpu.memory_space<any>>
      %113 = tpu.memref_squeeze %112 : memref<1x1x16x128xf32, #tpu.memory_space<any>> -> memref<1x16x128xf32, #tpu.memory_space<any>>
      %c0_i32_85 = arith.constant 0 : i32
      %c0_i32_86 = arith.constant 0 : i32
      %c0_i32_87 = arith.constant 0 : i32
      %114 = tpu.memref_slice %arg12[%c0_i32_85, %c0_i32_86, %c0_i32_87] : memref<18x16x128xf32, #tpu.memory_space<vmem>> -> memref<1x16x128xf32, #tpu.memory_space<vmem>>
      %115 = tpu.memref_slice %arg14[%c1_i32_24] : memref<3x!tpu.dma_semaphore, #tpu.memory_space<semaphore_mem>> -> memref<1x!tpu.dma_semaphore, #tpu.memory_space<semaphore_mem>>
      %116 = tpu.memref_squeeze %115 : memref<1x!tpu.dma_semaphore, #tpu.memory_space<semaphore_mem>> -> memref<!tpu.dma_semaphore, #tpu.memory_space<semaphore_mem>>
      tpu.wait_dma2 semaphore(%116 : memref<!tpu.dma_semaphore, #tpu.memory_space<semaphore_mem>>) src(%113 : memref<1x16x128xf32, #tpu.memory_space<any>>) dst(%114 : memref<1x16x128xf32, #tpu.memory_space<vmem>>)
    } else {
    }
    %c0_i32_26 = arith.constant 0 : i32
    %28 = arith.cmpi slt, %arg1, %c0_i32_26 : i32
    %29 = arith.extui %28 : i1 to i32
    %c2_i32_27 = arith.constant 2 : i32
    %c0_i32_28 = arith.constant 0 : i32
    %30 = arith.cmpi ne, %29, %c0_i32_28 : i32
    scf.if %30 {
      %c0_i32_83 = arith.constant 0 : i32
      %c0_i32_84 = arith.constant 0 : i32
      %112 = tpu.memref_slice %arg2[%arg0, %4, %c0_i32_83, %c0_i32_84] : memref<2x16x16x128xf32, #tpu.memory_space<any>> -> memref<1x1x16x128xf32, #tpu.memory_space<any>>
      %113 = tpu.memref_squeeze %112 : memref<1x1x16x128xf32, #tpu.memory_space<any>> -> memref<1x16x128xf32, #tpu.memory_space<any>>
      %c17_i32 = arith.constant 17 : i32
      %c0_i32_85 = arith.constant 0 : i32
      %c0_i32_86 = arith.constant 0 : i32
      %114 = tpu.memref_slice %arg12[%c17_i32, %c0_i32_85, %c0_i32_86] : memref<18x16x128xf32, #tpu.memory_space<vmem>> -> memref<1x16x128xf32, #tpu.memory_space<vmem>>
      %115 = tpu.memref_slice %arg14[%c2_i32_27] : memref<3x!tpu.dma_semaphore, #tpu.memory_space<semaphore_mem>> -> memref<1x!tpu.dma_semaphore, #tpu.memory_space<semaphore_mem>>
      %116 = tpu.memref_squeeze %115 : memref<1x!tpu.dma_semaphore, #tpu.memory_space<semaphore_mem>> -> memref<!tpu.dma_semaphore, #tpu.memory_space<semaphore_mem>>
      tpu.wait_dma2 semaphore(%116 : memref<!tpu.dma_semaphore, #tpu.memory_space<semaphore_mem>>) src(%113 : memref<1x16x128xf32, #tpu.memory_space<any>>) dst(%114 : memref<1x16x128xf32, #tpu.memory_space<vmem>>)
    } else {
    }
    %c0_i32_29 = arith.constant 0 : i32
    %31 = arith.cmpi eq, %arg1, %c0_i32_29 : i32
    %32 = arith.extui %31 : i1 to i32
    %c0_i32_30 = arith.constant 0 : i32
    %33 = arith.cmpi ne, %32, %c0_i32_30 : i32
    scf.if %33 {
      %cst_83 = arith.constant 0.000000e+00 : f32
      %112 = vector.broadcast %cst_83 : f32 to vector<1x16x128xf32>
      %c0_84 = arith.constant 0 : index
      %c0_85 = arith.constant 0 : index
      %c0_86 = arith.constant 0 : index
      %113 = vector.load %arg12[%c0_84, %c0_85, %c0_86] : memref<18x16x128xf32, #tpu.memory_space<vmem>>, vector<1x16x128xf32>
      tpu.vector_store %arg12[%c0_84, %c0_85, %c0_86], %112 {strides = array<i32>} : memref<18x16x128xf32, #tpu.memory_space<vmem>>, vector<1x16x128xf32>,
    } else {
    }
    %c0_i32_31 = arith.constant 0 : i32
    %34 = arith.cmpi eq, %arg1, %c0_i32_31 : i32
    %35 = arith.extui %34 : i1 to i32
    %c0_i32_32 = arith.constant 0 : i32
    %36 = arith.cmpi ne, %35, %c0_i32_32 : i32
    scf.if %36 {
      %cst_83 = arith.constant 0.000000e+00 : f32
      %112 = vector.broadcast %cst_83 : f32 to vector<1x16x128xf32>
      %c17 = arith.constant 17 : index
      %c0_84 = arith.constant 0 : index
      %c0_85 = arith.constant 0 : index
      %113 = vector.load %arg12[%c17, %c0_84, %c0_85] : memref<18x16x128xf32, #tpu.memory_space<vmem>>, vector<1x16x128xf32>
      tpu.vector_store %arg12[%c17, %c0_84, %c0_85], %112 {strides = array<i32>} : memref<18x16x128xf32, #tpu.memory_space<vmem>>, vector<1x16x128xf32>,
    } else {
    }
    %c0_33 = arith.constant 0 : index
    %c0_34 = arith.constant 0 : index
    %c0_35 = arith.constant 0 : index
    %37 = vector.load %arg12[%c0_33, %c0_34, %c0_35] : memref<18x16x128xf32, #tpu.memory_space<vmem>>, vector<18x16x128xf32>
    %38 = vector.shape_cast %37 : vector<18x16x128xf32> to vector<288x128xf32>
    %c0_36 = arith.constant 0 : index
    %c0_37 = arith.constant 0 : index
    %39 = vector.load %arg3[%c0_36, %c0_37] : memref<1x128xf32, #tpu.memory_space<vmem>>, vector<1x128xf32>
    %40 = vector.shape_cast %39 : vector<1x128xf32> to vector<128xf32>
    %41 = vector.shape_cast %40 : vector<128xf32> to vector<1x128xf32>
    %42 = vector.broadcast %41 : vector<1x128xf32> to vector<288x128xf32>
    %43 = arith.mulf %38, %42 : vector<288x128xf32>
    %c0_38 = arith.constant 0 : index
    %c0_39 = arith.constant 0 : index
    %44 = vector.load %arg4[%c0_38, %c0_39] : memref<1x128xf32, #tpu.memory_space<vmem>>, vector<1x128xf32>
    %45 = vector.shape_cast %44 : vector<1x128xf32> to vector<128xf32>
    %46 = vector.shape_cast %45 : vector<128xf32> to vector<1x128xf32>
    %47 = vector.broadcast %46 : vector<1x128xf32> to vector<288x128xf32>
    %48 = arith.addf %43, %47 : vector<288x128xf32>
    %cst_40 = arith.constant 0.000000e+00 : f32
    %49 = vector.broadcast %cst_40 : f32 to vector<288x128xf32>
    %50 = arith.maximumf %48, %49 : vector<288x128xf32>
    %c0_41 = arith.constant 0 : index
    %c0_42 = arith.constant 0 : index
    %51 = vector.load %arg5[%c0_41, %c0_42] : memref<128x128xf32, #tpu.memory_space<vmem>>, vector<128x128xf32>
    %cst_43 = arith.constant dense<0.000000e+00> : vector<288x128xf32>
    %52 = tpu.matmul %50, %51, %cst_43 {dimension_numbers = #tpu.dot_dimension_numbers<[1], [0], [0], [1], [0, 0, 1, 1], [], []>} : vector<288x128xf32>, vector<128x128xf32>, vector<288x128xf32> -> vector<288x128xf32>
    %c0_44 = arith.constant 0 : index
    %c0_45 = arith.constant 0 : index
    %53 = vector.load %arg6[%c0_44, %c0_45] : memref<1x128xf32, #tpu.memory_space<vmem>>, vector<1x128xf32>
    %54 = vector.shape_cast %53 : vector<1x128xf32> to vector<128xf32>
    %55 = vector.shape_cast %54 : vector<128xf32> to vector<1x128xf32>
    %56 = vector.broadcast %55 : vector<1x128xf32> to vector<288x128xf32>
    %57 = arith.addf %52, %56 : vector<288x128xf32>
    %cst_46 = arith.constant 0.000000e+00 : f32
    %58 = vector.broadcast %cst_46 : f32 to vector<288x128xf32>
    %59 = arith.maximumf %57, %58 : vector<288x128xf32>
    %60 = vector.shape_cast %59 : vector<288x128xf32> to vector<18x16x128xf32>
    %c0_47 = arith.constant 0 : index
    %c8 = arith.constant 8 : index
    %c0_48 = arith.constant 0 : index
    %61 = vector.load %arg13[%c0_47, %c8, %c0_48] : memref<18x25x128xf32, #tpu.memory_space<vmem>>, vector<18x16x128xf32>
    tpu.vector_store %arg13[%c0_47, %c8, %c0_48], %60 {strides = array<i32>} : memref<18x25x128xf32, #tpu.memory_space<vmem>>, vector<18x16x128xf32>,
    %c0_i32_49 = arith.constant 0 : i32
    %62 = arith.cmpi eq, %arg1, %c0_i32_49 : i32
    %63 = arith.extui %62 : i1 to i32
    %c0_i32_50 = arith.constant 0 : i32
    %64 = arith.cmpi ne, %63, %c0_i32_50 : i32
    scf.if %64 {
      %cst_83 = arith.constant 0.000000e+00 : f32
      %112 = vector.broadcast %cst_83 : f32 to vector<1x25x128xf32>
      %c0_84 = arith.constant 0 : index
      %c0_85 = arith.constant 0 : index
      %c0_86 = arith.constant 0 : index
      %113 = vector.load %arg13[%c0_84, %c0_85, %c0_86] : memref<18x25x128xf32, #tpu.memory_space<vmem>>, vector<1x25x128xf32>
      tpu.vector_store %arg13[%c0_84, %c0_85, %c0_86], %112 {strides = array<i32>} : memref<18x25x128xf32, #tpu.memory_space<vmem>>, vector<1x25x128xf32>,
    } else {
    }
    %c0_i32_51 = arith.constant 0 : i32
    %65 = arith.cmpi eq, %arg1, %c0_i32_51 : i32
    %66 = arith.extui %65 : i1 to i32
    %c0_i32_52 = arith.constant 0 : i32
    %67 = arith.cmpi ne, %66, %c0_i32_52 : i32
    scf.if %67 {
      %cst_83 = arith.constant 0.000000e+00 : f32
      %112 = vector.broadcast %cst_83 : f32 to vector<1x25x128xf32>
      %c17 = arith.constant 17 : index
      %c0_84 = arith.constant 0 : index
      %c0_85 = arith.constant 0 : index
      %113 = vector.load %arg13[%c17, %c0_84, %c0_85] : memref<18x25x128xf32, #tpu.memory_space<vmem>>, vector<1x25x128xf32>
      tpu.vector_store %arg13[%c17, %c0_84, %c0_85], %112 {strides = array<i32>} : memref<18x25x128xf32, #tpu.memory_space<vmem>>, vector<1x25x128xf32>,
    } else {
    }
    %cst_53 = arith.constant 0.000000e+00 : f32
    %68 = vector.broadcast %cst_53 : f32 to vector<256x128xf32>
    %c0_54 = arith.constant 0 : index
    %c7 = arith.constant 7 : index
    %c0_55 = arith.constant 0 : index
    %69 = vector.load %arg13[%c0_54, %c7, %c0_55] : memref<18x25x128xf32, #tpu.memory_space<vmem>>, vector<18x16x128xf32>
    %c0_56 = arith.constant 0 : index
    %c8_57 = arith.constant 8 : index
    %c0_58 = arith.constant 0 : index
    %70 = vector.load %arg13[%c0_56, %c8_57, %c0_58] : memref<18x25x128xf32, #tpu.memory_space<vmem>>, vector<18x16x128xf32>
    %c0_59 = arith.constant 0 : index
    %c9 = arith.constant 9 : index
    %c0_60 = arith.constant 0 : index
    %71 = vector.load %arg13[%c0_59, %c9, %c0_60] : memref<18x25x128xf32, #tpu.memory_space<vmem>>, vector<18x16x128xf32>
    %72 = tpu.concatenate %69, %70, %71 in 2 : vector<18x16x128xf32>, vector<18x16x128xf32>, vector<18x16x128xf32> -> vector<18x16x384xf32>
    %73 = vector.extract_strided_slice %72 {offsets = [0, 0, 0], sizes = [16, 16, 384], strides = [1, 1, 1]} : vector<18x16x384xf32> to vector<16x16x384xf32>
    %74 = vector.shape_cast %73 : vector<16x16x384xf32> to vector<256x384xf32>
    %c0_61 = arith.constant 0 : index
    %c0_62 = arith.constant 0 : index
    %c0_63 = arith.constant 0 : index
    %75 = vector.load %arg7[%c0_61, %c0_62, %c0_63] : memref<3x384x128xf32, #tpu.memory_space<vmem>>, vector<1x384x128xf32>
    %76 = vector.shape_cast %75 : vector<1x384x128xf32> to vector<384x128xf32>
    %cst_64 = arith.constant dense<0.000000e+00> : vector<256x128xf32>
    %77 = tpu.matmul %74, %76, %cst_64 {dimension_numbers = #tpu.dot_dimension_numbers<[1], [0], [0], [1], [0, 0, 1, 1], [], []>} : vector<256x384xf32>, vector<384x128xf32>, vector<256x128xf32> -> vector<256x128xf32>
    %78 = arith.addf %68, %77 : vector<256x128xf32>
    %79 = vector.extract_strided_slice %72 {offsets = [1, 0, 0], sizes = [16, 16, 384], strides = [1, 1, 1]} : vector<18x16x384xf32> to vector<16x16x384xf32>
    %80 = vector.shape_cast %79 : vector<16x16x384xf32> to vector<256x384xf32>
    %c1 = arith.constant 1 : index
    %c0_65 = arith.constant 0 : index
    %c0_66 = arith.constant 0 : index
    %81 = vector.load %arg7[%c1, %c0_65, %c0_66] : memref<3x384x128xf32, #tpu.memory_space<vmem>>, vector<1x384x128xf32>
    %82 = vector.shape_cast %81 : vector<1x384x128xf32> to vector<384x128xf32>
    %cst_67 = arith.constant dense<0.000000e+00> : vector<256x128xf32>
    %83 = tpu.matmul %80, %82, %cst_67 {dimension_numbers = #tpu.dot_dimension_numbers<[1], [0], [0], [1], [0, 0, 1, 1], [], []>} : vector<256x384xf32>, vector<384x128xf32>, vector<256x128xf32> -> vector<256x128xf32>
    %84 = arith.addf %78, %83 : vector<256x128xf32>
    %85 = vector.extract_strided_slice %72 {offsets = [2, 0, 0], sizes = [16, 16, 384], strides = [1, 1, 1]} : vector<18x16x384xf32> to vector<16x16x384xf32>
    %86 = vector.shape_cast %85 : vector<16x16x384xf32> to vector<256x384xf32>
    %c2 = arith.constant 2 : index
    %c0_68 = arith.constant 0 : index
    %c0_69 = arith.constant 0 : index
    %87 = vector.load %arg7[%c2, %c0_68, %c0_69] : memref<3x384x128xf32, #tpu.memory_space<vmem>>, vector<1x384x128xf32>
    %88 = vector.shape_cast %87 : vector<1x384x128xf32> to vector<384x128xf32>
    %cst_70 = arith.constant dense<0.000000e+00> : vector<256x128xf32>
    %89 = tpu.matmul %86, %88, %cst_70 {dimension_numbers = #tpu.dot_dimension_numbers<[1], [0], [0], [1], [0, 0, 1, 1], [], []>} : vector<256x384xf32>, vector<384x128xf32>, vector<256x128xf32> -> vector<256x128xf32>
    %90 = arith.addf %84, %89 : vector<256x128xf32>
    %c0_71 = arith.constant 0 : index
    %c0_72 = arith.constant 0 : index
    %91 = vector.load %arg8[%c0_71, %c0_72] : memref<1x128xf32, #tpu.memory_space<vmem>>, vector<1x128xf32>
    %92 = vector.shape_cast %91 : vector<1x128xf32> to vector<128xf32>
    %93 = vector.shape_cast %92 : vector<128xf32> to vector<1x128xf32>
    %94 = vector.broadcast %93 : vector<1x128xf32> to vector<256x128xf32>
    %95 = arith.addf %90, %94 : vector<256x128xf32>
    %cst_73 = arith.constant 0.000000e+00 : f32
    %96 = vector.broadcast %cst_73 : f32 to vector<256x128xf32>
    %97 = arith.maximumf %95, %96 : vector<256x128xf32>
    %98 = vector.extract_strided_slice %37 {offsets = [1, 0, 0], sizes = [16, 16, 128], strides = [1, 1, 1]} : vector<18x16x128xf32> to vector<16x16x128xf32>
    %99 = vector.shape_cast %98 : vector<16x16x128xf32> to vector<256x128xf32>
    %c0_74 = arith.constant 0 : index
    %c0_75 = arith.constant 0 : index
    %100 = vector.load %arg9[%c0_74, %c0_75] : memref<128x128xf32, #tpu.memory_space<vmem>>, vector<128x128xf32>
    %cst_76 = arith.constant dense<0.000000e+00> : vector<256x128xf32>
    %101 = tpu.matmul %97, %100, %cst_76 {dimension_numbers = #tpu.dot_dimension_numbers<[1], [0], [0], [1], [0, 0, 1, 1], [], []>} : vector<256x128xf32>, vector<128x128xf32>, vector<256x128xf32> -> vector<256x128xf32>
    %c0_77 = arith.constant 0 : index
    %c0_78 = arith.constant 0 : index
    %102 = vector.load %arg10[%c0_77, %c0_78] : memref<1x128xf32, #tpu.memory_space<vmem>>, vector<1x128xf32>
    %103 = vector.shape_cast %102 : vector<1x128xf32> to vector<128xf32>
    %104 = vector.shape_cast %103 : vector<128xf32> to vector<1x128xf32>
    %105 = vector.broadcast %104 : vector<1x128xf32> to vector<256x128xf32>
    %106 = arith.addf %101, %105 : vector<256x128xf32>
    %107 = arith.addf %106, %99 : vector<256x128xf32>
    %108 = vector.shape_cast %107 : vector<256x128xf32> to vector<16x16x128xf32>
    %c0_79 = arith.constant 0 : index
    %c0_80 = arith.constant 0 : index
    %c0_81 = arith.constant 0 : index
    %c0_82 = arith.constant 0 : index
    %109 = vector.load %arg11[%c0_79, %c0_80, %c0_81, %c0_82] : memref<1x16x16x128xf32, #tpu.memory_space<vmem>>, vector<1x16x16x128xf32>
    %110 = vector.shape_cast %109 : vector<1x16x16x128xf32> to vector<16x16x128xf32>
    %111 = vector.shape_cast %108 : vector<16x16x128xf32> to vector<1x16x16x128xf32>
    tpu.vector_store %arg11[%c0_79, %c0_80, %c0_81, %c0_82], %111 {strides = array<i32>} : memref<1x16x16x128xf32, #tpu.memory_space<vmem>>, vector<1x16x16x128xf32>,
    return
  }
  func.func @transform_1(%arg0: i32, %arg1: i32) -> (i32, i32) {
    %c0_i32 = arith.constant 0 : i32
    %c0_i32_0 = arith.constant 0 : i32
    %c0_i32_1 = arith.constant 0 : i32
    return %c0_i32, %c0_i32_0 : i32, i32
  }
  func.func @transform_2(%arg0: i32, %arg1: i32) -> (i32, i32) {
    %c0_i32 = arith.constant 0 : i32
    %c0_i32_0 = arith.constant 0 : i32
    %c0_i32_1 = arith.constant 0 : i32
    return %c0_i32, %c0_i32_0 : i32, i32
  }
  func.func @transform_3(%arg0: i32, %arg1: i32) -> (i32, i32) {
    %c0_i32 = arith.constant 0 : i32
    %c0_i32_0 = arith.constant 0 : i32
    %c0_i32_1 = arith.constant 0 : i32
    return %c0_i32, %c0_i32_0 : i32, i32
  }
  func.func @transform_4(%arg0: i32, %arg1: i32) -> (i32, i32) {
    %c0_i32 = arith.constant 0 : i32
    %c0_i32_0 = arith.constant 0 : i32
    %c0_i32_1 = arith.constant 0 : i32
    return %c0_i32, %c0_i32_0 : i32, i32
  }
  func.func @transform_5(%arg0: i32, %arg1: i32) -> (i32, i32, i32) {
    %c0_i32 = arith.constant 0 : i32
    %c0_i32_0 = arith.constant 0 : i32
    %c0_i32_1 = arith.constant 0 : i32
    %c0_i32_2 = arith.constant 0 : i32
    return %c0_i32, %c0_i32_0, %c0_i32_1 : i32, i32, i32
  }
  func.func @transform_6(%arg0: i32, %arg1: i32) -> (i32, i32) {
    %c0_i32 = arith.constant 0 : i32
    %c0_i32_0 = arith.constant 0 : i32
    %c0_i32_1 = arith.constant 0 : i32
    return %c0_i32, %c0_i32_0 : i32, i32
  }
  func.func @transform_7(%arg0: i32, %arg1: i32) -> (i32, i32) {
    %c0_i32 = arith.constant 0 : i32
    %c0_i32_0 = arith.constant 0 : i32
    %c0_i32_1 = arith.constant 0 : i32
    return %c0_i32, %c0_i32_0 : i32, i32
  }
  func.func @transform_8(%arg0: i32, %arg1: i32) -> (i32, i32) {
    %c0_i32 = arith.constant 0 : i32
    %c0_i32_0 = arith.constant 0 : i32
    %c0_i32_1 = arith.constant 0 : i32
    return %c0_i32, %c0_i32_0 : i32, i32
  }
  func.func @transform_9(%arg0: i32, %arg1: i32) -> (i32, i32, i32, i32) {
    %c0_i32 = arith.constant 0 : i32
    %c0_i32_0 = arith.constant 0 : i32
    %c0_i32_1 = arith.constant 0 : i32
    return %arg0, %arg1, %c0_i32, %c0_i32_0 : i32, i32, i32, i32
  }
}

</mosaic_0001>

<bundles_post_ra>
// kernel: tpu_custom_call.1
= control target key start
LH: loop header
LB: loop body
LE: loop exit
PB: predicated region body
PF: predicated region fallthrough
CT: control target
= control target key end

     0   :  { %s5947_s0 = inlined_call_operand.hbm [shape: f32[2,16,16,128], index: 0, kind: input, shape index: {}]   ;;  %s5948_s1 = inlined_call_operand.vmem [shape: f32[1,128], index: 1, kind: input, shape index: {}]   ;;  %s5949_s2 = inlined_call_operand.vmem [shape: f32[1,128], index: 2, kind: input, shape index: {}]   ;;  %s5950_s3 = inlined_call_operand.hbm [shape: f32[128,128], index: 3, kind: input, shape index: {}]   ;;  %s5951_s4 = inlined_call_operand.vmem [shape: f32[1,128], index: 4, kind: input, shape index: {}]   ;;  %s5952_s5 = inlined_call_operand.hbm [shape: f32[3,384,128], index: 5, kind: input, shape index: {}]   ;;  %s5953_s6 = inlined_call_operand.vmem [shape: f32[1,128], index: 6, kind: input, shape index: {}]   ;;  %s5954_s7 = inlined_call_operand.hbm [shape: f32[128,128], index: 7, kind: input, shape index: {}]   ;;  %s5955_s8 = inlined_call_operand.vmem [shape: f32[1,128], index: 8, kind: input, shape index: {}]   ;;  %s5956_s9 = inlined_call_operand.hbm [shape: f32[2,16,16,128], index: 9, kind: output, shape index: {}]  }
   0x1   :  { %6016 = sst [smem:[#allocation59_spill]] %s5952_s5 }
   0x2   :  { %14 = vsyncpa [#allocation6], 0 }
   0x3   :  { %15 = vsyncpa [#allocation9], 0 }
   0x4   :  { %16 = vsyncpa [#allocation7], 0 }
   0x5   :  { %18 = vsyncpa [#allocation7 + $0x1], 0  ;;  %s4585_s30 = smov 0   ;;  %s4587_s10 = smov 0  }
   0x6   :  { %s4589_s11 = smov 0   ;;  %s4591_s12 = smov 0  }
   0x7   :  { %s4593_s13 = smov 0   ;;  %s4595_s14 = smov 0  }
   0x8 LB: > { %6017 = sst [smem:[#allocation24_spill]] %s4501_s30  ;;  %s3147_s15 = sadd.s32 4294967295, %s4521_s14   ;;  %s4521_s14 = sphi %s4595_s14, %s24_s14   ;;  %s4517_s13 = sphi %s4593_s13, %s6100_s13   ;;  %s4513_s12 = sphi %s4591_s12, %s6099_s12   ;;  %s4509_s11 = sphi %s4589_s11, %s6098_s11   ;;  %s4505_s10 = sphi %s4587_s10, %s6102_s10   ;;  %s4501_s30 = sphi %s4585_s30, %s6101_s30  }
   0x9   : > { %6018 = sst [smem:[#allocation25_spill]] %s4509_s11  ;;  %s3148_s16 = sadd.s32 4294967294, %s4521_s14  }
   0xa   : > { %6019 = sst [smem:[#allocation26_spill]] %s4517_s13  ;;  %s36_s17 = sadd.s32 1, %s4517_s13 }
   0xb   : > { %s213_s18 = sadd.s32 1, %s4509_s11  ;;  %p38_p0 = scmp.ge.s32.totalorder %s36_s17, 2 }
   0xc   : > { %p223_p1 = scmp.ne.s32.totalorder %s4509_s11, %s4505_s10  ;;  %p224_p2 = scmp.eq.s32.totalorder %s3147_s15, 1 }
   0xd   : > { %p229_p3 = scmp.ne.s32.totalorder %s4505_s10, %s4501_s30  ;;  %s6104_s17 = smov (%p38_p0, %s36_s17), 0 }
   0xe   : > { %6020 = sst [smem:[#allocation27_spill]] %s6104_s17  ;;  %p4625_p4 = por %p224_p2, %p223_p1 }
   0xf   : > { %p230_p5 = scmp.eq.s32.totalorder %s3148_s16, 1  ;;  %s208_s20 = ssub.s32 %s4517_s13, %s6104_s17 }
  0x10   : > { %s6021_s19 = scalar_select %p4625_p4, 1, 0 }
  0x11   : > { %p3149_p6 = scmp.ge.s32.totalorder %s4521_s14, 1  ;;  %p211_p7 = scmp.eq.s32.totalorder %s208_s20, 0 }
  0x12   : > { %p4632_p8 = por %p230_p5, %p229_p3  ;;  %p237_p9 = scmp.lt.s32.totalorder %s4521_s14, 3 }
  0x13   : > { %s4638_s22 = scalar_select %p211_p7, %s4509_s11, %s213_s18  }
  0x14   : > { %s6022_s21 = scalar_select %p4632_p8, 1, 0 }
  0x15   : > { %6024 = sst [smem:[#allocation29_spill]] %s4638_s22  ;;  %p4640_p10 = pnand %p3149_p6, %p237_p9 }
  0x16   : > { %6023 = sst [smem:[#allocation28_spill]] %s6022_s21  ;;  %p4644_p11 = scmp.eq.s32.totalorder %s3147_s15, 0 }
  0x17   : > { %s6025_s23 = scalar_select %p4640_p10, 1, 0 }
  0x18   : > { %s6026_s24 = scalar_select %p4644_p11, 1, 0 }
  0x19   : > { %p4164_p12 = pneg %p4640_p10  ;;  %s4523_s25 = smov [#allocation8]  }
  0x1a   : > { %s271_s26 = sshll.u32 %s4523_s25, 4  ;;  %s4524_s28 = smov [#allocation5]   ;;  %s272_s26 = int_to_ptr.vmem [resolvable:$true] %s271_s26 }
  0x1b   : > { %p4652_p13 = pnand %p4644_p11, %p4164_p12  ;;  %s255_s29 = sshll.u32 %s4524_s28, 4  ;;  %s256_s29 = int_to_ptr.vmem [resolvable:$true] %s255_s29 }
  0x1c   : > { %s6028_s5 = sld [smem:[#allocation59_spill]] }
  0x1d   : > { %p4664_p1 = pneg %p4652_p13 }
  0x22   : > { %s4325_s15 = scalar_lea.hbm %s6028_s5, 18432 }
  0x23   : > { %p4326_p0 = scmp.ne.s32.totalorder %s6028_s5, %s4325_s15  ;;  %p4332_p5 = scmp.lt.u32.totalorder %s4325_s15, %s6028_s5 }
  0x25   : > { %p4328_p2 = pnand %p4664_p1, %p4326_p0 }
  0x27   : > { %p4329_p3 = pneg %p4328_p2 }
  0x29   : > { %p4334_p6 = pnand %p4332_p5, %p4329_p3 }
  0x2b   : > { %4337 = shalt.err (!%p4334_p6)
}
  0x2c   : > { %s4338_s28 = scalar_lea.vmem %s272_s26, 18432  ;;  %p4346_p8 = scmp.lt.s32.totalorder %s272_s26, %s272_s26 }
  0x2d   : > { %p4339_p7 = scmp.ne.s32.totalorder %s272_s26, %s4338_s28  ;;  %p4347_p4 = scmp.lt.s32.totalorder %s4338_s28, %s4338_s28 }
  0x2f   : > { %p4341_p9 = pnand %p4339_p7, %p4664_p1  ;;  %p4348_p11 = por %p4347_p4, %p4346_p8 }
  0x31   : > { %p4342_p12 = pneg %p4341_p9 }
  0x33   : > { %p4349_p10 = pnand %p4348_p11, %p4342_p12 }
  0x35   : > { %4352 = shalt.err (!%p4349_p10)
}
  0x36   : > { %s4525_s17 = smov 128   ;;  %s4526_s16 = smov 8  }
  0x37   : > { %4170 = dma.hbm_to_vmem [thread:$0]  (!%p4652_p13), %s6028_s5, 18432, %s272_s26, [#allocation9], %s4525_s17, %s4525_s17, %s4526_s16  }
  0x38   : > { %s4353_s20 = scalar_lea.hbm %s5950_s3, 2048 }
  0x39   : > { %p4354_p4 = scmp.ne.s32.totalorder %s5950_s3, %s4353_s20  ;;  %p4360_p11 = scmp.lt.u32.totalorder %s4353_s20, %s5950_s3 }
  0x3b   : > { %p4356_p8 = pnand %p4354_p4, %p4664_p1 }
  0x3d   : > { %p4357_p10 = pneg %p4356_p8 }
  0x3f   : > { %p4362_p0 = pnand %p4360_p11, %p4357_p10 }
  0x41   : > { %4365 = shalt.err (!%p4362_p0)
}
  0x42   : > { %s4366_s13 = scalar_lea.vmem %s256_s29, 2048  ;;  %p4374_p6 = scmp.lt.s32.totalorder %s256_s29, %s256_s29 }
  0x43   : > { %p4367_p2 = scmp.ne.s32.totalorder %s256_s29, %s4366_s13  ;;  %p4375_p7 = scmp.lt.s32.totalorder %s4366_s13, %s4366_s13 }
  0x45   : > { %p4369_p3 = pnand %p4367_p2, %p4664_p1  ;;  %p4376_p9 = por %p4375_p7, %p4374_p6 }
  0x47   : > { %p4370_p5 = pneg %p4369_p3 }
  0x49   : > { %p4377_p12 = pnand %p4376_p9, %p4370_p5 }
  0x4b   : > { %4380 = shalt.err (!%p4377_p12)
}
  0x4c   : > { %4167 = dma.hbm_to_vmem [thread:$0]  (!%p4652_p13), %s5950_s3, 2048, %s256_s29, [#allocation6], %s4525_s17, %s4525_s17, %s4526_s16  }
  0x4d   : > { %s4527_s21 = smov [#allocation10]   ;;  %s4381_s15 = scalar_lea.hbm %s5954_s7, 2048 }
  0x4e   : > { %s287_s26 = sshll.u32 %s4527_s21, 4  ;;  %p4382_p4 = scmp.ne.s32.totalorder %s5954_s7, %s4381_s15  ;;  %s288_s26 = int_to_ptr.vmem [resolvable:$true] %s287_s26 }
  0x4f   : > { %p4388_p11 = scmp.lt.u32.totalorder %s4381_s15, %s5954_s7 }
  0x50   : > { %p4384_p8 = pnand %p4382_p4, %p4664_p1 }
  0x52   : > { %p4385_p10 = pneg %p4384_p8 }
  0x54   : > { %p4390_p0 = pnand %p4388_p11, %p4385_p10 }
  0x56   : > { %4393 = shalt.err (!%p4390_p0)
}
  0x57   : > { %s4394_s29 = scalar_lea.vmem %s288_s26, 2048  ;;  %p4402_p6 = scmp.lt.s32.totalorder %s288_s26, %s288_s26 }
  0x58   : > { %p4395_p2 = scmp.ne.s32.totalorder %s288_s26, %s4394_s29  ;;  %p4403_p7 = scmp.lt.s32.totalorder %s4394_s29, %s4394_s29 }
  0x5a   : > { %p4397_p3 = pnand %p4395_p2, %p4664_p1  ;;  %p4404_p9 = por %p4403_p7, %p4402_p6 }
  0x5c   : > { %p4398_p5 = pneg %p4397_p3 }
  0x5e   : > { %p4405_p12 = pnand %p4404_p9, %p4398_p5 }
  0x60   : > { %4408 = shalt.err (!%p4405_p12)
}
  0x61   : > { %4173 = dma.hbm_to_vmem [thread:$0]  (!%p4652_p13), %s5954_s7, 2048, %s288_s26, [#allocation9], %s4525_s17, %s4525_s17, %s4526_s16  }
  0x62   : > { %p6030_p4 = scmp.ne.s32.totalorder %s6025_s23, 0 }
  0x64   : > { %306 = sbr.rel (%p6030_p4) target bundleno = 1200 (0x4b0), region = 52 }
  0x6b   : > { %p6031_p1 = scmp.ne.s32.totalorder %s6026_s24, 0 }
  0x6d   : > { %4486 = dma.done.wait (%p6031_p1), [#allocation6], 2048  }
  0x6e   : > { %4488 = vsyncadd (%p6031_p1), [#allocation6], 4294965248 }
  0x6f   : > { %4490 = dma.done.wait (%p6031_p1), [#allocation9], 20480  }
  0x70   : > { %4492 = vsyncadd (%p6031_p1), [#allocation9], 4294946816  ;;  %s340_s27 = sand.u32 1, %s4505_s10   ;;  %s3175_s25 = sshll.u32 %s4513_s12, 12  ;;  %v4528_v0 = vmov 0.0  }
  0x71   : > { %s4739_s23 = sshll.u32 %s340_s27, 8  ;;  %s4746_s11 = scalar_lea.hbm %s5947_s0, %s3175_s25  ;;  %409 = vst [vmem:[#allocation3] sm:$0xff] %v4528_v0  ;;  %410 = vst [vmem:[#allocation3 + $0x20] sm:$0xff] %v4528_v0 }
  0x72   : > { %411 = vst [vmem:[#allocation3 + $0x40] sm:$0xff] %v4528_v0  ;;  %412 = vst [vmem:[#allocation3 + $0x60] sm:$0xff] %v4528_v0  ;;  %s4529_s24 = smov [#allocation2 + $0x10]   ;;  %s4409_s26 = scalar_lea.hbm %s4746_s11, 4096 }
  0x73   : > { %413 = vst [vmem:[#allocation3 + $0x80] sm:$0xff] %v4528_v0  ;;  %414 = vst [vmem:[#allocation3 + $0xa0] sm:$0xff] %v4528_v0  ;;  %s364_s21 = sshll.u32 %s4529_s24, 4  ;;  %p4410_p13 = scmp.ne.s32.totalorder %s4746_s11, %s4409_s26  ;;  %s365_s21 = int_to_ptr.vmem [resolvable:$true] %s364_s21 }
  0x74   : > { %415 = vst [vmem:[#allocation3 + $0xc0] sm:$0xff] %v4528_v0  ;;  %416 = vst [vmem:[#allocation3 + $0xe0] sm:$0xff] %v4528_v0  ;;  %s4411_s15 = scalar_lea.hbm %s5947_s0, 8192  ;;  %p4412_p8 = scmp.lt.u32.totalorder %s4746_s11, %s5947_s0 }
  0x75   : > { %417 = vst [vmem:[#allocation3 + $0x100] sm:$0xff] %v4528_v0  ;;  %418 = vst [vmem:[#allocation3 + $0x120] sm:$0xff] %v4528_v0  ;;  %p4413_p10 = scmp.lt.u32.totalorder %s4411_s15, %s4409_s26  ;;  %p4415_p0 = scmp.lt.u32.totalorder %s4409_s26, %s4746_s11 }
  0x76   : > { %419 = vst [vmem:[#allocation3 + $0x140] sm:$0xff] %v4528_v0  ;;  %420 = vst [vmem:[#allocation3 + $0x160] sm:$0xff] %v4528_v0 }
  0x77   : > { %421 = vst [vmem:[#allocation3 + $0x180] sm:$0xff] %v4528_v0  ;;  %422 = vst [vmem:[#allocation3 + $0x1a0] sm:$0xff] %v4528_v0  ;;  %p4414_p11 = por %p4413_p10, %p4412_p8 }
  0x78   : > { %423 = vst [vmem:[#allocation3 + $0x1c0] sm:$0xff] %v4528_v0  ;;  %424 = vst [vmem:[#allocation3 + $0x1e0] sm:$0xff] %v4528_v0 }
  0x79   : > { %425 = vst [vmem:[#allocation3 + $0x200] sm:$0xff] %v4528_v0  ;;  %426 = vst [vmem:[#allocation3 + $0x220] sm:$0xff] %v4528_v0  ;;  %p4416_p2 = por %p4415_p0, %p4414_p11 }
  0x7a   : > { %427 = vst [vmem:[#allocation3 + $0x18] sm:$0x1] %v4528_v0  ;;  %428 = vst [vmem:[#allocation3 + $0x38] sm:$0x1] %v4528_v0 }
  0x7b   : > { %429 = vst [vmem:[#allocation3 + $0x58] sm:$0x1] %v4528_v0  ;;  %430 = vst [vmem:[#allocation3 + $0x78] sm:$0x1] %v4528_v0  ;;  %p4417_p3 = pnand %p4416_p2, %p4410_p13 }
  0x7c   : > { %431 = vst [vmem:[#allocation3 + $0x98] sm:$0x1] %v4528_v0  ;;  %432 = vst [vmem:[#allocation3 + $0xb8] sm:$0x1] %v4528_v0 }
  0x7d   : > { %433 = vst [vmem:[#allocation3 + $0xd8] sm:$0x1] %v4528_v0  ;;  %434 = vst [vmem:[#allocation3 + $0xf8] sm:$0x1] %v4528_v0 }
  0x7e   : > { %435 = vst [vmem:[#allocation3 + $0x118] sm:$0x1] %v4528_v0  ;;  %436 = vst [vmem:[#allocation3 + $0x138] sm:$0x1] %v4528_v0 }
  0x7f   : > { %437 = vst [vmem:[#allocation3 + $0x158] sm:$0x1] %v4528_v0  ;;  %438 = vst [vmem:[#allocation3 + $0x178] sm:$0x1] %v4528_v0 }
  0x80   : > { %439 = vst [vmem:[#allocation3 + $0x198] sm:$0x1] %v4528_v0  ;;  %440 = vst [vmem:[#allocation3 + $0x1b8] sm:$0x1] %v4528_v0 }
  0x81   : > { %441 = vst [vmem:[#allocation3 + $0x1d8] sm:$0x1] %v4528_v0  ;;  %442 = vst [vmem:[#allocation3 + $0x1f8] sm:$0x1] %v4528_v0 }
  0x82   : > { %443 = vst [vmem:[#allocation3 + $0x218] sm:$0x1] %v4528_v0  ;;  %444 = vst [vmem:[#allocation3 + $0x238] sm:$0x1] %v4528_v0 }
  0x83   : > { %4420 = shalt.err (!%p4417_p3)  }
  0x84   : > { %s4421_s13 = scalar_lea.vmem %s365_s21, 4096  ;;  %s4530_s29 = smov [#allocation2]  }
  0x85   : > { %p4422_p5 = scmp.ne.s32.totalorder %s365_s21, %s4421_s13  ;;  %s4423_s5 = sshll.u32 %s4530_s29, 4  ;;  %s4424_s5 = int_to_ptr.vmem [resolvable:$false] %s4423_s5 }
  0x86   : > { %s4425_s30 = scalar_lea.vmem %s4424_s5, 4608  ;;  %p4426_p6 = scmp.lt.s32.totalorder %s365_s21, %s4424_s5 }
  0x87   : > { %p4427_p7 = scmp.lt.s32.totalorder %s4425_s30, %s4421_s13 }
  0x89   : > { %p4428_p9 = por %p4427_p7, %p4426_p6 }
  0x8b   : > { %p4429_p12 = pnand %p4428_p9, %p4422_p5 }
  0x8d   : > { %4432 = shalt.err (!%p4429_p12)  }
  0x8e   : > { %367 = dma.hbm_to_vmem [thread:$0]  %s4746_s11, 4096, %s365_s21, [#allocation4] }
  0x8f   : > { %s4796_s17 = scalar_lea.vmem [#allocation11], %s4739_s23 }
  0x90   : > { %4493 = dma.done.wait [#allocation4], 4096 }
  0x91   : > { %4494 = vsyncadd [#allocation4], 4294963200  ;;  %469 = vst [vmem:[#allocation2] sm:$0xff] %v4528_v0  ;;  %v5966_v1 = vmov 0.0|0.0   ;;  %v632_v2 = vld [vmem:[#allocation5] sm:$0xff]  ;;  %v633_v3 = vld [vmem:[#allocation5 + $0x8] sm:$0xff]  ;;  %s5893_s5 = scalar_lea.hbm %s5956_s9, %s3175_s25 }
  0x92   : > { %975 = vst [vmem:[#allocation3] sm:$0xff] %v4528_v0  ;;  %978 = vst [vmem:[#allocation3 + $0x18] sm:$0x1] %v4528_v0  ;;  %3862 = vmatprep.subr.bf16.mxu1 %v5966_v1  ;;  %v634_v4 = vld [vmem:[#allocation5 + $0x10] sm:$0xff]  ;;  %v3830_v5 = vpack.c.bf16 %v633_v3, %v632_v2  ;;  %v635_v6 = vld [vmem:[#allocation5 + $0x18] sm:$0xff]  ;;  %s3020_s28 = sshll.u32 %s4796_s17, 4  ;;  %s5895_s28 = int_to_ptr.vmem [resolvable:$true] %s3020_s28 }
  0x93   : > { %980 = vst [vmem:[#allocation3 + $0x220] sm:$0xff] %v4528_v0  ;;  %983 = vst [vmem:[#allocation3 + $0x238] sm:$0x1] %v4528_v0  ;;  %v3834_v7 = vpack.c.bf16 %v635_v6, %v634_v4  ;;  %v636_v8 = vld [vmem:[#allocation5 + $0x20] sm:$0xff]  ;;  %v637_v9 = vld [vmem:[#allocation5 + $0x28] sm:$0xff]  ;;  %s5901_s30 = scalar_lea.sflag [#allocation7], %s340_s27 }
  0x94   : > { %977 = vst [vmem:[#allocation3 + $0x10] sm:$0xff] %v4528_v0  ;;  %976 = vst [vmem:[#allocation3 + $0x8] sm:$0xff] %v4528_v0  ;;  %3831 = vmatprep.subr.bf16.mxu0 %v3830_v5  ;;  %v3838_v10 = vpack.c.bf16 %v637_v9, %v636_v8  ;;  %v4811_v11 = vld [vmem:[%s5948_s1] ss:$0 sm:$0xff]  ;;  %v638_v13 = vld [vmem:[#allocation5 + $0x30] sm:$0xff]  ;;  %s4433_s23 = scalar_lea.vmem %s5895_s28, 4096 }
  0x95   : > { %982 = vst [vmem:[#allocation3 + $0x230] sm:$0xff] %v4528_v0  ;;  %981 = vst [vmem:[#allocation3 + $0x228] sm:$0xff] %v4528_v0  ;;  %3833 = vmatpush3.bf16.msra.mxu0 %v3830_v5  ;;  %v4816_v12 = vld [vmem:[%s5949_s2] ss:$0 sm:$0xff]  ;;  %v639_v14 = vld [vmem:[#allocation5 + $0x38] sm:$0xff]  ;;  %v517_v15 = vmul.f32 0.0, %v4811_v11  ;;  %p4434_p4 = scmp.ne.s32.totalorder %s5895_s28, %s4433_s23 }
  0x96   : > { %3835 = vmatprep.subr.bf16.mxu0 %v3834_v7  ;;  %v3842_v17 = vpack.c.bf16 %v639_v14, %v638_v13  ;;  %v640_v18 = vld [vmem:[#allocation5 + $0x40] sm:$0xff]  ;;  %v641_v19 = vld [vmem:[#allocation5 + $0x48] sm:$0xff]  ;;  %v642_v22 = vld [vmem:[#allocation5 + $0x50] sm:$0xff]  ;;  %p6093_p1 = scmp.ne.s32.totalorder %s6021_s19, 0  ;;  %s4532_s12 = smov [#allocation11]  }
  0x97   : > { %v560_v16 = vadd.f32 %v4816_v12, %v517_v15  ;;  %v3846_v21 = vpack.c.bf16 %v641_v19, %v640_v18  ;;  %v643_v23 = vld [vmem:[#allocation5 + $0x58] sm:$0xff]  ;;  %v644_v25 = vld [vmem:[#allocation5 + $0x60] sm:$0xff]  ;;  %v645_v26 = vld [vmem:[#allocation5 + $0x68] sm:$0xff]  ;;  %s4437_s25 = sshll.u32 %s4532_s12, 4  ;;  %s4438_s25 = int_to_ptr.vmem [resolvable:$false] %s4437_s25 }
  0x98   : > { %v3850_v24 = vpack.c.bf16 %v643_v23, %v642_v22  ;;  %v3854_v27 = vpack.c.bf16 %v645_v26, %v644_v25  ;;  %v476_v28 = vld [vmem:[#allocation2 + $0x10] sm:$0xff]  ;;  %v647_v30 = vld [vmem:[#allocation5 + $0x78] sm:$0xff]  ;;  %v478_v34 = vld [vmem:[#allocation2 + $0x20] sm:$0xff]  ;;  %p4435_p13 = pnand %p4434_p4, %p6093_p1  ;;  %s4439_s16 = scalar_lea.vmem %s4438_s25, 8192 }
  0x99   : > { %3837 = vmatpush3.bf16.msra.mxu0 %v3834_v7  ;;  %v4820_v20 = vmax.f32 %v560_v16, 0.0  ;;  %v646_v29 = vld [vmem:[#allocation5 + $0x70] sm:$0xff]  ;;  %v519_v31 = vmul.f32 %v4811_v11, %v476_v28  ;;  %v477_v32 = vld [vmem:[#allocation2 + $0x18] sm:$0xff]  ;;  %v521_v37 = vmul.f32 %v4811_v11, %v478_v34  ;;  %v479_v38 = vld [vmem:[#allocation2 + $0x28] sm:$0xff]  ;;  %p4440_p10 = scmp.lt.s32.totalorder %s5895_s28, %s4438_s25  ;;  %p4441_p11 = scmp.lt.s32.totalorder %s4439_s16, %s4433_s23 }
  0x9a   : > { %3839 = vmatprep.subr.bf16.mxu0 %v3838_v10  ;;  %v3858_v33 = vpack.c.bf16 %v647_v30, %v646_v29  ;;  %v520_v35 = vmul.f32 %v4811_v11, %v477_v32  ;;  %v1141_v39 = vld [vmem:[#allocation8 + $0x180] sm:$0xff]  ;;  %v1142_v40 = vld [vmem:[#allocation8 + $0x188] sm:$0xff]  ;;  %v480_v41 = vld [vmem:[#allocation2 + $0x30] sm:$0xff]  ;;  %v522_v45 = vmul.f32 %v4811_v11, %v479_v38  ;;  %p4436_p8 = pneg %p4435_p13 }
  0x9b   : > { %3456 = vmatprep.mubr.f32.mxu0 %v4820_v20  ;;  %v562_v36 = vadd.f32 %v4816_v12, %v519_v31  ;;  %v1143_v42 = vld [vmem:[#allocation8 + $0x190] sm:$0xff]  ;;  %v1144_v43 = vld [vmem:[#allocation8 + $0x198] sm:$0xff]  ;;  %v3863_v46 = vpack.c.bf16 %v1142_v40, %v1141_v39  ;;  %v1173_v47 = vld [vmem:[#allocation8 + $0x280] sm:$0xff]  ;;  %v564_v50 = vadd.f32 %v4816_v12, %v521_v37  ;;  %v523_v51 = vmul.f32 %v4811_v11, %v480_v41  ;;  %p4442_p0 = por %p4441_p11, %p4440_p10 }
  0x9c   : > { %v563_v44 = vadd.f32 %v4816_v12, %v520_v35  ;;  %v1174_v48 = vld [vmem:[#allocation8 + $0x288] sm:$0xff]  ;;  %v481_v52 = vld [vmem:[#allocation2 + $0x38] sm:$0xff]  ;;  %v1175_v53 = vld [vmem:[#allocation8 + $0x290] sm:$0xff]  ;;  %v3866_v56 = vpack.c.bf16 %v1144_v43, %v1143_v42  ;;  %v565_v61 = vadd.f32 %v4816_v12, %v522_v45 }
  0x9d   : > { %3841 = vmatpush3.bf16.msra.mxu0 %v3838_v10  ;;  %v598_v49 = vmax.f32 %v562_v36, 0.0  ;;  %v1176_v54 = vld [vmem:[#allocation8 + $0x298] sm:$0xff]  ;;  %v482_v55 = vld [vmem:[#allocation2 + $0x40] sm:$0xff]  ;;  %3864 = vmatpush1.bf16.msra.mxu1 %v3863_v46  ;;  %v1146_v58 = vld [vmem:[#allocation8 + $0x1a8] sm:$0xff]  ;;  %v3910_v59 = vpack.c.bf16 %v1174_v48, %v1173_v47  ;;  %v524_v62 = vmul.f32 %v4811_v11, %v481_v52  ;;  %v600_v3 = vmax.f32 %v564_v50, 0.0  ;;  %p4443_p2 = pnand %p4442_p0, %p4436_p8 }
  0x9e   : > { %3843 = vmatprep.subr.bf16.mxu0 %v3842_v17  ;;  %3865 = vmatprep.subr.bf16.mxu1 %v5966_v1  ;;  %v1145_v57 = vld [vmem:[#allocation8 + $0x1a0] sm:$0xff]  ;;  %v599_v60 = vmax.f32 %v563_v44, 0.0  ;;  %v3914_v63 = vpack.c.bf16 %v1176_v54, %v1175_v53  ;;  %v1178_v2 = vld [vmem:[#allocation8 + $0x2a8] sm:$0xff]  ;;  %v566_v4 = vadd.f32 %v4816_v12, %v523_v51  ;;  %v525_v5 = vmul.f32 %v4811_v11, %v482_v55  ;;  %v484_v7 = vld [vmem:[#allocation2 + $0x50] sm:$0xff] }
  0x9f   : > { %v1177_v0 = vld [vmem:[#allocation8 + $0x2a0] sm:$0xff]  ;;  %v483_v6 = vld [vmem:[#allocation2 + $0x48] sm:$0xff]  ;;  %v3869_v8 = vpack.c.bf16 %v1146_v58, %v1145_v57  ;;  %v1147_v9 = vld [vmem:[#allocation8 + $0x1b0] sm:$0xff]  ;;  %v601_v14 = vmax.f32 %v565_v61, 0.0  ;;  %v567_v15 = vadd.f32 %v4816_v12, %v524_v62  ;;  %v527_v22 = vmul.f32 %v4811_v11, %v484_v7 }
  0xa0   : > { %v1148_v10 = vld [vmem:[#allocation8 + $0x1b8] sm:$0xff]  ;;  %v3918_v13 = vpack.c.bf16 %v1178_v2, %v1177_v0  ;;  %v526_v16 = vmul.f32 %v4811_v11, %v483_v6  ;;  %v602_v19 = vmax.f32 %v566_v4, 0.0  ;;  %v1149_v26 = vld [vmem:[#allocation8 + $0x1c0] sm:$0xff]  ;;  %v487_v35 = vld [vmem:[#allocation2 + $0x68] sm:$0xff] }
  0xa1   : > { %3845 = vmatpush3.bf16.msra.mxu0 %v3842_v17  ;;  %3867 = vmatpush1.bf16.msra.mxu1 %v3866_v56  ;;  %v1179_v17 = vld [vmem:[#allocation8 + $0x2b0] sm:$0xff]  ;;  %v1180_v18 = vld [vmem:[#allocation8 + $0x2b8] sm:$0xff]  ;;  %v3872_v25 = vpack.c.bf16 %v1148_v10, %v1147_v9  ;;  %v603_v29 = vmax.f32 %v567_v15, 0.0  ;;  %v530_v42 = vmul.f32 %v4811_v11, %v487_v35  ;;  %v490_v47 = vld [vmem:[#allocation2 + $0x80] sm:$0xff] }
  0xa2   : > { %3847 = vmatprep.subr.bf16.mxu0 %v3846_v21  ;;  %3868 = vmatprep.subr.bf16.mxu1 %v5966_v1  ;;  %v485_v23 = vld [vmem:[#allocation2 + $0x58] sm:$0xff]  ;;  %v3922_v28 = vpack.c.bf16 %v1180_v18, %v1179_v17  ;;  %v569_v30 = vadd.f32 %v4816_v12, %v526_v16  ;;  %v488_v36 = vld [vmem:[#allocation2 + $0x70] sm:$0xff]  ;;  %v1154_v50 = vld [vmem:[#allocation8 + $0x1e8] sm:$0xff]  ;;  %v533_v56 = vmul.f32 %v4811_v11, %v490_v47 }
  0xa3   : > { %v528_v31 = vmul.f32 %v4811_v11, %v485_v23  ;;  %v1151_v38 = vld [vmem:[#allocation8 + $0x1d0] sm:$0xff]  ;;  %v1152_v39 = vld [vmem:[#allocation8 + $0x1d8] sm:$0xff]  ;;  %v531_v45 = vmul.f32 %v4811_v11, %v488_v36  ;;  %v573_v52 = vadd.f32 %v4816_v12, %v530_v42  ;;  %v491_v57 = vld [vmem:[#allocation2 + $0x88] sm:$0xff] }
  0xa4   : > { %v605_v40 = vmax.f32 %v569_v30, 0.0  ;;  %v489_v46 = vld [vmem:[#allocation2 + $0x78] sm:$0xff]  ;;  %v3878_v48 = vpack.c.bf16 %v1152_v39, %v1151_v38  ;;  %v492_v58 = vld [vmem:[#allocation2 + $0x90] sm:$0xff]  ;;  %v534_v0 = vmul.f32 %v4811_v11, %v491_v57  ;;  %v494_v6 = vld [vmem:[#allocation2 + $0xa0] sm:$0xff] }
  0xa5   : > { %3849 = vmatpush3.bf16.msra.mxu0 %v3846_v21  ;;  %v568_v21 = vadd.f32 %v4816_v12, %v525_v5  ;;  %3870 = vmatpush1.bf16.msra.mxu1 %v3869_v8  ;;  %v571_v41 = vadd.f32 %v4816_v12, %v528_v31  ;;  %v532_v53 = vmul.f32 %v4811_v11, %v489_v46  ;;  %v1156_v61 = vld [vmem:[#allocation8 + $0x1f8] sm:$0xff]  ;;  %v609_v62 = vmax.f32 %v573_v52, 0.0  ;;  %v1157_v8 = vld [vmem:[#allocation8 + $0x200] sm:$0xff]  ;;  %v1158_v9 = vld [vmem:[#allocation8 + $0x208] sm:$0xff] }
  0xa6   : > { %3851 = vmatprep.subr.bf16.mxu0 %v3850_v24  ;;  %3871 = vmatprep.subr.bf16.mxu1 %v5966_v1  ;;  %v574_v55 = vadd.f32 %v4816_v12, %v531_v45  ;;  %v535_v4 = vmul.f32 %v4811_v11, %v492_v58  ;;  %v493_v5 = vld [vmem:[#allocation2 + $0x98] sm:$0xff]  ;;  %v537_v17 = vmul.f32 %v4811_v11, %v494_v6  ;;  %v495_v18 = vld [vmem:[#allocation2 + $0xa8] sm:$0xff]  ;;  %v498_v31 = vld [vmem:[#allocation2 + $0xc0] sm:$0xff] }
  0xa7   : > { %v604_v32 = vmax.f32 %v568_v21, 0.0  ;;  %v607_v51 = vmax.f32 %v571_v41, 0.0  ;;  %v3887_v21 = vpack.c.bf16 %v1158_v9, %v1157_v8  ;;  %v1160_v23 = vld [vmem:[#allocation8 + $0x218] sm:$0xff]  ;;  %v499_v41 = vld [vmem:[#allocation2 + $0xc8] sm:$0xff]  ;;  %v500_v42 = vld [vmem:[#allocation2 + $0xd0] sm:$0xff] }
  0xa8   : > { %v610_v2 = vmax.f32 %v574_v55, 0.0  ;;  %v578_v16 = vadd.f32 %v4816_v12, %v535_v4  ;;  %v497_v30 = vld [vmem:[#allocation2 + $0xb8] sm:$0xff] }
  0xa9   : > { %3853 = vmatpush3.bf16.msra.mxu0 %v3850_v24  ;;  %v486_v24 = vld [vmem:[#allocation2 + $0x60] sm:$0xff]  ;;  %3873 = vmatpush1.bf16.msra.mxu1 %v3872_v25  ;;  %v1164_v45 = vld [vmem:[#allocation8 + $0x238] sm:$0xff] }
  0xaa   : > { %3855 = vmatprep.subr.bf16.mxu0 %v3854_v27  ;;  %v529_v34 = vmul.f32 %v4811_v11, %v486_v24  ;;  %3874 = vmatprep.subr.bf16.mxu1 %v5966_v1  ;;  %v501_v52 = vld [vmem:[#allocation2 + $0xd8] sm:$0xff] }
  0xab   : > { %v544_v57 = vmul.f32 %v4811_v11, %v501_v52  ;;  %v505_v6 = vld [vmem:[#allocation2 + $0xf8] sm:$0xff] }
  0xac   : > { %v572_v44 = vadd.f32 %v4816_v12, %v529_v34  ;;  %v1162_v34 = vld [vmem:[#allocation8 + $0x228] sm:$0xff] }
  0xad   : > { %3857 = vmatpush3.bf16.msra.mxu0 %v3854_v27  ;;  %v1150_v27 = vld [vmem:[#allocation8 + $0x1c8] sm:$0xff] }
  0xae   : > { %3859 = vmatprep.subr.bf16.mxu0 %v3858_v33  ;;  %v3875_v37 = vpack.c.bf16 %v1150_v27, %v1149_v26  ;;  %v608_v54 = vmax.f32 %v572_v44, 0.0  ;;  %v538_v26 = vmul.f32 %v4811_v11, %v495_v18  ;;  %v614_v27 = vmax.f32 %v578_v16, 0.0  ;;  %v1163_v44 = vld [vmem:[#allocation8 + $0x230] sm:$0xff]  ;;  %v507_v16 = vld [vmem:[#allocation2 + $0x108] sm:$0xff] }
  0xb0   : > { %3876 = vmatpush1.bf16.msra.mxu1 %v3875_v37  ;;  %v581_v36 = vadd.f32 %v4816_v12, %v538_v26  ;;  %v540_v37 = vmul.f32 %v4811_v11, %v497_v30  ;;  %v1181_v30 = vld [vmem:[#allocation8 + $0x2c0] sm:$0xff] }
  0xb1   : > { %3861 = vmatpush3.bf16.msra.mxu0 %v3858_v33  ;;  %v570_v33 = vadd.f32 %v4816_v12, %v527_v22  ;;  %3877 = vmatprep.subr.bf16.mxu1 %v5966_v1  ;;  %v1159_v22 = vld [vmem:[#allocation8 + $0x210] sm:$0xff] }
  0xb2   : > { %3911 = vmatprep.subr.bf16.mxu0 %v3910_v59  ;;  %v617_v46 = vmax.f32 %v581_v36, 0.0  ;;  %v583_v47 = vadd.f32 %v4816_v12, %v540_v37  ;;  %v1169_v37 = vld [vmem:[#allocation8 + $0x260] sm:$0xff] }
  0xb3   : > { %v606_v43 = vmax.f32 %v570_v33, 0.0  ;;  %v1161_v33 = vld [vmem:[#allocation8 + $0x220] sm:$0xff] }
  0xb4   : > { %3457 = vmatmul.mubr.f32.vlgmr.msra.gmra.mrb[0].mxu0 %v4820_v20  ;;  %3879 = vmatpush1.bf16.msra.mxu1 %v3878_v48  ;;  %v542_v48 = vmul.f32 %v4811_v11, %v499_v41  ;;  %v619_v55 = vmax.f32 %v583_v47, 0.0  ;;  %v1186_v41 = vld [vmem:[#allocation8 + $0x2e8] sm:$0xff]  ;;  %v1188_v47 = vld [vmem:[#allocation8 + $0x2f8] sm:$0xff] }
  0xb5   : > { %3459 = vmatprep.mubr.f32.mxu0 %v598_v49  ;;  %3913 = vmatpush3.bf16.msra.mxu0 %v3910_v59  ;;  %v1153_v49 = vld [vmem:[#allocation8 + $0x1e0] sm:$0xff] }
  0xb6   : > { %3915 = vmatprep.subr.bf16.mxu0 %v3914_v63  ;;  %v3881_v59 = vpack.c.bf16 %v1154_v50, %v1153_v49  ;;  %3880 = vmatprep.subr.bf16.mxu1 %v5966_v1 }
  0xb8   : > { %3460 = vmatmul.mubr.f32.gmra.mrb[2].mxu0 %v599_v60  ;;  %v1155_v60 = vld [vmem:[#allocation8 + $0x1f0] sm:$0xff]  ;;  %3882 = vmatpush1.bf16.msra.mxu1 %v3881_v59 }
  0xb9   : > { %3462 = vmatprep.mubr.f32.mxu0 %v600_v3  ;;  %3917 = vmatpush3.bf16.msra.mxu0 %v3914_v63  ;;  %v575_v63 = vadd.f32 %v4816_v12, %v532_v53  ;;  %v576_v3 = vadd.f32 %v4816_v12, %v533_v56  ;;  %v3884_v7 = vpack.c.bf16 %v1156_v61, %v1155_v60  ;;  %v502_v53 = vld [vmem:[#allocation2 + $0xe0] sm:$0xff]  ;;  %v503_v61 = vld [vmem:[#allocation2 + $0xe8] sm:$0xff] }
  0xba   : > { %3919 = vmatprep.subr.bf16.mxu0 %v3918_v13  ;;  %3883 = vmatprep.subr.bf16.mxu1 %v5966_v1  ;;  %v585_v56 = vadd.f32 %v4816_v12, %v542_v48  ;;  %v545_v60 = vmul.f32 %v4811_v11, %v502_v53 }
  0xbb   : > { %v611_v10 = vmax.f32 %v575_v63, 0.0  ;;  %v612_v15 = vmax.f32 %v576_v3, 0.0 }
  0xbc   : > { %3463 = vmatmul.mubr.f32.gmra.mrb[4].mxu0 %v601_v14  ;;  %v536_v14 = vmul.f32 %v4811_v11, %v493_v5  ;;  %3885 = vmatpush1.bf16.msra.mxu1 %v3884_v7  ;;  %v621_v63 = vmax.f32 %v585_v56, 0.0  ;;  %v588_v4 = vadd.f32 %v4816_v12, %v545_v60  ;;  %v506_v7 = vld [vmem:[#allocation2 + $0x100] sm:$0xff] }
  0xbd   : > { %3465 = vmatprep.mubr.f32.mxu0 %v602_v19  ;;  %3921 = vmatpush3.bf16.msra.mxu0 %v3918_v13  ;;  %v577_v13 = vadd.f32 %v4816_v12, %v534_v0  ;;  %v496_v19 = vld [vmem:[#allocation2 + $0xb0] sm:$0xff]  ;;  %v587_v0 = vadd.f32 %v4816_v12, %v544_v57 }
  0xbe   : > { %3923 = vmatprep.subr.bf16.mxu0 %v3922_v28  ;;  %3886 = vmatprep.subr.bf16.mxu1 %v5966_v1  ;;  %v579_v25 = vadd.f32 %v4816_v12, %v536_v14 }
  0xbf   : > { %v613_v24 = vmax.f32 %v577_v13, 0.0  ;;  %v623_v8 = vmax.f32 %v587_v0, 0.0  ;;  %v624_v13 = vmax.f32 %v588_v4, 0.0 }
  0xc0   : > { %3466 = vmatmul.mubr.f32.gmra.mrb[6].mxu0 %v603_v29  ;;  %v539_v29 = vmul.f32 %v4811_v11, %v496_v19  ;;  %3888 = vmatpush1.bf16.msra.mxu1 %v3887_v21  ;;  %v615_v35 = vmax.f32 %v579_v25, 0.0  ;;  %v550_v19 = vmul.f32 %v4811_v11, %v507_v16 }
  0xc1   : > { %3468 = vmatprep.mubr.f32.mxu0 %v604_v32  ;;  %3925 = vmatpush3.bf16.msra.mxu0 %v3922_v28  ;;  %v580_v28 = vadd.f32 %v4816_v12, %v537_v17  ;;  %v3890_v32 = vpack.c.bf16 %v1160_v23, %v1159_v22 }
  0xc2   : > { %3889 = vmatprep.subr.bf16.mxu1 %v5966_v1  ;;  %v582_v39 = vadd.f32 %v4816_v12, %v539_v29 }
  0xc3   : > { %v616_v38 = vmax.f32 %v580_v28, 0.0  ;;  %v1166_v28 = vld [vmem:[#allocation8 + $0x248] sm:$0xff] }
  0xc4   : > { %3469 = vmatmul.mubr.f32.gmra.mrb[8].mxu0 %v605_v40  ;;  %v541_v40 = vmul.f32 %v4811_v11, %v498_v31  ;;  %3891 = vmatpush1.bf16.msra.mxu1 %v3890_v32  ;;  %v618_v49 = vmax.f32 %v582_v39, 0.0  ;;  %v1182_v31 = vld [vmem:[#allocation8 + $0x2c8] sm:$0xff]  ;;  %v1167_v32 = vld [vmem:[#allocation8 + $0x250] sm:$0xff]  ;;  %v1185_v39 = vld [vmem:[#allocation8 + $0x2e0] sm:$0xff] }
  0xc5   : > { %3471 = vmatprep.mubr.f32.mxu0 %v606_v43  ;;  %v3893_v43 = vpack.c.bf16 %v1162_v34, %v1161_v33  ;;  %3892 = vmatprep.subr.bf16.mxu1 %v5966_v1  ;;  %v1168_v33 = vld [vmem:[#allocation8 + $0x258] sm:$0xff]  ;;  %v1183_v34 = vld [vmem:[#allocation8 + $0x2d0] sm:$0xff] }
  0xc6   : > { %v584_v50 = vadd.f32 %v4816_v12, %v541_v40 }
  0xc8   : > { %3472 = vmatmul.mubr.f32.gmra.mrb[10].mxu0 %v607_v51  ;;  %v543_v51 = vmul.f32 %v4811_v11, %v500_v42  ;;  %3894 = vmatpush1.bf16.msra.mxu1 %v3893_v43  ;;  %v620_v58 = vmax.f32 %v584_v50, 0.0  ;;  %v3934_v42 = vpack.c.bf16 %v1186_v41, %v1185_v39  ;;  %v1171_v43 = vld [vmem:[#allocation8 + $0x270] sm:$0xff]  ;;  %v1125_v50 = vld [vmem:[#allocation8 + $0x108] sm:$0xff]  ;;  %v1131_v41 = vld [vmem:[#allocation8 + $0x138] sm:$0xff] }
  0xc9   : > { %3474 = vmatprep.mubr.f32.mxu0 %v608_v54  ;;  %v3896_v54 = vpack.c.bf16 %v1164_v45, %v1163_v44  ;;  %3895 = vmatprep.subr.bf16.mxu1 %v5966_v1  ;;  %v1172_v44 = vld [vmem:[#allocation8 + $0x278] sm:$0xff]  ;;  %v1187_v45 = vld [vmem:[#allocation8 + $0x2f0] sm:$0xff] }
  0xca   : > { %v586_v59 = vadd.f32 %v4816_v12, %v543_v51  ;;  %v3938_v48 = vpack.c.bf16 %v1188_v47, %v1187_v45 }
  0xcc   : > { %3475 = vmatmul.mubr.f32.gmra.mrb[12].mxu0 %v609_v62  ;;  %v504_v62 = vld [vmem:[#allocation2 + $0xf0] sm:$0xff]  ;;  %3897 = vmatpush1.bf16.msra.mxu1 %v3896_v54  ;;  %v622_v3 = vmax.f32 %v586_v59, 0.0  ;;  %v4909_v54 = vld [vmem:[%s5951_s4] ss:$0 sm:$0xff] }
  0xcd   : > { %3477 = vmatprep.mubr.f32.mxu0 %v610_v2  ;;  %3898 = vmatprep.subr.bf16.mxu1 %v5966_v1  ;;  %v546_v2 = vmul.f32 %v4811_v11, %v503_v61  ;;  %v547_v5 = vmul.f32 %v4811_v11, %v504_v62 }
  0xcf   : > { %v589_v9 = vadd.f32 %v4816_v12, %v546_v2  ;;  %v590_v14 = vadd.f32 %v4816_v12, %v547_v5 }
  0xd0   : > { %3478 = vmatmul.mubr.f32.gmra.mrb[14].mxu0 %v611_v10  ;;  %v548_v10 = vmul.f32 %v4811_v11, %v505_v6  ;;  %v1092_v6 = vld [vmem:[#allocation8] sm:$0xff] }
  0xd1   : > { %3480 = vmatprep.mubr.f32.mxu0 %v612_v15  ;;  %v549_v15 = vmul.f32 %v4811_v11, %v506_v7  ;;  %v625_v17 = vmax.f32 %v589_v9, 0.0  ;;  %v626_v21 = vmax.f32 %v590_v14, 0.0  ;;  %v3926_v11 = vpack.c.bf16 %v1182_v31, %v1181_v30  ;;  %v1093_v7 = vld [vmem:[#allocation8 + $0x8] sm:$0xff]  ;;  %v1126_v9 = vld [vmem:[#allocation8 + $0x110] sm:$0xff] }
  0xd2   : > { %v591_v18 = vadd.f32 %v4816_v12, %v548_v10  ;;  %v1127_v10 = vld [vmem:[#allocation8 + $0x118] sm:$0xff]  ;;  %v3943_v16 = vpack.c.bf16 %v1093_v7, %v1092_v6 }
  0xd3   : > { %v592_v22 = vadd.f32 %v4816_v12, %v549_v15  ;;  %3927 = vmatprep.subr.bf16.mxu0 %v3926_v11 }
  0xd4   : > { %3481 = vmatmul.mubr.f32.gmra.mrb[16].mxu0 %v613_v24  ;;  %v627_v23 = vmax.f32 %v591_v18, 0.0  ;;  %v593_v24 = vadd.f32 %v4816_v12, %v550_v19  ;;  %v3902_v12 = vpack.c.bf16 %v1168_v33, %v1167_v32  ;;  %v1096_v33 = vld [vmem:[#allocation8 + $0x20] sm:$0xff] }
  0xd5   : > { %3483 = vmatprep.mubr.f32.mxu0 %v614_v27  ;;  %v628_v25 = vmax.f32 %v592_v22, 0.0  ;;  %v1165_v27 = vld [vmem:[#allocation8 + $0x240] sm:$0xff]  ;;  %3929 = vmatpush3.bf16.msra.mxu0 %v3926_v11 }
  0xd6   : > { %v629_v26 = vmax.f32 %v593_v24, 0.0  ;;  %v3899_v29 = vpack.c.bf16 %v1166_v28, %v1165_v27  ;;  %v3994_v24 = vpack.c.bf16 %v1127_v10, %v1126_v9  ;;  %v1128_v27 = vld [vmem:[#allocation8 + $0x120] sm:$0xff]  ;;  %v1129_v28 = vld [vmem:[#allocation8 + $0x128] sm:$0xff] }
  0xd8   : > { %3484 = vmatmul.mubr.f32.gmra.mrb[18].mxu0 %v615_v35  ;;  %3900 = vmatpush1.bf16.msra.mxu1 %v3899_v29  ;;  %v1184_v35 = vld [vmem:[#allocation8 + $0x2d8] sm:$0xff] }
  0xd9   : > { %3486 = vmatprep.mubr.f32.mxu0 %v616_v38  ;;  %3901 = vmatprep.subr.bf16.mxu1 %v5966_v1  ;;  %v3930_v36 = vpack.c.bf16 %v1184_v35, %v1183_v34  ;;  %v1170_v38 = vld [vmem:[#allocation8 + $0x268] sm:$0xff] }
  0xda   : > { %v3905_v40 = vpack.c.bf16 %v1170_v38, %v1169_v37  ;;  %v1097_v37 = vld [vmem:[#allocation8 + $0x28] sm:$0xff]  ;;  %v3998_v38 = vpack.c.bf16 %v1129_v28, %v1128_v27 }
  0xdb   : > { %3931 = vmatprep.subr.bf16.mxu0 %v3930_v36  ;;  %v3949_v47 = vpack.c.bf16 %v1097_v37, %v1096_v33  ;;  %v1103_v33 = vld [vmem:[#allocation8 + $0x58] sm:$0xff]  ;;  %v1136_v37 = vld [vmem:[#allocation8 + $0x160] sm:$0xff] }
  0xdc   : > { %3487 = vmatmul.mubr.f32.gmra.mrb[20].mxu0 %v617_v46  ;;  %3903 = vmatpush1.bf16.msra.mxu1 %v3902_v12  ;;  %v3908_v46 = vpack.c.bf16 %v1172_v44, %v1171_v43 }
  0xdd   : > { %3489 = vmatprep.mubr.f32.mxu0 %v618_v49  ;;  %3904 = vmatprep.subr.bf16.mxu1 %v5966_v1  ;;  %v1124_v49 = vld [vmem:[#allocation8 + $0x100] sm:$0xff] }
  0xde   : > { %3933 = vmatpush3.bf16.msra.mxu0 %v3930_v36  ;;  %v3990_v51 = vpack.c.bf16 %v1125_v50, %v1124_v49 }
  0xdf   : > { %3935 = vmatprep.subr.bf16.mxu0 %v3934_v42 }
  0xe0   : > { %3490 = vmatmul.mubr.f32.gmra.mrb[22].mxu0 %v619_v55  ;;  %3906 = vmatpush1.bf16.msra.mxu1 %v3905_v40  ;;  %v1130_v40 = vld [vmem:[#allocation8 + $0x130] sm:$0xff] }
  0xe1   : > { %3492 = vmatprep.mubr.f32.mxu0 %v620_v58  ;;  %3907 = vmatprep.subr.bf16.mxu1 %v5966_v1 }
  0xe2   : > { %3937 = vmatpush3.bf16.msra.mxu0 %v3934_v42 }
  0xe3   : > { %3939 = vmatprep.subr.bf16.mxu0 %v3938_v48 }
  0xe4   : > { %3493 = vmatmul.mubr.f32.gmra.mrb[24].mxu0 %v621_v63  ;;  %3909 = vmatpush1.bf16.msra.mxu1 %v3908_v46 }
  0xe5   : > { %3495 = vmatprep.mubr.f32.mxu0 %v622_v3  ;;  %3991 = vmatprep.subr.bf16.mxu1 %v3990_v51 }
  0xe6   : > { %3941 = vmatpush3.bf16.msra.mxu0 %v3938_v48 }
  0xe7   : > { %3942 = vmatprep.subr.bf16.mxu0 %v5966_v1 }
  0xe8   : > { %3496 = vmatmul.mubr.f32.gmra.mrb[26].mxu0 %v623_v8 }
  0xe9   : > { %3498 = vmatprep.mubr.f32.mxu0 %v624_v13 }
  0xec   : > { %3499 = vmatmul.mubr.f32.gmra.mrb[28].mxu0 %v625_v17  ;;  %v1094_v17 = vld [vmem:[#allocation8 + $0x10] sm:$0xff] }
  0xed   : > { %3501 = vmatprep.mubr.f32.mxu0 %v626_v21 }
  0xf0   : > { %3502 = vmatmul.mubr.f32.gmra.mrb[30].mxu0 %v627_v23  ;;  %v1095_v23 = vld [vmem:[#allocation8 + $0x18] sm:$0xff] }
  0xf1   : > { %3504 = vmatprep.mubr.f32.mxu0 %v628_v25  ;;  %v3946_v32 = vpack.c.bf16 %v1095_v23, %v1094_v17 }
  0xf4   : > { %3505 = vmatmul.mubr.f32.gmra.mrb[32].mxu0 %v629_v26 }
  0xf5   : > { %3507 = vmatprep.mubr.f32.mxu0 %v4820_v20 }
  0xf8   : > { %3508 = vmatmul.mubr.f32.gmra.mrb[34].mxu0 %v4820_v20 }
 0x187   : > { %v3458_v52 = vpop.f32.mrb[0].mxu0 }
 0x188   : > { %v721_v53 = vpop.f32.mrb[1].mxu0  ;;  %v1099_v52 = vld [vmem:[#allocation8 + $0x38] sm:$0xff] }
 0x189   : > { %v4002_v53 = vpack.c.bf16 %v1131_v41, %v1130_v40 }
 0x18b   : > { %v3461_v55 = vpop.f32.mrb[2].mxu0 }
 0x18c   : > { %v737_v56 = vadd.f32 %v3461_v55, %v4909_v54  ;;  %v731_v20 = vpop.f32.mrb[3].mxu0 }
 0x18d   : > { %v732_v57 = vadd.f32 %v4909_v54, %v731_v20  ;;  %v1133_v20 = vld [vmem:[#allocation8 + $0x148] sm:$0xff] }
 0x18e   : > { %v4913_v58 = vmax.f32 %v737_v56, 0.0  ;;  %v1132_v56 = vld [vmem:[#allocation8 + $0x140] sm:$0xff] }
 0x18f   : > { %v4915_v59 = vmax.f32 %v732_v57, 0.0  ;;  %v3464_v60 = vpop.f32.mrb[4].mxu0  ;;  %v4006_v9 = vpack.c.bf16 %v1133_v20, %v1132_v56 }
 0x190   : > { %939 = vst [vmem:[#allocation3 + $0x30] sm:$0xff] %v4913_v58  ;;  %v747_v61 = vadd.f32 %v3464_v60, %v4909_v54  ;;  %v741_v62 = vpop.f32.mrb[5].mxu0 }
 0x191   : > { %938 = vst [vmem:[#allocation3 + $0x28] sm:$0xff] %v4915_v59  ;;  %v742_v63 = vadd.f32 %v4909_v54, %v741_v62  ;;  %1253 = vmatprep.mubr.f32.mxu1 %v4915_v59 }
 0x192   : > { %v4922_v0 = vmax.f32 %v747_v61, 0.0 }
 0x193   : > { %v4924_v2 = vmax.f32 %v742_v63, 0.0  ;;  %v3467_v3 = vpop.f32.mrb[6].mxu0 }
 0x194   : > { %941 = vst [vmem:[#allocation3 + $0x50] sm:$0xff] %v4922_v0  ;;  %v757_v4 = vadd.f32 %v3467_v3, %v4909_v54  ;;  %v751_v5 = vpop.f32.mrb[7].mxu0  ;;  %v1100_v3 = vld [vmem:[#allocation8 + $0x40] sm:$0xff] }
 0x195   : > { %940 = vst [vmem:[#allocation3 + $0x48] sm:$0xff] %v4924_v2  ;;  %v752_v8 = vadd.f32 %v4909_v54, %v751_v5 }
 0x196   : > { %v4930_v13 = vmax.f32 %v757_v4, 0.0 }
 0x197   : > { %v4932_v14 = vmax.f32 %v752_v8, 0.0  ;;  %v3470_v15 = vpop.f32.mrb[8].mxu0  ;;  %v4944_v26 = vld [vmem:[#allocation3 + $0x31] sm:$0xff]  ;;  %v1101_v8 = vld [vmem:[#allocation8 + $0x48] sm:$0xff] }
 0x198   : > { %943 = vst [vmem:[#allocation3 + $0x70] sm:$0xff] %v4930_v13  ;;  %v767_v18 = vadd.f32 %v3470_v15, %v4909_v54  ;;  %v761_v19 = vpop.f32.mrb[9].mxu0  ;;  %v4936_v21 = vld [vmem:[#allocation3 + $0x29] sm:$0xff] }
 0x199   : > { %v4938_v22 = vld [vmem:[#allocation3 + $0x27] sm:$0xff]  ;;  %942 = vst [vmem:[#allocation3 + $0x68] sm:$0xff] %v4932_v14  ;;  %v762_v25 = vadd.f32 %v4909_v54, %v761_v19  ;;  %3542 = vmatprep.mubr.f32.mxu0 %v4936_v21  ;;  %v4958_v36 = vld [vmem:[#allocation3 + $0x2f] sm:$0xff] }
 0x19a   : > { %1254 = vmatmul.mubr.f32.vlgmr.msra.gmra.mrb[0].mxu1 %v4938_v22  ;;  %v4946_v29 = vmax.f32 %v767_v18, 0.0  ;;  %3543 = vmatmul.mubr.f32.vlgmr.msra.gmra.mrb[36].mxu0 %v4944_v26  ;;  %v1134_v15 = vld [vmem:[#allocation8 + $0x150] sm:$0xff] }
 0x19b   : > { %3993 = vmatpush3.bf16.msra.mxu1 %v3990_v51  ;;  %v4949_v30 = vmax.f32 %v762_v25, 0.0  ;;  %v3473_v31 = vpop.f32.mrb[10].mxu0  ;;  %1258 = vmatprep.mubr.f32.mxu1 %v4913_v58  ;;  %v4952_v11 = vld [vmem:[#allocation3 + $0x51] sm:$0xff]  ;;  %v3955_v25 = vpack.c.bf16 %v1101_v8, %v1100_v3 }
 0x19c   : > { %3944 = vmatpush1.bf16.msra.mxu0 %v3943_v16  ;;  %6032 = vst [vmem:[#allocation30_spill] sm:$0xff] %v4952_v11  ;;  %945 = vst [vmem:[#allocation3 + $0x90] sm:$0xff] %v4946_v29  ;;  %v777_v34 = vadd.f32 %v3473_v31, %v4909_v54  ;;  %v771_v12 = vpop.f32.mrb[11].mxu0  ;;  %v4956_v35 = vld [vmem:[#allocation3 + $0x49] sm:$0xff]  ;;  %3995 = vmatprep.subr.bf16.mxu1 %v3994_v24  ;;  %v1135_v16 = vld [vmem:[#allocation8 + $0x158] sm:$0xff] }
 0x19d   : > { %3945 = vmatprep.subr.bf16.mxu0 %v5966_v1  ;;  %944 = vst [vmem:[#allocation3 + $0x88] sm:$0xff] %v4949_v30  ;;  %v772_v39 = vadd.f32 %v4909_v54, %v771_v12  ;;  %3545 = vmatprep.mubr.f32.mxu0 %v4956_v35  ;;  %v4969_v43 = vld [vmem:[#allocation3 + $0x47] sm:$0xff]  ;;  %v1098_v51 = vld [vmem:[#allocation8 + $0x30] sm:$0xff] }
 0x19e   : > { %1259 = vmatmul.mubr.f32.gmra.mrb[2].mxu1 %v4958_v36  ;;  %v4965_v42 = vmax.f32 %v777_v34, 0.0  ;;  %3546 = vmatmul.mubr.f32.gmra.mrb[38].mxu0 %v4952_v11  ;;  %v3952_v63 = vpack.c.bf16 %v1099_v52, %v1098_v51  ;;  %v4996_v7 = vld [vmem:[#allocation3 + $0x4f] sm:$0xff]  ;;  %v4010_v34 = vpack.c.bf16 %v1135_v16, %v1134_v15  ;;  %v2125_v11 = vld [vmem:[#allocation8 + $0x418] sm:$0xff] }
 0x19f   : > { %1263 = vmatprep.mubr.f32.mxu1 %v4924_v2  ;;  %v4971_v44 = vmax.f32 %v772_v39, 0.0  ;;  %v3476_v45 = vpop.f32.mrb[12].mxu0  ;;  %v4973_v46 = vld [vmem:[#allocation3 + $0x71] sm:$0xff]  ;;  %3997 = vmatpush3.bf16.msra.mxu1 %v3994_v24 }
 0x1a0   : > { %3947 = vmatpush1.bf16.msra.mxu0 %v3946_v32  ;;  %6033 = vst [vmem:[#allocation31_spill] sm:$0xff] %v4973_v46  ;;  %947 = vst [vmem:[#allocation3 + $0xb0] sm:$0xff] %v4965_v42  ;;  %v787_v48 = vadd.f32 %v3476_v45, %v4909_v54  ;;  %v781_v49 = vpop.f32.mrb[13].mxu0  ;;  %v4977_v50 = vld [vmem:[#allocation3 + $0x69] sm:$0xff]  ;;  %3999 = vmatprep.subr.bf16.mxu1 %v3998_v38 }
 0x1a1   : > { %6034 = vst [vmem:[#allocation32_spill] sm:$0xff] %v4977_v50  ;;  %3948 = vmatprep.subr.bf16.mxu0 %v5966_v1  ;;  %946 = vst [vmem:[#allocation3 + $0xa8] sm:$0xff] %v4971_v44  ;;  %v782_v55 = vadd.f32 %v4909_v54, %v781_v49  ;;  %3548 = vmatprep.mubr.f32.mxu0 %v4977_v50  ;;  %v5007_v18 = vld [vmem:[#allocation3 + $0x67] sm:$0xff]  ;;  %v1102_v32 = vld [vmem:[#allocation8 + $0x50] sm:$0xff] }
 0x1a2   : > { %1264 = vmatmul.mubr.f32.gmra.mrb[4].mxu1 %v4969_v43  ;;  %v4984_v57 = vmax.f32 %v787_v48, 0.0  ;;  %3549 = vmatmul.mubr.f32.gmra.mrb[40].mxu0 %v4973_v46  ;;  %v1104_v48 = vld [vmem:[#allocation8 + $0x60] sm:$0xff] }
 0x1a3   : > { %1268 = vmatprep.mubr.f32.mxu1 %v4922_v0  ;;  %v4988_v60 = vmax.f32 %v782_v55, 0.0  ;;  %v3479_v61 = vpop.f32.mrb[14].mxu0  ;;  %v4990_v62 = vld [vmem:[#allocation3 + $0x91] sm:$0xff]  ;;  %4001 = vmatpush3.bf16.msra.mxu1 %v3998_v38  ;;  %v1137_v38 = vld [vmem:[#allocation8 + $0x168] sm:$0xff] }
 0x1a4   : > { %3950 = vmatpush1.bf16.msra.mxu0 %v3949_v47  ;;  %6035 = vst [vmem:[#allocation33_spill] sm:$0xff] %v4990_v62  ;;  %949 = vst [vmem:[#allocation3 + $0xd0] sm:$0xff] %v4984_v57  ;;  %v797_v4 = vadd.f32 %v3479_v61, %v4909_v54  ;;  %v791_v5 = vpop.f32.mrb[15].mxu0  ;;  %v4994_v6 = vld [vmem:[#allocation3 + $0x89] sm:$0xff]  ;;  %4003 = vmatprep.subr.bf16.mxu1 %v4002_v53  ;;  %v3958_v47 = vpack.c.bf16 %v1103_v33, %v1102_v32 }
 0x1a5   : > { %6036 = vst [vmem:[#allocation34_spill] sm:$0xff] %v4994_v6  ;;  %3951 = vmatprep.subr.bf16.mxu0 %v5966_v1  ;;  %948 = vst [vmem:[#allocation3 + $0xc8] sm:$0xff] %v4988_v60  ;;  %v792_v10 = vadd.f32 %v4909_v54, %v791_v5  ;;  %3551 = vmatprep.mubr.f32.mxu0 %v4994_v6  ;;  %v1105_v55 = vld [vmem:[#allocation8 + $0x68] sm:$0xff]  ;;  %v4014_v56 = vpack.c.bf16 %v1137_v38, %v1136_v37  ;;  %v1138_v61 = vld [vmem:[#allocation8 + $0x170] sm:$0xff] }
 0x1a6   : > { %1269 = vmatmul.mubr.f32.gmra.mrb[6].mxu1 %v4996_v7  ;;  %v5003_v17 = vmax.f32 %v797_v4, 0.0  ;;  %3552 = vmatmul.mubr.f32.gmra.mrb[42].mxu0 %v4990_v62  ;;  %v5045_v4 = vld [vmem:[#allocation3 + $0x87] sm:$0xff]  ;;  %v1119_v62 = vld [vmem:[#allocation8 + $0xd8] sm:$0xff] }
 0x1a7   : > { %1273 = vmatprep.mubr.f32.mxu1 %v4932_v14  ;;  %v5009_v19 = vmax.f32 %v792_v10, 0.0  ;;  %v3482_v23 = vpop.f32.mrb[16].mxu0  ;;  %v5011_v24 = vld [vmem:[#allocation3 + $0xb1] sm:$0xff]  ;;  %4005 = vmatpush3.bf16.msra.mxu1 %v4002_v53  ;;  %v3961_v10 = vpack.c.bf16 %v1105_v55, %v1104_v48  ;;  %v1109_v55 = vld [vmem:[#allocation8 + $0x88] sm:$0xff]  ;;  %v1120_v6 = vld [vmem:[#allocation8 + $0xe0] sm:$0xff] }
 0x1a8   : > { %3953 = vmatpush1.bf16.msra.mxu0 %v3952_v63  ;;  %6037 = vst [vmem:[#allocation35_spill] sm:$0xff] %v5011_v24  ;;  %951 = vst [vmem:[#allocation3 + $0xf0] sm:$0xff] %v5003_v17  ;;  %v807_v27 = vadd.f32 %v3482_v23, %v4909_v54  ;;  %v801_v28 = vpop.f32.mrb[17].mxu0  ;;  %v5015_v31 = vld [vmem:[#allocation3 + $0xa9] sm:$0xff]  ;;  %4007 = vmatprep.subr.bf16.mxu1 %v4006_v9  ;;  %v1139_v63 = vld [vmem:[#allocation8 + $0x178] sm:$0xff] }
 0x1a9   : > { %6038 = vst [vmem:[#allocation36_spill] sm:$0xff] %v5015_v31  ;;  %3954 = vmatprep.subr.bf16.mxu0 %v5966_v1  ;;  %950 = vst [vmem:[#allocation3 + $0xe8] sm:$0xff] %v5009_v19  ;;  %v802_v12 = vadd.f32 %v4909_v54, %v801_v28  ;;  %3554 = vmatprep.mubr.f32.mxu0 %v5015_v31  ;;  %v5034_v53 = vld [vmem:[#allocation3 + $0x6f] sm:$0xff]  ;;  %v4018_v28 = vpack.c.bf16 %v1139_v63, %v1138_v61  ;;  %v5083_v61 = vld [vmem:[#allocation3 + $0xa7] sm:$0xff] }
 0x1aa   : > { %1274 = vmatmul.mubr.f32.gmra.mrb[8].mxu1 %v5007_v18  ;;  %v5022_v39 = vmax.f32 %v807_v27, 0.0  ;;  %3555 = vmatmul.mubr.f32.gmra.mrb[44].mxu0 %v5011_v24  ;;  %v1107_v27 = vld [vmem:[#allocation8 + $0x78] sm:$0xff] }
 0x1ab   : > { %1278 = vmatprep.mubr.f32.mxu1 %v4930_v13  ;;  %v5026_v40 = vmax.f32 %v802_v12, 0.0  ;;  %v3485_v41 = vpop.f32.mrb[18].mxu0  ;;  %v5028_v45 = vld [vmem:[#allocation3 + $0xd1] sm:$0xff]  ;;  %4009 = vmatpush3.bf16.msra.mxu1 %v4006_v9 }
 0x1ac   : > { %3956 = vmatpush1.bf16.msra.mxu0 %v3955_v25  ;;  %6039 = vst [vmem:[#allocation37_spill] sm:$0xff] %v5028_v45  ;;  %953 = vst [vmem:[#allocation3 + $0x110] sm:$0xff] %v5022_v39  ;;  %v817_v49 = vadd.f32 %v3485_v41, %v4909_v54  ;;  %v811_v51 = vpop.f32.mrb[19].mxu0  ;;  %v5032_v52 = vld [vmem:[#allocation3 + $0xc9] sm:$0xff]  ;;  %4011 = vmatprep.subr.bf16.mxu1 %v4010_v34  ;;  %v1108_v41 = vld [vmem:[#allocation8 + $0x80] sm:$0xff] }
 0x1ad   : > { %6040 = vst [vmem:[#allocation38_spill] sm:$0xff] %v5032_v52  ;;  %3957 = vmatprep.subr.bf16.mxu0 %v5966_v1  ;;  %952 = vst [vmem:[#allocation3 + $0x108] sm:$0xff] %v5026_v40  ;;  %v812_v20 = vadd.f32 %v4909_v54, %v811_v51  ;;  %3557 = vmatprep.mubr.f32.mxu0 %v5032_v52  ;;  %v1106_v25 = vld [vmem:[#allocation8 + $0x70] sm:$0xff] }
 0x1ae   : > { %1279 = vmatmul.mubr.f32.gmra.mrb[10].mxu1 %v5034_v53  ;;  %v5041_v3 = vmax.f32 %v817_v49, 0.0  ;;  %3558 = vmatmul.mubr.f32.gmra.mrb[46].mxu0 %v5028_v45  ;;  %v3964_v38 = vpack.c.bf16 %v1107_v27, %v1106_v25  ;;  %v5072_v51 = vld [vmem:[#allocation3 + $0x8f] sm:$0xff]  ;;  %v1116_v45 = vld [vmem:[#allocation8 + $0xc0] sm:$0xff] }
 0x1af   : > { %1283 = vmatprep.mubr.f32.mxu1 %v4949_v30  ;;  %v5047_v5 = vmax.f32 %v812_v20, 0.0  ;;  %v3488_v8 = vpop.f32.mrb[20].mxu0  ;;  %v5049_v9 = vld [vmem:[#allocation3 + $0xf1] sm:$0xff]  ;;  %4013 = vmatpush3.bf16.msra.mxu1 %v4010_v34 }
 0x1b0   : > { %3959 = vmatpush1.bf16.msra.mxu0 %v3958_v47  ;;  %6041 = vst [vmem:[#allocation39_spill] sm:$0xff] %v5049_v9  ;;  %955 = vst [vmem:[#allocation3 + $0x130] sm:$0xff] %v5041_v3  ;;  %v827_v15 = vadd.f32 %v3488_v8, %v4909_v54  ;;  %v821_v16 = vpop.f32.mrb[21].mxu0  ;;  %v5053_v23 = vld [vmem:[#allocation3 + $0xe9] sm:$0xff]  ;;  %4015 = vmatprep.subr.bf16.mxu1 %v4014_v56 }
 0x1b1   : > { %6042 = vst [vmem:[#allocation40_spill] sm:$0xff] %v5053_v23  ;;  %3960 = vmatprep.subr.bf16.mxu0 %v5966_v1  ;;  %954 = vst [vmem:[#allocation3 + $0x128] sm:$0xff] %v5047_v5  ;;  %v822_v32 = vadd.f32 %v4909_v54, %v821_v16  ;;  %3560 = vmatprep.mubr.f32.mxu0 %v5053_v23 }
 0x1b2   : > { %1284 = vmatmul.mubr.f32.gmra.mrb[12].mxu1 %v5045_v4  ;;  %v5060_v33 = vmax.f32 %v827_v15, 0.0  ;;  %3561 = vmatmul.mubr.f32.gmra.mrb[48].mxu0 %v5049_v9  ;;  %v3967_v15 = vpack.c.bf16 %v1109_v55, %v1108_v41  ;;  %v1115_v9 = vld [vmem:[#allocation8 + $0xb8] sm:$0xff] }
 0x1b3   : > { %1288 = vmatprep.mubr.f32.mxu1 %v4946_v29  ;;  %v5064_v34 = vmax.f32 %v822_v32, 0.0  ;;  %v3491_v12 = vpop.f32.mrb[22].mxu0  ;;  %v5066_v37 = vld [vmem:[#allocation3 + $0x111] sm:$0xff]  ;;  %4017 = vmatpush3.bf16.msra.mxu1 %v4014_v56 }
 0x1b4   : > { %3962 = vmatpush1.bf16.msra.mxu0 %v3961_v10  ;;  %6043 = vst [vmem:[#allocation41_spill] sm:$0xff] %v5066_v37  ;;  %957 = vst [vmem:[#allocation3 + $0x150] sm:$0xff] %v5060_v33  ;;  %v837_v47 = vadd.f32 %v3491_v12, %v4909_v54  ;;  %v831_v48 = vpop.f32.mrb[23].mxu0  ;;  %v5070_v49 = vld [vmem:[#allocation3 + $0x109] sm:$0xff]  ;;  %4019 = vmatprep.subr.bf16.mxu1 %v4018_v28  ;;  %v1111_v12 = vld [vmem:[#allocation8 + $0x98] sm:$0xff] }
 0x1b5   : > { %6044 = vst [vmem:[#allocation42_spill] sm:$0xff] %v5070_v49  ;;  %3963 = vmatprep.subr.bf16.mxu0 %v5966_v1  ;;  %956 = vst [vmem:[#allocation3 + $0x148] sm:$0xff] %v5064_v34  ;;  %v832_v20 = vadd.f32 %v4909_v54, %v831_v48  ;;  %3563 = vmatprep.mubr.f32.mxu0 %v5070_v49  ;;  %v1110_v32 = vld [vmem:[#allocation8 + $0x90] sm:$0xff] }
 0x1b6   : > { %1289 = vmatmul.mubr.f32.gmra.mrb[14].mxu1 %v5072_v51  ;;  %v5079_v56 = vmax.f32 %v837_v47, 0.0  ;;  %3564 = vmatmul.mubr.f32.gmra.mrb[50].mxu0 %v5066_v37  ;;  %v3970_v55 = vpack.c.bf16 %v1111_v12, %v1110_v32  ;;  %v5122_v12 = vld [vmem:[#allocation3 + $0xc7] sm:$0xff] }
 0x1b7   : > { %1293 = vmatprep.mubr.f32.mxu1 %v4971_v44  ;;  %v5085_v63 = vmax.f32 %v832_v20, 0.0  ;;  %v3494_v8 = vpop.f32.mrb[24].mxu0  ;;  %v5087_v10 = vld [vmem:[#allocation3 + $0x131] sm:$0xff]  ;;  %4021 = vmatpush3.bf16.msra.mxu1 %v4018_v28  ;;  %v1112_v20 = vld [vmem:[#allocation8 + $0xa0] sm:$0xff] }
 0x1b8   : > { %3965 = vmatpush1.bf16.msra.mxu0 %v3964_v38  ;;  %6045 = vst [vmem:[#allocation43_spill] sm:$0xff] %v5087_v10  ;;  %959 = vst [vmem:[#allocation3 + $0x170] sm:$0xff] %v5079_v56  ;;  %v847_v16 = vadd.f32 %v3494_v8, %v4909_v54  ;;  %v841_v25 = vpop.f32.mrb[25].mxu0  ;;  %v5091_v27 = vld [vmem:[#allocation3 + $0x129] sm:$0xff]  ;;  %4022 = vmatprep.subr.bf16.mxu1 %v5966_v1 }
 0x1b9   : > { %6046 = vst [vmem:[#allocation44_spill] sm:$0xff] %v5091_v27  ;;  %3966 = vmatprep.subr.bf16.mxu0 %v5966_v1  ;;  %958 = vst [vmem:[#allocation3 + $0x168] sm:$0xff] %v5085_v63  ;;  %v842_v38 = vadd.f32 %v4909_v54, %v841_v25  ;;  %3566 = vmatprep.mubr.f32.mxu0 %v5091_v27  ;;  %v1113_v27 = vld [vmem:[#allocation8 + $0xa8] sm:$0xff] }
 0x1ba   : > { %1294 = vmatmul.mubr.f32.gmra.mrb[16].mxu1 %v5083_v61  ;;  %v5099_v28 = vmax.f32 %v847_v16, 0.0  ;;  %3567 = vmatmul.mubr.f32.gmra.mrb[52].mxu0 %v5087_v10  ;;  %v5111_v16 = vld [vmem:[#allocation3 + $0xaf] sm:$0xff]  ;;  %v6049_v10 = vmov 0.0|0.0   ;;  %v3973_v49 = vpack.c.bf16 %v1113_v27, %v1112_v20 }
 0x1bb   : > { %1298 = vmatprep.mubr.f32.mxu1 %v4965_v42  ;;  %v5103_v41 = vmax.f32 %v842_v38, 0.0  ;;  %v3497_v47 = vpop.f32.mrb[26].mxu0  ;;  %v5105_v48 = vld [vmem:[#allocation3 + $0x151] sm:$0xff] }
 0x1bc   : > { %3968 = vmatpush1.bf16.msra.mxu0 %v3967_v15  ;;  %6047 = vst [vmem:[#allocation45_spill] sm:$0xff] %v5105_v48  ;;  %961 = vst [vmem:[#allocation3 + $0x190] sm:$0xff] %v5099_v28  ;;  %v857_v8 = vadd.f32 %v3497_v47, %v4909_v54  ;;  %v851_v25 = vpop.f32.mrb[27].mxu0  ;;  %v5109_v1 = vld [vmem:[#allocation3 + $0x149] sm:$0xff] }
 0x1bd   : > { %6048 = vst [vmem:[#allocation46_spill] sm:$0xff] %v5109_v1  ;;  %3969 = vmatprep.subr.bf16.mxu0 %v6049_v10  ;;  %960 = vst [vmem:[#allocation3 + $0x188] sm:$0xff] %v5103_v41  ;;  %v852_v15 = vadd.f32 %v4909_v54, %v851_v25  ;;  %3569 = vmatprep.mubr.f32.mxu0 %v5109_v1 }
 0x1be   : > { %1299 = vmatmul.mubr.f32.gmra.mrb[18].mxu1 %v5111_v16  ;;  %v5118_v32 = vmax.f32 %v857_v8, 0.0  ;;  %3570 = vmatmul.mubr.f32.gmra.mrb[54].mxu0 %v5105_v48  ;;  %v1114_v48 = vld [vmem:[#allocation8 + $0xb0] sm:$0xff] }
 0x1bf   : > { %1303 = vmatprep.mubr.f32.mxu1 %v4988_v60  ;;  %v5124_v38 = vmax.f32 %v852_v15, 0.0  ;;  %v3500_v47 = vpop.f32.mrb[28].mxu0  ;;  %v5126_v37 = vld [vmem:[#allocation3 + $0x171] sm:$0xff]  ;;  %v3976_v23 = vpack.c.bf16 %v1115_v9, %v1114_v48  ;;  %v5160_v48 = vld [vmem:[#allocation3 + $0xe7] sm:$0xff] }
 0x1c0   : > { %3971 = vmatpush1.bf16.msra.mxu0 %v3970_v55  ;;  %6050 = vst [vmem:[#allocation47_spill] sm:$0xff] %v5126_v37  ;;  %963 = vst [vmem:[#allocation3 + $0x1b0] sm:$0xff] %v5118_v32  ;;  %v867_v25 = vadd.f32 %v3500_v47, %v4909_v54  ;;  %v861_v1 = vpop.f32.mrb[29].mxu0  ;;  %v5130_v8 = vld [vmem:[#allocation3 + $0x169] sm:$0xff] }
 0x1c1   : > { %6051 = vst [vmem:[#allocation48_spill] sm:$0xff] %v5130_v8  ;;  %3972 = vmatprep.subr.bf16.mxu0 %v6049_v10  ;;  %962 = vst [vmem:[#allocation3 + $0x1a8] sm:$0xff] %v5124_v38  ;;  %v862_v15 = vadd.f32 %v4909_v54, %v861_v1  ;;  %3572 = vmatprep.mubr.f32.mxu0 %v5130_v8 }
 0x1c2   : > { %1304 = vmatmul.mubr.f32.gmra.mrb[20].mxu1 %v5122_v12  ;;  %v5137_v27 = vmax.f32 %v867_v25, 0.0  ;;  %3573 = vmatmul.mubr.f32.gmra.mrb[56].mxu0 %v5126_v37  ;;  %v5149_v25 = vld [vmem:[#allocation3 + $0xcf] sm:$0xff] }
 0x1c3   : > { %1308 = vmatprep.mubr.f32.mxu1 %v4984_v57  ;;  %v5141_v55 = vmax.f32 %v862_v15, 0.0  ;;  %v3503_v20 = vpop.f32.mrb[30].mxu0  ;;  %v5143_v47 = vld [vmem:[#allocation3 + $0x191] sm:$0xff]  ;;  %v1117_v37 = vld [vmem:[#allocation8 + $0xc8] sm:$0xff] }
 0x1c4   : > { %3974 = vmatpush1.bf16.msra.mxu0 %v3973_v49  ;;  %6052 = vst [vmem:[#allocation49_spill] sm:$0xff] %v5143_v47  ;;  %965 = vst [vmem:[#allocation3 + $0x1d0] sm:$0xff] %v5137_v27  ;;  %v877_v1 = vadd.f32 %v3503_v20, %v4909_v54  ;;  %v871_v8 = vpop.f32.mrb[31].mxu0  ;;  %v5147_v52 = vld [vmem:[#allocation3 + $0x189] sm:$0xff]  ;;  %v3979_v31 = vpack.c.bf16 %v1117_v37, %v1116_v45 }
 0x1c5   : > { %6053 = vst [vmem:[#allocation50_spill] sm:$0xff] %v5147_v52  ;;  %3975 = vmatprep.subr.bf16.mxu0 %v6049_v10  ;;  %964 = vst [vmem:[#allocation3 + $0x1c8] sm:$0xff] %v5141_v55  ;;  %v872_v49 = vadd.f32 %v4909_v54, %v871_v8  ;;  %3575 = vmatprep.mubr.f32.mxu0 %v5147_v52 }
 0x1c6   : > { %1309 = vmatmul.mubr.f32.gmra.mrb[22].mxu1 %v5149_v25  ;;  %v5156_v9 = vmax.f32 %v877_v1, 0.0  ;;  %3576 = vmatmul.mubr.f32.gmra.mrb[58].mxu0 %v5143_v47  ;;  %v1118_v47 = vld [vmem:[#allocation8 + $0xd0] sm:$0xff] }
 0x1c7   : > { %1313 = vmatprep.mubr.f32.mxu1 %v5009_v19  ;;  %v5162_v15 = vmax.f32 %v872_v49, 0.0  ;;  %v3506_v20 = vpop.f32.mrb[32].mxu0  ;;  %v5164_v24 = vld [vmem:[#allocation3 + $0x1b1] sm:$0xff] }
 0x1c8   : > { %3977 = vmatpush1.bf16.msra.mxu0 %v3976_v23  ;;  %6054 = vst [vmem:[#allocation51_spill] sm:$0xff] %v5164_v24  ;;  %967 = vst [vmem:[#allocation3 + $0x1f0] sm:$0xff] %v5156_v9  ;;  %v5168_v8 = vadd.f32 %v3506_v20, %v4909_v54  ;;  %v881_v1 = vpop.f32.mrb[33].mxu0  ;;  %v5170_v52 = vld [vmem:[#allocation3 + $0x1a9] sm:$0xff]  ;;  %v3982_v20 = vpack.c.bf16 %v1119_v62, %v1118_v47 }
 0x1c9   : > { %6055 = vst [vmem:[#allocation52_spill] sm:$0xff] %v5170_v52  ;;  %3978 = vmatprep.subr.bf16.mxu0 %v6049_v10  ;;  %966 = vst [vmem:[#allocation3 + $0x1e8] sm:$0xff] %v5162_v15  ;;  %v5175_v49 = vadd.f32 %v4909_v54, %v881_v1  ;;  %3578 = vmatprep.mubr.f32.mxu0 %v5170_v52  ;;  %v5189_v1 = vld [vmem:[#allocation3 + $0xef] sm:$0xff]  ;;  %v5198_v62 = vld [vmem:[#allocation3 + $0x107] sm:$0xff] }
 0x1ca   : > { %1314 = vmatmul.mubr.f32.gmra.mrb[24].mxu1 %v5160_v48  ;;  %v6002_v45 = vmax.f32 %v5168_v8, 0.0  ;;  %3579 = vmatmul.mubr.f32.gmra.mrb[60].mxu0 %v5164_v24  ;;  %v1121_v52 = vld [vmem:[#allocation8 + $0xe8] sm:$0xff]  ;;  %v1122_v24 = vld [vmem:[#allocation8 + $0xf0] sm:$0xff] }
 0x1cb   : > { %1318 = vmatprep.mubr.f32.mxu1 %v5003_v17  ;;  %v6004_v23 = vmax.f32 %v5175_v49, 0.0  ;;  %v5183_v37 = vld [vmem:[#allocation3 + $0x1d1] sm:$0xff]  ;;  %v3985_v47 = vpack.c.bf16 %v1121_v52, %v1120_v6 }
 0x1cc   : > { %3980 = vmatpush1.bf16.msra.mxu0 %v3979_v31  ;;  %6056 = vst [vmem:[#allocation53_spill] sm:$0xff] %v5183_v37  ;;  %969 = vst [vmem:[#allocation3 + $0x210] sm:$0xff] %v6002_v45  ;;  %v5187_v54 = vld [vmem:[#allocation3 + $0x1c9] sm:$0xff] }
 0x1cd   : > { %6057 = vst [vmem:[#allocation54_spill] sm:$0xff] %v5187_v54  ;;  %3981 = vmatprep.subr.bf16.mxu0 %v6049_v10  ;;  %968 = vst [vmem:[#allocation3 + $0x208] sm:$0xff] %v6004_v23  ;;  %3581 = vmatprep.mubr.f32.mxu0 %v5187_v54  ;;  %v1123_v23 = vld [vmem:[#allocation8 + $0xf8] sm:$0xff]  ;;  %v2122_v54 = vld [vmem:[#allocation8 + $0x400] sm:$0xff] }
 0x1ce   : > { %1319 = vmatmul.mubr.f32.gmra.mrb[26].mxu1 %v5189_v1  ;;  %3582 = vmatmul.mubr.f32.gmra.mrb[62].mxu0 %v5183_v37  ;;  %v2123_v37 = vld [vmem:[#allocation8 + $0x408] sm:$0xff]  ;;  %v3988_v46 = vpack.c.bf16 %v1123_v23, %v1122_v24 }
 0x1cf   : > { %1323 = vmatprep.mubr.f32.mxu1 %v5026_v40  ;;  %v5200_v31 = vld [vmem:[#allocation3 + $0x1f1] sm:$0xff]  ;;  %v5212_v50 = vpack.c.bf16 %v2123_v37, %v2122_v54  ;;  %v984_v24 = vld [vmem:[#allocation3 + $0x7] sm:$0xff] }
 0x1d0   : > { %3983 = vmatpush1.bf16.msra.mxu0 %v3982_v20  ;;  %6058 = vst [vmem:[#allocation55_spill] sm:$0xff] %v5200_v31  ;;  %v5202_v45 = vld [vmem:[#allocation3 + $0x1e9] sm:$0xff]  ;;  %v2126_v37 = vld [vmem:[#allocation8 + $0x420] sm:$0xff] }
 0x1d1   : > { %6059 = vst [vmem:[#allocation56_spill] sm:$0xff] %v5202_v45  ;;  %3984 = vmatprep.subr.bf16.mxu0 %v6049_v10  ;;  %3584 = vmatprep.mubr.f32.mxu0 %v5202_v45  ;;  %v5209_v52 = vld [vmem:[#allocation3 + $0x10f] sm:$0xff] }
 0x1d2   : > { %1324 = vmatmul.mubr.f32.gmra.mrb[28].mxu1 %v5198_v62  ;;  %3585 = vmatmul.mubr.f32.gmra.mrb[64].mxu0 %v5200_v31  ;;  %v2124_v45 = vld [vmem:[#allocation8 + $0x410] sm:$0xff]  ;;  %v5216_v31 = vld [vmem:[#allocation3 + $0x127] sm:$0xff] }
 0x1d3   : > { %1328 = vmatprep.mubr.f32.mxu1 %v5022_v39  ;;  %v1089_v20 = vld [vmem:[#allocation3 + $0x211] sm:$0xff]  ;;  %v5219_v23 = vpack.c.bf16 %v2125_v11, %v2124_v45  ;;  %v2127_v54 = vld [vmem:[#allocation8 + $0x428] sm:$0xff] }
 0x1d4   : > { %3986 = vmatpush1.bf16.msra.mxu0 %v3985_v47  ;;  %v1088_v6 = vld [vmem:[#allocation3 + $0x209] sm:$0xff]  ;;  %v4243_v47 = vld [vmem:[#allocation2] sm:$0xff]  ;;  %v2129_v45 = vld [vmem:[#allocation8 + $0x438] sm:$0xff] }
 0x1d5   : > { %3987 = vmatprep.subr.bf16.mxu0 %v6049_v10  ;;  %3587 = vmatprep.mubr.f32.mxu0 %v1088_v6  ;;  %v5224_v6 = vld [vmem:[#allocation3 + $0x12f] sm:$0xff] }
 0x1d6   : > { %1329 = vmatmul.mubr.f32.gmra.mrb[30].mxu1 %v5209_v52  ;;  %3588 = vmatmul.mubr.f32.gmra.mrb[66].mxu0 %v1089_v20  ;;  %v985_v20 = vld [vmem:[#allocation3 + $0xf] sm:$0xff] }
 0x1d7   : > { %1333 = vmatprep.mubr.f32.mxu1 %v5047_v5  ;;  %1703 = vmatprep.mubr.f32.mxu0 %v4243_v47  ;;  %v2128_v11 = vld [vmem:[#allocation8 + $0x430] sm:$0xff] }
 0x1d8   : > { %3989 = vmatpush1.bf16.msra.mxu0 %v3988_v46  ;;  %v5227_v46 = vpack.c.bf16 %v2127_v54, %v2126_v37  ;;  %v2130_v37 = vld [vmem:[#allocation8 + $0x440] sm:$0xff]  ;;  %v2131_v54 = vld [vmem:[#allocation8 + $0x448] sm:$0xff] }
 0x1d9   : > { %4071 = vmatprep.subr.bf16.mxu0 %v5212_v50 }
 0x1da   : > { %1334 = vmatmul.mubr.f32.gmra.mrb[32].mxu1 %v5216_v31  ;;  %6060 = vst [vmem:[#allocation57_spill] sm:$0xff] %v5227_v46 }
 0x1db   : > { %1704 = vmatmul.mubr.f32.vlgmr.msra.gmra.mrb[68].mxu0 %v984_v24  ;;  %1338 = vmatprep.mubr.f32.mxu1 %v5041_v3  ;;  %v5231_v24 = vld [vmem:[#allocation3 + $0x147] sm:$0xff] }
 0x1dc   : > { %1708 = vmatprep.mubr.f32.mxu0 %v4243_v47  ;;  %4073 = vmatpush3.bf16.msra.mxu0 %v5212_v50  ;;  %v5236_v47 = vpack.c.bf16 %v2129_v45, %v2128_v11  ;;  %v2132_v11 = vld [vmem:[#allocation8 + $0x450] sm:$0xff]  ;;  %v2133_v45 = vld [vmem:[#allocation8 + $0x458] sm:$0xff] }
 0x1dd   : > { %4075 = vmatprep.subr.bf16.mxu0 %v5219_v23 }
 0x1de   : > { %1339 = vmatmul.mubr.f32.gmra.mrb[34].mxu1 %v5224_v6  ;;  %6061 = vst [vmem:[#allocation58_spill] sm:$0xff] %v5236_v47 }
 0x1df   : > { %1709 = vmatmul.mubr.f32.gmra.mrb[70].mxu0 %v985_v20  ;;  %1343 = vmatprep.mubr.f32.mxu1 %v5064_v34  ;;  %v5243_v20 = vld [vmem:[#allocation3 + $0x14f] sm:$0xff] }
 0x1e0   : > { %1713 = vmatprep.mubr.f32.mxu0 %v4915_v59  ;;  %4077 = vmatpush3.bf16.msra.mxu0 %v5219_v23  ;;  %v5246_v59 = vpack.c.bf16 %v2131_v54, %v2130_v37  ;;  %v2134_v37 = vld [vmem:[#allocation8 + $0x460] sm:$0xff]  ;;  %v2135_v54 = vld [vmem:[#allocation8 + $0x468] sm:$0xff] }
 0x1e1   : > { %4079 = vmatprep.subr.bf16.mxu0 %v5227_v46 }
 0x1e2   : > { %1344 = vmatmul.mubr.f32.gmra.mrb[36].mxu1 %v5231_v24 }
 0x1e3   : > { %1714 = vmatmul.mubr.f32.gmra.mrb[72].mxu0 %v4938_v22  ;;  %1348 = vmatprep.mubr.f32.mxu1 %v5060_v33  ;;  %v5251_v22 = vld [vmem:[#allocation3 + $0x167] sm:$0xff] }
 0x1e4   : > { %1718 = vmatprep.mubr.f32.mxu0 %v4913_v58  ;;  %4081 = vmatpush3.bf16.msra.mxu0 %v5227_v46  ;;  %v5256_v58 = vpack.c.bf16 %v2133_v45, %v2132_v11  ;;  %v3509_v46 = vpop.f32.mrb[34].mxu0  ;;  %v5266_v11 = vpack.c.bf16 %v2135_v54, %v2134_v37  ;;  %v2136_v45 = vld [vmem:[#allocation8 + $0x470] sm:$0xff]  ;;  %v2091_v37 = vld [vmem:[#allocation8 + $0x308] sm:$0xff] }
 0x1e5   : > { %4083 = vmatprep.subr.bf16.mxu0 %v5236_v47  ;;  %v5327_v46 = vld [vmem:[#allocation3 + $0x207] sm:$0xff]  ;;  %v5335_v54 = vld [vmem:[#allocation3 + $0x20f] sm:$0xff] }
 0x1e6   : > { %1349 = vmatmul.mubr.f32.gmra.mrb[38].mxu1 %v5243_v20 }
 0x1e7   : > { %1719 = vmatmul.mubr.f32.gmra.mrb[74].mxu0 %v4958_v36  ;;  %1353 = vmatprep.mubr.f32.mxu1 %v5085_v63  ;;  %v891_v36 = vpop.f32.mrb[35].mxu0 }
 0x1e8   : > { %1723 = vmatprep.mubr.f32.mxu0 %v4924_v2  ;;  %4085 = vmatpush3.bf16.msra.mxu0 %v5236_v47  ;;  %v5263_v2 = vld [vmem:[#allocation3 + $0x16f] sm:$0xff]  ;;  %v2137_v47 = vld [vmem:[#allocation8 + $0x478] sm:$0xff] }
 0x1e9   : > { %4087 = vmatprep.subr.bf16.mxu0 %v5246_v59  ;;  %v2092_v36 = vld [vmem:[#allocation8 + $0x310] sm:$0xff] }
 0x1ea   : > { %1354 = vmatmul.mubr.f32.gmra.mrb[40].mxu1 %v5251_v22 }
 0x1eb   : > { %1724 = vmatmul.mubr.f32.gmra.mrb[76].mxu0 %v4969_v43  ;;  %1358 = vmatprep.mubr.f32.mxu1 %v5079_v56  ;;  %v5271_v43 = vld [vmem:[#allocation3 + $0x187] sm:$0xff] }
 0x1ec   : > { %1728 = vmatprep.mubr.f32.mxu0 %v4922_v0  ;;  %4089 = vmatpush3.bf16.msra.mxu0 %v5246_v59  ;;  %v5276_v0 = vpack.c.bf16 %v2137_v47, %v2136_v45  ;;  %v2090_v47 = vld [vmem:[#allocation8 + $0x300] sm:$0xff]  ;;  %v2093_v45 = vld [vmem:[#allocation8 + $0x318] sm:$0xff] }
 0x1ed   : > { %4091 = vmatprep.subr.bf16.mxu0 %v5256_v58 }
 0x1ee   : > { %1359 = vmatmul.mubr.f32.gmra.mrb[42].mxu1 %v5263_v2 }
 0x1ef   : > { %1729 = vmatmul.mubr.f32.gmra.mrb[78].mxu0 %v4996_v7  ;;  %1363 = vmatprep.mubr.f32.mxu1 %v5103_v41  ;;  %v5283_v7 = vld [vmem:[#allocation3 + $0x18f] sm:$0xff] }
 0x1f0   : > { %1733 = vmatprep.mubr.f32.mxu0 %v4932_v14  ;;  %4093 = vmatpush3.bf16.msra.mxu0 %v5256_v58  ;;  %v5289_v14 = vld [vmem:[#allocation3 + $0x1a7] sm:$0xff] }
 0x1f1   : > { %4095 = vmatprep.subr.bf16.mxu0 %v5266_v11 }
 0x1f2   : > { %1364 = vmatmul.mubr.f32.gmra.mrb[44].mxu1 %v5271_v43 }
 0x1f3   : > { %1734 = vmatmul.mubr.f32.gmra.mrb[80].mxu0 %v5007_v18  ;;  %1368 = vmatprep.mubr.f32.mxu1 %v5099_v28  ;;  %v5302_v18 = vld [vmem:[#allocation3 + $0x1c7] sm:$0xff] }
 0x1f4   : > { %1738 = vmatprep.mubr.f32.mxu0 %v4930_v13  ;;  %4097 = vmatpush3.bf16.msra.mxu0 %v5266_v11  ;;  %v5297_v13 = vld [vmem:[#allocation3 + $0x1af] sm:$0xff] }
 0x1f5   : > { %4099 = vmatprep.subr.bf16.mxu0 %v5276_v0 }
 0x1f6   : > { %1369 = vmatmul.mubr.f32.gmra.mrb[46].mxu1 %v5283_v7 }
 0x1f7   : > { %1739 = vmatmul.mubr.f32.gmra.mrb[82].mxu0 %v5034_v53  ;;  %1373 = vmatprep.mubr.f32.mxu1 %v5124_v38 }
 0x1f8   : > { %1743 = vmatprep.mubr.f32.mxu0 %v4949_v30  ;;  %4101 = vmatpush3.bf16.msra.mxu0 %v5276_v0  ;;  %v5314_v30 = vld [vmem:[#allocation3 + $0x1e7] sm:$0xff] }
 0x1fa   : > { %1374 = vmatmul.mubr.f32.gmra.mrb[48].mxu1 %v5289_v14 }
 0x1fb   : > { %1744 = vmatmul.mubr.f32.gmra.mrb[84].mxu0 %v5045_v4  ;;  %1378 = vmatprep.mubr.f32.mxu1 %v5118_v32 }
 0x1fc   : > { %1748 = vmatprep.mubr.f32.mxu0 %v4946_v29  ;;  %v5309_v29 = vld [vmem:[#allocation3 + $0x1cf] sm:$0xff] }
 0x1fe   : > { %1379 = vmatmul.mubr.f32.gmra.mrb[50].mxu1 %v5297_v13 }
 0x1ff   : > { %1749 = vmatmul.mubr.f32.gmra.mrb[86].mxu0 %v5072_v51  ;;  %1383 = vmatprep.mubr.f32.mxu1 %v5141_v55 }
 0x200   : > { %1753 = vmatprep.mubr.f32.mxu0 %v4971_v44  ;;  %v6062_v44 = vmax.f32 %v5175_v49, 0.0  ;;  %v4023_v49 = vpack.c.bf16 %v2091_v37, %v2090_v47  ;;  %v2098_v47 = vld [vmem:[#allocation8 + $0x340] sm:$0xff]  ;;  %v2099_v37 = vld [vmem:[#allocation8 + $0x348] sm:$0xff] }
 0x202   : > { %1384 = vmatmul.mubr.f32.gmra.mrb[52].mxu1 %v5302_v18 }
 0x203   : > { %1754 = vmatmul.mubr.f32.gmra.mrb[88].mxu0 %v5083_v61  ;;  %1388 = vmatprep.mubr.f32.mxu1 %v5137_v27 }
 0x204   : > { %1758 = vmatprep.mubr.f32.mxu0 %v4965_v42  ;;  %v5321_v42 = vld [vmem:[#allocation3 + $0x1ef] sm:$0xff] }
 0x206   : > { %1389 = vmatmul.mubr.f32.gmra.mrb[54].mxu1 %v5309_v29 }
 0x207   : > { %1759 = vmatmul.mubr.f32.gmra.mrb[90].mxu0 %v5111_v16  ;;  %1393 = vmatprep.mubr.f32.mxu1 %v5162_v15 }
 0x208   : > { %1763 = vmatprep.mubr.f32.mxu0 %v4988_v60  ;;  %v6063_v60 = vmax.f32 %v5168_v8, 0.0  ;;  %v2094_v8 = vld [vmem:[#allocation8 + $0x320] sm:$0xff] }
 0x20a   : > { %1394 = vmatmul.mubr.f32.gmra.mrb[56].mxu1 %v5314_v30 }
 0x20b   : > { %1764 = vmatmul.mubr.f32.gmra.mrb[92].mxu0 %v5122_v12  ;;  %1398 = vmatprep.mubr.f32.mxu1 %v5156_v9 }
 0x20c   : > { %1768 = vmatprep.mubr.f32.mxu0 %v4984_v57  ;;  %v1056_v57 = vld [vmem:[#allocation3 + $0x9] sm:$0xff] }
 0x20e   : > { %1399 = vmatmul.mubr.f32.gmra.mrb[58].mxu1 %v5321_v42 }
 0x20f   : > { %1769 = vmatmul.mubr.f32.gmra.mrb[94].mxu0 %v5149_v25  ;;  %1403 = vmatprep.mubr.f32.mxu1 %v6062_v44  ;;  %v2095_v44 = vld [vmem:[#allocation8 + $0x328] sm:$0xff] }
 0x210   : > { %1773 = vmatprep.mubr.f32.mxu0 %v5009_v19  ;;  %v1057_v19 = vld [vmem:[#allocation3 + $0x11] sm:$0xff] }
 0x212   : > { %1404 = vmatmul.mubr.f32.gmra.mrb[60].mxu1 %v5327_v46 }
 0x213   : > { %1774 = vmatmul.mubr.f32.gmra.mrb[96].mxu0 %v5160_v48  ;;  %1408 = vmatprep.mubr.f32.mxu1 %v6063_v60  ;;  %v2096_v60 = vld [vmem:[#allocation8 + $0x330] sm:$0xff] }
 0x214   : > { %1778 = vmatprep.mubr.f32.mxu0 %v5003_v17  ;;  %v4026_v17 = vpack.c.bf16 %v2093_v45, %v2092_v36  ;;  %v2101_v36 = vld [vmem:[#allocation8 + $0x358] sm:$0xff] }
 0x216   : > { %1409 = vmatmul.mubr.f32.gmra.mrb[62].mxu1 %v5335_v54 }
 0x217   : > { %1779 = vmatmul.mubr.f32.gmra.mrb[98].mxu0 %v5189_v1  ;;  %3622 = vmatprep.mubr.f32.mxu1 %v1056_v57  ;;  %v2097_v57 = vld [vmem:[#allocation8 + $0x338] sm:$0xff] }
 0x218   : > { %1783 = vmatprep.mubr.f32.mxu0 %v5026_v40  ;;  %v4029_v40 = vpack.c.bf16 %v2095_v44, %v2094_v8  ;;  %v2102_v8 = vld [vmem:[#allocation8 + $0x360] sm:$0xff]  ;;  %v2103_v44 = vld [vmem:[#allocation8 + $0x368] sm:$0xff] }
 0x21a   : > { %3623 = vmatmul.mubr.f32.vlgmr.msra.gmra.mrb[64].mxu1 %v1057_v19  ;;  %v6067_v19 = vld [vmem:[#allocation34_spill] sm:$0xff] }
 0x21b   : > { %1784 = vmatmul.mubr.f32.gmra.mrb[100].mxu0 %v5198_v62  ;;  %4024 = vmatpush1.bf16.msra.mxu1 %v4023_v49  ;;  %v2100_v49 = vld [vmem:[#allocation8 + $0x350] sm:$0xff] }
 0x21c   : > { %1788 = vmatprep.mubr.f32.mxu0 %v5022_v39  ;;  %3625 = vmatprep.mubr.f32.mxu1 %v4936_v21  ;;  %v6064_v39 = vld [vmem:[#allocation30_spill] sm:$0xff]  ;;  %v4032_v21 = vpack.c.bf16 %v2097_v57, %v2096_v60  ;;  %v4038_v45 = vpack.c.bf16 %v2101_v36, %v2100_v49  ;;  %v2104_v57 = vld [vmem:[#allocation8 + $0x370] sm:$0xff]  ;;  %v2109_v49 = vld [vmem:[#allocation8 + $0x398] sm:$0xff] }
 0x21d   : > { %4025 = vmatprep.subr.bf16.mxu1 %v6049_v10  ;;  %v6071_v60 = vld [vmem:[#allocation38_spill] sm:$0xff] }
 0x21e   : > { %3626 = vmatmul.mubr.f32.gmra.mrb[66].mxu1 %v4944_v26  ;;  %v6065_v26 = vld [vmem:[#allocation32_spill] sm:$0xff] }
 0x21f   : > { %1789 = vmatmul.mubr.f32.gmra.mrb[102].mxu0 %v5209_v52  ;;  %4027 = vmatpush1.bf16.msra.mxu1 %v4026_v17  ;;  %v6069_v17 = vld [vmem:[#allocation36_spill] sm:$0xff] }
 0x220   : > { %1793 = vmatprep.mubr.f32.mxu0 %v5047_v5  ;;  %3628 = vmatprep.mubr.f32.mxu1 %v4956_v35  ;;  %v6066_v5 = vld [vmem:[#allocation31_spill] sm:$0xff]  ;;  %v4035_v35 = vpack.c.bf16 %v2099_v37, %v2098_v47  ;;  %v2106_v47 = vld [vmem:[#allocation8 + $0x380] sm:$0xff] }
 0x221   : > { %4028 = vmatprep.subr.bf16.mxu1 %v6049_v10  ;;  %v2107_v37 = vld [vmem:[#allocation8 + $0x388] sm:$0xff] }
 0x222   : > { %3629 = vmatmul.mubr.f32.gmra.mrb[68].mxu1 %v6064_v39  ;;  %v2105_v39 = vld [vmem:[#allocation8 + $0x378] sm:$0xff] }
 0x223   : > { %1794 = vmatmul.mubr.f32.gmra.mrb[104].mxu0 %v5216_v31  ;;  %4030 = vmatpush1.bf16.msra.mxu1 %v4029_v40  ;;  %v4041_v40 = vpack.c.bf16 %v2103_v44, %v2102_v8  ;;  %v2111_v8 = vld [vmem:[#allocation8 + $0x3a8] sm:$0xff] }
 0x224   : > { %1798 = vmatprep.mubr.f32.mxu0 %v5041_v3  ;;  %3631 = vmatprep.mubr.f32.mxu1 %v6065_v26  ;;  %v6068_v3 = vld [vmem:[#allocation33_spill] sm:$0xff]  ;;  %v6073_v26 = vld [vmem:[#allocation40_spill] sm:$0xff] }
 0x225   : > { %4031 = vmatprep.subr.bf16.mxu1 %v6049_v10 }
 0x226   : > { %3632 = vmatmul.mubr.f32.gmra.mrb[70].mxu1 %v6066_v5  ;;  %v4047_v5 = vpack.c.bf16 %v2107_v37, %v2106_v47  ;;  %v2114_v47 = vld [vmem:[#allocation8 + $0x3c0] sm:$0xff]  ;;  %v2115_v37 = vld [vmem:[#allocation8 + $0x3c8] sm:$0xff] }
 0x227   : > { %1799 = vmatmul.mubr.f32.gmra.mrb[106].mxu0 %v5224_v6  ;;  %4033 = vmatpush1.bf16.msra.mxu1 %v4032_v21  ;;  %v4044_v21 = vpack.c.bf16 %v2105_v39, %v2104_v57  ;;  %v2113_v57 = vld [vmem:[#allocation8 + $0x3b8] sm:$0xff] }
 0x228   : > { %1803 = vmatprep.mubr.f32.mxu0 %v5064_v34  ;;  %3634 = vmatprep.mubr.f32.mxu1 %v6067_v19  ;;  %v6070_v34 = vld [vmem:[#allocation35_spill] sm:$0xff]  ;;  %v2108_v19 = vld [vmem:[#allocation8 + $0x390] sm:$0xff] }
 0x229   : > { %4034 = vmatprep.subr.bf16.mxu1 %v6049_v10  ;;  %v4050_v36 = vpack.c.bf16 %v2109_v49, %v2108_v19  ;;  %v6083_v19 = vld [vmem:[#allocation50_spill] sm:$0xff]  ;;  %v2116_v49 = vld [vmem:[#allocation8 + $0x3d0] sm:$0xff] }
 0x22a   : > { %3635 = vmatmul.mubr.f32.gmra.mrb[72].mxu1 %v6068_v3  ;;  %v6077_v3 = vld [vmem:[#allocation44_spill] sm:$0xff] }
 0x22b   : > { %1804 = vmatmul.mubr.f32.gmra.mrb[108].mxu0 %v5231_v24  ;;  %4036 = vmatpush1.bf16.msra.mxu1 %v4035_v35  ;;  %v6075_v35 = vld [vmem:[#allocation42_spill] sm:$0xff] }
 0x22c   : > { %1808 = vmatprep.mubr.f32.mxu0 %v5060_v33  ;;  %3637 = vmatprep.mubr.f32.mxu1 %v6069_v17  ;;  %v6072_v33 = vld [vmem:[#allocation37_spill] sm:$0xff] }
 0x22d   : > { %4037 = vmatprep.subr.bf16.mxu1 %v6049_v10 }
 0x22e   : > { %3638 = vmatmul.mubr.f32.gmra.mrb[74].mxu1 %v6070_v34  ;;  %v6079_v34 = vld [vmem:[#allocation46_spill] sm:$0xff] }
 0x22f   : > { %1809 = vmatmul.mubr.f32.gmra.mrb[110].mxu0 %v5243_v20  ;;  %4039 = vmatpush1.bf16.msra.mxu1 %v4038_v45  ;;  %v2110_v45 = vld [vmem:[#allocation8 + $0x3a0] sm:$0xff] }
 0x230   : > { %1813 = vmatprep.mubr.f32.mxu0 %v5085_v63  ;;  %3640 = vmatprep.mubr.f32.mxu1 %v6071_v60  ;;  %v6074_v63 = vld [vmem:[#allocation39_spill] sm:$0xff]  ;;  %v4053_v44 = vpack.c.bf16 %v2111_v8, %v2110_v45  ;;  %v6085_v8 = vld [vmem:[#allocation52_spill] sm:$0xff] }
 0x231   : > { %4040 = vmatprep.subr.bf16.mxu1 %v6049_v10 }
 0x232   : > { %3641 = vmatmul.mubr.f32.gmra.mrb[76].mxu1 %v6072_v33 }
 0x233   : > { %1814 = vmatmul.mubr.f32.gmra.mrb[112].mxu0 %v5251_v22  ;;  %4042 = vmatpush1.bf16.msra.mxu1 %v4041_v40  ;;  %v2112_v40 = vld [vmem:[#allocation8 + $0x3b0] sm:$0xff] }
 0x234   : > { %1818 = vmatprep.mubr.f32.mxu0 %v5079_v56  ;;  %3643 = vmatprep.mubr.f32.mxu1 %v6073_v26  ;;  %v6076_v56 = vld [vmem:[#allocation41_spill] sm:$0xff]  ;;  %v4056_v39 = vpack.c.bf16 %v2113_v57, %v2112_v40  ;;  %v2119_v40 = vld [vmem:[#allocation8 + $0x3e8] sm:$0xff] }
 0x235   : > { %4043 = vmatprep.subr.bf16.mxu1 %v6049_v10 }
 0x236   : > { %3644 = vmatmul.mubr.f32.gmra.mrb[78].mxu1 %v6074_v63 }
 0x237   : > { %1819 = vmatmul.mubr.f32.gmra.mrb[114].mxu0 %v5263_v2  ;;  %4045 = vmatpush1.bf16.msra.mxu1 %v4044_v21  ;;  %v6081_v21 = vld [vmem:[#allocation48_spill] sm:$0xff] }
 0x238   : > { %1823 = vmatprep.mubr.f32.mxu0 %v5103_v41  ;;  %3646 = vmatprep.mubr.f32.mxu1 %v6075_v35  ;;  %v6078_v41 = vld [vmem:[#allocation43_spill] sm:$0xff] }
 0x239   : > { %4046 = vmatprep.subr.bf16.mxu1 %v6049_v10 }
 0x23a   : > { %3647 = vmatmul.mubr.f32.gmra.mrb[80].mxu1 %v6076_v56 }
 0x23b   : > { %1824 = vmatmul.mubr.f32.gmra.mrb[116].mxu0 %v5271_v43  ;;  %4048 = vmatpush1.bf16.msra.mxu1 %v4047_v5  ;;  %v4059_v5 = vpack.c.bf16 %v2115_v37, %v2114_v47  ;;  %v2120_v47 = vld [vmem:[#allocation8 + $0x3f0] sm:$0xff]  ;;  %v2121_v37 = vld [vmem:[#allocation8 + $0x3f8] sm:$0xff] }
 0x23c   : > { %1828 = vmatprep.mubr.f32.mxu0 %v5099_v28  ;;  %3649 = vmatprep.mubr.f32.mxu1 %v6077_v3  ;;  %v6080_v28 = vld [vmem:[#allocation45_spill] sm:$0xff] }
 0x23d   : > { %4049 = vmatprep.subr.bf16.mxu1 %v6049_v10 }
 0x23e   : > { %3650 = vmatmul.mubr.f32.gmra.mrb[82].mxu1 %v6078_v41 }
 0x23f   : > { %1829 = vmatmul.mubr.f32.gmra.mrb[118].mxu0 %v5283_v7  ;;  %4051 = vmatpush1.bf16.msra.mxu1 %v4050_v36  ;;  %v2117_v36 = vld [vmem:[#allocation8 + $0x3d8] sm:$0xff] }
 0x240   : > { %1833 = vmatprep.mubr.f32.mxu0 %v5124_v38  ;;  %3652 = vmatprep.mubr.f32.mxu1 %v6079_v34  ;;  %v6082_v38 = vld [vmem:[#allocation47_spill] sm:$0xff]  ;;  %v4062_v45 = vpack.c.bf16 %v2117_v36, %v2116_v49  ;;  %v6089_v49 = vld [vmem:[#allocation56_spill] sm:$0xff] }
 0x241   : > { %4052 = vmatprep.subr.bf16.mxu1 %v6049_v10  ;;  %v6090_v36 = vld [vmem:[#allocation55_spill] sm:$0xff] }
 0x242   : > { %3653 = vmatmul.mubr.f32.gmra.mrb[84].mxu1 %v6080_v28 }
 0x243   : > { %1834 = vmatmul.mubr.f32.gmra.mrb[120].mxu0 %v5289_v14  ;;  %4054 = vmatpush1.bf16.msra.mxu1 %v4053_v44  ;;  %v2118_v44 = vld [vmem:[#allocation8 + $0x3e0] sm:$0xff] }
 0x244   : > { %1838 = vmatprep.mubr.f32.mxu0 %v5118_v32  ;;  %3655 = vmatprep.mubr.f32.mxu1 %v6081_v21  ;;  %v6084_v32 = vld [vmem:[#allocation49_spill] sm:$0xff]  ;;  %v4065_v57 = vpack.c.bf16 %v2119_v40, %v2118_v44  ;;  %v4248_v44 = vld [vmem:[#allocation3 + $0x50] sm:$0xff] }
 0x245   : > { %4055 = vmatprep.subr.bf16.mxu1 %v6049_v10  ;;  %v4250_v40 = vld [vmem:[#allocation3 + $0x4f] sm:$0xff] }
 0x246   : > { %3656 = vmatmul.mubr.f32.gmra.mrb[86].mxu1 %v6082_v38 }
 0x247   : > { %1839 = vmatmul.mubr.f32.gmra.mrb[122].mxu0 %v5297_v13  ;;  %4057 = vmatpush1.bf16.msra.mxu1 %v4056_v39  ;;  %v6087_v39 = vld [vmem:[#allocation54_spill] sm:$0xff] }
 0x248   : > { %1843 = vmatprep.mubr.f32.mxu0 %v5141_v55  ;;  %3658 = vmatprep.mubr.f32.mxu1 %v6083_v19  ;;  %v6086_v55 = vld [vmem:[#allocation51_spill] sm:$0xff] }
 0x249   : > { %4058 = vmatprep.subr.bf16.mxu1 %v6049_v10 }
 0x24a   : > { %3659 = vmatmul.mubr.f32.gmra.mrb[88].mxu1 %v6084_v32 }
 0x24b   : > { %1844 = vmatmul.mubr.f32.gmra.mrb[124].mxu0 %v5302_v18  ;;  %4060 = vmatpush1.bf16.msra.mxu1 %v4059_v5  ;;  %v4068_v5 = vpack.c.bf16 %v2121_v37, %v2120_v47  ;;  %v6091_v47 = vld [vmem:[#allocation57_spill] sm:$0xff] }
 0x24c   : > { %1848 = vmatprep.mubr.f32.mxu0 %v5137_v27  ;;  %3661 = vmatprep.mubr.f32.mxu1 %v6085_v8  ;;  %v6088_v27 = vld [vmem:[#allocation53_spill] sm:$0xff]  ;;  %v4246_v8 = vld [vmem:[#allocation3 + $0x47] sm:$0xff] }
 0x24d   : > { %4061 = vmatprep.subr.bf16.mxu1 %v6049_v10  ;;  %v4255_v37 = vld [vmem:[#allocation3 + $0x91] sm:$0xff] }
 0x24e   : > { %3662 = vmatmul.mubr.f32.gmra.mrb[90].mxu1 %v6086_v55  ;;  %v4251_v55 = vld [vmem:[#allocation3 + $0x71] sm:$0xff] }
 0x24f   : > { %1849 = vmatmul.mubr.f32.gmra.mrb[126].mxu0 %v5309_v29  ;;  %4063 = vmatpush1.bf16.msra.mxu1 %v4062_v45  ;;  %v4245_v45 = vld [vmem:[#allocation3 + $0x49] sm:$0xff] }
 0x250   : > { %1853 = vmatprep.mubr.f32.mxu0 %v5162_v15  ;;  %3664 = vmatprep.mubr.f32.mxu1 %v6087_v39  ;;  %v4244_v15 = vld [vmem:[#allocation3 + $0x48] sm:$0xff] }
 0x251   : > { %4064 = vmatprep.subr.bf16.mxu1 %v6049_v10  ;;  %v4253_v39 = vld [vmem:[#allocation3 + $0x89] sm:$0xff] }
 0x252   : > { %3665 = vmatmul.mubr.f32.gmra.mrb[92].mxu1 %v6088_v27  ;;  %v4256_v27 = vld [vmem:[#allocation3 + $0x70] sm:$0xff] }
 0x253   : > { %1854 = vmatmul.mubr.f32.gmra.mrb[128].mxu0 %v5314_v30  ;;  %4066 = vmatpush1.bf16.msra.mxu1 %v4065_v57  ;;  %v4252_v57 = vld [vmem:[#allocation3 + $0x68] sm:$0xff] }
 0x254   : > { %1858 = vmatprep.mubr.f32.mxu0 %v5156_v9  ;;  %3667 = vmatprep.mubr.f32.mxu1 %v6089_v49  ;;  %v4247_v9 = vld [vmem:[#allocation3 + $0x51] sm:$0xff] }
 0x255   : > { %4067 = vmatprep.subr.bf16.mxu1 %v6049_v10  ;;  %v4249_v10 = vld [vmem:[#allocation3 + $0x69] sm:$0xff]  ;;  %v4257_v49 = vld [vmem:[#allocation3 + $0xb1] sm:$0xff] }
 0x256   : > { %3668 = vmatmul.mubr.f32.gmra.mrb[94].mxu1 %v6090_v36  ;;  %v4258_v36 = vld [vmem:[#allocation3 + $0x88] sm:$0xff] }
 0x257   : > { %1859 = vmatmul.mubr.f32.gmra.mrb[130].mxu0 %v5321_v42  ;;  %4069 = vmatpush1.bf16.msra.mxu1 %v4068_v5  ;;  %v6092_v5 = vld [vmem:[#allocation58_spill] sm:$0xff] }
 0x258   : > { %2202 = vmatprep.mubr.f32.mxu1 %v4244_v15  ;;  %3702 = vmatprep.mubr.f32.mxu0 %v4245_v45  ;;  %v4260_v45 = vld [vmem:[#allocation3 + $0xa8] sm:$0xff] }
 0x259   : > { %4134 = vmatprep.subr.bf16.mxu1 %v5212_v50 }
 0x25a   : > { %2203 = vmatmul.mubr.f32.vlgmr.msra.gmra.mrb[96].mxu1 %v4246_v8 }
 0x25b   : > { %4142 = vmatpush3.bf16.msra.mxu1 %v5212_v50  ;;  %3703 = vmatmul.mubr.f32.vlgmr.msra.gmra.mrb[132].mxu0 %v4247_v9  ;;  %v4254_v50 = vld [vmem:[#allocation3 + $0x67] sm:$0xff] }
 0x25c   : > { %2207 = vmatprep.mubr.f32.mxu1 %v4248_v44  ;;  %3705 = vmatprep.mubr.f32.mxu0 %v4249_v10 }
 0x25d   : > { %4135 = vmatprep.subr.bf16.mxu1 %v5219_v23 }
 0x25e   : > { %2208 = vmatmul.mubr.f32.gmra.mrb[98].mxu1 %v4250_v40 }
 0x25f   : > { %3706 = vmatmul.mubr.f32.gmra.mrb[134].mxu0 %v4251_v55  ;;  %2212 = vmatprep.mubr.f32.mxu1 %v4252_v57 }
 0x260   : > { %3708 = vmatprep.mubr.f32.mxu0 %v4253_v39  ;;  %4143 = vmatpush3.bf16.msra.mxu1 %v5219_v23  ;;  %v4259_v23 = vld [vmem:[#allocation3 + $0x90] sm:$0xff]  ;;  %v4264_v39 = vld [vmem:[#allocation3 + $0xe8] sm:$0xff] }
 0x261   : > { %4136 = vmatprep.subr.bf16.mxu1 %v6091_v47 }
 0x262   : > { %2213 = vmatmul.mubr.f32.gmra.mrb[100].mxu1 %v4254_v50 }
 0x263   : > { %3709 = vmatmul.mubr.f32.gmra.mrb[136].mxu0 %v4255_v37  ;;  %2217 = vmatprep.mubr.f32.mxu1 %v4256_v27  ;;  %v4265_v37 = vld [vmem:[#allocation3 + $0xf0] sm:$0xff] }
 0x264   : > { %3711 = vmatprep.mubr.f32.mxu0 %v6069_v17  ;;  %4144 = vmatpush3.bf16.msra.mxu1 %v6091_v47 }
 0x265   : > { %4137 = vmatprep.subr.bf16.mxu1 %v6092_v5 }
 0x266   : > { %2218 = vmatmul.mubr.f32.gmra.mrb[102].mxu1 %v5034_v53 }
 0x267   : > { %3712 = vmatmul.mubr.f32.gmra.mrb[138].mxu0 %v4257_v49  ;;  %2222 = vmatprep.mubr.f32.mxu1 %v4258_v36 }
 0x268   : > { %3714 = vmatprep.mubr.f32.mxu0 %v6071_v60  ;;  %4145 = vmatpush3.bf16.msra.mxu1 %v6092_v5 }
 0x269   : > { %4138 = vmatprep.subr.bf16.mxu1 %v5246_v59 }
 0x26a   : > { %2223 = vmatmul.mubr.f32.gmra.mrb[104].mxu1 %v5045_v4 }
 0x26b   : > { %3715 = vmatmul.mubr.f32.gmra.mrb[140].mxu0 %v6072_v33  ;;  %2227 = vmatprep.mubr.f32.mxu1 %v4259_v23 }
 0x26c   : > { %3717 = vmatprep.mubr.f32.mxu0 %v6073_v26  ;;  %4146 = vmatpush3.bf16.msra.mxu1 %v5246_v59 }
 0x26d   : > { %v1255_v53 = vpop.f32.mrb[0].mxu1  ;;  %4139 = vmatprep.subr.bf16.mxu1 %v5256_v58  ;;  %v3544_v17 = vpop.f32.mrb[36].mxu0 }
 0x26e   : > { %v1257_v15 = vpop.f32.mrb[1].mxu1  ;;  %2228 = vmatmul.mubr.f32.gmra.mrb[106].mxu1 %v5072_v51  ;;  %v1480_v60 = vpop.f32.mrb[37].mxu0 }
 0x26f   : > { %3718 = vmatmul.mubr.f32.gmra.mrb[142].mxu0 %v6074_v63  ;;  %2232 = vmatprep.mubr.f32.mxu1 %v4260_v45  ;;  %v5435_v4 = vadd.f32 %v1480_v60, %v1255_v53  ;;  %v4261_v63 = vld [vmem:[#allocation3 + $0xb0] sm:$0xff] }
 0x270   : > { %3720 = vmatprep.mubr.f32.mxu0 %v6075_v35  ;;  %4147 = vmatpush3.bf16.msra.mxu1 %v5256_v58 }
 0x271   : > { %v1260_v33 = vpop.f32.mrb[2].mxu1  ;;  %4140 = vmatprep.subr.bf16.mxu1 %v5266_v11  ;;  %v3547_v8 = vpop.f32.mrb[38].mxu0 }
 0x272   : > { %v5440_v59 = vadd.f32 %v3544_v17, %v1260_v33  ;;  %v1262_v26 = vpop.f32.mrb[3].mxu1  ;;  %2233 = vmatmul.mubr.f32.gmra.mrb[108].mxu1 %v5083_v61  ;;  %v1490_v51 = vpop.f32.mrb[39].mxu0  ;;  %v4262_v61 = vld [vmem:[#allocation3 + $0xc8] sm:$0xff]  ;;  %v4267_v17 = vld [vmem:[#allocation3 + $0x110] sm:$0xff] }
 0x273   : > { %3721 = vmatmul.mubr.f32.gmra.mrb[144].mxu0 %v6076_v56  ;;  %2237 = vmatprep.mubr.f32.mxu1 %v4261_v63  ;;  %v4268_v26 = vld [vmem:[#allocation3 + $0x128] sm:$0xff] }
 0x274   : > { %3723 = vmatprep.mubr.f32.mxu0 %v6077_v3  ;;  %4148 = vmatpush3.bf16.msra.mxu1 %v5266_v11 }
 0x275   : > { %v1265_v35 = vpop.f32.mrb[4].mxu1  ;;  %4141 = vmatprep.subr.bf16.mxu1 %v5276_v0  ;;  %v3550_v44 = vpop.f32.mrb[40].mxu0 }
 0x276   : > { %v5447_v58 = vadd.f32 %v1490_v51, %v1265_v35  ;;  %v1267_v9 = vpop.f32.mrb[5].mxu1  ;;  %2238 = vmatmul.mubr.f32.gmra.mrb[110].mxu1 %v5111_v16  ;;  %v1500_v56 = vpop.f32.mrb[41].mxu0  ;;  %v4263_v16 = vld [vmem:[#allocation3 + $0xd0] sm:$0xff] }
 0x277   : > { %3724 = vmatmul.mubr.f32.gmra.mrb[146].mxu0 %v6078_v41  ;;  %2242 = vmatprep.mubr.f32.mxu1 %v4262_v61  ;;  %v4269_v9 = vld [vmem:[#allocation3 + $0x130] sm:$0xff] }
 0x278   : > { %3726 = vmatprep.mubr.f32.mxu0 %v6079_v34  ;;  %4149 = vmatpush3.bf16.msra.mxu1 %v5276_v0 }
 0x279   : > { %v1270_v3 = vpop.f32.mrb[6].mxu1  ;;  %v3553_v40 = vpop.f32.mrb[42].mxu0 }
 0x27a   : > { %v5453_v11 = vadd.f32 %v3547_v8, %v1270_v3  ;;  %v1272_v10 = vpop.f32.mrb[7].mxu1  ;;  %2243 = vmatmul.mubr.f32.gmra.mrb[112].mxu1 %v5122_v12  ;;  %v1510_v55 = vpop.f32.mrb[43].mxu0 }
 0x27b   : > { %3727 = vmatmul.mubr.f32.gmra.mrb[148].mxu0 %v6080_v28  ;;  %2247 = vmatprep.mubr.f32.mxu1 %v4263_v16  ;;  %v4270_v10 = vld [vmem:[#allocation3 + $0x148] sm:$0xff]  ;;  %v2691_v16 = vld [vmem:[#allocation10] sm:$0xff] }
 0x27c   : > { %3729 = vmatprep.mubr.f32.mxu0 %v6081_v21 }
 0x27d   : > { %v1275_v41 = vpop.f32.mrb[8].mxu1  ;;  %v3556_v0 = vpop.f32.mrb[44].mxu0 }
 0x27e   : > { %v5458_v57 = vadd.f32 %v1500_v56, %v1275_v41  ;;  %v1277_v34 = vpop.f32.mrb[9].mxu1  ;;  %2248 = vmatmul.mubr.f32.gmra.mrb[114].mxu1 %v5149_v25  ;;  %v1520_v12 = vpop.f32.mrb[45].mxu0 }
 0x27f   : > { %3730 = vmatmul.mubr.f32.gmra.mrb[150].mxu0 %v6082_v38  ;;  %2252 = vmatprep.mubr.f32.mxu1 %v4264_v39 }
 0x280   : > { %3732 = vmatprep.mubr.f32.mxu0 %v6083_v19  ;;  %v4266_v19 = vld [vmem:[#allocation3 + $0x108] sm:$0xff] }
 0x281   : > { %v1280_v28 = vpop.f32.mrb[10].mxu1  ;;  %v3559_v21 = vpop.f32.mrb[46].mxu0 }
 0x282   : > { %v5463_v47 = vadd.f32 %v3550_v44, %v1280_v28  ;;  %v1282_v50 = vpop.f32.mrb[11].mxu1  ;;  %2253 = vmatmul.mubr.f32.gmra.mrb[116].mxu1 %v5160_v48  ;;  %v1530_v25 = vpop.f32.mrb[47].mxu0  ;;  %v2693_v28 = vld [vmem:[#allocation10 + $0x10] sm:$0xff] }
 0x283   : > { %3733 = vmatmul.mubr.f32.gmra.mrb[152].mxu0 %v6084_v32  ;;  %2257 = vmatprep.mubr.f32.mxu1 %v4265_v37  ;;  %v2694_v50 = vld [vmem:[#allocation10 + $0x18] sm:$0xff] }
 0x285   : > { %v1285_v27 = vpop.f32.mrb[12].mxu1  ;;  %v5470_v49 = vpop.f32.mrb[48].mxu0 }
 0x286   : > { %v5467_v5 = vadd.f32 %v1510_v55, %v1285_v27  ;;  %v1287_v38 = vpop.f32.mrb[13].mxu1  ;;  %2258 = vmatmul.mubr.f32.gmra.mrb[118].mxu1 %v5189_v1  ;;  %v1540_v36 = vpop.f32.mrb[49].mxu0 }
 0x287   : > { %2262 = vmatprep.mubr.f32.mxu1 %v4266_v19 }
 0x289   : > { %v1290_v23 = vpop.f32.mrb[14].mxu1  ;;  %v5475_v32 = vpop.f32.mrb[50].mxu0 }
 0x28a   : > { %v5472_v53 = vadd.f32 %v3553_v40, %v1290_v23  ;;  %v1292_v48 = vpop.f32.mrb[15].mxu1  ;;  %2263 = vmatmul.mubr.f32.gmra.mrb[120].mxu1 %v5198_v62  ;;  %v5477_v15 = vpop.f32.mrb[51].mxu0  ;;  %v2695_v23 = vld [vmem:[#allocation10 + $0x20] sm:$0xff] }
 0x28b   : > { %2267 = vmatprep.mubr.f32.mxu1 %v4267_v17  ;;  %v2696_v48 = vld [vmem:[#allocation10 + $0x28] sm:$0xff] }
 0x28d   : > { %v1295_v60 = vpop.f32.mrb[16].mxu1  ;;  %v5482_v33 = vpop.f32.mrb[52].mxu0 }
 0x28e   : > { %v5479_v45 = vadd.f32 %v1520_v12, %v1295_v60  ;;  %v1297_v1 = vpop.f32.mrb[17].mxu1  ;;  %2268 = vmatmul.mubr.f32.gmra.mrb[122].mxu1 %v5209_v52  ;;  %v5484_v8 = vpop.f32.mrb[53].mxu0  ;;  %v4271_v12 = vld [vmem:[#allocation3 + $0x150] sm:$0xff]  ;;  %v4110_v60 = vpack.c.bf16 %v2696_v48, %v2695_v23 }
 0x28f   : > { %2272 = vmatprep.mubr.f32.mxu1 %v4268_v26 }
 0x291   : > { %v1300_v51 = vpop.f32.mrb[18].mxu1  ;;  %v5489_v35 = vpop.f32.mrb[54].mxu0 }
 0x292   : > { %v5486_v62 = vadd.f32 %v3556_v0, %v1300_v51  ;;  %v1302_v63 = vpop.f32.mrb[19].mxu1  ;;  %2273 = vmatmul.mubr.f32.gmra.mrb[124].mxu1 %v5216_v31  ;;  %v5491_v44 = vpop.f32.mrb[55].mxu0  ;;  %v2692_v31 = vld [vmem:[#allocation10 + $0x8] sm:$0xff] }
 0x293   : > { %2277 = vmatprep.mubr.f32.mxu1 %v4269_v9  ;;  %v4102_v41 = vpack.c.bf16 %v2692_v31, %v2691_v16  ;;  %v2697_v63 = vld [vmem:[#allocation10 + $0x30] sm:$0xff]  ;;  %v2698_v9 = vld [vmem:[#allocation10 + $0x38] sm:$0xff] }
 0x295   : > { %v1305_v61 = vpop.f32.mrb[20].mxu1  ;;  %v5496_v3 = vpop.f32.mrb[56].mxu0  ;;  %4103 = vmatprep.subr.bf16.mxu0 %v4102_v41 }
 0x296   : > { %v5493_v52 = vadd.f32 %v1530_v25, %v1305_v61  ;;  %v1307_v56 = vpop.f32.mrb[21].mxu1  ;;  %2278 = vmatmul.mubr.f32.gmra.mrb[126].mxu1 %v5224_v6  ;;  %v5498_v40 = vpop.f32.mrb[57].mxu0  ;;  %4105 = vmatpush3.bf16.msra.mxu0 %v4102_v41  ;;  %v4106_v25 = vpack.c.bf16 %v2694_v50, %v2693_v28  ;;  %v2700_v41 = vld [vmem:[#allocation10 + $0x48] sm:$0xff] }
 0x297   : > { %2282 = vmatprep.mubr.f32.mxu1 %v4270_v10  ;;  %v4114_v56 = vpack.c.bf16 %v2698_v9, %v2697_v63  ;;  %v2704_v63 = vld [vmem:[#allocation10 + $0x68] sm:$0xff] }
 0x298   : > { %4107 = vmatprep.subr.bf16.mxu0 %v4106_v25 }
 0x299   : > { %v1310_v55 = vpop.f32.mrb[22].mxu1  ;;  %v5503_v39 = vpop.f32.mrb[58].mxu0 }
 0x29a   : > { %v5500_v34 = vadd.f32 %v3559_v21, %v1310_v55  ;;  %v1312_v0 = vpop.f32.mrb[23].mxu1  ;;  %2283 = vmatmul.mubr.f32.gmra.mrb[128].mxu1 %v5231_v24  ;;  %v5505_v6 = vpop.f32.mrb[59].mxu0  ;;  %v4272_v24 = vld [vmem:[#allocation3 + $0x168] sm:$0xff]  ;;  %4109 = vmatpush3.bf16.msra.mxu0 %v4106_v25  ;;  %v2699_v55 = vld [vmem:[#allocation10 + $0x40] sm:$0xff]  ;;  %v2701_v25 = vld [vmem:[#allocation10 + $0x50] sm:$0xff] }
 0x29b   : > { %2287 = vmatprep.mubr.f32.mxu1 %v4271_v12  ;;  %4111 = vmatprep.subr.bf16.mxu0 %v4110_v60  ;;  %v4118_v12 = vpack.c.bf16 %v2700_v41, %v2699_v55  ;;  %v2705_v55 = vld [vmem:[#allocation10 + $0x70] sm:$0xff]  ;;  %v2706_v41 = vld [vmem:[#allocation10 + $0x78] sm:$0xff] }
 0x29d   : > { %v1315_v37 = vpop.f32.mrb[24].mxu1  ;;  %v5510_v21 = vpop.f32.mrb[60].mxu0 }
 0x29e   : > { %v5507_v27 = vadd.f32 %v1540_v36, %v1315_v37  ;;  %v1317_v38 = vpop.f32.mrb[25].mxu1  ;;  %2288 = vmatmul.mubr.f32.gmra.mrb[130].mxu1 %v5243_v20  ;;  %v5512_v19 = vpop.f32.mrb[61].mxu0  ;;  %v4273_v20 = vld [vmem:[#allocation3 + $0x170] sm:$0xff]  ;;  %4113 = vmatpush3.bf16.msra.mxu0 %v4110_v60  ;;  %v4276_v60 = vld [vmem:[#allocation3 + $0x1a8] sm:$0xff] }
 0x29f   : > { %2292 = vmatprep.mubr.f32.mxu1 %v4272_v24  ;;  %4115 = vmatprep.subr.bf16.mxu0 %v4114_v56  ;;  %v2702_v38 = vld [vmem:[#allocation10 + $0x58] sm:$0xff] }
 0x2a0   : > { %v4122_v23 = vpack.c.bf16 %v2702_v38, %v2701_v25  ;;  %v4278_v25 = vld [vmem:[#allocation3 + $0x1c8] sm:$0xff] }
 0x2a1   : > { %v1320_v17 = vpop.f32.mrb[26].mxu1  ;;  %v5518_v26 = vpop.f32.mrb[62].mxu0 }
 0x2a2   : > { %v5515_v1 = vadd.f32 %v5470_v49, %v1320_v17  ;;  %v1322_v36 = vpop.f32.mrb[27].mxu1  ;;  %2293 = vmatmul.mubr.f32.gmra.mrb[132].mxu1 %v5251_v22  ;;  %v5520_v51 = vpop.f32.mrb[63].mxu0  ;;  %v4274_v22 = vld [vmem:[#allocation3 + $0x188] sm:$0xff]  ;;  %4117 = vmatpush3.bf16.msra.mxu0 %v4114_v56 }
 0x2a3   : > { %2297 = vmatprep.mubr.f32.mxu1 %v4273_v20  ;;  %4119 = vmatprep.subr.bf16.mxu0 %v4118_v12  ;;  %v2703_v20 = vld [vmem:[#allocation10 + $0x60] sm:$0xff] }
 0x2a5   : > { %v1325_v61 = vpop.f32.mrb[28].mxu1  ;;  %v5526_v16 = vpop.f32.mrb[64].mxu0 }
 0x2a6   : > { %v5523_v10 = vadd.f32 %v5477_v15, %v1325_v61  ;;  %v1327_v49 = vpop.f32.mrb[29].mxu1  ;;  %2298 = vmatmul.mubr.f32.gmra.mrb[134].mxu1 %v5263_v2  ;;  %v5528_v31 = vpop.f32.mrb[65].mxu0  ;;  %v4275_v2 = vld [vmem:[#allocation3 + $0x190] sm:$0xff]  ;;  %4121 = vmatpush3.bf16.msra.mxu0 %v4118_v12  ;;  %v4126_v61 = vpack.c.bf16 %v2704_v63, %v2703_v20  ;;  %v4130_v12 = vpack.c.bf16 %v2706_v41, %v2705_v55 }
 0x2a7   : > { %2302 = vmatprep.mubr.f32.mxu1 %v4274_v22  ;;  %4123 = vmatprep.subr.bf16.mxu0 %v4122_v23 }
 0x2a9   : > { %v1330_v0 = vpop.f32.mrb[30].mxu1  ;;  %v5534_v50 = vpop.f32.mrb[66].mxu0 }
 0x2aa   : > { %v5531_v28 = vadd.f32 %v5475_v32, %v1330_v0  ;;  %v1332_v15 = vpop.f32.mrb[31].mxu1  ;;  %2303 = vmatmul.mubr.f32.gmra.mrb[136].mxu1 %v5271_v43  ;;  %v5536_v37 = vpop.f32.mrb[67].mxu0  ;;  %4125 = vmatpush3.bf16.msra.mxu0 %v4122_v23 }
 0x2ab   : > { %2307 = vmatprep.mubr.f32.mxu1 %v4275_v2  ;;  %4127 = vmatprep.subr.bf16.mxu0 %v4126_v61 }
 0x2ad   : > { %v1335_v24 = vpop.f32.mrb[32].mxu1 }
 0x2ae   : > { %v5539_v48 = vadd.f32 %v5484_v8, %v1335_v24  ;;  %v1705_v32 = vpop.f32.mrb[68].mxu0  ;;  %v1337_v17 = vpop.f32.mrb[33].mxu1  ;;  %2308 = vmatmul.mubr.f32.gmra.mrb[138].mxu1 %v5283_v7  ;;  %4129 = vmatpush3.bf16.msra.mxu0 %v4126_v61 }
 0x2af   : > { %v5543_v43 = vadd.f32 %v1705_v32, %v5435_v4  ;;  %2312 = vmatprep.mubr.f32.mxu1 %v4276_v60  ;;  %v1707_v36 = vpop.f32.mrb[69].mxu0  ;;  %v4277_v4 = vld [vmem:[#allocation3 + $0x1b0] sm:$0xff]  ;;  %4131 = vmatprep.subr.bf16.mxu0 %v4130_v12 }
 0x2b0   : > { %v4279_v17 = vld [vmem:[#allocation3 + $0x1d0] sm:$0xff] }
 0x2b1   : > { %v1340_v9 = vpop.f32.mrb[34].mxu1 }
 0x2b2   : > { %v5546_v56 = vadd.f32 %v5482_v33, %v1340_v9  ;;  %v1710_v8 = vpop.f32.mrb[70].mxu0  ;;  %v1342_v49 = vpop.f32.mrb[35].mxu1  ;;  %2313 = vmatmul.mubr.f32.gmra.mrb[140].mxu1 %v5289_v14  ;;  %4133 = vmatpush3.bf16.msra.mxu0 %v4130_v12  ;;  %v4280_v9 = vld [vmem:[#allocation3 + $0x1e8] sm:$0xff] }
 0x2b3   : > { %v5550_v7 = vadd.f32 %v1710_v8, %v5440_v59  ;;  %2317 = vmatprep.mubr.f32.mxu1 %v4277_v4  ;;  %v1712_v22 = vpop.f32.mrb[71].mxu0  ;;  %v4281_v4 = vld [vmem:[#allocation3 + $0x1f0] sm:$0xff] }
 0x2b5   : > { %v1345_v0 = vpop.f32.mrb[36].mxu1 }
 0x2b6   : > { %v5553_v15 = vadd.f32 %v5491_v44, %v1345_v0  ;;  %v1715_v33 = vpop.f32.mrb[72].mxu0  ;;  %v1347_v2 = vpop.f32.mrb[37].mxu1  ;;  %2318 = vmatmul.mubr.f32.gmra.mrb[142].mxu1 %v5297_v13  ;;  %v4282_v0 = vld [vmem:[#allocation3 + $0x208] sm:$0xff] }
 0x2b7   : > { %v5557_v14 = vadd.f32 %v1715_v33, %v5447_v58  ;;  %v1717_v59 = vpop.f32.mrb[73].mxu0  ;;  %2322 = vmatprep.mubr.f32.mxu1 %v4278_v25 }
 0x2b8   : > { %v4283_v59 = vld [vmem:[#allocation3 + $0x210] sm:$0xff] }
 0x2b9   : > { %v1350_v38 = vpop.f32.mrb[38].mxu1 }
 0x2ba   : > { %v5560_v24 = vadd.f32 %v5489_v35, %v1350_v38  ;;  %v1720_v23 = vpop.f32.mrb[74].mxu0  ;;  %v1352_v32 = vpop.f32.mrb[39].mxu1  ;;  %2323 = vmatmul.mubr.f32.gmra.mrb[144].mxu1 %v5302_v18 }
 0x2bb   : > { %v5564_v44 = vadd.f32 %v1720_v23, %v5453_v11  ;;  %v1722_v13 = vpop.f32.mrb[75].mxu0  ;;  %2327 = vmatprep.mubr.f32.mxu1 %v4279_v17  ;;  %v4284_v32 = vld [vmem:[#allocation2] sm:$0xff] }
 0x2bd   : > { %v1355_v58 = vpop.f32.mrb[40].mxu1 }
 0x2be   : > { %v5567_v60 = vadd.f32 %v5498_v40, %v1355_v58  ;;  %v1725_v36 = vpop.f32.mrb[76].mxu0  ;;  %v1357_v20 = vpop.f32.mrb[41].mxu1  ;;  %2328 = vmatmul.mubr.f32.gmra.mrb[146].mxu1 %v5309_v29 }
 0x2bf   : > { %v5571_v35 = vadd.f32 %v1725_v36, %v5458_v57  ;;  %v1727_v63 = vpop.f32.mrb[77].mxu0  ;;  %2332 = vmatprep.mubr.f32.mxu1 %v4280_v9 }
 0x2c1   : > { %v1360_v18 = vpop.f32.mrb[42].mxu1 }
 0x2c2   : > { %v5574_v11 = vadd.f32 %v5496_v3, %v1360_v18  ;;  %v1730_v61 = vpop.f32.mrb[78].mxu0  ;;  %v1362_v8 = vpop.f32.mrb[43].mxu1  ;;  %2333 = vmatmul.mubr.f32.gmra.mrb[148].mxu1 %v5314_v30 }
 0x2c3   : > { %v5578_v40 = vadd.f32 %v1730_v61, %v5463_v47  ;;  %v1732_v49 = vpop.f32.mrb[79].mxu0  ;;  %2337 = vmatprep.mubr.f32.mxu1 %v4281_v4  ;;  %v4285_v61 = vld [vmem:[#allocation3 + $0x1a9] sm:$0xff] }
 0x2c5   : > { %v1365_v29 = vpop.f32.mrb[44].mxu1 }
 0x2c6   : > { %v5581_v57 = vadd.f32 %v5505_v6, %v1365_v29  ;;  %v1735_v22 = vpop.f32.mrb[80].mxu0  ;;  %v1367_v55 = vpop.f32.mrb[45].mxu1  ;;  %2338 = vmatmul.mubr.f32.gmra.mrb[150].mxu1 %v5321_v42  ;;  %v4286_v29 = vld [vmem:[#allocation3 + $0x1b1] sm:$0xff] }
 0x2c7   : > { %v5585_v3 = vadd.f32 %v1735_v22, %v5467_v5  ;;  %v1737_v41 = vpop.f32.mrb[81].mxu0  ;;  %2342 = vmatprep.mubr.f32.mxu1 %v4282_v0  ;;  %v4287_v55 = vld [vmem:[#allocation3 + $0x1c9] sm:$0xff] }
 0x2c9   : > { %v1370_v30 = vpop.f32.mrb[46].mxu1 }
 0x2ca   : > { %v5588_v47 = vadd.f32 %v5503_v39, %v1370_v30  ;;  %v1740_v12 = vpop.f32.mrb[82].mxu0  ;;  %v1372_v33 = vpop.f32.mrb[47].mxu1  ;;  %2343 = vmatmul.mubr.f32.gmra.mrb[152].mxu1 %v5327_v46  ;;  %v1018_v46 = vld [vmem:[#allocation3 + $0x227] sm:$0xff] }
 0x2cb   : > { %v5592_v6 = vadd.f32 %v1740_v12, %v5472_v53  ;;  %v1742_v2 = vpop.f32.mrb[83].mxu0  ;;  %2347 = vmatprep.mubr.f32.mxu1 %v4283_v59  ;;  %v4288_v12 = vld [vmem:[#allocation3 + $0x1d1] sm:$0xff] }
 0x2cc   : > { %v4289_v2 = vld [vmem:[#allocation3 + $0x1e9] sm:$0xff] }
 0x2cd   : > { %v1375_v42 = vpop.f32.mrb[48].mxu1 }
 0x2ce   : > { %v5595_v5 = vadd.f32 %v5512_v19, %v1375_v42  ;;  %v1745_v25 = vpop.f32.mrb[84].mxu0  ;;  %v1377_v38 = vpop.f32.mrb[49].mxu1  ;;  %2348 = vmatmul.mubr.f32.gmra.mrb[154].mxu1 %v5335_v54  ;;  %v1019_v54 = vld [vmem:[#allocation3 + $0x22f] sm:$0xff] }
 0x2cf   : > { %v5599_v39 = vadd.f32 %v1745_v25, %v5479_v45  ;;  %v1747_v23 = vpop.f32.mrb[85].mxu0  ;;  %2352 = vmatprep.mubr.f32.mxu1 %v4284_v32  ;;  %v4290_v38 = vld [vmem:[#allocation3 + $0x1f1] sm:$0xff] }
 0x2d1   : > { %v1380_v53 = vpop.f32.mrb[50].mxu1 }
 0x2d2   : > { %v5602_v13 = vadd.f32 %v5510_v21, %v1380_v53  ;;  %v1750_v17 = vpop.f32.mrb[86].mxu0  ;;  %v1382_v58 = vpop.f32.mrb[51].mxu1  ;;  %2353 = vmatmul.mubr.f32.gmra.mrb[156].mxu1 %v1018_v46  ;;  %v1090_v46 = vld [vmem:[#allocation3 + $0x229] sm:$0xff] }
 0x2d3   : > { %v5605_v19 = vadd.f32 %v1750_v17, %v5486_v62  ;;  %v1752_v36 = vpop.f32.mrb[87].mxu0  ;;  %2357 = vmatprep.mubr.f32.mxu1 %v4284_v32  ;;  %v4291_v32 = vld [vmem:[#allocation3 + $0x209] sm:$0xff] }
 0x2d4   : > { %v4292_v36 = vld [vmem:[#allocation3 + $0x211] sm:$0xff] }
 0x2d5   : > { %v1385_v20 = vpop.f32.mrb[52].mxu1 }
 0x2d6   : > { %v5608_v45 = vadd.f32 %v5520_v51, %v1385_v20  ;;  %v1755_v63 = vpop.f32.mrb[88].mxu0  ;;  %v1387_v9 = vpop.f32.mrb[53].mxu1  ;;  %2358 = vmatmul.mubr.f32.gmra.mrb[158].mxu1 %v1019_v54  ;;  %v1091_v20 = vld [vmem:[#allocation3 + $0x231] sm:$0xff] }
 0x2d7   : > { %v5611_v18 = vadd.f32 %v1755_v63, %v5493_v52  ;;  %v1757_v21 = vpop.f32.mrb[89].mxu0  ;;  %3735 = vmatprep.mubr.f32.mxu1 %v4285_v61 }
 0x2d9   : > { %v1390_v8 = vpop.f32.mrb[54].mxu1 }
 0x2da   : > { %v5614_v62 = vadd.f32 %v5518_v26, %v1390_v8  ;;  %v1760_v49 = vpop.f32.mrb[90].mxu0  ;;  %v1392_v4 = vpop.f32.mrb[55].mxu1  ;;  %3736 = vmatmul.mubr.f32.vlgmr.msra.gmra.mrb[160].mxu1 %v4286_v29 }
 0x2db   : > { %v5617_v51 = vadd.f32 %v1760_v49, %v5500_v34  ;;  %v1762_v22 = vpop.f32.mrb[91].mxu0  ;;  %3738 = vmatprep.mubr.f32.mxu1 %v4287_v55 }
 0x2dd   : > { %v1395_v41 = vpop.f32.mrb[56].mxu1 }
 0x2de   : > { %v5620_v52 = vadd.f32 %v5528_v31, %v1395_v41  ;;  %v1765_v0 = vpop.f32.mrb[92].mxu0  ;;  %v1397_v30 = vpop.f32.mrb[57].mxu1  ;;  %3739 = vmatmul.mubr.f32.gmra.mrb[162].mxu1 %v4288_v12 }
 0x2df   : > { %v5623_v26 = vadd.f32 %v1765_v0, %v5507_v27  ;;  %v1767_v33 = vpop.f32.mrb[93].mxu0  ;;  %3741 = vmatprep.mubr.f32.mxu1 %v4289_v2 }
 0x2e1   : > { %v1400_v59 = vpop.f32.mrb[58].mxu1 }
 0x2e2   : > { %v5626_v34 = vadd.f32 %v5526_v16, %v1400_v59  ;;  %v1770_v42 = vpop.f32.mrb[94].mxu0  ;;  %v1402_v25 = vpop.f32.mrb[59].mxu1  ;;  %3742 = vmatmul.mubr.f32.gmra.mrb[164].mxu1 %v4290_v38 }
 0x2e3   : > { %v5629_v31 = vadd.f32 %v1770_v42, %v5515_v1  ;;  %v1772_v23 = vpop.f32.mrb[95].mxu0  ;;  %3744 = vmatprep.mubr.f32.mxu1 %v4291_v32 }
 0x2e5   : > { %v1405_v27 = vpop.f32.mrb[60].mxu1 }
 0x2e6   : > { %v5632_v53 = vadd.f32 %v5536_v37, %v1405_v27  ;;  %v1775_v17 = vpop.f32.mrb[96].mxu0  ;;  %v1407_v58 = vpop.f32.mrb[61].mxu1  ;;  %3745 = vmatmul.mubr.f32.gmra.mrb[166].mxu1 %v4292_v36 }
 0x2e7   : > { %v5635_v16 = vadd.f32 %v1775_v17, %v5523_v10  ;;  %v1777_v54 = vpop.f32.mrb[97].mxu0  ;;  %3747 = vmatprep.mubr.f32.mxu1 %v1090_v46 }
 0x2e9   : > { %v1410_v1 = vpop.f32.mrb[62].mxu1 }
 0x2ea   : > { %v5638_v63 = vadd.f32 %v5534_v50, %v1410_v1  ;;  %v1780_v9 = vpop.f32.mrb[98].mxu0  ;;  %v1412_v21 = vpop.f32.mrb[63].mxu1  ;;  %3748 = vmatmul.mubr.f32.gmra.mrb[168].mxu1 %v1091_v20 }
 0x2eb   : > { %v1781_v37 = vadd.f32 %v1780_v9, %v5531_v28  ;;  %v1782_v61 = vpop.f32.mrb[99].mxu0 }
 0x2ed   : > { %v3624_v8 = vpop.f32.mrb[64].mxu1 }
 0x2ee   : > { %v1785_v49 = vpop.f32.mrb[100].mxu0  ;;  %v5642_v4 = vadd.f32 %v3624_v8, %v5550_v7  ;;  %v1930_v10 = vpop.f32.mrb[65].mxu1 }
 0x2ef   : > { %v1786_v29 = vadd.f32 %v1785_v49, %v5539_v48  ;;  %v1787_v22 = vpop.f32.mrb[101].mxu0  ;;  %v5646_v55 = vadd.f32 %v1930_v10, %v5543_v43 }
 0x2f1   : > { %v3627_v50 = vpop.f32.mrb[66].mxu1 }
 0x2f2   : > { %v1790_v41 = vpop.f32.mrb[102].mxu0  ;;  %v5649_v0 = vadd.f32 %v3627_v50, %v5564_v44  ;;  %v1940_v30 = vpop.f32.mrb[67].mxu1 }
 0x2f3   : > { %v1791_v28 = vadd.f32 %v1790_v41, %v5546_v56  ;;  %v1792_v12 = vpop.f32.mrb[103].mxu0  ;;  %v5653_v33 = vadd.f32 %v1940_v30, %v5557_v14 }
 0x2f5   : > { %v3630_v7 = vpop.f32.mrb[68].mxu1 }
 0x2f6   : > { %v1795_v2 = vpop.f32.mrb[104].mxu0  ;;  %v5656_v48 = vadd.f32 %v3630_v7, %v5578_v40  ;;  %v1950_v59 = vpop.f32.mrb[69].mxu1 }
 0x2f7   : > { %v1796_v43 = vadd.f32 %v1795_v2, %v5553_v15  ;;  %v1797_v42 = vpop.f32.mrb[105].mxu0  ;;  %v5660_v25 = vadd.f32 %v1950_v59, %v5571_v35 }
 0x2f9   : > { %v3633_v44 = vpop.f32.mrb[70].mxu1 }
 0x2fa   : > { %v1800_v38 = vpop.f32.mrb[106].mxu0  ;;  %v5663_v56 = vadd.f32 %v3633_v44, %v5592_v6  ;;  %v1960_v23 = vpop.f32.mrb[71].mxu1 }
 0x2fb   : > { %v1801_v14 = vadd.f32 %v1800_v38, %v5560_v24  ;;  %v1802_v32 = vpop.f32.mrb[107].mxu0  ;;  %v5667_v46 = vadd.f32 %v1960_v23, %v5585_v3 }
 0x2fd   : > { %v3636_v40 = vpop.f32.mrb[72].mxu1 }
 0x2fe   : > { %v1805_v27 = vpop.f32.mrb[108].mxu0  ;;  %v5670_v15 = vadd.f32 %v3636_v40, %v5605_v19  ;;  %v1970_v17 = vpop.f32.mrb[73].mxu1 }
 0x2ff   : > { %v1806_v35 = vadd.f32 %v1805_v27, %v5567_v60  ;;  %v1807_v58 = vpop.f32.mrb[109].mxu0  ;;  %v5674_v36 = vadd.f32 %v1970_v17, %v5599_v39 }
 0x301   : > { %v3639_v6 = vpop.f32.mrb[74].mxu1 }
 0x302   : > { %v1810_v54 = vpop.f32.mrb[110].mxu0  ;;  %v5677_v24 = vadd.f32 %v3639_v6, %v5617_v51  ;;  %v1980_v20 = vpop.f32.mrb[75].mxu1 }
 0x303   : > { %v1811_v3 = vadd.f32 %v1810_v54, %v5574_v11  ;;  %v1812_v1 = vpop.f32.mrb[111].mxu0  ;;  %v5681_v9 = vadd.f32 %v1980_v20, %v5611_v18 }
 0x305   : > { %v3642_v19 = vpop.f32.mrb[76].mxu1 }
 0x306   : > { %v1815_v21 = vpop.f32.mrb[112].mxu0  ;;  %v5684_v60 = vadd.f32 %v3642_v19, %v5629_v31  ;;  %v1990_v61 = vpop.f32.mrb[77].mxu1 }
 0x307   : > { %v1816_v39 = vadd.f32 %v1815_v21, %v5581_v57  ;;  %v1817_v8 = vpop.f32.mrb[113].mxu0  ;;  %v5688_v49 = vadd.f32 %v1990_v61, %v5623_v26 }
 0x309   : > { %v3645_v51 = vpop.f32.mrb[78].mxu1 }
 0x30a   : > { %v1820_v10 = vpop.f32.mrb[114].mxu0  ;;  %v5690_v22 = vadd.f32 %v3645_v51, %v1781_v37  ;;  %v2000_v11 = vpop.f32.mrb[79].mxu1 }
 0x30b   : > { %v1821_v18 = vadd.f32 %v1820_v10, %v5588_v47  ;;  %v1822_v50 = vpop.f32.mrb[115].mxu0  ;;  %v5694_v41 = vadd.f32 %v2000_v11, %v5635_v16 }
 0x30d   : > { %v3648_v31 = vpop.f32.mrb[80].mxu1 }
 0x30e   : > { %v1825_v30 = vpop.f32.mrb[116].mxu0  ;;  %v5696_v12 = vadd.f32 %v3648_v31, %v1791_v28  ;;  %v2010_v57 = vpop.f32.mrb[81].mxu1 }
 0x30f   : > { %v1826_v7 = vadd.f32 %v1825_v30, %v5595_v5  ;;  %v1827_v26 = vpop.f32.mrb[117].mxu0  ;;  %v5699_v2 = vadd.f32 %v2010_v57, %v1786_v29 }
 0x311   : > { %v3651_v59 = vpop.f32.mrb[82].mxu1 }
 0x312   : > { %v1830_v37 = vpop.f32.mrb[118].mxu0  ;;  %v5701_v42 = vadd.f32 %v3651_v59, %v1801_v14  ;;  %v2020_v44 = vpop.f32.mrb[83].mxu1 }
 0x313   : > { %v1831_v47 = vadd.f32 %v1830_v37, %v5602_v13  ;;  %v1832_v38 = vpop.f32.mrb[119].mxu0  ;;  %v5704_v16 = vadd.f32 %v2020_v44, %v1796_v43 }
 0x315   : > { %v3654_v23 = vpop.f32.mrb[84].mxu1 }
 0x316   : > { %v1835_v32 = vpop.f32.mrb[120].mxu0  ;;  %v5706_v28 = vadd.f32 %v3654_v23, %v1811_v3  ;;  %v2030_v40 = vpop.f32.mrb[85].mxu1 }
 0x317   : > { %v1836_v5 = vadd.f32 %v1835_v32, %v5608_v45  ;;  %v1837_v27 = vpop.f32.mrb[121].mxu0  ;;  %v5709_v29 = vadd.f32 %v2030_v40, %v1806_v35 }
 0x319   : > { %v3657_v17 = vpop.f32.mrb[86].mxu1 }
 0x31a   : > { %v1840_v58 = vpop.f32.mrb[122].mxu0  ;;  %v5711_v14 = vadd.f32 %v3657_v17, %v1821_v18  ;;  %v2040_v6 = vpop.f32.mrb[87].mxu1 }
 0x31b   : > { %v1841_v13 = vadd.f32 %v1840_v58, %v5614_v62  ;;  %v1842_v54 = vpop.f32.mrb[123].mxu0  ;;  %v5714_v43 = vadd.f32 %v2040_v6, %v1816_v39 }
 0x31d   : > { %v3660_v20 = vpop.f32.mrb[88].mxu1 }
 0x31e   : > { %v1845_v1 = vpop.f32.mrb[124].mxu0  ;;  %v5716_v3 = vadd.f32 %v3660_v20, %v1831_v47  ;;  %v2050_v19 = vpop.f32.mrb[89].mxu1 }
 0x31f   : > { %v1846_v45 = vadd.f32 %v1845_v1, %v5620_v52  ;;  %v1847_v21 = vpop.f32.mrb[125].mxu0  ;;  %v5719_v35 = vadd.f32 %v2050_v19, %v1826_v7 }
 0x321   : > { %v3663_v61 = vpop.f32.mrb[90].mxu1 }
 0x322   : > { %v1850_v8 = vpop.f32.mrb[126].mxu0  ;;  %v5721_v51 = vadd.f32 %v3663_v61, %v1841_v13  ;;  %v2060_v10 = vpop.f32.mrb[91].mxu1 }
 0x323   : > { %v1851_v62 = vadd.f32 %v1850_v8, %v5626_v34  ;;  %v1852_v11 = vpop.f32.mrb[127].mxu0  ;;  %v5724_v39 = vadd.f32 %v2060_v10, %v1836_v5 }
 0x325   : > { %v3666_v18 = vpop.f32.mrb[92].mxu1 }
 0x326   : > { %v1855_v50 = vpop.f32.mrb[128].mxu0  ;;  %v5726_v31 = vadd.f32 %v3666_v18, %v1851_v62  ;;  %v2070_v30 = vpop.f32.mrb[93].mxu1 }
 0x327   : > { %v1856_v52 = vadd.f32 %v1855_v50, %v5632_v53  ;;  %v1857_v57 = vpop.f32.mrb[129].mxu0  ;;  %v5729_v7 = vadd.f32 %v2070_v30, %v1846_v45  ;;  %v5739_v53 = vld [vmem:[%s5953_s6] ss:$0 sm:$0xff] }
 0x329   : > { %v3669_v26 = vpop.f32.mrb[94].mxu1 }
 0x32a   : > { %v1860_v59 = vpop.f32.mrb[130].mxu0  ;;  %v2080_v37 = vpop.f32.mrb[95].mxu1 }
 0x32b   : > { %v1861_v44 = vadd.f32 %v1860_v59, %v5638_v63  ;;  %v1862_v47 = vpop.f32.mrb[131].mxu0  ;;  %v5732_v34 = vadd.f32 %v2080_v37, %v1856_v52 }
 0x32d   : > { %v5734_v38 = vadd.f32 %v3669_v26, %v1861_v44  ;;  %v2204_v23 = vpop.f32.mrb[96].mxu1 }
 0x32e   : > { %v3704_v32 = vpop.f32.mrb[132].mxu0  ;;  %v2206_v40 = vpop.f32.mrb[97].mxu1 }
 0x32f   : > { %v2429_v5 = vpop.f32.mrb[133].mxu0 }
 0x330   : > { %v2430_v27 = vadd.f32 %v2429_v5, %v2204_v23 }
 0x331   : > { %v2209_v17 = vpop.f32.mrb[98].mxu1 }
 0x332   : > { %v2588_v58 = vadd.f32 %v2430_v27, %v5646_v55  ;;  %v2435_v6 = vadd.f32 %v3704_v32, %v2209_v17  ;;  %v3707_v63 = vpop.f32.mrb[134].mxu0  ;;  %v2211_v13 = vpop.f32.mrb[99].mxu1 }
 0x333   : > { %v2439_v54 = vpop.f32.mrb[135].mxu0 }
 0x334   : > { %v2589_v20 = vadd.f32 %v2435_v6, %v5642_v4  ;;  %v2627_v1 = vadd.f32 %v5739_v53, %v2588_v58 }
 0x335   : > { %v2214_v19 = vpop.f32.mrb[100].mxu1 }
 0x336   : > { %v2628_v45 = vadd.f32 %v5739_v53, %v2589_v20  ;;  %v2440_v21 = vadd.f32 %v2439_v54, %v2214_v19  ;;  %v3710_v61 = vpop.f32.mrb[136].mxu0  ;;  %v2216_v8 = vpop.f32.mrb[101].mxu1  ;;  %v2659_v10 = vmax.f32 %v2627_v1, 0.0 }
 0x337   : > { %v2449_v62 = vpop.f32.mrb[137].mxu0 }
 0x338   : > { %v2660_v11 = vmax.f32 %v2628_v45, 0.0  ;;  %v2590_v18 = vadd.f32 %v2440_v21, %v5653_v33  ;;  %3782 = vmatprep.mubr.f32.mxu0 %v2659_v10 }
 0x339   : > { %v2219_v55 = vpop.f32.mrb[102].mxu1 }
 0x33a   : > { %v2445_v50 = vadd.f32 %v3707_v63, %v2219_v55  ;;  %v3713_v30 = vpop.f32.mrb[138].mxu0  ;;  %v2221_v52 = vpop.f32.mrb[103].mxu1  ;;  %3783 = vmatmul.mubr.f32.vlgmr.msra.gmra.mrb[154].mxu0 %v2660_v11  ;;  %v2629_v4 = vadd.f32 %v5739_v53, %v2590_v18 }
 0x33b   : > { %v2459_v57 = vpop.f32.mrb[139].mxu0 }
 0x33c   : > { %v2591_v26 = vadd.f32 %v2445_v50, %v5649_v0  ;;  %v2661_v59 = vmax.f32 %v2629_v4, 0.0 }
 0x33d   : > { %v2224_v37 = vpop.f32.mrb[104].mxu1 }
 0x33e   : > { %v2450_v44 = vadd.f32 %v2449_v62, %v2224_v37  ;;  %v3716_v47 = vpop.f32.mrb[140].mxu0  ;;  %v2226_v23 = vpop.f32.mrb[105].mxu1  ;;  %3785 = vmatprep.mubr.f32.mxu0 %v2661_v59  ;;  %v2630_v32 = vadd.f32 %v5739_v53, %v2591_v26 }
 0x33f   : > { %v2469_v33 = vpop.f32.mrb[141].mxu0 }
 0x340   : > { %v2592_v40 = vadd.f32 %v2450_v44, %v5660_v25  ;;  %v2662_v5 = vmax.f32 %v2630_v32, 0.0 }
 0x341   : > { %v2229_v27 = vpop.f32.mrb[106].mxu1 }
 0x342   : > { %v2455_v17 = vadd.f32 %v3710_v61, %v2229_v27  ;;  %v3719_v58 = vpop.f32.mrb[142].mxu0  ;;  %v2231_v6 = vpop.f32.mrb[107].mxu1  ;;  %3786 = vmatmul.mubr.f32.gmra.mrb[156].mxu0 %v2662_v5  ;;  %v2631_v63 = vadd.f32 %v5739_v53, %v2592_v40 }
 0x343   : > { %v2479_v0 = vpop.f32.mrb[143].mxu0 }
 0x344   : > { %v2593_v13 = vadd.f32 %v2455_v17, %v5656_v48  ;;  %v2663_v54 = vmax.f32 %v2631_v63, 0.0 }
 0x345   : > { %v2234_v20 = vpop.f32.mrb[108].mxu1 }
 0x346   : > { %v2460_v1 = vadd.f32 %v2459_v57, %v2234_v20  ;;  %v3722_v19 = vpop.f32.mrb[144].mxu0  ;;  %v2236_v45 = vpop.f32.mrb[109].mxu1  ;;  %3788 = vmatprep.mubr.f32.mxu0 %v2663_v54  ;;  %v2632_v21 = vadd.f32 %v5739_v53, %v2593_v13 }
 0x347   : > { %v2489_v25 = vpop.f32.mrb[145].mxu0 }
 0x348   : > { %v2594_v8 = vadd.f32 %v2460_v1, %v5667_v46  ;;  %v2664_v61 = vmax.f32 %v2632_v21, 0.0 }
 0x349   : > { %v2239_v10 = vpop.f32.mrb[110].mxu1 }
 0x34a   : > { %v2465_v62 = vadd.f32 %v3713_v30, %v2239_v10  ;;  %v5754_v11 = vpop.f32.mrb[146].mxu0  ;;  %v2241_v18 = vpop.f32.mrb[111].mxu1  ;;  %3789 = vmatmul.mubr.f32.gmra.mrb[158].mxu0 %v2664_v61  ;;  %v2633_v48 = vadd.f32 %v5739_v53, %v2594_v8 }
 0x34b   : > { %v2499_v55 = vpop.f32.mrb[147].mxu0 }
 0x34c   : > { %v2595_v50 = vadd.f32 %v2465_v62, %v5663_v56  ;;  %v2665_v52 = vmax.f32 %v2633_v48, 0.0 }
 0x34d   : > { %v2244_v4 = vpop.f32.mrb[112].mxu1 }
 0x34e   : > { %v2470_v57 = vadd.f32 %v2469_v33, %v2244_v4  ;;  %v5758_v26 = vpop.f32.mrb[148].mxu0  ;;  %v2246_v59 = vpop.f32.mrb[113].mxu1  ;;  %3791 = vmatprep.mubr.f32.mxu0 %v2665_v52  ;;  %v2634_v46 = vadd.f32 %v5739_v53, %v2595_v50 }
 0x34f   : > { %v2509_v37 = vpop.f32.mrb[149].mxu0 }
 0x350   : > { %v2596_v30 = vadd.f32 %v2470_v57, %v5674_v36  ;;  %v2666_v44 = vmax.f32 %v2634_v46, 0.0 }
 0x351   : > { %v2249_v23 = vpop.f32.mrb[114].mxu1 }
 0x352   : > { %v2475_v32 = vadd.f32 %v3716_v47, %v2249_v23  ;;  %v5762_v40 = vpop.f32.mrb[150].mxu0  ;;  %v2251_v5 = vpop.f32.mrb[115].mxu1  ;;  %3792 = vmatmul.mubr.f32.gmra.mrb[160].mxu0 %v2666_v44  ;;  %v2635_v56 = vadd.f32 %v5739_v53, %v2596_v30 }
 0x353   : > { %v2519_v27 = vpop.f32.mrb[151].mxu0 }
 0x354   : > { %v2597_v33 = vadd.f32 %v2475_v32, %v5670_v15  ;;  %v2667_v17 = vmax.f32 %v2635_v56, 0.0 }
 0x355   : > { %v2254_v6 = vpop.f32.mrb[116].mxu1 }
 0x356   : > { %v2480_v63 = vadd.f32 %v2479_v0, %v2254_v6  ;;  %v5766_v13 = vpop.f32.mrb[152].mxu0  ;;  %v2256_v54 = vpop.f32.mrb[117].mxu1  ;;  %3794 = vmatprep.mubr.f32.mxu0 %v2667_v17  ;;  %v2636_v36 = vadd.f32 %v5739_v53, %v2597_v33 }
 0x357   : > { %v5769_v20 = vpop.f32.mrb[153].mxu0 }
 0x358   : > { %v2598_v47 = vadd.f32 %v2480_v63, %v5681_v9  ;;  %v2668_v1 = vmax.f32 %v2636_v36, 0.0 }
 0x359   : > { %v2259_v45 = vpop.f32.mrb[118].mxu1 }
 0x35a   : > { %v2485_v21 = vadd.f32 %v3719_v58, %v2259_v45  ;;  %v2261_v8 = vpop.f32.mrb[119].mxu1  ;;  %3795 = vmatmul.mubr.f32.gmra.mrb[162].mxu0 %v2668_v1  ;;  %v2637_v15 = vadd.f32 %v5739_v53, %v2598_v47 }
 0x35c   : > { %v2599_v61 = vadd.f32 %v2485_v21, %v5677_v24  ;;  %v2669_v0 = vmax.f32 %v2637_v15, 0.0 }
 0x35d   : > { %v2264_v10 = vpop.f32.mrb[120].mxu1 }
 0x35e   : > { %v2490_v62 = vadd.f32 %v2489_v25, %v2264_v10  ;;  %v2266_v18 = vpop.f32.mrb[121].mxu1  ;;  %3797 = vmatprep.mubr.f32.mxu0 %v2669_v0  ;;  %v2638_v48 = vadd.f32 %v5739_v53, %v2599_v61 }
 0x360   : > { %v2600_v50 = vadd.f32 %v2490_v62, %v5688_v49  ;;  %v2670_v52 = vmax.f32 %v2638_v48, 0.0 }
 0x361   : > { %v2269_v9 = vpop.f32.mrb[122].mxu1 }
 0x362   : > { %v2495_v4 = vadd.f32 %v3722_v19, %v2269_v9  ;;  %v2271_v57 = vpop.f32.mrb[123].mxu1  ;;  %3798 = vmatmul.mubr.f32.gmra.mrb[164].mxu0 %v2670_v52  ;;  %v2639_v58 = vadd.f32 %v5739_v53, %v2600_v50 }
 0x364   : > { %v2601_v59 = vadd.f32 %v2495_v4, %v5684_v60  ;;  %v2671_v46 = vmax.f32 %v2639_v58, 0.0 }
 0x365   : > { %v2274_v24 = vpop.f32.mrb[124].mxu1 }
 0x366   : > { %v2500_v30 = vadd.f32 %v2499_v55, %v2274_v24  ;;  %v2276_v44 = vpop.f32.mrb[125].mxu1  ;;  %3800 = vmatprep.mubr.f32.mxu0 %v2671_v46  ;;  %v2640_v25 = vadd.f32 %v5739_v53, %v2601_v59 }
 0x368   : > { %v2602_v23 = vadd.f32 %v2500_v30, %v5694_v41  ;;  %v2672_v32 = vmax.f32 %v2640_v25, 0.0 }
 0x369   : > { %v2279_v49 = vpop.f32.mrb[126].mxu1 }
 0x36a   : > { %v2505_v5 = vadd.f32 %v5754_v11, %v2279_v49  ;;  %v2281_v19 = vpop.f32.mrb[127].mxu1  ;;  %3801 = vmatmul.mubr.f32.gmra.mrb[166].mxu0 %v2672_v32  ;;  %v2641_v56 = vadd.f32 %v5739_v53, %v2602_v23 }
 0x36c   : > { %v2603_v33 = vadd.f32 %v2505_v5, %v5690_v22  ;;  %v2673_v60 = vmax.f32 %v2641_v56, 0.0 }
 0x36d   : > { %v2284_v17 = vpop.f32.mrb[128].mxu1 }
 0x36e   : > { %v2510_v6 = vadd.f32 %v2509_v37, %v2284_v17  ;;  %v2286_v55 = vpop.f32.mrb[129].mxu1  ;;  %3803 = vmatprep.mubr.f32.mxu0 %v2673_v60  ;;  %v2642_v63 = vadd.f32 %v5739_v53, %v2603_v33 }
 0x370   : > { %v2604_v54 = vadd.f32 %v2510_v6, %v5699_v2  ;;  %v2674_v41 = vmax.f32 %v2642_v63, 0.0 }
 0x371   : > { %v2289_v36 = vpop.f32.mrb[130].mxu1 }
 0x372   : > { %v2515_v47 = vadd.f32 %v5758_v26, %v2289_v36  ;;  %v2291_v11 = vpop.f32.mrb[131].mxu1  ;;  %3804 = vmatmul.mubr.f32.gmra.mrb[168].mxu0 %v2674_v41  ;;  %v2643_v1 = vadd.f32 %v5739_v53, %v2604_v54 }
 0x374   : > { %v2605_v45 = vadd.f32 %v2515_v47, %v5696_v12  ;;  %v2675_v22 = vmax.f32 %v2643_v1, 0.0 }
 0x375   : > { %v2294_v21 = vpop.f32.mrb[132].mxu1 }
 0x376   : > { %v2520_v8 = vadd.f32 %v2519_v27, %v2294_v21  ;;  %v2296_v37 = vpop.f32.mrb[133].mxu1  ;;  %3806 = vmatprep.mubr.f32.mxu0 %v2675_v22  ;;  %v2644_v15 = vadd.f32 %v5739_v53, %v2605_v45 }
 0x378   : > { %v2606_v61 = vadd.f32 %v2520_v8, %v5704_v16  ;;  %v2676_v2 = vmax.f32 %v2644_v15, 0.0 }
 0x379   : > { %v2299_v0 = vpop.f32.mrb[134].mxu1 }
 0x37a   : > { %v2525_v10 = vadd.f32 %v5762_v40, %v2299_v0  ;;  %v2301_v26 = vpop.f32.mrb[135].mxu1  ;;  %3807 = vmatmul.mubr.f32.gmra.mrb[170].mxu0 %v2676_v2  ;;  %v2645_v62 = vadd.f32 %v5739_v53, %v2606_v61 }
 0x37c   : > { %v2607_v18 = vadd.f32 %v2525_v10, %v5701_v42  ;;  %v2677_v12 = vmax.f32 %v2645_v62, 0.0 }
 0x37d   : > { %v2304_v48 = vpop.f32.mrb[136].mxu1 }
 0x37e   : > { %v2530_v27 = vadd.f32 %v5769_v20, %v2304_v48  ;;  %v2306_v50 = vpop.f32.mrb[137].mxu1  ;;  %3809 = vmatprep.mubr.f32.mxu0 %v2677_v12  ;;  %v2646_v52 = vadd.f32 %v5739_v53, %v2607_v18 }
 0x380   : > { %v2608_v16 = vadd.f32 %v2530_v27, %v5709_v29  ;;  %v2678_v9 = vmax.f32 %v2646_v52, 0.0 }
 0x381   : > { %v2309_v4 = vpop.f32.mrb[138].mxu1 }
 0x382   : > { %v2535_v40 = vadd.f32 %v5766_v13, %v2309_v4  ;;  %v2311_v57 = vpop.f32.mrb[139].mxu1  ;;  %3810 = vmatmul.mubr.f32.gmra.mrb[172].mxu0 %v2678_v9  ;;  %v2647_v58 = vadd.f32 %v5739_v53, %v2608_v16 }
 0x384   : > { %v2609_v42 = vadd.f32 %v2535_v40, %v5706_v28  ;;  %v2679_v59 = vmax.f32 %v2647_v58, 0.0 }
 0x385   : > { %v2314_v46 = vpop.f32.mrb[140].mxu1 }
 0x386   : > { %v2316_v24 = vpop.f32.mrb[141].mxu1  ;;  %3812 = vmatprep.mubr.f32.mxu0 %v2679_v59  ;;  %v2648_v20 = vadd.f32 %v5739_v53, %v2609_v42 }
 0x388   : > { %v2680_v30 = vmax.f32 %v2648_v20, 0.0 }
 0x389   : > { %v2319_v44 = vpop.f32.mrb[142].mxu1 }
 0x38a   : > { %v2321_v25 = vpop.f32.mrb[143].mxu1  ;;  %3813 = vmatmul.mubr.f32.gmra.mrb[174].mxu0 %v2680_v30 }
 0x38d   : > { %v2324_v29 = vpop.f32.mrb[144].mxu1 }
 0x38e   : > { %v2326_v23 = vpop.f32.mrb[145].mxu1 }
 0x391   : > { %v2329_v32 = vpop.f32.mrb[146].mxu1 }
 0x392   : > { %v2331_v13 = vpop.f32.mrb[147].mxu1 }
 0x395   : > { %v2334_v49 = vpop.f32.mrb[148].mxu1 }
 0x396   : > { %v2336_v5 = vpop.f32.mrb[149].mxu1 }
 0x399   : > { %v2339_v19 = vpop.f32.mrb[150].mxu1 }
 0x39a   : > { %v2341_v56 = vpop.f32.mrb[151].mxu1 }
 0x39d   : > { %v2344_v33 = vpop.f32.mrb[152].mxu1 }
 0x39e   : > { %v2346_v28 = vpop.f32.mrb[153].mxu1 }
 0x39f   : > { %v4294_v28 = vld [vmem:[#allocation2 + $0x10] sm:$0xff] }
 0x3a1   : > { %v2349_v60 = vpop.f32.mrb[154].mxu1 }
 0x3a2   : > { %v2351_v17 = vpop.f32.mrb[155].mxu1 }
 0x3a5   : > { %v2354_v6 = vpop.f32.mrb[156].mxu1 }
 0x3a6   : > { %v2356_v55 = vpop.f32.mrb[157].mxu1 }
 0x3a9   : > { %v2359_v63 = vpop.f32.mrb[158].mxu1 }
 0x3aa   : > { %v2361_v54 = vpop.f32.mrb[159].mxu1 }
 0x3ab   : > { %v4295_v54 = vld [vmem:[#allocation2 + $0x28] sm:$0xff] }
 0x3ad   : > { %v3737_v41 = vpop.f32.mrb[160].mxu1 }
 0x3ae   : > { %v2545_v36 = vadd.f32 %v3737_v41, %v2319_v44  ;;  %v2539_v47 = vpop.f32.mrb[161].mxu1 }
 0x3af   : > { %v2540_v11 = vadd.f32 %v2539_v47, %v2314_v46 }
 0x3b0   : > { %v2611_v1 = vadd.f32 %v2545_v36, %v5711_v14  ;;  %v4296_v36 = vld [vmem:[#allocation2 + $0x20] sm:$0xff] }
 0x3b1   : > { %v2610_v45 = vadd.f32 %v2540_v11, %v5714_v43  ;;  %v3740_v22 = vpop.f32.mrb[162].mxu1 }
 0x3b2   : > { %v2555_v21 = vadd.f32 %v3740_v22, %v2329_v32  ;;  %v2549_v8 = vpop.f32.mrb[163].mxu1  ;;  %v2650_v37 = vadd.f32 %v5739_v53, %v2611_v1 }
 0x3b3   : > { %v2550_v15 = vadd.f32 %v2549_v8, %v2324_v29  ;;  %v2649_v61 = vadd.f32 %v5739_v53, %v2610_v45 }
 0x3b4   : > { %v2613_v2 = vadd.f32 %v2555_v21, %v5716_v3  ;;  %v2682_v12 = vmax.f32 %v2650_v37, 0.0  ;;  %v4297_v21 = vld [vmem:[#allocation2 + $0x38] sm:$0xff]  ;;  %v4298_v37 = vld [vmem:[#allocation2 + $0x30] sm:$0xff] }
 0x3b5   : > { %v2612_v0 = vadd.f32 %v2550_v15, %v5719_v35  ;;  %v3743_v10 = vpop.f32.mrb[164].mxu1  ;;  %v2681_v26 = vmax.f32 %v2649_v61, 0.0 }
 0x3b6   : > { %v2565_v62 = vadd.f32 %v3743_v10, %v2339_v19  ;;  %v2559_v18 = vpop.f32.mrb[165].mxu1  ;;  %v2652_v14 = vadd.f32 %v5739_v53, %v2613_v2 }
 0x3b7   : > { %v2560_v43 = vadd.f32 %v2559_v18, %v2334_v49  ;;  %3815 = vmatprep.mubr.f32.mxu0 %v2681_v26  ;;  %v2651_v48 = vadd.f32 %v5739_v53, %v2612_v0  ;;  %v4299_v26 = vld [vmem:[#allocation2 + $0x48] sm:$0xff]  ;;  %v4300_v18 = vld [vmem:[#allocation2 + $0x40] sm:$0xff] }
 0x3b8   : > { %v2615_v27 = vadd.f32 %v2565_v62, %v5721_v51  ;;  %3816 = vmatmul.mubr.f32.gmra.mrb[176].mxu0 %v2682_v12  ;;  %v2684_v9 = vmax.f32 %v2652_v14, 0.0 }
 0x3b9   : > { %v2614_v50 = vadd.f32 %v2560_v43, %v5724_v39  ;;  %v3746_v52 = vpop.f32.mrb[166].mxu1  ;;  %v2683_v3 = vmax.f32 %v2651_v48, 0.0 }
 0x3ba   : > { %v2575_v16 = vadd.f32 %v3746_v52, %v2349_v60  ;;  %v2569_v35 = vpop.f32.mrb[167].mxu1  ;;  %v2654_v4 = vadd.f32 %v5739_v53, %v2615_v27 }
 0x3bb   : > { %v2570_v40 = vadd.f32 %v2569_v35, %v2344_v33  ;;  %3818 = vmatprep.mubr.f32.mxu0 %v2683_v3  ;;  %v2653_v57 = vadd.f32 %v5739_v53, %v2614_v50  ;;  %v4301_v50 = vld [vmem:[#allocation2 + $0x58] sm:$0xff]  ;;  %v4302_v3 = vld [vmem:[#allocation2 + $0x50] sm:$0xff] }
 0x3bc   : > { %v2617_v58 = vadd.f32 %v2575_v16, %v5726_v31  ;;  %3819 = vmatmul.mubr.f32.gmra.mrb[178].mxu0 %v2684_v9  ;;  %v2686_v24 = vmax.f32 %v2654_v4, 0.0 }
 0x3bd   : > { %v2616_v42 = vadd.f32 %v2570_v40, %v5729_v7  ;;  %v3749_v51 = vpop.f32.mrb[168].mxu1  ;;  %v2685_v59 = vmax.f32 %v2653_v57, 0.0  ;;  %v4303_v57 = vld [vmem:[#allocation2 + $0x68] sm:$0xff] }
 0x3be   : > { %v2585_v46 = vadd.f32 %v3749_v51, %v2359_v63  ;;  %v2579_v39 = vpop.f32.mrb[169].mxu1  ;;  %v2656_v20 = vadd.f32 %v5739_v53, %v2617_v58 }
 0x3bf   : > { %v2580_v30 = vadd.f32 %v2579_v39, %v2354_v6  ;;  %3821 = vmatprep.mubr.f32.mxu0 %v2685_v59  ;;  %v2655_v44 = vadd.f32 %v5739_v53, %v2616_v42  ;;  %v4304_v42 = vld [vmem:[#allocation2 + $0x60] sm:$0xff] }
 0x3c0   : > { %v2619_v25 = vadd.f32 %v2585_v46, %v5734_v38  ;;  %3822 = vmatmul.mubr.f32.gmra.mrb[180].mxu0 %v2686_v24  ;;  %v2688_v23 = vmax.f32 %v2656_v20, 0.0  ;;  %v5823_v38 = vld [vmem:[%s5955_s8] ss:$0 sm:$0xff]  ;;  %v4305_v20 = vld [vmem:[#allocation2 + $0x78] sm:$0xff] }
 0x3c1   : > { %v2618_v29 = vadd.f32 %v2580_v30, %v5732_v34  ;;  %v2687_v31 = vmax.f32 %v2655_v44, 0.0  ;;  %v4306_v44 = vld [vmem:[#allocation2 + $0x70] sm:$0xff] }
 0x3c2   : > { %v2658_v7 = vadd.f32 %v5739_v53, %v2619_v25 }
 0x3c3   : > { %3824 = vmatprep.mubr.f32.mxu0 %v2687_v31  ;;  %v2657_v32 = vadd.f32 %v5739_v53, %v2618_v29  ;;  %v4293_v53 = vld [vmem:[#allocation2 + $0x18] sm:$0xff] }
 0x3c4   : > { %3825 = vmatmul.mubr.f32.gmra.mrb[182].mxu0 %v2688_v23  ;;  %v2690_v49 = vmax.f32 %v2658_v7, 0.0 }
 0x3c5   : > { %v2689_v13 = vmax.f32 %v2657_v32, 0.0  ;;  %v4307_v32 = vld [vmem:[#allocation2 + $0x88] sm:$0xff] }
 0x3c7   : > { %3827 = vmatprep.mubr.f32.mxu0 %v2689_v13 }
 0x3c8   : > { %3828 = vmatmul.mubr.f32.gmra.mrb[184].mxu0 %v2690_v49  ;;  %v4308_v49 = vld [vmem:[#allocation2 + $0x80] sm:$0xff] }
 0x40d   : > { %v3784_v34 = vpop.f32.mrb[154].mxu0 }
 0x40e   : > { %v2786_v5 = vadd.f32 %v3784_v34, %v5823_v38  ;;  %v2780_v19 = vpop.f32.mrb[155].mxu0 }
 0x40f   : > { %v2781_v56 = vadd.f32 %v5823_v38, %v2780_v19 }
 0x410   : > { %v2940_v33 = vadd.f32 %v4293_v53, %v2786_v5 }
 0x411   : > { %v2939_v60 = vadd.f32 %v4294_v28, %v2781_v56 }
 0x412   : > { %2972 = vst [vmem:[%s4796_s17 + $0x8] sm:$0xff] %v2940_v33  ;;  %v4309_v33 = vld [vmem:[#allocation2 + $0x98] sm:$0xff] }
 0x413   : > { %2971 = vst [vmem:[%s4796_s17] sm:$0xff] %v2939_v60  ;;  %v4310_v60 = vld [vmem:[#allocation2 + $0x90] sm:$0xff] }
 0x415   : > { %v3787_v17 = vpop.f32.mrb[156].mxu0 }
 0x416   : > { %v2796_v6 = vadd.f32 %v3787_v17, %v5823_v38  ;;  %v2790_v55 = vpop.f32.mrb[157].mxu0 }
 0x417   : > { %v2791_v63 = vadd.f32 %v5823_v38, %v2790_v55 }
 0x418   : > { %v2942_v41 = vadd.f32 %v4295_v54, %v2796_v6 }
 0x419   : > { %v2941_v47 = vadd.f32 %v4296_v36, %v2791_v63 }
 0x41a   : > { %2974 = vst [vmem:[%s4796_s17 + $0x18] sm:$0xff] %v2942_v41  ;;  %v4311_v41 = vld [vmem:[#allocation2 + $0xa8] sm:$0xff] }
 0x41b   : > { %2973 = vst [vmem:[%s4796_s17 + $0x10] sm:$0xff] %v2941_v47  ;;  %v4312_v47 = vld [vmem:[#allocation2 + $0xa0] sm:$0xff] }
 0x41d   : > { %v3790_v11 = vpop.f32.mrb[158].mxu0 }
 0x41e   : > { %v2806_v1 = vadd.f32 %v3790_v11, %v5823_v38  ;;  %v2800_v45 = vpop.f32.mrb[159].mxu0 }
 0x41f   : > { %v2801_v22 = vadd.f32 %v5823_v38, %v2800_v45 }
 0x420   : > { %v2944_v8 = vadd.f32 %v4297_v21, %v2806_v1 }
 0x421   : > { %v2943_v15 = vadd.f32 %v4298_v37, %v2801_v22 }
 0x422   : > { %2976 = vst [vmem:[%s4796_s17 + $0x28] sm:$0xff] %v2944_v8  ;;  %v4313_v8 = vld [vmem:[#allocation2 + $0xb8] sm:$0xff] }
 0x423   : > { %2975 = vst [vmem:[%s4796_s17 + $0x20] sm:$0xff] %v2943_v15  ;;  %v4314_v15 = vld [vmem:[#allocation2 + $0xb0] sm:$0xff] }
 0x425   : > { %v3793_v61 = vpop.f32.mrb[160].mxu0 }
 0x426   : > { %v2816_v2 = vadd.f32 %v3793_v61, %v5823_v38  ;;  %v2810_v0 = vpop.f32.mrb[161].mxu0 }
 0x427   : > { %v2811_v10 = vadd.f32 %v5823_v38, %v2810_v0 }
 0x428   : > { %v2946_v62 = vadd.f32 %v4299_v26, %v2816_v2 }
 0x429   : > { %v2945_v12 = vadd.f32 %v4300_v18, %v2811_v10 }
 0x42a   : > { %2978 = vst [vmem:[%s4796_s17 + $0x38] sm:$0xff] %v2946_v62  ;;  %v4315_v62 = vld [vmem:[#allocation2 + $0xc8] sm:$0xff] }
 0x42b   : > { %2977 = vst [vmem:[%s4796_s17 + $0x30] sm:$0xff] %v2945_v12  ;;  %v4316_v12 = vld [vmem:[#allocation2 + $0xc0] sm:$0xff] }
 0x42d   : > { %v3796_v14 = vpop.f32.mrb[162].mxu0 }
 0x42e   : > { %v2826_v43 = vadd.f32 %v3796_v14, %v5823_v38  ;;  %v2820_v48 = vpop.f32.mrb[163].mxu0 }
 0x42f   : > { %v2821_v27 = vadd.f32 %v5823_v38, %v2820_v48 }
 0x430   : > { %v2948_v52 = vadd.f32 %v4301_v50, %v2826_v43 }
 0x431   : > { %v2947_v16 = vadd.f32 %v4302_v3, %v2821_v27 }
 0x432   : > { %2980 = vst [vmem:[%s4796_s17 + $0x48] sm:$0xff] %v2948_v52  ;;  %v4317_v52 = vld [vmem:[#allocation2 + $0xd8] sm:$0xff] }
 0x433   : > { %2979 = vst [vmem:[%s4796_s17 + $0x40] sm:$0xff] %v2947_v16  ;;  %v4318_v16 = vld [vmem:[#allocation2 + $0xd0] sm:$0xff] }
 0x435   : > { %v3799_v35 = vpop.f32.mrb[164].mxu0 }
 0x436   : > { %v2836_v9 = vadd.f32 %v3799_v35, %v5823_v38  ;;  %v2830_v4 = vpop.f32.mrb[165].mxu0 }
 0x437   : > { %v2831_v40 = vadd.f32 %v5823_v38, %v2830_v4 }
 0x438   : > { %v2950_v58 = vadd.f32 %v4303_v57, %v2836_v9 }
 0x439   : > { %v2949_v51 = vadd.f32 %v4304_v42, %v2831_v40 }
 0x43a   : > { %2982 = vst [vmem:[%s4796_s17 + $0x58] sm:$0xff] %v2950_v58  ;;  %v4319_v58 = vld [vmem:[#allocation2 + $0xe8] sm:$0xff] }
 0x43b   : > { %2981 = vst [vmem:[%s4796_s17 + $0x50] sm:$0xff] %v2949_v51  ;;  %v4320_v51 = vld [vmem:[#allocation2 + $0xe0] sm:$0xff] }
 0x43d   : > { %v3802_v59 = vpop.f32.mrb[166].mxu0 }
 0x43e   : > { %v2846_v46 = vadd.f32 %v3802_v59, %v5823_v38  ;;  %v2840_v39 = vpop.f32.mrb[167].mxu0 }
 0x43f   : > { %v2841_v24 = vadd.f32 %v5823_v38, %v2840_v39 }
 0x440   : > { %v2952_v30 = vadd.f32 %v4305_v20, %v2846_v46 }
 0x441   : > { %v2951_v25 = vadd.f32 %v4306_v44, %v2841_v24 }
 0x442   : > { %2984 = vst [vmem:[%s4796_s17 + $0x68] sm:$0xff] %v2952_v30  ;;  %v4321_v30 = vld [vmem:[#allocation2 + $0xf8] sm:$0xff] }
 0x443   : > { %2983 = vst [vmem:[%s4796_s17 + $0x60] sm:$0xff] %v2951_v25  ;;  %v4322_v25 = vld [vmem:[#allocation2 + $0xf0] sm:$0xff] }
 0x445   : > { %v3805_v29 = vpop.f32.mrb[168].mxu0 }
 0x446   : > { %v2856_v31 = vadd.f32 %v3805_v29, %v5823_v38  ;;  %v2850_v23 = vpop.f32.mrb[169].mxu0 }
 0x447   : > { %v2851_v7 = vadd.f32 %v5823_v38, %v2850_v23 }
 0x448   : > { %v2954_v13 = vadd.f32 %v4307_v32, %v2856_v31 }
 0x449   : > { %v2953_v34 = vadd.f32 %v4308_v49, %v2851_v7 }
 0x44a   : > { %2986 = vst [vmem:[%s4796_s17 + $0x78] sm:$0xff] %v2954_v13  ;;  %v4323_v13 = vld [vmem:[#allocation2 + $0x108] sm:$0xff] }
 0x44b   : > { %2985 = vst [vmem:[%s4796_s17 + $0x70] sm:$0xff] %v2953_v34  ;;  %v4324_v34 = vld [vmem:[#allocation2 + $0x100] sm:$0xff] }
 0x44d   : > { %v3808_v5 = vpop.f32.mrb[170].mxu0 }
 0x44e   : > { %v2866_v19 = vadd.f32 %v3808_v5, %v5823_v38  ;;  %v2860_v56 = vpop.f32.mrb[171].mxu0 }
 0x44f   : > { %v2861_v53 = vadd.f32 %v5823_v38, %v2860_v56 }
 0x450   : > { %v2956_v28 = vadd.f32 %v4309_v33, %v2866_v19 }
 0x451   : > { %v2955_v17 = vadd.f32 %v4310_v60, %v2861_v53 }
 0x452   : > { %2988 = vst [vmem:[%s4796_s17 + $0x88] sm:$0xff] %v2956_v28 }
 0x453   : > { %2987 = vst [vmem:[%s4796_s17 + $0x80] sm:$0xff] %v2955_v17 }
 0x455   : > { %v3811_v6 = vpop.f32.mrb[172].mxu0 }
 0x456   : > { %v2876_v55 = vadd.f32 %v3811_v6, %v5823_v38  ;;  %v2870_v63 = vpop.f32.mrb[173].mxu0 }
 0x457   : > { %v2871_v54 = vadd.f32 %v5823_v38, %v2870_v63 }
 0x458   : > { %v2958_v36 = vadd.f32 %v4311_v41, %v2876_v55 }
 0x459   : > { %v2957_v11 = vadd.f32 %v4312_v47, %v2871_v54 }
 0x45a   : > { %2990 = vst [vmem:[%s4796_s17 + $0x98] sm:$0xff] %v2958_v36 }
 0x45b   : > { %2989 = vst [vmem:[%s4796_s17 + $0x90] sm:$0xff] %v2957_v11 }
 0x45d   : > { %v3814_v1 = vpop.f32.mrb[174].mxu0 }
 0x45e   : > { %v2886_v45 = vadd.f32 %v3814_v1, %v5823_v38  ;;  %v2880_v22 = vpop.f32.mrb[175].mxu0 }
 0x45f   : > { %v2881_v21 = vadd.f32 %v5823_v38, %v2880_v22 }
 0x460   : > { %v2960_v37 = vadd.f32 %v4313_v8, %v2886_v45 }
 0x461   : > { %v2959_v61 = vadd.f32 %v4314_v15, %v2881_v21 }
 0x462   : > { %2992 = vst [vmem:[%s4796_s17 + $0xa8] sm:$0xff] %v2960_v37 }
 0x463   : > { %2991 = vst [vmem:[%s4796_s17 + $0xa0] sm:$0xff] %v2959_v61 }
 0x48b   : > { %v3817_v2 = vpop.f32.mrb[176].mxu0 }
 0x48c   : > { %v2896_v0 = vadd.f32 %v3817_v2, %v5823_v38  ;;  %v2890_v10 = vpop.f32.mrb[177].mxu0 }
 0x48d   : > { %v2891_v26 = vadd.f32 %v5823_v38, %v2890_v10 }
 0x48e   : > { %v2962_v18 = vadd.f32 %v4315_v62, %v2896_v0 }
 0x48f   : > { %v2961_v14 = vadd.f32 %v4316_v12, %v2891_v26  ;;  %v3820_v43 = vpop.f32.mrb[178].mxu0 }
 0x490   : > { %2994 = vst [vmem:[%s4796_s17 + $0xb8] sm:$0xff] %v2962_v18  ;;  %v2906_v48 = vadd.f32 %v3820_v43, %v5823_v38  ;;  %v2900_v27 = vpop.f32.mrb[179].mxu0 }
 0x491   : > { %2993 = vst [vmem:[%s4796_s17 + $0xb0] sm:$0xff] %v2961_v14  ;;  %v2901_v50 = vadd.f32 %v5823_v38, %v2900_v27 }
 0x492   : > { %v2964_v3 = vadd.f32 %v4317_v52, %v2906_v48 }
 0x493   : > { %v2963_v35 = vadd.f32 %v4318_v16, %v2901_v50  ;;  %v3823_v9 = vpop.f32.mrb[180].mxu0 }
 0x494   : > { %2996 = vst [vmem:[%s4796_s17 + $0xc8] sm:$0xff] %v2964_v3  ;;  %v2916_v4 = vadd.f32 %v3823_v9, %v5823_v38  ;;  %v2910_v40 = vpop.f32.mrb[181].mxu0 }
 0x495   : > { %2995 = vst [vmem:[%s4796_s17 + $0xc0] sm:$0xff] %v2963_v35  ;;  %v2911_v57 = vadd.f32 %v5823_v38, %v2910_v40 }
 0x496   : > { %v2966_v42 = vadd.f32 %v4319_v58, %v2916_v4 }
 0x497   : > { %v2965_v59 = vadd.f32 %v4320_v51, %v2911_v57  ;;  %v3826_v46 = vpop.f32.mrb[182].mxu0 }
 0x498   : > { %2998 = vst [vmem:[%s4796_s17 + $0xd8] sm:$0xff] %v2966_v42  ;;  %v2926_v39 = vadd.f32 %v3826_v46, %v5823_v38  ;;  %v2920_v24 = vpop.f32.mrb[183].mxu0 }
 0x499   : > { %2997 = vst [vmem:[%s4796_s17 + $0xd0] sm:$0xff] %v2965_v59  ;;  %v2921_v20 = vadd.f32 %v5823_v38, %v2920_v24 }
 0x49a   : > { %v2968_v44 = vadd.f32 %v4321_v30, %v2926_v39 }
 0x49b   : > { %v2967_v29 = vadd.f32 %v4322_v25, %v2921_v20  ;;  %v3829_v31 = vpop.f32.mrb[184].mxu0 }
 0x49c   : > { %3000 = vst [vmem:[%s4796_s17 + $0xe8] sm:$0xff] %v2968_v44  ;;  %v2936_v23 = vadd.f32 %v3829_v31, %v5823_v38  ;;  %v2930_v7 = vpop.f32.mrb[185].mxu0 }
 0x49d   : > { %2999 = vst [vmem:[%s4796_s17 + $0xe0] sm:$0xff] %v2967_v29  ;;  %v2931_v32 = vadd.f32 %v5823_v38, %v2930_v7 }
 0x49e   : > { %v2970_v49 = vadd.f32 %v4323_v13, %v2936_v23 }
 0x49f   : > { %v2969_v5 = vadd.f32 %v4324_v34, %v2931_v32 }
 0x4a0   : > { %3002 = vst [vmem:[%s4796_s17 + $0xf8] sm:$0xff] %v2970_v49 }
 0x4a1   : > { %3001 = vst [vmem:[%s4796_s17 + $0xf0] sm:$0xff] %v2969_v5 }
 0x4a2   : > { %4446 = shalt.err (!%p4443_p2)
}
 0x4a3   : > { %s4447_s27 = scalar_lea.hbm %s5893_s5, 4096  ;;  %s4451_s24 = scalar_lea.hbm %s5956_s9, 8192 }
 0x4a4   : > { %p4448_p3 = scmp.ne.s32.totalorder %s5893_s5, %s4447_s27  ;;  %p4452_p7 = scmp.lt.u32.totalorder %s5893_s5, %s5956_s9 }
 0x4a5   : > { %p4453_p9 = scmp.lt.u32.totalorder %s4451_s24, %s4447_s27  ;;  %p4455_p4 = scmp.lt.u32.totalorder %s4447_s27, %s5893_s5 }
 0x4a6   : > { %p4449_p5 = pnand %p4448_p3, %p6093_p1 }
 0x4a7   : > { %p4454_p12 = por %p4453_p9, %p4452_p7 }
 0x4a8   : > { %p4450_p6 = pneg %p4449_p5 }
 0x4a9   : > { %p4456_p13 = por %p4455_p4, %p4454_p12 }
 0x4ab   : > { %p4457_p8 = pnand %p4456_p13, %p4450_p6 }
 0x4ad   : > { %4460 = shalt.err (!%p4457_p8)
}
 0x4ae   : > { %s4533_s22 = smov 128   ;;  %s4534_s18 = smov 8  }
 0x4af   : > { %4162 = dma.vmem_to_hbm [thread:$0]  (%p6093_p1), %s5895_s28, 4096, %s5893_s5, %s5901_s30, %s4533_s22, %s4533_s22, %s4534_s18  }
 0x4b0 PF: > { %s6094_s15 = sld [smem:[#allocation24_spill]]  ;;  %s6095_s20 = sld [smem:[#allocation28_spill]] }
 0x4b1   : > { %p4184_p10 = scmp.ge.s32.totalorder %s4521_s14, 2 }
 0x4b6   : > { %s3035_s13 = sand.u32 1, %s6094_s15   ;;  %p6096_p11 = scmp.ne.s32.totalorder %s6095_s20, 0 }
 0x4b7   : > { %s3036_s29 = scalar_lea.sflag [#allocation7], %s3035_s13 }
 0x4b8   : > { %p4175_p0 = pnand %p4184_p10, %p6096_p11 }
 0x4ba   : > { %4496 = dma.done.wait (!%p4175_p0), %s3036_s29, 4096  }
 0x4bb   : > { %4498 = vsyncadd (!%p4175_p0), %s3036_s29, 4294963200  ;;  %s24_s14 = sadd.s32 1, %s4521_s14   ;;  %s6097_s23 = sld [smem:[#allocation25_spill]] }
 0x4bc   : > { %p21_p2 = scmp.ge.s32.totalorder %s24_s14, 4   ;;  %s6098_s11 = sld [smem:[#allocation29_spill]] }
 0x4bd   : > { %s6099_s12 = sld [smem:[#allocation26_spill]]  ;;  %s6100_s13 = sld [smem:[#allocation27_spill]] }
 0x4be   : > { %s6101_s30 = smov %s4505_s10  ;;  %23 = sbr.rel (!%p21_p2) target bundleno = 8 (0x8), region = 148 }
 0x4c1   : > { %s6102_s10 = smov %s6097_s23 }
 0x4c5   :  { %3041 = vsyncpa [#allocation6], 1 }
 0x4c6   :  { %3043 = vsyncpa [#allocation6 + $0x1], 1 }
 0x4c7   :  { %3044 = vsyncpa [#allocation9], 1 }
 0x4c8   :  { %3045 = vsyncpa [#allocation7], 1 }
 0x4c9   :  { %3047 = vsyncpa [#allocation7 + $0x1], 1 }
 0x4ca   :  { %3048 = vsyncmov [#allocation4] }
 0x4cd   :  { %s3049_s19 = vpop.sfrf %3048 }
 0x4ce   :  { %p3172_p1 = scmp.ne.s32.totalorder %s3049_s19, 0 }
 0x4d0   :  { %3053 = shalt.err (%p3172_p1)  }
 0x4d1   :  { %3055 = vsyncmov [#allocation4 + $0x1] }
 0x4d4   :  { %s3056_s28 = vpop.sfrf %3055 }
 0x4d5   :  { %p3173_p3 = scmp.ne.s32.totalorder %s3056_s28, 0 }
 0x4d7   :  { %3060 = shalt.err (%p3173_p3)  }
 0x4d8   :  { %3062 = vsyncmov [#allocation4 + $0x2] }
 0x4db   :  { %s3063_s5 = vpop.sfrf %3062 }
 0x4dc   :  { %p3174_p5 = scmp.ne.s32.totalorder %s3063_s5, 0 }
 0x4de   :  { %3067 = shalt.err (%p3174_p5)  }

// kernel: tpu_custom_call.1
= control target key start
LH: loop header
LB: loop body
LE: loop exit
PB: predicated region body
PF: predicated region fallthrough
CT: control target
= control target key end

     0   :  { %s5947_s0 = inlined_call_operand.hbm [shape: f32[2,16,16,128], index: 0, kind: input, shape index: {}]   ;;  %s5948_s1 = inlined_call_operand.vmem [shape: f32[1,128], index: 1, kind: input, shape index: {}]   ;;  %s5949_s2 = inlined_call_operand.vmem [shape: f32[1,128], index: 2, kind: input, shape index: {}]   ;;  %s5950_s3 = inlined_call_operand.hbm [shape: f32[128,128], index: 3, kind: input, shape index: {}]   ;;  %s5951_s4 = inlined_call_operand.vmem [shape: f32[1,128], index: 4, kind: input, shape index: {}]   ;;  %s5952_s5 = inlined_call_operand.hbm [shape: f32[3,384,128], index: 5, kind: input, shape index: {}]   ;;  %s5953_s6 = inlined_call_operand.vmem [shape: f32[1,128], index: 6, kind: input, shape index: {}]   ;;  %s5954_s7 = inlined_call_operand.hbm [shape: f32[128,128], index: 7, kind: input, shape index: {}]   ;;  %s5955_s8 = inlined_call_operand.vmem [shape: f32[1,128], index: 8, kind: input, shape index: {}]   ;;  %s5956_s9 = inlined_call_operand.hbm [shape: f32[2,16,16,128], index: 9, kind: output, shape index: {}]  }
   0x1   :  { %6016 = sst [smem:[#allocation59_spill]] %s5952_s5 }
   0x2   :  { %14 = vsyncpa [#allocation6], 0 }
   0x3   :  { %15 = vsyncpa [#allocation9], 0 }
   0x4   :  { %16 = vsyncpa [#allocation7], 0 }
   0x5   :  { %18 = vsyncpa [#allocation7 + $0x1], 0  ;;  %s4585_s30 = smov 0   ;;  %s4587_s10 = smov 0  }
   0x6   :  { %s4589_s11 = smov 0   ;;  %s4591_s12 = smov 0  }
   0x7   :  { %s4593_s13 = smov 0   ;;  %s4595_s14 = smov 0  }
   0x8 LB: > { %6017 = sst [smem:[#allocation24_spill]] %s4501_s30  ;;  %s3147_s15 = sadd.s32 4294967295, %s4521_s14   ;;  %s4521_s14 = sphi %s4595_s14, %s24_s14   ;;  %s4517_s13 = sphi %s4593_s13, %s6100_s13   ;;  %s4513_s12 = sphi %s4591_s12, %s6099_s12   ;;  %s4509_s11 = sphi %s4589_s11, %s6098_s11   ;;  %s4505_s10 = sphi %s4587_s10, %s6102_s10   ;;  %s4501_s30 = sphi %s4585_s30, %s6101_s30  }
   0x9   : > { %6018 = sst [smem:[#allocation25_spill]] %s4509_s11  ;;  %s3148_s16 = sadd.s32 4294967294, %s4521_s14  }
   0xa   : > { %6019 = sst [smem:[#allocation26_spill]] %s4517_s13  ;;  %s36_s17 = sadd.s32 1, %s4517_s13 }
   0xb   : > { %s213_s18 = sadd.s32 1, %s4509_s11  ;;  %p38_p0 = scmp.ge.s32.totalorder %s36_s17, 2 }
   0xc   : > { %p223_p1 = scmp.ne.s32.totalorder %s4509_s11, %s4505_s10  ;;  %p224_p2 = scmp.eq.s32.totalorder %s3147_s15, 1 }
   0xd   : > { %p229_p3 = scmp.ne.s32.totalorder %s4505_s10, %s4501_s30  ;;  %s6104_s17 = smov (%p38_p0, %s36_s17), 0 }
   0xe   : > { %6020 = sst [smem:[#allocation27_spill]] %s6104_s17  ;;  %p4625_p4 = por %p224_p2, %p223_p1 }
   0xf   : > { %p230_p5 = scmp.eq.s32.totalorder %s3148_s16, 1  ;;  %s208_s20 = ssub.s32 %s4517_s13, %s6104_s17 }
  0x10   : > { %s6021_s19 = scalar_select %p4625_p4, 1, 0 }
  0x11   : > { %p3149_p6 = scmp.ge.s32.totalorder %s4521_s14, 1  ;;  %p211_p7 = scmp.eq.s32.totalorder %s208_s20, 0 }
  0x12   : > { %p4632_p8 = por %p230_p5, %p229_p3  ;;  %p237_p9 = scmp.lt.s32.totalorder %s4521_s14, 3 }
  0x13   : > { %s4638_s22 = scalar_select %p211_p7, %s4509_s11, %s213_s18  }
  0x14   : > { %s6022_s21 = scalar_select %p4632_p8, 1, 0 }
  0x15   : > { %6024 = sst [smem:[#allocation29_spill]] %s4638_s22  ;;  %p4640_p10 = pnand %p3149_p6, %p237_p9 }
  0x16   : > { %6023 = sst [smem:[#allocation28_spill]] %s6022_s21  ;;  %p4644_p11 = scmp.eq.s32.totalorder %s3147_s15, 0 }
  0x17   : > { %s6025_s23 = scalar_select %p4640_p10, 1, 0 }
  0x18   : > { %s6026_s24 = scalar_select %p4644_p11, 1, 0 }
  0x19   : > { %p4164_p12 = pneg %p4640_p10  ;;  %s4523_s25 = smov [#allocation8]  }
  0x1a   : > { %s271_s26 = sshll.u32 %s4523_s25, 4  ;;  %s4524_s28 = smov [#allocation5]   ;;  %s272_s26 = int_to_ptr.vmem [resolvable:$true] %s271_s26 }
  0x1b   : > { %p4652_p13 = pnand %p4644_p11, %p4164_p12  ;;  %s255_s29 = sshll.u32 %s4524_s28, 4  ;;  %s256_s29 = int_to_ptr.vmem [resolvable:$true] %s255_s29 }
  0x1c   : > { %s6028_s5 = sld [smem:[#allocation59_spill]] }
  0x1d   : > { %p4664_p1 = pneg %p4652_p13 }
  0x22   : > { %s4325_s15 = scalar_lea.hbm %s6028_s5, 18432 }
  0x23   : > { %p4326_p0 = scmp.ne.s32.totalorder %s6028_s5, %s4325_s15  ;;  %p4332_p5 = scmp.lt.u32.totalorder %s4325_s15, %s6028_s5 }
  0x25   : > { %p4328_p2 = pnand %p4664_p1, %p4326_p0 }
  0x27   : > { %p4329_p3 = pneg %p4328_p2 }
  0x29   : > { %p4334_p6 = pnand %p4332_p5, %p4329_p3 }
  0x2b   : > { %4337 = shalt.err (!%p4334_p6)
}
  0x2c   : > { %s4338_s28 = scalar_lea.vmem %s272_s26, 18432  ;;  %p4346_p8 = scmp.lt.s32.totalorder %s272_s26, %s272_s26 }
  0x2d   : > { %p4339_p7 = scmp.ne.s32.totalorder %s272_s26, %s4338_s28  ;;  %p4347_p4 = scmp.lt.s32.totalorder %s4338_s28, %s4338_s28 }
  0x2f   : > { %p4341_p9 = pnand %p4339_p7, %p4664_p1  ;;  %p4348_p11 = por %p4347_p4, %p4346_p8 }
  0x31   : > { %p4342_p12 = pneg %p4341_p9 }
  0x33   : > { %p4349_p10 = pnand %p4348_p11, %p4342_p12 }
  0x35   : > { %4352 = shalt.err (!%p4349_p10)
}
  0x36   : > { %s4525_s17 = smov 128   ;;  %s4526_s16 = smov 8  }
  0x37   : > { %4170 = dma.hbm_to_vmem [thread:$0]  (!%p4652_p13), %s6028_s5, 18432, %s272_s26, [#allocation9], %s4525_s17, %s4525_s17, %s4526_s16  }
  0x38   : > { %s4353_s20 = scalar_lea.hbm %s5950_s3, 2048 }
  0x39   : > { %p4354_p4 = scmp.ne.s32.totalorder %s5950_s3, %s4353_s20  ;;  %p4360_p11 = scmp.lt.u32.totalorder %s4353_s20, %s5950_s3 }
  0x3b   : > { %p4356_p8 = pnand %p4354_p4, %p4664_p1 }
  0x3d   : > { %p4357_p10 = pneg %p4356_p8 }
  0x3f   : > { %p4362_p0 = pnand %p4360_p11, %p4357_p10 }
  0x41   : > { %4365 = shalt.err (!%p4362_p0)
}
  0x42   : > { %s4366_s13 = scalar_lea.vmem %s256_s29, 2048  ;;  %p4374_p6 = scmp.lt.s32.totalorder %s256_s29, %s256_s29 }
  0x43   : > { %p4367_p2 = scmp.ne.s32.totalorder %s256_s29, %s4366_s13  ;;  %p4375_p7 = scmp.lt.s32.totalorder %s4366_s13, %s4366_s13 }
  0x45   : > { %p4369_p3 = pnand %p4367_p2, %p4664_p1  ;;  %p4376_p9 = por %p4375_p7, %p4374_p6 }
  0x47   : > { %p4370_p5 = pneg %p4369_p3 }
  0x49   : > { %p4377_p12 = pnand %p4376_p9, %p4370_p5 }
  0x4b   : > { %4380 = shalt.err (!%p4377_p12)
}
  0x4c   : > { %4167 = dma.hbm_to_vmem [thread:$0]  (!%p4652_p13), %s5950_s3, 2048, %s256_s29, [#allocation6], %s4525_s17, %s4525_s17, %s4526_s16  }
  0x4d   : > { %s4527_s21 = smov [#allocation10]   ;;  %s4381_s15 = scalar_lea.hbm %s5954_s7, 2048 }
  0x4e   : > { %s287_s26 = sshll.u32 %s4527_s21, 4  ;;  %p4382_p4 = scmp.ne.s32.totalorder %s5954_s7, %s4381_s15  ;;  %s288_s26 = int_to_ptr.vmem [resolvable:$true] %s287_s26 }
  0x4f   : > { %p4388_p11 = scmp.lt.u32.totalorder %s4381_s15, %s5954_s7 }
  0x50   : > { %p4384_p8 = pnand %p4382_p4, %p4664_p1 }
  0x52   : > { %p4385_p10 = pneg %p4384_p8 }
  0x54   : > { %p4390_p0 = pnand %p4388_p11, %p4385_p10 }
  0x56   : > { %4393 = shalt.err (!%p4390_p0)
}
  0x57   : > { %s4394_s29 = scalar_lea.vmem %s288_s26, 2048  ;;  %p4402_p6 = scmp.lt.s32.totalorder %s288_s26, %s288_s26 }
  0x58   : > { %p4395_p2 = scmp.ne.s32.totalorder %s288_s26, %s4394_s29  ;;  %p4403_p7 = scmp.lt.s32.totalorder %s4394_s29, %s4394_s29 }
  0x5a   : > { %p4397_p3 = pnand %p4395_p2, %p4664_p1  ;;  %p4404_p9 = por %p4403_p7, %p4402_p6 }
  0x5c   : > { %p4398_p5 = pneg %p4397_p3 }
  0x5e   : > { %p4405_p12 = pnand %p4404_p9, %p4398_p5 }
  0x60   : > { %4408 = shalt.err (!%p4405_p12)
}
  0x61   : > { %4173 = dma.hbm_to_vmem [thread:$0]  (!%p4652_p13), %s5954_s7, 2048, %s288_s26, [#allocation9], %s4525_s17, %s4525_s17, %s4526_s16  }
  0x62   : > { %p6030_p4 = scmp.ne.s32.totalorder %s6025_s23, 0 }
  0x64   : > { %306 = sbr.rel (%p6030_p4) target bundleno = 1200 (0x4b0), region = 52 }
  0x6b   : > { %p6031_p1 = scmp.ne.s32.totalorder %s6026_s24, 0 }
  0x6d   : > { %4486 = dma.done.wait (%p6031_p1), [#allocation6], 2048  }
  0x6e   : > { %4488 = vsyncadd (%p6031_p1), [#allocation6], 4294965248 }
  0x6f   : > { %4490 = dma.done.wait (%p6031_p1), [#allocation9], 20480  }
  0x70   : > { %4492 = vsyncadd (%p6031_p1), [#allocation9], 4294946816  ;;  %s340_s27 = sand.u32 1, %s4505_s10   ;;  %s3175_s25 = sshll.u32 %s4513_s12, 12  ;;  %v4528_v0 = vmov 0.0  }
  0x71   : > { %s4739_s23 = sshll.u32 %s340_s27, 8  ;;  %s4746_s11 = scalar_lea.hbm %s5947_s0, %s3175_s25  ;;  %409 = vst [vmem:[#allocation3] sm:$0xff] %v4528_v0  ;;  %410 = vst [vmem:[#allocation3 + $0x20] sm:$0xff] %v4528_v0 }
  0x72   : > { %411 = vst [vmem:[#allocation3 + $0x40] sm:$0xff] %v4528_v0  ;;  %412 = vst [vmem:[#allocation3 + $0x60] sm:$0xff] %v4528_v0  ;;  %s4529_s24 = smov [#allocation2 + $0x10]   ;;  %s4409_s26 = scalar_lea.hbm %s4746_s11, 4096 }
  0x73   : > { %413 = vst [vmem:[#allocation3 + $0x80] sm:$0xff] %v4528_v0  ;;  %414 = vst [vmem:[#allocation3 + $0xa0] sm:$0xff] %v4528_v0  ;;  %s364_s21 = sshll.u32 %s4529_s24, 4  ;;  %p4410_p13 = scmp.ne.s32.totalorder %s4746_s11, %s4409_s26  ;;  %s365_s21 = int_to_ptr.vmem [resolvable:$true] %s364_s21 }
  0x74   : > { %415 = vst [vmem:[#allocation3 + $0xc0] sm:$0xff] %v4528_v0  ;;  %416 = vst [vmem:[#allocation3 + $0xe0] sm:$0xff] %v4528_v0  ;;  %s4411_s15 = scalar_lea.hbm %s5947_s0, 8192  ;;  %p4412_p8 = scmp.lt.u32.totalorder %s4746_s11, %s5947_s0 }
  0x75   : > { %417 = vst [vmem:[#allocation3 + $0x100] sm:$0xff] %v4528_v0  ;;  %418 = vst [vmem:[#allocation3 + $0x120] sm:$0xff] %v4528_v0  ;;  %p4413_p10 = scmp.lt.u32.totalorder %s4411_s15, %s4409_s26  ;;  %p4415_p0 = scmp.lt.u32.totalorder %s4409_s26, %s4746_s11 }
  0x76   : > { %419 = vst [vmem:[#allocation3 + $0x140] sm:$0xff] %v4528_v0  ;;  %420 = vst [vmem:[#allocation3 + $0x160] sm:$0xff] %v4528_v0 }
  0x77   : > { %421 = vst [vmem:[#allocation3 + $0x180] sm:$0xff] %v4528_v0  ;;  %422 = vst [vmem:[#allocation3 + $0x1a0] sm:$0xff] %v4528_v0  ;;  %p4414_p11 = por %p4413_p10, %p4412_p8 }
  0x78   : > { %423 = vst [vmem:[#allocation3 + $0x1c0] sm:$0xff] %v4528_v0  ;;  %424 = vst [vmem:[#allocation3 + $0x1e0] sm:$0xff] %v4528_v0 }
  0x79   : > { %425 = vst [vmem:[#allocation3 + $0x200] sm:$0xff] %v4528_v0  ;;  %426 = vst [vmem:[#allocation3 + $0x220] sm:$0xff] %v4528_v0  ;;  %p4416_p2 = por %p4415_p0, %p4414_p11 }
  0x7a   : > { %427 = vst [vmem:[#allocation3 + $0x18] sm:$0x1] %v4528_v0  ;;  %428 = vst [vmem:[#allocation3 + $0x38] sm:$0x1] %v4528_v0 }
  0x7b   : > { %429 = vst [vmem:[#allocation3 + $0x58] sm:$0x1] %v4528_v0  ;;  %430 = vst [vmem:[#allocation3 + $0x78] sm:$0x1] %v4528_v0  ;;  %p4417_p3 = pnand %p4416_p2, %p4410_p13 }
  0x7c   : > { %431 = vst [vmem:[#allocation3 + $0x98] sm:$0x1] %v4528_v0  ;;  %432 = vst [vmem:[#allocation3 + $0xb8] sm:$0x1] %v4528_v0 }
  0x7d   : > { %433 = vst [vmem:[#allocation3 + $0xd8] sm:$0x1] %v4528_v0  ;;  %434 = vst [vmem:[#allocation3 + $0xf8] sm:$0x1] %v4528_v0 }
  0x7e   : > { %435 = vst [vmem:[#allocation3 + $0x118] sm:$0x1] %v4528_v0  ;;  %436 = vst [vmem:[#allocation3 + $0x138] sm:$0x1] %v4528_v0 }
  0x7f   : > { %437 = vst [vmem:[#allocation3 + $0x158] sm:$0x1] %v4528_v0  ;;  %438 = vst [vmem:[#allocation3 + $0x178] sm:$0x1] %v4528_v0 }
  0x80   : > { %439 = vst [vmem:[#allocation3 + $0x198] sm:$0x1] %v4528_v0  ;;  %440 = vst [vmem:[#allocation3 + $0x1b8] sm:$0x1] %v4528_v0 }
  0x81   : > { %441 = vst [vmem:[#allocation3 + $0x1d8] sm:$0x1] %v4528_v0  ;;  %442 = vst [vmem:[#allocation3 + $0x1f8] sm:$0x1] %v4528_v0 }
  0x82   : > { %443 = vst [vmem:[#allocation3 + $0x218] sm:$0x1] %v4528_v0  ;;  %444 = vst [vmem:[#allocation3 + $0x238] sm:$0x1] %v4528_v0 }
  0x83   : > { %4420 = shalt.err (!%p4417_p3)  }
  0x84   : > { %s4421_s13 = scalar_lea.vmem %s365_s21, 4096  ;;  %s4530_s29 = smov [#allocation2]  }
  0x85   : > { %p4422_p5 = scmp.ne.s32.totalorder %s365_s21, %s4421_s13  ;;  %s4423_s5 = sshll.u32 %s4530_s29, 4  ;;  %s4424_s5 = int_to_ptr.vmem [resolvable:$false] %s4423_s5 }
  0x86   : > { %s4425_s30 = scalar_lea.vmem %s4424_s5, 4608  ;;  %p4426_p6 = scmp.lt.s32.totalorder %s365_s21, %s4424_s5 }
  0x87   : > { %p4427_p7 = scmp.lt.s32.totalorder %s4425_s30, %s4421_s13 }
  0x89   : > { %p4428_p9 = por %p4427_p7, %p4426_p6 }
  0x8b   : > { %p4429_p12 = pnand %p4428_p9, %p4422_p5 }
  0x8d   : > { %4432 = shalt.err (!%p4429_p12)  }
  0x8e   : > { %367 = dma.hbm_to_vmem [thread:$0]  %s4746_s11, 4096, %s365_s21, [#allocation4] }
  0x8f   : > { %s4796_s17 = scalar_lea.vmem [#allocation11], %s4739_s23 }
  0x90   : > { %4493 = dma.done.wait [#allocation4], 4096 }
  0x91   : > { %4494 = vsyncadd [#allocation4], 4294963200  ;;  %469 = vst [vmem:[#allocation2] sm:$0xff] %v4528_v0  ;;  %v5966_v1 = vmov 0.0|0.0   ;;  %v632_v2 = vld [vmem:[#allocation5] sm:$0xff]  ;;  %v633_v3 = vld [vmem:[#allocation5 + $0x8] sm:$0xff]  ;;  %s5893_s5 = scalar_lea.hbm %s5956_s9, %s3175_s25 }
  0x92   : > { %975 = vst [vmem:[#allocation3] sm:$0xff] %v4528_v0  ;;  %978 = vst [vmem:[#allocation3 + $0x18] sm:$0x1] %v4528_v0  ;;  %3862 = vmatprep.subr.bf16.mxu1 %v5966_v1  ;;  %v634_v4 = vld [vmem:[#allocation5 + $0x10] sm:$0xff]  ;;  %v3830_v5 = vpack.c.bf16 %v633_v3, %v632_v2  ;;  %v635_v6 = vld [vmem:[#allocation5 + $0x18] sm:$0xff]  ;;  %s3020_s28 = sshll.u32 %s4796_s17, 4  ;;  %s5895_s28 = int_to_ptr.vmem [resolvable:$true] %s3020_s28 }
  0x93   : > { %980 = vst [vmem:[#allocation3 + $0x220] sm:$0xff] %v4528_v0  ;;  %983 = vst [vmem:[#allocation3 + $0x238] sm:$0x1] %v4528_v0  ;;  %v3834_v7 = vpack.c.bf16 %v635_v6, %v634_v4  ;;  %v636_v8 = vld [vmem:[#allocation5 + $0x20] sm:$0xff]  ;;  %v637_v9 = vld [vmem:[#allocation5 + $0x28] sm:$0xff]  ;;  %s5901_s30 = scalar_lea.sflag [#allocation7], %s340_s27 }
  0x94   : > { %977 = vst [vmem:[#allocation3 + $0x10] sm:$0xff] %v4528_v0  ;;  %976 = vst [vmem:[#allocation3 + $0x8] sm:$0xff] %v4528_v0  ;;  %3831 = vmatprep.subr.bf16.mxu0 %v3830_v5  ;;  %v3838_v10 = vpack.c.bf16 %v637_v9, %v636_v8  ;;  %v4811_v11 = vld [vmem:[%s5948_s1] ss:$0 sm:$0xff]  ;;  %v638_v13 = vld [vmem:[#allocation5 + $0x30] sm:$0xff]  ;;  %s4433_s23 = scalar_lea.vmem %s5895_s28, 4096 }
  0x95   : > { %982 = vst [vmem:[#allocation3 + $0x230] sm:$0xff] %v4528_v0  ;;  %981 = vst [vmem:[#allocation3 + $0x228] sm:$0xff] %v4528_v0  ;;  %3833 = vmatpush3.bf16.msra.mxu0 %v3830_v5  ;;  %v4816_v12 = vld [vmem:[%s5949_s2] ss:$0 sm:$0xff]  ;;  %v639_v14 = vld [vmem:[#allocation5 + $0x38] sm:$0xff]  ;;  %v517_v15 = vmul.f32 0.0, %v4811_v11  ;;  %p4434_p4 = scmp.ne.s32.totalorder %s5895_s28, %s4433_s23 }
  0x96   : > { %3835 = vmatprep.subr.bf16.mxu0 %v3834_v7  ;;  %v3842_v17 = vpack.c.bf16 %v639_v14, %v638_v13  ;;  %v640_v18 = vld [vmem:[#allocation5 + $0x40] sm:$0xff]  ;;  %v641_v19 = vld [vmem:[#allocation5 + $0x48] sm:$0xff]  ;;  %v642_v22 = vld [vmem:[#allocation5 + $0x50] sm:$0xff]  ;;  %p6093_p1 = scmp.ne.s32.totalorder %s6021_s19, 0  ;;  %s4532_s12 = smov [#allocation11]  }
  0x97   : > { %v560_v16 = vadd.f32 %v4816_v12, %v517_v15  ;;  %v3846_v21 = vpack.c.bf16 %v641_v19, %v640_v18  ;;  %v643_v23 = vld [vmem:[#allocation5 + $0x58] sm:$0xff]  ;;  %v644_v25 = vld [vmem:[#allocation5 + $0x60] sm:$0xff]  ;;  %v645_v26 = vld [vmem:[#allocation5 + $0x68] sm:$0xff]  ;;  %s4437_s25 = sshll.u32 %s4532_s12, 4  ;;  %s4438_s25 = int_to_ptr.vmem [resolvable:$false] %s4437_s25 }
  0x98   : > { %v3850_v24 = vpack.c.bf16 %v643_v23, %v642_v22  ;;  %v3854_v27 = vpack.c.bf16 %v645_v26, %v644_v25  ;;  %v476_v28 = vld [vmem:[#allocation2 + $0x10] sm:$0xff]  ;;  %v647_v30 = vld [vmem:[#allocation5 + $0x78] sm:$0xff]  ;;  %v478_v34 = vld [vmem:[#allocation2 + $0x20] sm:$0xff]  ;;  %p4435_p13 = pnand %p4434_p4, %p6093_p1  ;;  %s4439_s16 = scalar_lea.vmem %s4438_s25, 8192 }
  0x99   : > { %3837 = vmatpush3.bf16.msra.mxu0 %v3834_v7  ;;  %v4820_v20 = vmax.f32 %v560_v16, 0.0  ;;  %v646_v29 = vld [vmem:[#allocation5 + $0x70] sm:$0xff]  ;;  %v519_v31 = vmul.f32 %v4811_v11, %v476_v28  ;;  %v477_v32 = vld [vmem:[#allocation2 + $0x18] sm:$0xff]  ;;  %v521_v37 = vmul.f32 %v4811_v11, %v478_v34  ;;  %v479_v38 = vld [vmem:[#allocation2 + $0x28] sm:$0xff]  ;;  %p4440_p10 = scmp.lt.s32.totalorder %s5895_s28, %s4438_s25  ;;  %p4441_p11 = scmp.lt.s32.totalorder %s4439_s16, %s4433_s23 }
  0x9a   : > { %3839 = vmatprep.subr.bf16.mxu0 %v3838_v10  ;;  %v3858_v33 = vpack.c.bf16 %v647_v30, %v646_v29  ;;  %v520_v35 = vmul.f32 %v4811_v11, %v477_v32  ;;  %v1141_v39 = vld [vmem:[#allocation8 + $0x180] sm:$0xff]  ;;  %v1142_v40 = vld [vmem:[#allocation8 + $0x188] sm:$0xff]  ;;  %v480_v41 = vld [vmem:[#allocation2 + $0x30] sm:$0xff]  ;;  %v522_v45 = vmul.f32 %v4811_v11, %v479_v38  ;;  %p4436_p8 = pneg %p4435_p13 }
  0x9b   : > { %3456 = vmatprep.mubr.f32.mxu0 %v4820_v20  ;;  %v562_v36 = vadd.f32 %v4816_v12, %v519_v31  ;;  %v1143_v42 = vld [vmem:[#allocation8 + $0x190] sm:$0xff]  ;;  %v1144_v43 = vld [vmem:[#allocation8 + $0x198] sm:$0xff]  ;;  %v3863_v46 = vpack.c.bf16 %v1142_v40, %v1141_v39  ;;  %v1173_v47 = vld [vmem:[#allocation8 + $0x280] sm:$0xff]  ;;  %v564_v50 = vadd.f32 %v4816_v12, %v521_v37  ;;  %v523_v51 = vmul.f32 %v4811_v11, %v480_v41  ;;  %p4442_p0 = por %p4441_p11, %p4440_p10 }
  0x9c   : > { %v563_v44 = vadd.f32 %v4816_v12, %v520_v35  ;;  %v1174_v48 = vld [vmem:[#allocation8 + $0x288] sm:$0xff]  ;;  %v481_v52 = vld [vmem:[#allocation2 + $0x38] sm:$0xff]  ;;  %v1175_v53 = vld [vmem:[#allocation8 + $0x290] sm:$0xff]  ;;  %v3866_v56 = vpack.c.bf16 %v1144_v43, %v1143_v42  ;;  %v565_v61 = vadd.f32 %v4816_v12, %v522_v45 }
  0x9d   : > { %3841 = vmatpush3.bf16.msra.mxu0 %v3838_v10  ;;  %v598_v49 = vmax.f32 %v562_v36, 0.0  ;;  %v1176_v54 = vld [vmem:[#allocation8 + $0x298] sm:$0xff]  ;;  %v482_v55 = vld [vmem:[#allocation2 + $0x40] sm:$0xff]  ;;  %3864 = vmatpush1.bf16.msra.mxu1 %v3863_v46  ;;  %v1146_v58 = vld [vmem:[#allocation8 + $0x1a8] sm:$0xff]  ;;  %v3910_v59 = vpack.c.bf16 %v1174_v48, %v1173_v47  ;;  %v524_v62 = vmul.f32 %v4811_v11, %v481_v52  ;;  %v600_v3 = vmax.f32 %v564_v50, 0.0  ;;  %p4443_p2 = pnand %p4442_p0, %p4436_p8 }
  0x9e   : > { %3843 = vmatprep.subr.bf16.mxu0 %v3842_v17  ;;  %3865 = vmatprep.subr.bf16.mxu1 %v5966_v1  ;;  %v1145_v57 = vld [vmem:[#allocation8 + $0x1a0] sm:$0xff]  ;;  %v599_v60 = vmax.f32 %v563_v44, 0.0  ;;  %v3914_v63 = vpack.c.bf16 %v1176_v54, %v1175_v53  ;;  %v1178_v2 = vld [vmem:[#allocation8 + $0x2a8] sm:$0xff]  ;;  %v566_v4 = vadd.f32 %v4816_v12, %v523_v51  ;;  %v525_v5 = vmul.f32 %v4811_v11, %v482_v55  ;;  %v484_v7 = vld [vmem:[#allocation2 + $0x50] sm:$0xff] }
  0x9f   : > { %v1177_v0 = vld [vmem:[#allocation8 + $0x2a0] sm:$0xff]  ;;  %v483_v6 = vld [vmem:[#allocation2 + $0x48] sm:$0xff]  ;;  %v3869_v8 = vpack.c.bf16 %v1146_v58, %v1145_v57  ;;  %v1147_v9 = vld [vmem:[#allocation8 + $0x1b0] sm:$0xff]  ;;  %v601_v14 = vmax.f32 %v565_v61, 0.0  ;;  %v567_v15 = vadd.f32 %v4816_v12, %v524_v62  ;;  %v527_v22 = vmul.f32 %v4811_v11, %v484_v7 }
  0xa0   : > { %v1148_v10 = vld [vmem:[#allocation8 + $0x1b8] sm:$0xff]  ;;  %v3918_v13 = vpack.c.bf16 %v1178_v2, %v1177_v0  ;;  %v526_v16 = vmul.f32 %v4811_v11, %v483_v6  ;;  %v602_v19 = vmax.f32 %v566_v4, 0.0  ;;  %v1149_v26 = vld [vmem:[#allocation8 + $0x1c0] sm:$0xff]  ;;  %v487_v35 = vld [vmem:[#allocation2 + $0x68] sm:$0xff] }
  0xa1   : > { %3845 = vmatpush3.bf16.msra.mxu0 %v3842_v17  ;;  %3867 = vmatpush1.bf16.msra.mxu1 %v3866_v56  ;;  %v1179_v17 = vld [vmem:[#allocation8 + $0x2b0] sm:$0xff]  ;;  %v1180_v18 = vld [vmem:[#allocation8 + $0x2b8] sm:$0xff]  ;;  %v3872_v25 = vpack.c.bf16 %v1148_v10, %v1147_v9  ;;  %v603_v29 = vmax.f32 %v567_v15, 0.0  ;;  %v530_v42 = vmul.f32 %v4811_v11, %v487_v35  ;;  %v490_v47 = vld [vmem:[#allocation2 + $0x80] sm:$0xff] }
  0xa2   : > { %3847 = vmatprep.subr.bf16.mxu0 %v3846_v21  ;;  %3868 = vmatprep.subr.bf16.mxu1 %v5966_v1  ;;  %v485_v23 = vld [vmem:[#allocation2 + $0x58] sm:$0xff]  ;;  %v3922_v28 = vpack.c.bf16 %v1180_v18, %v1179_v17  ;;  %v569_v30 = vadd.f32 %v4816_v12, %v526_v16  ;;  %v488_v36 = vld [vmem:[#allocation2 + $0x70] sm:$0xff]  ;;  %v1154_v50 = vld [vmem:[#allocation8 + $0x1e8] sm:$0xff]  ;;  %v533_v56 = vmul.f32 %v4811_v11, %v490_v47 }
  0xa3   : > { %v528_v31 = vmul.f32 %v4811_v11, %v485_v23  ;;  %v1151_v38 = vld [vmem:[#allocation8 + $0x1d0] sm:$0xff]  ;;  %v1152_v39 = vld [vmem:[#allocation8 + $0x1d8] sm:$0xff]  ;;  %v531_v45 = vmul.f32 %v4811_v11, %v488_v36  ;;  %v573_v52 = vadd.f32 %v4816_v12, %v530_v42  ;;  %v491_v57 = vld [vmem:[#allocation2 + $0x88] sm:$0xff] }
  0xa4   : > { %v605_v40 = vmax.f32 %v569_v30, 0.0  ;;  %v489_v46 = vld [vmem:[#allocation2 + $0x78] sm:$0xff]  ;;  %v3878_v48 = vpack.c.bf16 %v1152_v39, %v1151_v38  ;;  %v492_v58 = vld [vmem:[#allocation2 + $0x90] sm:$0xff]  ;;  %v534_v0 = vmul.f32 %v4811_v11, %v491_v57  ;;  %v494_v6 = vld [vmem:[#allocation2 + $0xa0] sm:$0xff] }
  0xa5   : > { %3849 = vmatpush3.bf16.msra.mxu0 %v3846_v21  ;;  %v568_v21 = vadd.f32 %v4816_v12, %v525_v5  ;;  %3870 = vmatpush1.bf16.msra.mxu1 %v3869_v8  ;;  %v571_v41 = vadd.f32 %v4816_v12, %v528_v31  ;;  %v532_v53 = vmul.f32 %v4811_v11, %v489_v46  ;;  %v1156_v61 = vld [vmem:[#allocation8 + $0x1f8] sm:$0xff]  ;;  %v609_v62 = vmax.f32 %v573_v52, 0.0  ;;  %v1157_v8 = vld [vmem:[#allocation8 + $0x200] sm:$0xff]  ;;  %v1158_v9 = vld [vmem:[#allocation8 + $0x208] sm:$0xff] }
  0xa6   : > { %3851 = vmatprep.subr.bf16.mxu0 %v3850_v24  ;;  %3871 = vmatprep.subr.bf16.mxu1 %v5966_v1  ;;  %v574_v55 = vadd.f32 %v4816_v12, %v531_v45  ;;  %v535_v4 = vmul.f32 %v4811_v11, %v492_v58  ;;  %v493_v5 = vld [vmem:[#allocation2 + $0x98] sm:$0xff]  ;;  %v537_v17 = vmul.f32 %v4811_v11, %v494_v6  ;;  %v495_v18 = vld [vmem:[#allocation2 + $0xa8] sm:$0xff]  ;;  %v498_v31 = vld [vmem:[#allocation2 + $0xc0] sm:$0xff] }
  0xa7   : > { %v604_v32 = vmax.f32 %v568_v21, 0.0  ;;  %v607_v51 = vmax.f32 %v571_v41, 0.0  ;;  %v3887_v21 = vpack.c.bf16 %v1158_v9, %v1157_v8  ;;  %v1160_v23 = vld [vmem:[#allocation8 + $0x218] sm:$0xff]  ;;  %v499_v41 = vld [vmem:[#allocation2 + $0xc8] sm:$0xff]  ;;  %v500_v42 = vld [vmem:[#allocation2 + $0xd0] sm:$0xff] }
  0xa8   : > { %v610_v2 = vmax.f32 %v574_v55, 0.0  ;;  %v578_v16 = vadd.f32 %v4816_v12, %v535_v4  ;;  %v497_v30 = vld [vmem:[#allocation2 + $0xb8] sm:$0xff] }
  0xa9   : > { %3853 = vmatpush3.bf16.msra.mxu0 %v3850_v24  ;;  %v486_v24 = vld [vmem:[#allocation2 + $0x60] sm:$0xff]  ;;  %3873 = vmatpush1.bf16.msra.mxu1 %v3872_v25  ;;  %v1164_v45 = vld [vmem:[#allocation8 + $0x238] sm:$0xff] }
  0xaa   : > { %3855 = vmatprep.subr.bf16.mxu0 %v3854_v27  ;;  %v529_v34 = vmul.f32 %v4811_v11, %v486_v24  ;;  %3874 = vmatprep.subr.bf16.mxu1 %v5966_v1  ;;  %v501_v52 = vld [vmem:[#allocation2 + $0xd8] sm:$0xff] }
  0xab   : > { %v544_v57 = vmul.f32 %v4811_v11, %v501_v52  ;;  %v505_v6 = vld [vmem:[#allocation2 + $0xf8] sm:$0xff] }
  0xac   : > { %v572_v44 = vadd.f32 %v4816_v12, %v529_v34  ;;  %v1162_v34 = vld [vmem:[#allocation8 + $0x228] sm:$0xff] }
  0xad   : > { %3857 = vmatpush3.bf16.msra.mxu0 %v3854_v27  ;;  %v1150_v27 = vld [vmem:[#allocation8 + $0x1c8] sm:$0xff] }
  0xae   : > { %3859 = vmatprep.subr.bf16.mxu0 %v3858_v33  ;;  %v3875_v37 = vpack.c.bf16 %v1150_v27, %v1149_v26  ;;  %v608_v54 = vmax.f32 %v572_v44, 0.0  ;;  %v538_v26 = vmul.f32 %v4811_v11, %v495_v18  ;;  %v614_v27 = vmax.f32 %v578_v16, 0.0  ;;  %v1163_v44 = vld [vmem:[#allocation8 + $0x230] sm:$0xff]  ;;  %v507_v16 = vld [vmem:[#allocation2 + $0x108] sm:$0xff] }
  0xb0   : > { %3876 = vmatpush1.bf16.msra.mxu1 %v3875_v37  ;;  %v581_v36 = vadd.f32 %v4816_v12, %v538_v26  ;;  %v540_v37 = vmul.f32 %v4811_v11, %v497_v30  ;;  %v1181_v30 = vld [vmem:[#allocation8 + $0x2c0] sm:$0xff] }
  0xb1   : > { %3861 = vmatpush3.bf16.msra.mxu0 %v3858_v33  ;;  %v570_v33 = vadd.f32 %v4816_v12, %v527_v22  ;;  %3877 = vmatprep.subr.bf16.mxu1 %v5966_v1  ;;  %v1159_v22 = vld [vmem:[#allocation8 + $0x210] sm:$0xff] }
  0xb2   : > { %3911 = vmatprep.subr.bf16.mxu0 %v3910_v59  ;;  %v617_v46 = vmax.f32 %v581_v36, 0.0  ;;  %v583_v47 = vadd.f32 %v4816_v12, %v540_v37  ;;  %v1169_v37 = vld [vmem:[#allocation8 + $0x260] sm:$0xff] }
  0xb3   : > { %v606_v43 = vmax.f32 %v570_v33, 0.0  ;;  %v1161_v33 = vld [vmem:[#allocation8 + $0x220] sm:$0xff] }
  0xb4   : > { %3457 = vmatmul.mubr.f32.vlgmr.msra.gmra.mrb[0].mxu0 %v4820_v20  ;;  %3879 = vmatpush1.bf16.msra.mxu1 %v3878_v48  ;;  %v542_v48 = vmul.f32 %v4811_v11, %v499_v41  ;;  %v619_v55 = vmax.f32 %v583_v47, 0.0  ;;  %v1186_v41 = vld [vmem:[#allocation8 + $0x2e8] sm:$0xff]  ;;  %v1188_v47 = vld [vmem:[#allocation8 + $0x2f8] sm:$0xff] }
  0xb5   : > { %3459 = vmatprep.mubr.f32.mxu0 %v598_v49  ;;  %3913 = vmatpush3.bf16.msra.mxu0 %v3910_v59  ;;  %v1153_v49 = vld [vmem:[#allocation8 + $0x1e0] sm:$0xff] }
  0xb6   : > { %3915 = vmatprep.subr.bf16.mxu0 %v3914_v63  ;;  %v3881_v59 = vpack.c.bf16 %v1154_v50, %v1153_v49  ;;  %3880 = vmatprep.subr.bf16.mxu1 %v5966_v1 }
  0xb8   : > { %3460 = vmatmul.mubr.f32.gmra.mrb[2].mxu0 %v599_v60  ;;  %v1155_v60 = vld [vmem:[#allocation8 + $0x1f0] sm:$0xff]  ;;  %3882 = vmatpush1.bf16.msra.mxu1 %v3881_v59 }
  0xb9   : > { %3462 = vmatprep.mubr.f32.mxu0 %v600_v3  ;;  %3917 = vmatpush3.bf16.msra.mxu0 %v3914_v63  ;;  %v575_v63 = vadd.f32 %v4816_v12, %v532_v53  ;;  %v576_v3 = vadd.f32 %v4816_v12, %v533_v56  ;;  %v3884_v7 = vpack.c.bf16 %v1156_v61, %v1155_v60  ;;  %v502_v53 = vld [vmem:[#allocation2 + $0xe0] sm:$0xff]  ;;  %v503_v61 = vld [vmem:[#allocation2 + $0xe8] sm:$0xff] }
  0xba   : > { %3919 = vmatprep.subr.bf16.mxu0 %v3918_v13  ;;  %3883 = vmatprep.subr.bf16.mxu1 %v5966_v1  ;;  %v585_v56 = vadd.f32 %v4816_v12, %v542_v48  ;;  %v545_v60 = vmul.f32 %v4811_v11, %v502_v53 }
  0xbb   : > { %v611_v10 = vmax.f32 %v575_v63, 0.0  ;;  %v612_v15 = vmax.f32 %v576_v3, 0.0 }
  0xbc   : > { %3463 = vmatmul.mubr.f32.gmra.mrb[4].mxu0 %v601_v14  ;;  %v536_v14 = vmul.f32 %v4811_v11, %v493_v5  ;;  %3885 = vmatpush1.bf16.msra.mxu1 %v3884_v7  ;;  %v621_v63 = vmax.f32 %v585_v56, 0.0  ;;  %v588_v4 = vadd.f32 %v4816_v12, %v545_v60  ;;  %v506_v7 = vld [vmem:[#allocation2 + $0x100] sm:$0xff] }
  0xbd   : > { %3465 = vmatprep.mubr.f32.mxu0 %v602_v19  ;;  %3921 = vmatpush3.bf16.msra.mxu0 %v3918_v13  ;;  %v577_v13 = vadd.f32 %v4816_v12, %v534_v0  ;;  %v496_v19 = vld [vmem:[#allocation2 + $0xb0] sm:$0xff]  ;;  %v587_v0 = vadd.f32 %v4816_v12, %v544_v57 }
  0xbe   : > { %3923 = vmatprep.subr.bf16.mxu0 %v3922_v28  ;;  %3886 = vmatprep.subr.bf16.mxu1 %v5966_v1  ;;  %v579_v25 = vadd.f32 %v4816_v12, %v536_v14 }
  0xbf   : > { %v613_v24 = vmax.f32 %v577_v13, 0.0  ;;  %v623_v8 = vmax.f32 %v587_v0, 0.0  ;;  %v624_v13 = vmax.f32 %v588_v4, 0.0 }
  0xc0   : > { %3466 = vmatmul.mubr.f32.gmra.mrb[6].mxu0 %v603_v29  ;;  %v539_v29 = vmul.f32 %v4811_v11, %v496_v19  ;;  %3888 = vmatpush1.bf16.msra.mxu1 %v3887_v21  ;;  %v615_v35 = vmax.f32 %v579_v25, 0.0  ;;  %v550_v19 = vmul.f32 %v4811_v11, %v507_v16 }
  0xc1   : > { %3468 = vmatprep.mubr.f32.mxu0 %v604_v32  ;;  %3925 = vmatpush3.bf16.msra.mxu0 %v3922_v28  ;;  %v580_v28 = vadd.f32 %v4816_v12, %v537_v17  ;;  %v3890_v32 = vpack.c.bf16 %v1160_v23, %v1159_v22 }
  0xc2   : > { %3889 = vmatprep.subr.bf16.mxu1 %v5966_v1  ;;  %v582_v39 = vadd.f32 %v4816_v12, %v539_v29 }
  0xc3   : > { %v616_v38 = vmax.f32 %v580_v28, 0.0  ;;  %v1166_v28 = vld [vmem:[#allocation8 + $0x248] sm:$0xff] }
  0xc4   : > { %3469 = vmatmul.mubr.f32.gmra.mrb[8].mxu0 %v605_v40  ;;  %v541_v40 = vmul.f32 %v4811_v11, %v498_v31  ;;  %3891 = vmatpush1.bf16.msra.mxu1 %v3890_v32  ;;  %v618_v49 = vmax.f32 %v582_v39, 0.0  ;;  %v1182_v31 = vld [vmem:[#allocation8 + $0x2c8] sm:$0xff]  ;;  %v1167_v32 = vld [vmem:[#allocation8 + $0x250] sm:$0xff]  ;;  %v1185_v39 = vld [vmem:[#allocation8 + $0x2e0] sm:$0xff] }
  0xc5   : > { %3471 = vmatprep.mubr.f32.mxu0 %v606_v43  ;;  %v3893_v43 = vpack.c.bf16 %v1162_v34, %v1161_v33  ;;  %3892 = vmatprep.subr.bf16.mxu1 %v5966_v1  ;;  %v1168_v33 = vld [vmem:[#allocation8 + $0x258] sm:$0xff]  ;;  %v1183_v34 = vld [vmem:[#allocation8 + $0x2d0] sm:$0xff] }
  0xc6   : > { %v584_v50 = vadd.f32 %v4816_v12, %v541_v40 }
  0xc8   : > { %3472 = vmatmul.mubr.f32.gmra.mrb[10].mxu0 %v607_v51  ;;  %v543_v51 = vmul.f32 %v4811_v11, %v500_v42  ;;  %3894 = vmatpush1.bf16.msra.mxu1 %v3893_v43  ;;  %v620_v58 = vmax.f32 %v584_v50, 0.0  ;;  %v3934_v42 = vpack.c.bf16 %v1186_v41, %v1185_v39  ;;  %v1171_v43 = vld [vmem:[#allocation8 + $0x270] sm:$0xff]  ;;  %v1125_v50 = vld [vmem:[#allocation8 + $0x108] sm:$0xff]  ;;  %v1131_v41 = vld [vmem:[#allocation8 + $0x138] sm:$0xff] }
  0xc9   : > { %3474 = vmatprep.mubr.f32.mxu0 %v608_v54  ;;  %v3896_v54 = vpack.c.bf16 %v1164_v45, %v1163_v44  ;;  %3895 = vmatprep.subr.bf16.mxu1 %v5966_v1  ;;  %v1172_v44 = vld [vmem:[#allocation8 + $0x278] sm:$0xff]  ;;  %v1187_v45 = vld [vmem:[#allocation8 + $0x2f0] sm:$0xff] }
  0xca   : > { %v586_v59 = vadd.f32 %v4816_v12, %v543_v51  ;;  %v3938_v48 = vpack.c.bf16 %v1188_v47, %v1187_v45 }
  0xcc   : > { %3475 = vmatmul.mubr.f32.gmra.mrb[12].mxu0 %v609_v62  ;;  %v504_v62 = vld [vmem:[#allocation2 + $0xf0] sm:$0xff]  ;;  %3897 = vmatpush1.bf16.msra.mxu1 %v3896_v54  ;;  %v622_v3 = vmax.f32 %v586_v59, 0.0  ;;  %v4909_v54 = vld [vmem:[%s5951_s4] ss:$0 sm:$0xff] }
  0xcd   : > { %3477 = vmatprep.mubr.f32.mxu0 %v610_v2  ;;  %3898 = vmatprep.subr.bf16.mxu1 %v5966_v1  ;;  %v546_v2 = vmul.f32 %v4811_v11, %v503_v61  ;;  %v547_v5 = vmul.f32 %v4811_v11, %v504_v62 }
  0xcf   : > { %v589_v9 = vadd.f32 %v4816_v12, %v546_v2  ;;  %v590_v14 = vadd.f32 %v4816_v12, %v547_v5 }
  0xd0   : > { %3478 = vmatmul.mubr.f32.gmra.mrb[14].mxu0 %v611_v10  ;;  %v548_v10 = vmul.f32 %v4811_v11, %v505_v6  ;;  %v1092_v6 = vld [vmem:[#allocation8] sm:$0xff] }
  0xd1   : > { %3480 = vmatprep.mubr.f32.mxu0 %v612_v15  ;;  %v549_v15 = vmul.f32 %v4811_v11, %v506_v7  ;;  %v625_v17 = vmax.f32 %v589_v9, 0.0  ;;  %v626_v21 = vmax.f32 %v590_v14, 0.0  ;;  %v3926_v11 = vpack.c.bf16 %v1182_v31, %v1181_v30  ;;  %v1093_v7 = vld [vmem:[#allocation8 + $0x8] sm:$0xff]  ;;  %v1126_v9 = vld [vmem:[#allocation8 + $0x110] sm:$0xff] }
  0xd2   : > { %v591_v18 = vadd.f32 %v4816_v12, %v548_v10  ;;  %v1127_v10 = vld [vmem:[#allocation8 + $0x118] sm:$0xff]  ;;  %v3943_v16 = vpack.c.bf16 %v1093_v7, %v1092_v6 }
  0xd3   : > { %v592_v22 = vadd.f32 %v4816_v12, %v549_v15  ;;  %3927 = vmatprep.subr.bf16.mxu0 %v3926_v11 }
  0xd4   : > { %3481 = vmatmul.mubr.f32.gmra.mrb[16].mxu0 %v613_v24  ;;  %v627_v23 = vmax.f32 %v591_v18, 0.0  ;;  %v593_v24 = vadd.f32 %v4816_v12, %v550_v19  ;;  %v3902_v12 = vpack.c.bf16 %v1168_v33, %v1167_v32  ;;  %v1096_v33 = vld [vmem:[#allocation8 + $0x20] sm:$0xff] }
  0xd5   : > { %3483 = vmatprep.mubr.f32.mxu0 %v614_v27  ;;  %v628_v25 = vmax.f32 %v592_v22, 0.0  ;;  %v1165_v27 = vld [vmem:[#allocation8 + $0x240] sm:$0xff]  ;;  %3929 = vmatpush3.bf16.msra.mxu0 %v3926_v11 }
  0xd6   : > { %v629_v26 = vmax.f32 %v593_v24, 0.0  ;;  %v3899_v29 = vpack.c.bf16 %v1166_v28, %v1165_v27  ;;  %v3994_v24 = vpack.c.bf16 %v1127_v10, %v1126_v9  ;;  %v1128_v27 = vld [vmem:[#allocation8 + $0x120] sm:$0xff]  ;;  %v1129_v28 = vld [vmem:[#allocation8 + $0x128] sm:$0xff] }
  0xd8   : > { %3484 = vmatmul.mubr.f32.gmra.mrb[18].mxu0 %v615_v35  ;;  %3900 = vmatpush1.bf16.msra.mxu1 %v3899_v29  ;;  %v1184_v35 = vld [vmem:[#allocation8 + $0x2d8] sm:$0xff] }
  0xd9   : > { %3486 = vmatprep.mubr.f32.mxu0 %v616_v38  ;;  %3901 = vmatprep.subr.bf16.mxu1 %v5966_v1  ;;  %v3930_v36 = vpack.c.bf16 %v1184_v35, %v1183_v34  ;;  %v1170_v38 = vld [vmem:[#allocation8 + $0x268] sm:$0xff] }
  0xda   : > { %v3905_v40 = vpack.c.bf16 %v1170_v38, %v1169_v37  ;;  %v1097_v37 = vld [vmem:[#allocation8 + $0x28] sm:$0xff]  ;;  %v3998_v38 = vpack.c.bf16 %v1129_v28, %v1128_v27 }
  0xdb   : > { %3931 = vmatprep.subr.bf16.mxu0 %v3930_v36  ;;  %v3949_v47 = vpack.c.bf16 %v1097_v37, %v1096_v33  ;;  %v1103_v33 = vld [vmem:[#allocation8 + $0x58] sm:$0xff]  ;;  %v1136_v37 = vld [vmem:[#allocation8 + $0x160] sm:$0xff] }
  0xdc   : > { %3487 = vmatmul.mubr.f32.gmra.mrb[20].mxu0 %v617_v46  ;;  %3903 = vmatpush1.bf16.msra.mxu1 %v3902_v12  ;;  %v3908_v46 = vpack.c.bf16 %v1172_v44, %v1171_v43 }
  0xdd   : > { %3489 = vmatprep.mubr.f32.mxu0 %v618_v49  ;;  %3904 = vmatprep.subr.bf16.mxu1 %v5966_v1  ;;  %v1124_v49 = vld [vmem:[#allocation8 + $0x100] sm:$0xff] }
  0xde   : > { %3933 = vmatpush3.bf16.msra.mxu0 %v3930_v36  ;;  %v3990_v51 = vpack.c.bf16 %v1125_v50, %v1124_v49 }
  0xdf   : > { %3935 = vmatprep.subr.bf16.mxu0 %v3934_v42 }
  0xe0   : > { %3490 = vmatmul.mubr.f32.gmra.mrb[22].mxu0 %v619_v55  ;;  %3906 = vmatpush1.bf16.msra.mxu1 %v3905_v40  ;;  %v1130_v40 = vld [vmem:[#allocation8 + $0x130] sm:$0xff] }
  0xe1   : > { %3492 = vmatprep.mubr.f32.mxu0 %v620_v58  ;;  %3907 = vmatprep.subr.bf16.mxu1 %v5966_v1 }
  0xe2   : > { %3937 = vmatpush3.bf16.msra.mxu0 %v3934_v42 }
  0xe3   : > { %3939 = vmatprep.subr.bf16.mxu0 %v3938_v48 }
  0xe4   : > { %3493 = vmatmul.mubr.f32.gmra.mrb[24].mxu0 %v621_v63  ;;  %3909 = vmatpush1.bf16.msra.mxu1 %v3908_v46 }
  0xe5   : > { %3495 = vmatprep.mubr.f32.mxu0 %v622_v3  ;;  %3991 = vmatprep.subr.bf16.mxu1 %v3990_v51 }
  0xe6   : > { %3941 = vmatpush3.bf16.msra.mxu0 %v3938_v48 }
  0xe7   : > { %3942 = vmatprep.subr.bf16.mxu0 %v5966_v1 }
  0xe8   : > { %3496 = vmatmul.mubr.f32.gmra.mrb[26].mxu0 %v623_v8 }
  0xe9   : > { %3498 = vmatprep.mubr.f32.mxu0 %v624_v13 }
  0xec   : > { %3499 = vmatmul.mubr.f32.gmra.mrb[28].mxu0 %v625_v17  ;;  %v1094_v17 = vld [vmem:[#allocation8 + $0x10] sm:$0xff] }
  0xed   : > { %3501 = vmatprep.mubr.f32.mxu0 %v626_v21 }
  0xf0   : > { %3502 = vmatmul.mubr.f32.gmra.mrb[30].mxu0 %v627_v23  ;;  %v1095_v23 = vld [vmem:[#allocation8 + $0x18] sm:$0xff] }
  0xf1   : > { %3504 = vmatprep.mubr.f32.mxu0 %v628_v25  ;;  %v3946_v32 = vpack.c.bf16 %v1095_v23, %v1094_v17 }
  0xf4   : > { %3505 = vmatmul.mubr.f32.gmra.mrb[32].mxu0 %v629_v26 }
  0xf5   : > { %3507 = vmatprep.mubr.f32.mxu0 %v4820_v20 }
  0xf8   : > { %3508 = vmatmul.mubr.f32.gmra.mrb[34].mxu0 %v4820_v20 }
 0x187   : > { %v3458_v52 = vpop.f32.mrb[0].mxu0 }
 0x188   : > { %v721_v53 = vpop.f32.mrb[1].mxu0  ;;  %v1099_v52 = vld [vmem:[#allocation8 + $0x38] sm:$0xff] }
 0x189   : > { %v4002_v53 = vpack.c.bf16 %v1131_v41, %v1130_v40 }
 0x18b   : > { %v3461_v55 = vpop.f32.mrb[2].mxu0 }
 0x18c   : > { %v737_v56 = vadd.f32 %v3461_v55, %v4909_v54  ;;  %v731_v20 = vpop.f32.mrb[3].mxu0 }
 0x18d   : > { %v732_v57 = vadd.f32 %v4909_v54, %v731_v20  ;;  %v1133_v20 = vld [vmem:[#allocation8 + $0x148] sm:$0xff] }
 0x18e   : > { %v4913_v58 = vmax.f32 %v737_v56, 0.0  ;;  %v1132_v56 = vld [vmem:[#allocation8 + $0x140] sm:$0xff] }
 0x18f   : > { %v4915_v59 = vmax.f32 %v732_v57, 0.0  ;;  %v3464_v60 = vpop.f32.mrb[4].mxu0  ;;  %v4006_v9 = vpack.c.bf16 %v1133_v20, %v1132_v56 }
 0x190   : > { %939 = vst [vmem:[#allocation3 + $0x30] sm:$0xff] %v4913_v58  ;;  %v747_v61 = vadd.f32 %v3464_v60, %v4909_v54  ;;  %v741_v62 = vpop.f32.mrb[5].mxu0 }
 0x191   : > { %938 = vst [vmem:[#allocation3 + $0x28] sm:$0xff] %v4915_v59  ;;  %v742_v63 = vadd.f32 %v4909_v54, %v741_v62  ;;  %1253 = vmatprep.mubr.f32.mxu1 %v4915_v59 }
 0x192   : > { %v4922_v0 = vmax.f32 %v747_v61, 0.0 }
 0x193   : > { %v4924_v2 = vmax.f32 %v742_v63, 0.0  ;;  %v3467_v3 = vpop.f32.mrb[6].mxu0 }
 0x194   : > { %941 = vst [vmem:[#allocation3 + $0x50] sm:$0xff] %v4922_v0  ;;  %v757_v4 = vadd.f32 %v3467_v3, %v4909_v54  ;;  %v751_v5 = vpop.f32.mrb[7].mxu0  ;;  %v1100_v3 = vld [vmem:[#allocation8 + $0x40] sm:$0xff] }
 0x195   : > { %940 = vst [vmem:[#allocation3 + $0x48] sm:$0xff] %v4924_v2  ;;  %v752_v8 = vadd.f32 %v4909_v54, %v751_v5 }
 0x196   : > { %v4930_v13 = vmax.f32 %v757_v4, 0.0 }
 0x197   : > { %v4932_v14 = vmax.f32 %v752_v8, 0.0  ;;  %v3470_v15 = vpop.f32.mrb[8].mxu0  ;;  %v4944_v26 = vld [vmem:[#allocation3 + $0x31] sm:$0xff]  ;;  %v1101_v8 = vld [vmem:[#allocation8 + $0x48] sm:$0xff] }
 0x198   : > { %943 = vst [vmem:[#allocation3 + $0x70] sm:$0xff] %v4930_v13  ;;  %v767_v18 = vadd.f32 %v3470_v15, %v4909_v54  ;;  %v761_v19 = vpop.f32.mrb[9].mxu0  ;;  %v4936_v21 = vld [vmem:[#allocation3 + $0x29] sm:$0xff] }
 0x199   : > { %v4938_v22 = vld [vmem:[#allocation3 + $0x27] sm:$0xff]  ;;  %942 = vst [vmem:[#allocation3 + $0x68] sm:$0xff] %v4932_v14  ;;  %v762_v25 = vadd.f32 %v4909_v54, %v761_v19  ;;  %3542 = vmatprep.mubr.f32.mxu0 %v4936_v21  ;;  %v4958_v36 = vld [vmem:[#allocation3 + $0x2f] sm:$0xff] }
 0x19a   : > { %1254 = vmatmul.mubr.f32.vlgmr.msra.gmra.mrb[0].mxu1 %v4938_v22  ;;  %v4946_v29 = vmax.f32 %v767_v18, 0.0  ;;  %3543 = vmatmul.mubr.f32.vlgmr.msra.gmra.mrb[36].mxu0 %v4944_v26  ;;  %v1134_v15 = vld [vmem:[#allocation8 + $0x150] sm:$0xff] }
 0x19b   : > { %3993 = vmatpush3.bf16.msra.mxu1 %v3990_v51  ;;  %v4949_v30 = vmax.f32 %v762_v25, 0.0  ;;  %v3473_v31 = vpop.f32.mrb[10].mxu0  ;;  %1258 = vmatprep.mubr.f32.mxu1 %v4913_v58  ;;  %v4952_v11 = vld [vmem:[#allocation3 + $0x51] sm:$0xff]  ;;  %v3955_v25 = vpack.c.bf16 %v1101_v8, %v1100_v3 }
 0x19c   : > { %3944 = vmatpush1.bf16.msra.mxu0 %v3943_v16  ;;  %6032 = vst [vmem:[#allocation30_spill] sm:$0xff] %v4952_v11  ;;  %945 = vst [vmem:[#allocation3 + $0x90] sm:$0xff] %v4946_v29  ;;  %v777_v34 = vadd.f32 %v3473_v31, %v4909_v54  ;;  %v771_v12 = vpop.f32.mrb[11].mxu0  ;;  %v4956_v35 = vld [vmem:[#allocation3 + $0x49] sm:$0xff]  ;;  %3995 = vmatprep.subr.bf16.mxu1 %v3994_v24  ;;  %v1135_v16 = vld [vmem:[#allocation8 + $0x158] sm:$0xff] }
 0x19d   : > { %3945 = vmatprep.subr.bf16.mxu0 %v5966_v1  ;;  %944 = vst [vmem:[#allocation3 + $0x88] sm:$0xff] %v4949_v30  ;;  %v772_v39 = vadd.f32 %v4909_v54, %v771_v12  ;;  %3545 = vmatprep.mubr.f32.mxu0 %v4956_v35  ;;  %v4969_v43 = vld [vmem:[#allocation3 + $0x47] sm:$0xff]  ;;  %v1098_v51 = vld [vmem:[#allocation8 + $0x30] sm:$0xff] }
 0x19e   : > { %1259 = vmatmul.mubr.f32.gmra.mrb[2].mxu1 %v4958_v36  ;;  %v4965_v42 = vmax.f32 %v777_v34, 0.0  ;;  %3546 = vmatmul.mubr.f32.gmra.mrb[38].mxu0 %v4952_v11  ;;  %v3952_v63 = vpack.c.bf16 %v1099_v52, %v1098_v51  ;;  %v4996_v7 = vld [vmem:[#allocation3 + $0x4f] sm:$0xff]  ;;  %v4010_v34 = vpack.c.bf16 %v1135_v16, %v1134_v15  ;;  %v2125_v11 = vld [vmem:[#allocation8 + $0x418] sm:$0xff] }
 0x19f   : > { %1263 = vmatprep.mubr.f32.mxu1 %v4924_v2  ;;  %v4971_v44 = vmax.f32 %v772_v39, 0.0  ;;  %v3476_v45 = vpop.f32.mrb[12].mxu0  ;;  %v4973_v46 = vld [vmem:[#allocation3 + $0x71] sm:$0xff]  ;;  %3997 = vmatpush3.bf16.msra.mxu1 %v3994_v24 }
 0x1a0   : > { %3947 = vmatpush1.bf16.msra.mxu0 %v3946_v32  ;;  %6033 = vst [vmem:[#allocation31_spill] sm:$0xff] %v4973_v46  ;;  %947 = vst [vmem:[#allocation3 + $0xb0] sm:$0xff] %v4965_v42  ;;  %v787_v48 = vadd.f32 %v3476_v45, %v4909_v54  ;;  %v781_v49 = vpop.f32.mrb[13].mxu0  ;;  %v4977_v50 = vld [vmem:[#allocation3 + $0x69] sm:$0xff]  ;;  %3999 = vmatprep.subr.bf16.mxu1 %v3998_v38 }
 0x1a1   : > { %6034 = vst [vmem:[#allocation32_spill] sm:$0xff] %v4977_v50  ;;  %3948 = vmatprep.subr.bf16.mxu0 %v5966_v1  ;;  %946 = vst [vmem:[#allocation3 + $0xa8] sm:$0xff] %v4971_v44  ;;  %v782_v55 = vadd.f32 %v4909_v54, %v781_v49  ;;  %3548 = vmatprep.mubr.f32.mxu0 %v4977_v50  ;;  %v5007_v18 = vld [vmem:[#allocation3 + $0x67] sm:$0xff]  ;;  %v1102_v32 = vld [vmem:[#allocation8 + $0x50] sm:$0xff] }
 0x1a2   : > { %1264 = vmatmul.mubr.f32.gmra.mrb[4].mxu1 %v4969_v43  ;;  %v4984_v57 = vmax.f32 %v787_v48, 0.0  ;;  %3549 = vmatmul.mubr.f32.gmra.mrb[40].mxu0 %v4973_v46  ;;  %v1104_v48 = vld [vmem:[#allocation8 + $0x60] sm:$0xff] }
 0x1a3   : > { %1268 = vmatprep.mubr.f32.mxu1 %v4922_v0  ;;  %v4988_v60 = vmax.f32 %v782_v55, 0.0  ;;  %v3479_v61 = vpop.f32.mrb[14].mxu0  ;;  %v4990_v62 = vld [vmem:[#allocation3 + $0x91] sm:$0xff]  ;;  %4001 = vmatpush3.bf16.msra.mxu1 %v3998_v38  ;;  %v1137_v38 = vld [vmem:[#allocation8 + $0x168] sm:$0xff] }
 0x1a4   : > { %3950 = vmatpush1.bf16.msra.mxu0 %v3949_v47  ;;  %6035 = vst [vmem:[#allocation33_spill] sm:$0xff] %v4990_v62  ;;  %949 = vst [vmem:[#allocation3 + $0xd0] sm:$0xff] %v4984_v57  ;;  %v797_v4 = vadd.f32 %v3479_v61, %v4909_v54  ;;  %v791_v5 = vpop.f32.mrb[15].mxu0  ;;  %v4994_v6 = vld [vmem:[#allocation3 + $0x89] sm:$0xff]  ;;  %4003 = vmatprep.subr.bf16.mxu1 %v4002_v53  ;;  %v3958_v47 = vpack.c.bf16 %v1103_v33, %v1102_v32 }
 0x1a5   : > { %6036 = vst [vmem:[#allocation34_spill] sm:$0xff] %v4994_v6  ;;  %3951 = vmatprep.subr.bf16.mxu0 %v5966_v1  ;;  %948 = vst [vmem:[#allocation3 + $0xc8] sm:$0xff] %v4988_v60  ;;  %v792_v10 = vadd.f32 %v4909_v54, %v791_v5  ;;  %3551 = vmatprep.mubr.f32.mxu0 %v4994_v6  ;;  %v1105_v55 = vld [vmem:[#allocation8 + $0x68] sm:$0xff]  ;;  %v4014_v56 = vpack.c.bf16 %v1137_v38, %v1136_v37  ;;  %v1138_v61 = vld [vmem:[#allocation8 + $0x170] sm:$0xff] }
 0x1a6   : > { %1269 = vmatmul.mubr.f32.gmra.mrb[6].mxu1 %v4996_v7  ;;  %v5003_v17 = vmax.f32 %v797_v4, 0.0  ;;  %3552 = vmatmul.mubr.f32.gmra.mrb[42].mxu0 %v4990_v62  ;;  %v5045_v4 = vld [vmem:[#allocation3 + $0x87] sm:$0xff]  ;;  %v1119_v62 = vld [vmem:[#allocation8 + $0xd8] sm:$0xff] }
 0x1a7   : > { %1273 = vmatprep.mubr.f32.mxu1 %v4932_v14  ;;  %v5009_v19 = vmax.f32 %v792_v10, 0.0  ;;  %v3482_v23 = vpop.f32.mrb[16].mxu0  ;;  %v5011_v24 = vld [vmem:[#allocation3 + $0xb1] sm:$0xff]  ;;  %4005 = vmatpush3.bf16.msra.mxu1 %v4002_v53  ;;  %v3961_v10 = vpack.c.bf16 %v1105_v55, %v1104_v48  ;;  %v1109_v55 = vld [vmem:[#allocation8 + $0x88] sm:$0xff]  ;;  %v1120_v6 = vld [vmem:[#allocation8 + $0xe0] sm:$0xff] }
 0x1a8   : > { %3953 = vmatpush1.bf16.msra.mxu0 %v3952_v63  ;;  %6037 = vst [vmem:[#allocation35_spill] sm:$0xff] %v5011_v24  ;;  %951 = vst [vmem:[#allocation3 + $0xf0] sm:$0xff] %v5003_v17  ;;  %v807_v27 = vadd.f32 %v3482_v23, %v4909_v54  ;;  %v801_v28 = vpop.f32.mrb[17].mxu0  ;;  %v5015_v31 = vld [vmem:[#allocation3 + $0xa9] sm:$0xff]  ;;  %4007 = vmatprep.subr.bf16.mxu1 %v4006_v9  ;;  %v1139_v63 = vld [vmem:[#allocation8 + $0x178] sm:$0xff] }
 0x1a9   : > { %6038 = vst [vmem:[#allocation36_spill] sm:$0xff] %v5015_v31  ;;  %3954 = vmatprep.subr.bf16.mxu0 %v5966_v1  ;;  %950 = vst [vmem:[#allocation3 + $0xe8] sm:$0xff] %v5009_v19  ;;  %v802_v12 = vadd.f32 %v4909_v54, %v801_v28  ;;  %3554 = vmatprep.mubr.f32.mxu0 %v5015_v31  ;;  %v5034_v53 = vld [vmem:[#allocation3 + $0x6f] sm:$0xff]  ;;  %v4018_v28 = vpack.c.bf16 %v1139_v63, %v1138_v61  ;;  %v5083_v61 = vld [vmem:[#allocation3 + $0xa7] sm:$0xff] }
 0x1aa   : > { %1274 = vmatmul.mubr.f32.gmra.mrb[8].mxu1 %v5007_v18  ;;  %v5022_v39 = vmax.f32 %v807_v27, 0.0  ;;  %3555 = vmatmul.mubr.f32.gmra.mrb[44].mxu0 %v5011_v24  ;;  %v1107_v27 = vld [vmem:[#allocation8 + $0x78] sm:$0xff] }
 0x1ab   : > { %1278 = vmatprep.mubr.f32.mxu1 %v4930_v13  ;;  %v5026_v40 = vmax.f32 %v802_v12, 0.0  ;;  %v3485_v41 = vpop.f32.mrb[18].mxu0  ;;  %v5028_v45 = vld [vmem:[#allocation3 + $0xd1] sm:$0xff]  ;;  %4009 = vmatpush3.bf16.msra.mxu1 %v4006_v9 }
 0x1ac   : > { %3956 = vmatpush1.bf16.msra.mxu0 %v3955_v25  ;;  %6039 = vst [vmem:[#allocation37_spill] sm:$0xff] %v5028_v45  ;;  %953 = vst [vmem:[#allocation3 + $0x110] sm:$0xff] %v5022_v39  ;;  %v817_v49 = vadd.f32 %v3485_v41, %v4909_v54  ;;  %v811_v51 = vpop.f32.mrb[19].mxu0  ;;  %v5032_v52 = vld [vmem:[#allocation3 + $0xc9] sm:$0xff]  ;;  %4011 = vmatprep.subr.bf16.mxu1 %v4010_v34  ;;  %v1108_v41 = vld [vmem:[#allocation8 + $0x80] sm:$0xff] }
 0x1ad   : > { %6040 = vst [vmem:[#allocation38_spill] sm:$0xff] %v5032_v52  ;;  %3957 = vmatprep.subr.bf16.mxu0 %v5966_v1  ;;  %952 = vst [vmem:[#allocation3 + $0x108] sm:$0xff] %v5026_v40  ;;  %v812_v20 = vadd.f32 %v4909_v54, %v811_v51  ;;  %3557 = vmatprep.mubr.f32.mxu0 %v5032_v52  ;;  %v1106_v25 = vld [vmem:[#allocation8 + $0x70] sm:$0xff] }
 0x1ae   : > { %1279 = vmatmul.mubr.f32.gmra.mrb[10].mxu1 %v5034_v53  ;;  %v5041_v3 = vmax.f32 %v817_v49, 0.0  ;;  %3558 = vmatmul.mubr.f32.gmra.mrb[46].mxu0 %v5028_v45  ;;  %v3964_v38 = vpack.c.bf16 %v1107_v27, %v1106_v25  ;;  %v5072_v51 = vld [vmem:[#allocation3 + $0x8f] sm:$0xff]  ;;  %v1116_v45 = vld [vmem:[#allocation8 + $0xc0] sm:$0xff] }
 0x1af   : > { %1283 = vmatprep.mubr.f32.mxu1 %v4949_v30  ;;  %v5047_v5 = vmax.f32 %v812_v20, 0.0  ;;  %v3488_v8 = vpop.f32.mrb[20].mxu0  ;;  %v5049_v9 = vld [vmem:[#allocation3 + $0xf1] sm:$0xff]  ;;  %4013 = vmatpush3.bf16.msra.mxu1 %v4010_v34 }
 0x1b0   : > { %3959 = vmatpush1.bf16.msra.mxu0 %v3958_v47  ;;  %6041 = vst [vmem:[#allocation39_spill] sm:$0xff] %v5049_v9  ;;  %955 = vst [vmem:[#allocation3 + $0x130] sm:$0xff] %v5041_v3  ;;  %v827_v15 = vadd.f32 %v3488_v8, %v4909_v54  ;;  %v821_v16 = vpop.f32.mrb[21].mxu0  ;;  %v5053_v23 = vld [vmem:[#allocation3 + $0xe9] sm:$0xff]  ;;  %4015 = vmatprep.subr.bf16.mxu1 %v4014_v56 }
 0x1b1   : > { %6042 = vst [vmem:[#allocation40_spill] sm:$0xff] %v5053_v23  ;;  %3960 = vmatprep.subr.bf16.mxu0 %v5966_v1  ;;  %954 = vst [vmem:[#allocation3 + $0x128] sm:$0xff] %v5047_v5  ;;  %v822_v32 = vadd.f32 %v4909_v54, %v821_v16  ;;  %3560 = vmatprep.mubr.f32.mxu0 %v5053_v23 }
 0x1b2   : > { %1284 = vmatmul.mubr.f32.gmra.mrb[12].mxu1 %v5045_v4  ;;  %v5060_v33 = vmax.f32 %v827_v15, 0.0  ;;  %3561 = vmatmul.mubr.f32.gmra.mrb[48].mxu0 %v5049_v9  ;;  %v3967_v15 = vpack.c.bf16 %v1109_v55, %v1108_v41  ;;  %v1115_v9 = vld [vmem:[#allocation8 + $0xb8] sm:$0xff] }
 0x1b3   : > { %1288 = vmatprep.mubr.f32.mxu1 %v4946_v29  ;;  %v5064_v34 = vmax.f32 %v822_v32, 0.0  ;;  %v3491_v12 = vpop.f32.mrb[22].mxu0  ;;  %v5066_v37 = vld [vmem:[#allocation3 + $0x111] sm:$0xff]  ;;  %4017 = vmatpush3.bf16.msra.mxu1 %v4014_v56 }
 0x1b4   : > { %3962 = vmatpush1.bf16.msra.mxu0 %v3961_v10  ;;  %6043 = vst [vmem:[#allocation41_spill] sm:$0xff] %v5066_v37  ;;  %957 = vst [vmem:[#allocation3 + $0x150] sm:$0xff] %v5060_v33  ;;  %v837_v47 = vadd.f32 %v3491_v12, %v4909_v54  ;;  %v831_v48 = vpop.f32.mrb[23].mxu0  ;;  %v5070_v49 = vld [vmem:[#allocation3 + $0x109] sm:$0xff]  ;;  %4019 = vmatprep.subr.bf16.mxu1 %v4018_v28  ;;  %v1111_v12 = vld [vmem:[#allocation8 + $0x98] sm:$0xff] }
 0x1b5   : > { %6044 = vst [vmem:[#allocation42_spill] sm:$0xff] %v5070_v49  ;;  %3963 = vmatprep.subr.bf16.mxu0 %v5966_v1  ;;  %956 = vst [vmem:[#allocation3 + $0x148] sm:$0xff] %v5064_v34  ;;  %v832_v20 = vadd.f32 %v4909_v54, %v831_v48  ;;  %3563 = vmatprep.mubr.f32.mxu0 %v5070_v49  ;;  %v1110_v32 = vld [vmem:[#allocation8 + $0x90] sm:$0xff] }
 0x1b6   : > { %1289 = vmatmul.mubr.f32.gmra.mrb[14].mxu1 %v5072_v51  ;;  %v5079_v56 = vmax.f32 %v837_v47, 0.0  ;;  %3564 = vmatmul.mubr.f32.gmra.mrb[50].mxu0 %v5066_v37  ;;  %v3970_v55 = vpack.c.bf16 %v1111_v12, %v1110_v32  ;;  %v5122_v12 = vld [vmem:[#allocation3 + $0xc7] sm:$0xff] }
 0x1b7   : > { %1293 = vmatprep.mubr.f32.mxu1 %v4971_v44  ;;  %v5085_v63 = vmax.f32 %v832_v20, 0.0  ;;  %v3494_v8 = vpop.f32.mrb[24].mxu0  ;;  %v5087_v10 = vld [vmem:[#allocation3 + $0x131] sm:$0xff]  ;;  %4021 = vmatpush3.bf16.msra.mxu1 %v4018_v28  ;;  %v1112_v20 = vld [vmem:[#allocation8 + $0xa0] sm:$0xff] }
 0x1b8   : > { %3965 = vmatpush1.bf16.msra.mxu0 %v3964_v38  ;;  %6045 = vst [vmem:[#allocation43_spill] sm:$0xff] %v5087_v10  ;;  %959 = vst [vmem:[#allocation3 + $0x170] sm:$0xff] %v5079_v56  ;;  %v847_v16 = vadd.f32 %v3494_v8, %v4909_v54  ;;  %v841_v25 = vpop.f32.mrb[25].mxu0  ;;  %v5091_v27 = vld [vmem:[#allocation3 + $0x129] sm:$0xff]  ;;  %4022 = vmatprep.subr.bf16.mxu1 %v5966_v1 }
 0x1b9   : > { %6046 = vst [vmem:[#allocation44_spill] sm:$0xff] %v5091_v27  ;;  %3966 = vmatprep.subr.bf16.mxu0 %v5966_v1  ;;  %958 = vst [vmem:[#allocation3 + $0x168] sm:$0xff] %v5085_v63  ;;  %v842_v38 = vadd.f32 %v4909_v54, %v841_v25  ;;  %3566 = vmatprep.mubr.f32.mxu0 %v5091_v27  ;;  %v1113_v27 = vld [vmem:[#allocation8 + $0xa8] sm:$0xff] }
 0x1ba   : > { %1294 = vmatmul.mubr.f32.gmra.mrb[16].mxu1 %v5083_v61  ;;  %v5099_v28 = vmax.f32 %v847_v16, 0.0  ;;  %3567 = vmatmul.mubr.f32.gmra.mrb[52].mxu0 %v5087_v10  ;;  %v5111_v16 = vld [vmem:[#allocation3 + $0xaf] sm:$0xff]  ;;  %v6049_v10 = vmov 0.0|0.0   ;;  %v3973_v49 = vpack.c.bf16 %v1113_v27, %v1112_v20 }
 0x1bb   : > { %1298 = vmatprep.mubr.f32.mxu1 %v4965_v42  ;;  %v5103_v41 = vmax.f32 %v842_v38, 0.0  ;;  %v3497_v47 = vpop.f32.mrb[26].mxu0  ;;  %v5105_v48 = vld [vmem:[#allocation3 + $0x151] sm:$0xff] }
 0x1bc   : > { %3968 = vmatpush1.bf16.msra.mxu0 %v3967_v15  ;;  %6047 = vst [vmem:[#allocation45_spill] sm:$0xff] %v5105_v48  ;;  %961 = vst [vmem:[#allocation3 + $0x190] sm:$0xff] %v5099_v28  ;;  %v857_v8 = vadd.f32 %v3497_v47, %v4909_v54  ;;  %v851_v25 = vpop.f32.mrb[27].mxu0  ;;  %v5109_v1 = vld [vmem:[#allocation3 + $0x149] sm:$0xff] }
 0x1bd   : > { %6048 = vst [vmem:[#allocation46_spill] sm:$0xff] %v5109_v1  ;;  %3969 = vmatprep.subr.bf16.mxu0 %v6049_v10  ;;  %960 = vst [vmem:[#allocation3 + $0x188] sm:$0xff] %v5103_v41  ;;  %v852_v15 = vadd.f32 %v4909_v54, %v851_v25  ;;  %3569 = vmatprep.mubr.f32.mxu0 %v5109_v1 }
 0x1be   : > { %1299 = vmatmul.mubr.f32.gmra.mrb[18].mxu1 %v5111_v16  ;;  %v5118_v32 = vmax.f32 %v857_v8, 0.0  ;;  %3570 = vmatmul.mubr.f32.gmra.mrb[54].mxu0 %v5105_v48  ;;  %v1114_v48 = vld [vmem:[#allocation8 + $0xb0] sm:$0xff] }
 0x1bf   : > { %1303 = vmatprep.mubr.f32.mxu1 %v4988_v60  ;;  %v5124_v38 = vmax.f32 %v852_v15, 0.0  ;;  %v3500_v47 = vpop.f32.mrb[28].mxu0  ;;  %v5126_v37 = vld [vmem:[#allocation3 + $0x171] sm:$0xff]  ;;  %v3976_v23 = vpack.c.bf16 %v1115_v9, %v1114_v48  ;;  %v5160_v48 = vld [vmem:[#allocation3 + $0xe7] sm:$0xff] }
 0x1c0   : > { %3971 = vmatpush1.bf16.msra.mxu0 %v3970_v55  ;;  %6050 = vst [vmem:[#allocation47_spill] sm:$0xff] %v5126_v37  ;;  %963 = vst [vmem:[#allocation3 + $0x1b0] sm:$0xff] %v5118_v32  ;;  %v867_v25 = vadd.f32 %v3500_v47, %v4909_v54  ;;  %v861_v1 = vpop.f32.mrb[29].mxu0  ;;  %v5130_v8 = vld [vmem:[#allocation3 + $0x169] sm:$0xff] }
 0x1c1   : > { %6051 = vst [vmem:[#allocation48_spill] sm:$0xff] %v5130_v8  ;;  %3972 = vmatprep.subr.bf16.mxu0 %v6049_v10  ;;  %962 = vst [vmem:[#allocation3 + $0x1a8] sm:$0xff] %v5124_v38  ;;  %v862_v15 = vadd.f32 %v4909_v54, %v861_v1  ;;  %3572 = vmatprep.mubr.f32.mxu0 %v5130_v8 }
 0x1c2   : > { %1304 = vmatmul.mubr.f32.gmra.mrb[20].mxu1 %v5122_v12  ;;  %v5137_v27 = vmax.f32 %v867_v25, 0.0  ;;  %3573 = vmatmul.mubr.f32.gmra.mrb[56].mxu0 %v5126_v37  ;;  %v5149_v25 = vld [vmem:[#allocation3 + $0xcf] sm:$0xff] }
 0x1c3   : > { %1308 = vmatprep.mubr.f32.mxu1 %v4984_v57  ;;  %v5141_v55 = vmax.f32 %v862_v15, 0.0  ;;  %v3503_v20 = vpop.f32.mrb[30].mxu0  ;;  %v5143_v47 = vld [vmem:[#allocation3 + $0x191] sm:$0xff]  ;;  %v1117_v37 = vld [vmem:[#allocation8 + $0xc8] sm:$0xff] }
 0x1c4   : > { %3974 = vmatpush1.bf16.msra.mxu0 %v3973_v49  ;;  %6052 = vst [vmem:[#allocation49_spill] sm:$0xff] %v5143_v47  ;;  %965 = vst [vmem:[#allocation3 + $0x1d0] sm:$0xff] %v5137_v27  ;;  %v877_v1 = vadd.f32 %v3503_v20, %v4909_v54  ;;  %v871_v8 = vpop.f32.mrb[31].mxu0  ;;  %v5147_v52 = vld [vmem:[#allocation3 + $0x189] sm:$0xff]  ;;  %v3979_v31 = vpack.c.bf16 %v1117_v37, %v1116_v45 }
 0x1c5   : > { %6053 = vst [vmem:[#allocation50_spill] sm:$0xff] %v5147_v52  ;;  %3975 = vmatprep.subr.bf16.mxu0 %v6049_v10  ;;  %964 = vst [vmem:[#allocation3 + $0x1c8] sm:$0xff] %v5141_v55  ;;  %v872_v49 = vadd.f32 %v4909_v54, %v871_v8  ;;  %3575 = vmatprep.mubr.f32.mxu0 %v5147_v52 }
 0x1c6   : > { %1309 = vmatmul.mubr.f32.gmra.mrb[22].mxu1 %v5149_v25  ;;  %v5156_v9 = vmax.f32 %v877_v1, 0.0  ;;  %3576 = vmatmul.mubr.f32.gmra.mrb[58].mxu0 %v5143_v47  ;;  %v1118_v47 = vld [vmem:[#allocation8 + $0xd0] sm:$0xff] }
 0x1c7   : > { %1313 = vmatprep.mubr.f32.mxu1 %v5009_v19  ;;  %v5162_v15 = vmax.f32 %v872_v49, 0.0  ;;  %v3506_v20 = vpop.f32.mrb[32].mxu0  ;;  %v5164_v24 = vld [vmem:[#allocation3 + $0x1b1] sm:$0xff] }
 0x1c8   : > { %3977 = vmatpush1.bf16.msra.mxu0 %v3976_v23  ;;  %6054 = vst [vmem:[#allocation51_spill] sm:$0xff] %v5164_v24  ;;  %967 = vst [vmem:[#allocation3 + $0x1f0] sm:$0xff] %v5156_v9  ;;  %v5168_v8 = vadd.f32 %v3506_v20, %v4909_v54  ;;  %v881_v1 = vpop.f32.mrb[33].mxu0  ;;  %v5170_v52 = vld [vmem:[#allocation3 + $0x1a9] sm:$0xff]  ;;  %v3982_v20 = vpack.c.bf16 %v1119_v62, %v1118_v47 }
 0x1c9   : > { %6055 = vst [vmem:[#allocation52_spill] sm:$0xff] %v5170_v52  ;;  %3978 = vmatprep.subr.bf16.mxu0 %v6049_v10  ;;  %966 = vst [vmem:[#allocation3 + $0x1e8] sm:$0xff] %v5162_v15  ;;  %v5175_v49 = vadd.f32 %v4909_v54, %v881_v1  ;;  %3578 = vmatprep.mubr.f32.mxu0 %v5170_v52  ;;  %v5189_v1 = vld [vmem:[#allocation3 + $0xef] sm:$0xff]  ;;  %v5198_v62 = vld [vmem:[#allocation3 + $0x107] sm:$0xff] }
 0x1ca   : > { %1314 = vmatmul.mubr.f32.gmra.mrb[24].mxu1 %v5160_v48  ;;  %v6002_v45 = vmax.f32 %v5168_v8, 0.0  ;;  %3579 = vmatmul.mubr.f32.gmra.mrb[60].mxu0 %v5164_v24  ;;  %v1121_v52 = vld [vmem:[#allocation8 + $0xe8] sm:$0xff]  ;;  %v1122_v24 = vld [vmem:[#allocation8 + $0xf0] sm:$0xff] }
 0x1cb   : > { %1318 = vmatprep.mubr.f32.mxu1 %v5003_v17  ;;  %v6004_v23 = vmax.f32 %v5175_v49, 0.0  ;;  %v5183_v37 = vld [vmem:[#allocation3 + $0x1d1] sm:$0xff]  ;;  %v3985_v47 = vpack.c.bf16 %v1121_v52, %v1120_v6 }
 0x1cc   : > { %3980 = vmatpush1.bf16.msra.mxu0 %v3979_v31  ;;  %6056 = vst [vmem:[#allocation53_spill] sm:$0xff] %v5183_v37  ;;  %969 = vst [vmem:[#allocation3 + $0x210] sm:$0xff] %v6002_v45  ;;  %v5187_v54 = vld [vmem:[#allocation3 + $0x1c9] sm:$0xff] }
 0x1cd   : > { %6057 = vst [vmem:[#allocation54_spill] sm:$0xff] %v5187_v54  ;;  %3981 = vmatprep.subr.bf16.mxu0 %v6049_v10  ;;  %968 = vst [vmem:[#allocation3 + $0x208] sm:$0xff] %v6004_v23  ;;  %3581 = vmatprep.mubr.f32.mxu0 %v5187_v54  ;;  %v1123_v23 = vld [vmem:[#allocation8 + $0xf8] sm:$0xff]  ;;  %v2122_v54 = vld [vmem:[#allocation8 + $0x400] sm:$0xff] }
 0x1ce   : > { %1319 = vmatmul.mubr.f32.gmra.mrb[26].mxu1 %v5189_v1  ;;  %3582 = vmatmul.mubr.f32.gmra.mrb[62].mxu0 %v5183_v37  ;;  %v2123_v37 = vld [vmem:[#allocation8 + $0x408] sm:$0xff]  ;;  %v3988_v46 = vpack.c.bf16 %v1123_v23, %v1122_v24 }
 0x1cf   : > { %1323 = vmatprep.mubr.f32.mxu1 %v5026_v40  ;;  %v5200_v31 = vld [vmem:[#allocation3 + $0x1f1] sm:$0xff]  ;;  %v5212_v50 = vpack.c.bf16 %v2123_v37, %v2122_v54  ;;  %v984_v24 = vld [vmem:[#allocation3 + $0x7] sm:$0xff] }
 0x1d0   : > { %3983 = vmatpush1.bf16.msra.mxu0 %v3982_v20  ;;  %6058 = vst [vmem:[#allocation55_spill] sm:$0xff] %v5200_v31  ;;  %v5202_v45 = vld [vmem:[#allocation3 + $0x1e9] sm:$0xff]  ;;  %v2126_v37 = vld [vmem:[#allocation8 + $0x420] sm:$0xff] }
 0x1d1   : > { %6059 = vst [vmem:[#allocation56_spill] sm:$0xff] %v5202_v45  ;;  %3984 = vmatprep.subr.bf16.mxu0 %v6049_v10  ;;  %3584 = vmatprep.mubr.f32.mxu0 %v5202_v45  ;;  %v5209_v52 = vld [vmem:[#allocation3 + $0x10f] sm:$0xff] }
 0x1d2   : > { %1324 = vmatmul.mubr.f32.gmra.mrb[28].mxu1 %v5198_v62  ;;  %3585 = vmatmul.mubr.f32.gmra.mrb[64].mxu0 %v5200_v31  ;;  %v2124_v45 = vld [vmem:[#allocation8 + $0x410] sm:$0xff]  ;;  %v5216_v31 = vld [vmem:[#allocation3 + $0x127] sm:$0xff] }
 0x1d3   : > { %1328 = vmatprep.mubr.f32.mxu1 %v5022_v39  ;;  %v1089_v20 = vld [vmem:[#allocation3 + $0x211] sm:$0xff]  ;;  %v5219_v23 = vpack.c.bf16 %v2125_v11, %v2124_v45  ;;  %v2127_v54 = vld [vmem:[#allocation8 + $0x428] sm:$0xff] }
 0x1d4   : > { %3986 = vmatpush1.bf16.msra.mxu0 %v3985_v47  ;;  %v1088_v6 = vld [vmem:[#allocation3 + $0x209] sm:$0xff]  ;;  %v4243_v47 = vld [vmem:[#allocation2] sm:$0xff]  ;;  %v2129_v45 = vld [vmem:[#allocation8 + $0x438] sm:$0xff] }
 0x1d5   : > { %3987 = vmatprep.subr.bf16.mxu0 %v6049_v10  ;;  %3587 = vmatprep.mubr.f32.mxu0 %v1088_v6  ;;  %v5224_v6 = vld [vmem:[#allocation3 + $0x12f] sm:$0xff] }
 0x1d6   : > { %1329 = vmatmul.mubr.f32.gmra.mrb[30].mxu1 %v5209_v52  ;;  %3588 = vmatmul.mubr.f32.gmra.mrb[66].mxu0 %v1089_v20  ;;  %v985_v20 = vld [vmem:[#allocation3 + $0xf] sm:$0xff] }
 0x1d7   : > { %1333 = vmatprep.mubr.f32.mxu1 %v5047_v5  ;;  %1703 = vmatprep.mubr.f32.mxu0 %v4243_v47  ;;  %v2128_v11 = vld [vmem:[#allocation8 + $0x430] sm:$0xff] }
 0x1d8   : > { %3989 = vmatpush1.bf16.msra.mxu0 %v3988_v46  ;;  %v5227_v46 = vpack.c.bf16 %v2127_v54, %v2126_v37  ;;  %v2130_v37 = vld [vmem:[#allocation8 + $0x440] sm:$0xff]  ;;  %v2131_v54 = vld [vmem:[#allocation8 + $0x448] sm:$0xff] }
 0x1d9   : > { %4071 = vmatprep.subr.bf16.mxu0 %v5212_v50 }
 0x1da   : > { %1334 = vmatmul.mubr.f32.gmra.mrb[32].mxu1 %v5216_v31  ;;  %6060 = vst [vmem:[#allocation57_spill] sm:$0xff] %v5227_v46 }
 0x1db   : > { %1704 = vmatmul.mubr.f32.vlgmr.msra.gmra.mrb[68].mxu0 %v984_v24  ;;  %1338 = vmatprep.mubr.f32.mxu1 %v5041_v3  ;;  %v5231_v24 = vld [vmem:[#allocation3 + $0x147] sm:$0xff] }
 0x1dc   : > { %1708 = vmatprep.mubr.f32.mxu0 %v4243_v47  ;;  %4073 = vmatpush3.bf16.msra.mxu0 %v5212_v50  ;;  %v5236_v47 = vpack.c.bf16 %v2129_v45, %v2128_v11  ;;  %v2132_v11 = vld [vmem:[#allocation8 + $0x450] sm:$0xff]  ;;  %v2133_v45 = vld [vmem:[#allocation8 + $0x458] sm:$0xff] }
 0x1dd   : > { %4075 = vmatprep.subr.bf16.mxu0 %v5219_v23 }
 0x1de   : > { %1339 = vmatmul.mubr.f32.gmra.mrb[34].mxu1 %v5224_v6  ;;  %6061 = vst [vmem:[#allocation58_spill] sm:$0xff] %v5236_v47 }
 0x1df   : > { %1709 = vmatmul.mubr.f32.gmra.mrb[70].mxu0 %v985_v20  ;;  %1343 = vmatprep.mubr.f32.mxu1 %v5064_v34  ;;  %v5243_v20 = vld [vmem:[#allocation3 + $0x14f] sm:$0xff] }
 0x1e0   : > { %1713 = vmatprep.mubr.f32.mxu0 %v4915_v59  ;;  %4077 = vmatpush3.bf16.msra.mxu0 %v5219_v23  ;;  %v5246_v59 = vpack.c.bf16 %v2131_v54, %v2130_v37  ;;  %v2134_v37 = vld [vmem:[#allocation8 + $0x460] sm:$0xff]  ;;  %v2135_v54 = vld [vmem:[#allocation8 + $0x468] sm:$0xff] }
 0x1e1   : > { %4079 = vmatprep.subr.bf16.mxu0 %v5227_v46 }
 0x1e2   : > { %1344 = vmatmul.mubr.f32.gmra.mrb[36].mxu1 %v5231_v24 }
 0x1e3   : > { %1714 = vmatmul.mubr.f32.gmra.mrb[72].mxu0 %v4938_v22  ;;  %1348 = vmatprep.mubr.f32.mxu1 %v5060_v33  ;;  %v5251_v22 = vld [vmem:[#allocation3 + $0x167] sm:$0xff] }
 0x1e4   : > { %1718 = vmatprep.mubr.f32.mxu0 %v4913_v58  ;;  %4081 = vmatpush3.bf16.msra.mxu0 %v5227_v46  ;;  %v5256_v58 = vpack.c.bf16 %v2133_v45, %v2132_v11  ;;  %v3509_v46 = vpop.f32.mrb[34].mxu0  ;;  %v5266_v11 = vpack.c.bf16 %v2135_v54, %v2134_v37  ;;  %v2136_v45 = vld [vmem:[#allocation8 + $0x470] sm:$0xff]  ;;  %v2091_v37 = vld [vmem:[#allocation8 + $0x308] sm:$0xff] }
 0x1e5   : > { %4083 = vmatprep.subr.bf16.mxu0 %v5236_v47  ;;  %v5327_v46 = vld [vmem:[#allocation3 + $0x207] sm:$0xff]  ;;  %v5335_v54 = vld [vmem:[#allocation3 + $0x20f] sm:$0xff] }
 0x1e6   : > { %1349 = vmatmul.mubr.f32.gmra.mrb[38].mxu1 %v5243_v20 }
 0x1e7   : > { %1719 = vmatmul.mubr.f32.gmra.mrb[74].mxu0 %v4958_v36  ;;  %1353 = vmatprep.mubr.f32.mxu1 %v5085_v63  ;;  %v891_v36 = vpop.f32.mrb[35].mxu0 }
 0x1e8   : > { %1723 = vmatprep.mubr.f32.mxu0 %v4924_v2  ;;  %4085 = vmatpush3.bf16.msra.mxu0 %v5236_v47  ;;  %v5263_v2 = vld [vmem:[#allocation3 + $0x16f] sm:$0xff]  ;;  %v2137_v47 = vld [vmem:[#allocation8 + $0x478] sm:$0xff] }
 0x1e9   : > { %4087 = vmatprep.subr.bf16.mxu0 %v5246_v59  ;;  %v2092_v36 = vld [vmem:[#allocation8 + $0x310] sm:$0xff] }
 0x1ea   : > { %1354 = vmatmul.mubr.f32.gmra.mrb[40].mxu1 %v5251_v22 }
 0x1eb   : > { %1724 = vmatmul.mubr.f32.gmra.mrb[76].mxu0 %v4969_v43  ;;  %1358 = vmatprep.mubr.f32.mxu1 %v5079_v56  ;;  %v5271_v43 = vld [vmem:[#allocation3 + $0x187] sm:$0xff] }
 0x1ec   : > { %1728 = vmatprep.mubr.f32.mxu0 %v4922_v0  ;;  %4089 = vmatpush3.bf16.msra.mxu0 %v5246_v59  ;;  %v5276_v0 = vpack.c.bf16 %v2137_v47, %v2136_v45  ;;  %v2090_v47 = vld [vmem:[#allocation8 + $0x300] sm:$0xff]  ;;  %v2093_v45 = vld [vmem:[#allocation8 + $0x318] sm:$0xff] }
 0x1ed   : > { %4091 = vmatprep.subr.bf16.mxu0 %v5256_v58 }
 0x1ee   : > { %1359 = vmatmul.mubr.f32.gmra.mrb[42].mxu1 %v5263_v2 }
 0x1ef   : > { %1729 = vmatmul.mubr.f32.gmra.mrb[78].mxu0 %v4996_v7  ;;  %1363 = vmatprep.mubr.f32.mxu1 %v5103_v41  ;;  %v5283_v7 = vld [vmem:[#allocation3 + $0x18f] sm:$0xff] }
 0x1f0   : > { %1733 = vmatprep.mubr.f32.mxu0 %v4932_v14  ;;  %4093 = vmatpush3.bf16.msra.mxu0 %v5256_v58  ;;  %v5289_v14 = vld [vmem:[#allocation3 + $0x1a7] sm:$0xff] }
 0x1f1   : > { %4095 = vmatprep.subr.bf16.mxu0 %v5266_v11 }
 0x1f2   : > { %1364 = vmatmul.mubr.f32.gmra.mrb[44].mxu1 %v5271_v43 }
 0x1f3   : > { %1734 = vmatmul.mubr.f32.gmra.mrb[80].mxu0 %v5007_v18  ;;  %1368 = vmatprep.mubr.f32.mxu1 %v5099_v28  ;;  %v5302_v18 = vld [vmem:[#allocation3 + $0x1c7] sm:$0xff] }
 0x1f4   : > { %1738 = vmatprep.mubr.f32.mxu0 %v4930_v13  ;;  %4097 = vmatpush3.bf16.msra.mxu0 %v5266_v11  ;;  %v5297_v13 = vld [vmem:[#allocation3 + $0x1af] sm:$0xff] }
 0x1f5   : > { %4099 = vmatprep.subr.bf16.mxu0 %v5276_v0 }
 0x1f6   : > { %1369 = vmatmul.mubr.f32.gmra.mrb[46].mxu1 %v5283_v7 }
 0x1f7   : > { %1739 = vmatmul.mubr.f32.gmra.mrb[82].mxu0 %v5034_v53  ;;  %1373 = vmatprep.mubr.f32.mxu1 %v5124_v38 }
 0x1f8   : > { %1743 = vmatprep.mubr.f32.mxu0 %v4949_v30  ;;  %4101 = vmatpush3.bf16.msra.mxu0 %v5276_v0  ;;  %v5314_v30 = vld [vmem:[#allocation3 + $0x1e7] sm:$0xff] }
 0x1fa   : > { %1374 = vmatmul.mubr.f32.gmra.mrb[48].mxu1 %v5289_v14 }
 0x1fb   : > { %1744 = vmatmul.mubr.f32.gmra.mrb[84].mxu0 %v5045_v4  ;;  %1378 = vmatprep.mubr.f32.mxu1 %v5118_v32 }
 0x1fc   : > { %1748 = vmatprep.mubr.f32.mxu0 %v4946_v29  ;;  %v5309_v29 = vld [vmem:[#allocation3 + $0x1cf] sm:$0xff] }
 0x1fe   : > { %1379 = vmatmul.mubr.f32.gmra.mrb[50].mxu1 %v5297_v13 }
 0x1ff   : > { %1749 = vmatmul.mubr.f32.gmra.mrb[86].mxu0 %v5072_v51  ;;  %1383 = vmatprep.mubr.f32.mxu1 %v5141_v55 }
 0x200   : > { %1753 = vmatprep.mubr.f32.mxu0 %v4971_v44  ;;  %v6062_v44 = vmax.f32 %v5175_v49, 0.0  ;;  %v4023_v49 = vpack.c.bf16 %v2091_v37, %v2090_v47  ;;  %v2098_v47 = vld [vmem:[#allocation8 + $0x340] sm:$0xff]  ;;  %v2099_v37 = vld [vmem:[#allocation8 + $0x348] sm:$0xff] }
 0x202   : > { %1384 = vmatmul.mubr.f32.gmra.mrb[52].mxu1 %v5302_v18 }
 0x203   : > { %1754 = vmatmul.mubr.f32.gmra.mrb[88].mxu0 %v5083_v61  ;;  %1388 = vmatprep.mubr.f32.mxu1 %v5137_v27 }
 0x204   : > { %1758 = vmatprep.mubr.f32.mxu0 %v4965_v42  ;;  %v5321_v42 = vld [vmem:[#allocation3 + $0x1ef] sm:$0xff] }
 0x206   : > { %1389 = vmatmul.mubr.f32.gmra.mrb[54].mxu1 %v5309_v29 }
 0x207   : > { %1759 = vmatmul.mubr.f32.gmra.mrb[90].mxu0 %v5111_v16  ;;  %1393 = vmatprep.mubr.f32.mxu1 %v5162_v15 }
 0x208   : > { %1763 = vmatprep.mubr.f32.mxu0 %v4988_v60  ;;  %v6063_v60 = vmax.f32 %v5168_v8, 0.0  ;;  %v2094_v8 = vld [vmem:[#allocation8 + $0x320] sm:$0xff] }
 0x20a   : > { %1394 = vmatmul.mubr.f32.gmra.mrb[56].mxu1 %v5314_v30 }
 0x20b   : > { %1764 = vmatmul.mubr.f32.gmra.mrb[92].mxu0 %v5122_v12  ;;  %1398 = vmatprep.mubr.f32.mxu1 %v5156_v9 }
 0x20c   : > { %1768 = vmatprep.mubr.f32.mxu0 %v4984_v57  ;;  %v1056_v57 = vld [vmem:[#allocation3 + $0x9] sm:$0xff] }
 0x20e   : > { %1399 = vmatmul.mubr.f32.gmra.mrb[58].mxu1 %v5321_v42 }
 0x20f   : > { %1769 = vmatmul.mubr.f32.gmra.mrb[94].mxu0 %v5149_v25  ;;  %1403 = vmatprep.mubr.f32.mxu1 %v6062_v44  ;;  %v2095_v44 = vld [vmem:[#allocation8 + $0x328] sm:$0xff] }
 0x210   : > { %1773 = vmatprep.mubr.f32.mxu0 %v5009_v19  ;;  %v1057_v19 = vld [vmem:[#allocation3 + $0x11] sm:$0xff] }
 0x212   : > { %1404 = vmatmul.mubr.f32.gmra.mrb[60].mxu1 %v5327_v46 }
 0x213   : > { %1774 = vmatmul.mubr.f32.gmra.mrb[96].mxu0 %v5160_v48  ;;  %1408 = vmatprep.mubr.f32.mxu1 %v6063_v60  ;;  %v2096_v60 = vld [vmem:[#allocation8 + $0x330] sm:$0xff] }
 0x214   : > { %1778 = vmatprep.mubr.f32.mxu0 %v5003_v17  ;;  %v4026_v17 = vpack.c.bf16 %v2093_v45, %v2092_v36  ;;  %v2101_v36 = vld [vmem:[#allocation8 + $0x358] sm:$0xff] }
 0x216   : > { %1409 = vmatmul.mubr.f32.gmra.mrb[62].mxu1 %v5335_v54 }
 0x217   : > { %1779 = vmatmul.mubr.f32.gmra.mrb[98].mxu0 %v5189_v1  ;;  %3622 = vmatprep.mubr.f32.mxu1 %v1056_v57  ;;  %v2097_v57 = vld [vmem:[#allocation8 + $0x338] sm:$0xff] }
 0x218   : > { %1783 = vmatprep.mubr.f32.mxu0 %v5026_v40  ;;  %v4029_v40 = vpack.c.bf16 %v2095_v44, %v2094_v8  ;;  %v2102_v8 = vld [vmem:[#allocation8 + $0x360] sm:$0xff]  ;;  %v2103_v44 = vld [vmem:[#allocation8 + $0x368] sm:$0xff] }
 0x21a   : > { %3623 = vmatmul.mubr.f32.vlgmr.msra.gmra.mrb[64].mxu1 %v1057_v19  ;;  %v6067_v19 = vld [vmem:[#allocation34_spill] sm:$0xff] }
 0x21b   : > { %1784 = vmatmul.mubr.f32.gmra.mrb[100].mxu0 %v5198_v62  ;;  %4024 = vmatpush1.bf16.msra.mxu1 %v4023_v49  ;;  %v2100_v49 = vld [vmem:[#allocation8 + $0x350] sm:$0xff] }
 0x21c   : > { %1788 = vmatprep.mubr.f32.mxu0 %v5022_v39  ;;  %3625 = vmatprep.mubr.f32.mxu1 %v4936_v21  ;;  %v6064_v39 = vld [vmem:[#allocation30_spill] sm:$0xff]  ;;  %v4032_v21 = vpack.c.bf16 %v2097_v57, %v2096_v60  ;;  %v4038_v45 = vpack.c.bf16 %v2101_v36, %v2100_v49  ;;  %v2104_v57 = vld [vmem:[#allocation8 + $0x370] sm:$0xff]  ;;  %v2109_v49 = vld [vmem:[#allocation8 + $0x398] sm:$0xff] }
 0x21d   : > { %4025 = vmatprep.subr.bf16.mxu1 %v6049_v10  ;;  %v6071_v60 = vld [vmem:[#allocation38_spill] sm:$0xff] }
 0x21e   : > { %3626 = vmatmul.mubr.f32.gmra.mrb[66].mxu1 %v4944_v26  ;;  %v6065_v26 = vld [vmem:[#allocation32_spill] sm:$0xff] }
 0x21f   : > { %1789 = vmatmul.mubr.f32.gmra.mrb[102].mxu0 %v5209_v52  ;;  %4027 = vmatpush1.bf16.msra.mxu1 %v4026_v17  ;;  %v6069_v17 = vld [vmem:[#allocation36_spill] sm:$0xff] }
 0x220   : > { %1793 = vmatprep.mubr.f32.mxu0 %v5047_v5  ;;  %3628 = vmatprep.mubr.f32.mxu1 %v4956_v35  ;;  %v6066_v5 = vld [vmem:[#allocation31_spill] sm:$0xff]  ;;  %v4035_v35 = vpack.c.bf16 %v2099_v37, %v2098_v47  ;;  %v2106_v47 = vld [vmem:[#allocation8 + $0x380] sm:$0xff] }
 0x221   : > { %4028 = vmatprep.subr.bf16.mxu1 %v6049_v10  ;;  %v2107_v37 = vld [vmem:[#allocation8 + $0x388] sm:$0xff] }
 0x222   : > { %3629 = vmatmul.mubr.f32.gmra.mrb[68].mxu1 %v6064_v39  ;;  %v2105_v39 = vld [vmem:[#allocation8 + $0x378] sm:$0xff] }
 0x223   : > { %1794 = vmatmul.mubr.f32.gmra.mrb[104].mxu0 %v5216_v31  ;;  %4030 = vmatpush1.bf16.msra.mxu1 %v4029_v40  ;;  %v4041_v40 = vpack.c.bf16 %v2103_v44, %v2102_v8  ;;  %v2111_v8 = vld [vmem:[#allocation8 + $0x3a8] sm:$0xff] }
 0x224   : > { %1798 = vmatprep.mubr.f32.mxu0 %v5041_v3  ;;  %3631 = vmatprep.mubr.f32.mxu1 %v6065_v26  ;;  %v6068_v3 = vld [vmem:[#allocation33_spill] sm:$0xff]  ;;  %v6073_v26 = vld [vmem:[#allocation40_spill] sm:$0xff] }
 0x225   : > { %4031 = vmatprep.subr.bf16.mxu1 %v6049_v10 }
 0x226   : > { %3632 = vmatmul.mubr.f32.gmra.mrb[70].mxu1 %v6066_v5  ;;  %v4047_v5 = vpack.c.bf16 %v2107_v37, %v2106_v47  ;;  %v2114_v47 = vld [vmem:[#allocation8 + $0x3c0] sm:$0xff]  ;;  %v2115_v37 = vld [vmem:[#allocation8 + $0x3c8] sm:$0xff] }
 0x227   : > { %1799 = vmatmul.mubr.f32.gmra.mrb[106].mxu0 %v5224_v6  ;;  %4033 = vmatpush1.bf16.msra.mxu1 %v4032_v21  ;;  %v4044_v21 = vpack.c.bf16 %v2105_v39, %v2104_v57  ;;  %v2113_v57 = vld [vmem:[#allocation8 + $0x3b8] sm:$0xff] }
 0x228   : > { %1803 = vmatprep.mubr.f32.mxu0 %v5064_v34  ;;  %3634 = vmatprep.mubr.f32.mxu1 %v6067_v19  ;;  %v6070_v34 = vld [vmem:[#allocation35_spill] sm:$0xff]  ;;  %v2108_v19 = vld [vmem:[#allocation8 + $0x390] sm:$0xff] }
 0x229   : > { %4034 = vmatprep.subr.bf16.mxu1 %v6049_v10  ;;  %v4050_v36 = vpack.c.bf16 %v2109_v49, %v2108_v19  ;;  %v6083_v19 = vld [vmem:[#allocation50_spill] sm:$0xff]  ;;  %v2116_v49 = vld [vmem:[#allocation8 + $0x3d0] sm:$0xff] }
 0x22a   : > { %3635 = vmatmul.mubr.f32.gmra.mrb[72].mxu1 %v6068_v3  ;;  %v6077_v3 = vld [vmem:[#allocation44_spill] sm:$0xff] }
 0x22b   : > { %1804 = vmatmul.mubr.f32.gmra.mrb[108].mxu0 %v5231_v24  ;;  %4036 = vmatpush1.bf16.msra.mxu1 %v4035_v35  ;;  %v6075_v35 = vld [vmem:[#allocation42_spill] sm:$0xff] }
 0x22c   : > { %1808 = vmatprep.mubr.f32.mxu0 %v5060_v33  ;;  %3637 = vmatprep.mubr.f32.mxu1 %v6069_v17  ;;  %v6072_v33 = vld [vmem:[#allocation37_spill] sm:$0xff] }
 0x22d   : > { %4037 = vmatprep.subr.bf16.mxu1 %v6049_v10 }
 0x22e   : > { %3638 = vmatmul.mubr.f32.gmra.mrb[74].mxu1 %v6070_v34  ;;  %v6079_v34 = vld [vmem:[#allocation46_spill] sm:$0xff] }
 0x22f   : > { %1809 = vmatmul.mubr.f32.gmra.mrb[110].mxu0 %v5243_v20  ;;  %4039 = vmatpush1.bf16.msra.mxu1 %v4038_v45  ;;  %v2110_v45 = vld [vmem:[#allocation8 + $0x3a0] sm:$0xff] }
 0x230   : > { %1813 = vmatprep.mubr.f32.mxu0 %v5085_v63  ;;  %3640 = vmatprep.mubr.f32.mxu1 %v6071_v60  ;;  %v6074_v63 = vld [vmem:[#allocation39_spill] sm:$0xff]  ;;  %v4053_v44 = vpack.c.bf16 %v2111_v8, %v2110_v45  ;;  %v6085_v8 = vld [vmem:[#allocation52_spill] sm:$0xff] }
 0x231   : > { %4040 = vmatprep.subr.bf16.mxu1 %v6049_v10 }
 0x232   : > { %3641 = vmatmul.mubr.f32.gmra.mrb[76].mxu1 %v6072_v33 }
 0x233   : > { %1814 = vmatmul.mubr.f32.gmra.mrb[112].mxu0 %v5251_v22  ;;  %4042 = vmatpush1.bf16.msra.mxu1 %v4041_v40  ;;  %v2112_v40 = vld [vmem:[#allocation8 + $0x3b0] sm:$0xff] }
 0x234   : > { %1818 = vmatprep.mubr.f32.mxu0 %v5079_v56  ;;  %3643 = vmatprep.mubr.f32.mxu1 %v6073_v26  ;;  %v6076_v56 = vld [vmem:[#allocation41_spill] sm:$0xff]  ;;  %v4056_v39 = vpack.c.bf16 %v2113_v57, %v2112_v40  ;;  %v2119_v40 = vld [vmem:[#allocation8 + $0x3e8] sm:$0xff] }
 0x235   : > { %4043 = vmatprep.subr.bf16.mxu1 %v6049_v10 }
 0x236   : > { %3644 = vmatmul.mubr.f32.gmra.mrb[78].mxu1 %v6074_v63 }
 0x237   : > { %1819 = vmatmul.mubr.f32.gmra.mrb[114].mxu0 %v5263_v2  ;;  %4045 = vmatpush1.bf16.msra.mxu1 %v4044_v21  ;;  %v6081_v21 = vld [vmem:[#allocation48_spill] sm:$0xff] }
 0x238   : > { %1823 = vmatprep.mubr.f32.mxu0 %v5103_v41  ;;  %3646 = vmatprep.mubr.f32.mxu1 %v6075_v35  ;;  %v6078_v41 = vld [vmem:[#allocation43_spill] sm:$0xff] }
 0x239   : > { %4046 = vmatprep.subr.bf16.mxu1 %v6049_v10 }
 0x23a   : > { %3647 = vmatmul.mubr.f32.gmra.mrb[80].mxu1 %v6076_v56 }
 0x23b   : > { %1824 = vmatmul.mubr.f32.gmra.mrb[116].mxu0 %v5271_v43  ;;  %4048 = vmatpush1.bf16.msra.mxu1 %v4047_v5  ;;  %v4059_v5 = vpack.c.bf16 %v2115_v37, %v2114_v47  ;;  %v2120_v47 = vld [vmem:[#allocation8 + $0x3f0] sm:$0xff]  ;;  %v2121_v37 = vld [vmem:[#allocation8 + $0x3f8] sm:$0xff] }
 0x23c   : > { %1828 = vmatprep.mubr.f32.mxu0 %v5099_v28  ;;  %3649 = vmatprep.mubr.f32.mxu1 %v6077_v3  ;;  %v6080_v28 = vld [vmem:[#allocation45_spill] sm:$0xff] }
 0x23d   : > { %4049 = vmatprep.subr.bf16.mxu1 %v6049_v10 }
 0x23e   : > { %3650 = vmatmul.mubr.f32.gmra.mrb[82].mxu1 %v6078_v41 }
 0x23f   : > { %1829 = vmatmul.mubr.f32.gmra.mrb[118].mxu0 %v5283_v7  ;;  %4051 = vmatpush1.bf16.msra.mxu1 %v4050_v36  ;;  %v2117_v36 = vld [vmem:[#allocation8 + $0x3d8] sm:$0xff] }
 0x240   : > { %1833 = vmatprep.mubr.f32.mxu0 %v5124_v38  ;;  %3652 = vmatprep.mubr.f32.mxu1 %v6079_v34  ;;  %v6082_v38 = vld [vmem:[#allocation47_spill] sm:$0xff]  ;;  %v4062_v45 = vpack.c.bf16 %v2117_v36, %v2116_v49  ;;  %v6089_v49 = vld [vmem:[#allocation56_spill] sm:$0xff] }
 0x241   : > { %4052 = vmatprep.subr.bf16.mxu1 %v6049_v10  ;;  %v6090_v36 = vld [vmem:[#allocation55_spill] sm:$0xff] }
 0x242   : > { %3653 = vmatmul.mubr.f32.gmra.mrb[84].mxu1 %v6080_v28 }
 0x243   : > { %1834 = vmatmul.mubr.f32.gmra.mrb[120].mxu0 %v5289_v14  ;;  %4054 = vmatpush1.bf16.msra.mxu1 %v4053_v44  ;;  %v2118_v44 = vld [vmem:[#allocation8 + $0x3e0] sm:$0xff] }
 0x244   : > { %1838 = vmatprep.mubr.f32.mxu0 %v5118_v32  ;;  %3655 = vmatprep.mubr.f32.mxu1 %v6081_v21  ;;  %v6084_v32 = vld [vmem:[#allocation49_spill] sm:$0xff]  ;;  %v4065_v57 = vpack.c.bf16 %v2119_v40, %v2118_v44  ;;  %v4248_v44 = vld [vmem:[#allocation3 + $0x50] sm:$0xff] }
 0x245   : > { %4055 = vmatprep.subr.bf16.mxu1 %v6049_v10  ;;  %v4250_v40 = vld [vmem:[#allocation3 + $0x4f] sm:$0xff] }
 0x246   : > { %3656 = vmatmul.mubr.f32.gmra.mrb[86].mxu1 %v6082_v38 }
 0x247   : > { %1839 = vmatmul.mubr.f32.gmra.mrb[122].mxu0 %v5297_v13  ;;  %4057 = vmatpush1.bf16.msra.mxu1 %v4056_v39  ;;  %v6087_v39 = vld [vmem:[#allocation54_spill] sm:$0xff] }
 0x248   : > { %1843 = vmatprep.mubr.f32.mxu0 %v5141_v55  ;;  %3658 = vmatprep.mubr.f32.mxu1 %v6083_v19  ;;  %v6086_v55 = vld [vmem:[#allocation51_spill] sm:$0xff] }
 0x249   : > { %4058 = vmatprep.subr.bf16.mxu1 %v6049_v10 }
 0x24a   : > { %3659 = vmatmul.mubr.f32.gmra.mrb[88].mxu1 %v6084_v32 }
 0x24b   : > { %1844 = vmatmul.mubr.f32.gmra.mrb[124].mxu0 %v5302_v18  ;;  %4060 = vmatpush1.bf16.msra.mxu1 %v4059_v5  ;;  %v4068_v5 = vpack.c.bf16 %v2121_v37, %v2120_v47  ;;  %v6091_v47 = vld [vmem:[#allocation57_spill] sm:$0xff] }
 0x24c   : > { %1848 = vmatprep.mubr.f32.mxu0 %v5137_v27  ;;  %3661 = vmatprep.mubr.f32.mxu1 %v6085_v8  ;;  %v6088_v27 = vld [vmem:[#allocation53_spill] sm:$0xff]  ;;  %v4246_v8 = vld [vmem:[#allocation3 + $0x47] sm:$0xff] }
 0x24d   : > { %4061 = vmatprep.subr.bf16.mxu1 %v6049_v10  ;;  %v4255_v37 = vld [vmem:[#allocation3 + $0x91] sm:$0xff] }
 0x24e   : > { %3662 = vmatmul.mubr.f32.gmra.mrb[90].mxu1 %v6086_v55  ;;  %v4251_v55 = vld [vmem:[#allocation3 + $0x71] sm:$0xff] }
 0x24f   : > { %1849 = vmatmul.mubr.f32.gmra.mrb[126].mxu0 %v5309_v29  ;;  %4063 = vmatpush1.bf16.msra.mxu1 %v4062_v45  ;;  %v4245_v45 = vld [vmem:[#allocation3 + $0x49] sm:$0xff] }
 0x250   : > { %1853 = vmatprep.mubr.f32.mxu0 %v5162_v15  ;;  %3664 = vmatprep.mubr.f32.mxu1 %v6087_v39  ;;  %v4244_v15 = vld [vmem:[#allocation3 + $0x48] sm:$0xff] }
 0x251   : > { %4064 = vmatprep.subr.bf16.mxu1 %v6049_v10  ;;  %v4253_v39 = vld [vmem:[#allocation3 + $0x89] sm:$0xff] }
 0x252   : > { %3665 = vmatmul.mubr.f32.gmra.mrb[92].mxu1 %v6088_v27  ;;  %v4256_v27 = vld [vmem:[#allocation3 + $0x70] sm:$0xff] }
 0x253   : > { %1854 = vmatmul.mubr.f32.gmra.mrb[128].mxu0 %v5314_v30  ;;  %4066 = vmatpush1.bf16.msra.mxu1 %v4065_v57  ;;  %v4252_v57 = vld [vmem:[#allocation3 + $0x68] sm:$0xff] }
 0x254   : > { %1858 = vmatprep.mubr.f32.mxu0 %v5156_v9  ;;  %3667 = vmatprep.mubr.f32.mxu1 %v6089_v49  ;;  %v4247_v9 = vld [vmem:[#allocation3 + $0x51] sm:$0xff] }
 0x255   : > { %4067 = vmatprep.subr.bf16.mxu1 %v6049_v10  ;;  %v4249_v10 = vld [vmem:[#allocation3 + $0x69] sm:$0xff]  ;;  %v4257_v49 = vld [vmem:[#allocation3 + $0xb1] sm:$0xff] }
 0x256   : > { %3668 = vmatmul.mubr.f32.gmra.mrb[94].mxu1 %v6090_v36  ;;  %v4258_v36 = vld [vmem:[#allocation3 + $0x88] sm:$0xff] }
 0x257   : > { %1859 = vmatmul.mubr.f32.gmra.mrb[130].mxu0 %v5321_v42  ;;  %4069 = vmatpush1.bf16.msra.mxu1 %v4068_v5  ;;  %v6092_v5 = vld [vmem:[#allocation58_spill] sm:$0xff] }
 0x258   : > { %2202 = vmatprep.mubr.f32.mxu1 %v4244_v15  ;;  %3702 = vmatprep.mubr.f32.mxu0 %v4245_v45  ;;  %v4260_v45 = vld [vmem:[#allocation3 + $0xa8] sm:$0xff] }
 0x259   : > { %4134 = vmatprep.subr.bf16.mxu1 %v5212_v50 }
 0x25a   : > { %2203 = vmatmul.mubr.f32.vlgmr.msra.gmra.mrb[96].mxu1 %v4246_v8 }
 0x25b   : > { %4142 = vmatpush3.bf16.msra.mxu1 %v5212_v50  ;;  %3703 = vmatmul.mubr.f32.vlgmr.msra.gmra.mrb[132].mxu0 %v4247_v9  ;;  %v4254_v50 = vld [vmem:[#allocation3 + $0x67] sm:$0xff] }
 0x25c   : > { %2207 = vmatprep.mubr.f32.mxu1 %v4248_v44  ;;  %3705 = vmatprep.mubr.f32.mxu0 %v4249_v10 }
 0x25d   : > { %4135 = vmatprep.subr.bf16.mxu1 %v5219_v23 }
 0x25e   : > { %2208 = vmatmul.mubr.f32.gmra.mrb[98].mxu1 %v4250_v40 }
 0x25f   : > { %3706 = vmatmul.mubr.f32.gmra.mrb[134].mxu0 %v4251_v55  ;;  %2212 = vmatprep.mubr.f32.mxu1 %v4252_v57 }
 0x260   : > { %3708 = vmatprep.mubr.f32.mxu0 %v4253_v39  ;;  %4143 = vmatpush3.bf16.msra.mxu1 %v5219_v23  ;;  %v4259_v23 = vld [vmem:[#allocation3 + $0x90] sm:$0xff]  ;;  %v4264_v39 = vld [vmem:[#allocation3 + $0xe8] sm:$0xff] }
 0x261   : > { %4136 = vmatprep.subr.bf16.mxu1 %v6091_v47 }
 0x262   : > { %2213 = vmatmul.mubr.f32.gmra.mrb[100].mxu1 %v4254_v50 }
 0x263   : > { %3709 = vmatmul.mubr.f32.gmra.mrb[136].mxu0 %v4255_v37  ;;  %2217 = vmatprep.mubr.f32.mxu1 %v4256_v27  ;;  %v4265_v37 = vld [vmem:[#allocation3 + $0xf0] sm:$0xff] }
 0x264   : > { %3711 = vmatprep.mubr.f32.mxu0 %v6069_v17  ;;  %4144 = vmatpush3.bf16.msra.mxu1 %v6091_v47 }
 0x265   : > { %4137 = vmatprep.subr.bf16.mxu1 %v6092_v5 }
 0x266   : > { %2218 = vmatmul.mubr.f32.gmra.mrb[102].mxu1 %v5034_v53 }
 0x267   : > { %3712 = vmatmul.mubr.f32.gmra.mrb[138].mxu0 %v4257_v49  ;;  %2222 = vmatprep.mubr.f32.mxu1 %v4258_v36 }
 0x268   : > { %3714 = vmatprep.mubr.f32.mxu0 %v6071_v60  ;;  %4145 = vmatpush3.bf16.msra.mxu1 %v6092_v5 }
 0x269   : > { %4138 = vmatprep.subr.bf16.mxu1 %v5246_v59 }
 0x26a   : > { %2223 = vmatmul.mubr.f32.gmra.mrb[104].mxu1 %v5045_v4 }
 0x26b   : > { %3715 = vmatmul.mubr.f32.gmra.mrb[140].mxu0 %v6072_v33  ;;  %2227 = vmatprep.mubr.f32.mxu1 %v4259_v23 }
 0x26c   : > { %3717 = vmatprep.mubr.f32.mxu0 %v6073_v26  ;;  %4146 = vmatpush3.bf16.msra.mxu1 %v5246_v59 }
 0x26d   : > { %v1255_v53 = vpop.f32.mrb[0].mxu1  ;;  %4139 = vmatprep.subr.bf16.mxu1 %v5256_v58  ;;  %v3544_v17 = vpop.f32.mrb[36].mxu0 }
 0x26e   : > { %v1257_v15 = vpop.f32.mrb[1].mxu1  ;;  %2228 = vmatmul.mubr.f32.gmra.mrb[106].mxu1 %v5072_v51  ;;  %v1480_v60 = vpop.f32.mrb[37].mxu0 }
 0x26f   : > { %3718 = vmatmul.mubr.f32.gmra.mrb[142].mxu0 %v6074_v63  ;;  %2232 = vmatprep.mubr.f32.mxu1 %v4260_v45  ;;  %v5435_v4 = vadd.f32 %v1480_v60, %v1255_v53  ;;  %v4261_v63 = vld [vmem:[#allocation3 + $0xb0] sm:$0xff] }
 0x270   : > { %3720 = vmatprep.mubr.f32.mxu0 %v6075_v35  ;;  %4147 = vmatpush3.bf16.msra.mxu1 %v5256_v58 }
 0x271   : > { %v1260_v33 = vpop.f32.mrb[2].mxu1  ;;  %4140 = vmatprep.subr.bf16.mxu1 %v5266_v11  ;;  %v3547_v8 = vpop.f32.mrb[38].mxu0 }
 0x272   : > { %v5440_v59 = vadd.f32 %v3544_v17, %v1260_v33  ;;  %v1262_v26 = vpop.f32.mrb[3].mxu1  ;;  %2233 = vmatmul.mubr.f32.gmra.mrb[108].mxu1 %v5083_v61  ;;  %v1490_v51 = vpop.f32.mrb[39].mxu0  ;;  %v4262_v61 = vld [vmem:[#allocation3 + $0xc8] sm:$0xff]  ;;  %v4267_v17 = vld [vmem:[#allocation3 + $0x110] sm:$0xff] }
 0x273   : > { %3721 = vmatmul.mubr.f32.gmra.mrb[144].mxu0 %v6076_v56  ;;  %2237 = vmatprep.mubr.f32.mxu1 %v4261_v63  ;;  %v4268_v26 = vld [vmem:[#allocation3 + $0x128] sm:$0xff] }
 0x274   : > { %3723 = vmatprep.mubr.f32.mxu0 %v6077_v3  ;;  %4148 = vmatpush3.bf16.msra.mxu1 %v5266_v11 }
 0x275   : > { %v1265_v35 = vpop.f32.mrb[4].mxu1  ;;  %4141 = vmatprep.subr.bf16.mxu1 %v5276_v0  ;;  %v3550_v44 = vpop.f32.mrb[40].mxu0 }
 0x276   : > { %v5447_v58 = vadd.f32 %v1490_v51, %v1265_v35  ;;  %v1267_v9 = vpop.f32.mrb[5].mxu1  ;;  %2238 = vmatmul.mubr.f32.gmra.mrb[110].mxu1 %v5111_v16  ;;  %v1500_v56 = vpop.f32.mrb[41].mxu0  ;;  %v4263_v16 = vld [vmem:[#allocation3 + $0xd0] sm:$0xff] }
 0x277   : > { %3724 = vmatmul.mubr.f32.gmra.mrb[146].mxu0 %v6078_v41  ;;  %2242 = vmatprep.mubr.f32.mxu1 %v4262_v61  ;;  %v4269_v9 = vld [vmem:[#allocation3 + $0x130] sm:$0xff] }
 0x278   : > { %3726 = vmatprep.mubr.f32.mxu0 %v6079_v34  ;;  %4149 = vmatpush3.bf16.msra.mxu1 %v5276_v0 }
 0x279   : > { %v1270_v3 = vpop.f32.mrb[6].mxu1  ;;  %v3553_v40 = vpop.f32.mrb[42].mxu0 }
 0x27a   : > { %v5453_v11 = vadd.f32 %v3547_v8, %v1270_v3  ;;  %v1272_v10 = vpop.f32.mrb[7].mxu1  ;;  %2243 = vmatmul.mubr.f32.gmra.mrb[112].mxu1 %v5122_v12  ;;  %v1510_v55 = vpop.f32.mrb[43].mxu0 }
 0x27b   : > { %3727 = vmatmul.mubr.f32.gmra.mrb[148].mxu0 %v6080_v28  ;;  %2247 = vmatprep.mubr.f32.mxu1 %v4263_v16  ;;  %v4270_v10 = vld [vmem:[#allocation3 + $0x148] sm:$0xff]  ;;  %v2691_v16 = vld [vmem:[#allocation10] sm:$0xff] }
 0x27c   : > { %3729 = vmatprep.mubr.f32.mxu0 %v6081_v21 }
 0x27d   : > { %v1275_v41 = vpop.f32.mrb[8].mxu1  ;;  %v3556_v0 = vpop.f32.mrb[44].mxu0 }
 0x27e   : > { %v5458_v57 = vadd.f32 %v1500_v56, %v1275_v41  ;;  %v1277_v34 = vpop.f32.mrb[9].mxu1  ;;  %2248 = vmatmul.mubr.f32.gmra.mrb[114].mxu1 %v5149_v25  ;;  %v1520_v12 = vpop.f32.mrb[45].mxu0 }
 0x27f   : > { %3730 = vmatmul.mubr.f32.gmra.mrb[150].mxu0 %v6082_v38  ;;  %2252 = vmatprep.mubr.f32.mxu1 %v4264_v39 }
 0x280   : > { %3732 = vmatprep.mubr.f32.mxu0 %v6083_v19  ;;  %v4266_v19 = vld [vmem:[#allocation3 + $0x108] sm:$0xff] }
 0x281   : > { %v1280_v28 = vpop.f32.mrb[10].mxu1  ;;  %v3559_v21 = vpop.f32.mrb[46].mxu0 }
 0x282   : > { %v5463_v47 = vadd.f32 %v3550_v44, %v1280_v28  ;;  %v1282_v50 = vpop.f32.mrb[11].mxu1  ;;  %2253 = vmatmul.mubr.f32.gmra.mrb[116].mxu1 %v5160_v48  ;;  %v1530_v25 = vpop.f32.mrb[47].mxu0  ;;  %v2693_v28 = vld [vmem:[#allocation10 + $0x10] sm:$0xff] }
 0x283   : > { %3733 = vmatmul.mubr.f32.gmra.mrb[152].mxu0 %v6084_v32  ;;  %2257 = vmatprep.mubr.f32.mxu1 %v4265_v37  ;;  %v2694_v50 = vld [vmem:[#allocation10 + $0x18] sm:$0xff] }
 0x285   : > { %v1285_v27 = vpop.f32.mrb[12].mxu1  ;;  %v5470_v49 = vpop.f32.mrb[48].mxu0 }
 0x286   : > { %v5467_v5 = vadd.f32 %v1510_v55, %v1285_v27  ;;  %v1287_v38 = vpop.f32.mrb[13].mxu1  ;;  %2258 = vmatmul.mubr.f32.gmra.mrb[118].mxu1 %v5189_v1  ;;  %v1540_v36 = vpop.f32.mrb[49].mxu0 }
 0x287   : > { %2262 = vmatprep.mubr.f32.mxu1 %v4266_v19 }
 0x289   : > { %v1290_v23 = vpop.f32.mrb[14].mxu1  ;;  %v5475_v32 = vpop.f32.mrb[50].mxu0 }
 0x28a   : > { %v5472_v53 = vadd.f32 %v3553_v40, %v1290_v23  ;;  %v1292_v48 = vpop.f32.mrb[15].mxu1  ;;  %2263 = vmatmul.mubr.f32.gmra.mrb[120].mxu1 %v5198_v62  ;;  %v5477_v15 = vpop.f32.mrb[51].mxu0  ;;  %v2695_v23 = vld [vmem:[#allocation10 + $0x20] sm:$0xff] }
 0x28b   : > { %2267 = vmatprep.mubr.f32.mxu1 %v4267_v17  ;;  %v2696_v48 = vld [vmem:[#allocation10 + $0x28] sm:$0xff] }
 0x28d   : > { %v1295_v60 = vpop.f32.mrb[16].mxu1  ;;  %v5482_v33 = vpop.f32.mrb[52].mxu0 }
 0x28e   : > { %v5479_v45 = vadd.f32 %v1520_v12, %v1295_v60  ;;  %v1297_v1 = vpop.f32.mrb[17].mxu1  ;;  %2268 = vmatmul.mubr.f32.gmra.mrb[122].mxu1 %v5209_v52  ;;  %v5484_v8 = vpop.f32.mrb[53].mxu0  ;;  %v4271_v12 = vld [vmem:[#allocation3 + $0x150] sm:$0xff]  ;;  %v4110_v60 = vpack.c.bf16 %v2696_v48, %v2695_v23 }
 0x28f   : > { %2272 = vmatprep.mubr.f32.mxu1 %v4268_v26 }
 0x291   : > { %v1300_v51 = vpop.f32.mrb[18].mxu1  ;;  %v5489_v35 = vpop.f32.mrb[54].mxu0 }
 0x292   : > { %v5486_v62 = vadd.f32 %v3556_v0, %v1300_v51  ;;  %v1302_v63 = vpop.f32.mrb[19].mxu1  ;;  %2273 = vmatmul.mubr.f32.gmra.mrb[124].mxu1 %v5216_v31  ;;  %v5491_v44 = vpop.f32.mrb[55].mxu0  ;;  %v2692_v31 = vld [vmem:[#allocation10 + $0x8] sm:$0xff] }
 0x293   : > { %2277 = vmatprep.mubr.f32.mxu1 %v4269_v9  ;;  %v4102_v41 = vpack.c.bf16 %v2692_v31, %v2691_v16  ;;  %v2697_v63 = vld [vmem:[#allocation10 + $0x30] sm:$0xff]  ;;  %v2698_v9 = vld [vmem:[#allocation10 + $0x38] sm:$0xff] }
 0x295   : > { %v1305_v61 = vpop.f32.mrb[20].mxu1  ;;  %v5496_v3 = vpop.f32.mrb[56].mxu0  ;;  %4103 = vmatprep.subr.bf16.mxu0 %v4102_v41 }
 0x296   : > { %v5493_v52 = vadd.f32 %v1530_v25, %v1305_v61  ;;  %v1307_v56 = vpop.f32.mrb[21].mxu1  ;;  %2278 = vmatmul.mubr.f32.gmra.mrb[126].mxu1 %v5224_v6  ;;  %v5498_v40 = vpop.f32.mrb[57].mxu0  ;;  %4105 = vmatpush3.bf16.msra.mxu0 %v4102_v41  ;;  %v4106_v25 = vpack.c.bf16 %v2694_v50, %v2693_v28  ;;  %v2700_v41 = vld [vmem:[#allocation10 + $0x48] sm:$0xff] }
 0x297   : > { %2282 = vmatprep.mubr.f32.mxu1 %v4270_v10  ;;  %v4114_v56 = vpack.c.bf16 %v2698_v9, %v2697_v63  ;;  %v2704_v63 = vld [vmem:[#allocation10 + $0x68] sm:$0xff] }
 0x298   : > { %4107 = vmatprep.subr.bf16.mxu0 %v4106_v25 }
 0x299   : > { %v1310_v55 = vpop.f32.mrb[22].mxu1  ;;  %v5503_v39 = vpop.f32.mrb[58].mxu0 }
 0x29a   : > { %v5500_v34 = vadd.f32 %v3559_v21, %v1310_v55  ;;  %v1312_v0 = vpop.f32.mrb[23].mxu1  ;;  %2283 = vmatmul.mubr.f32.gmra.mrb[128].mxu1 %v5231_v24  ;;  %v5505_v6 = vpop.f32.mrb[59].mxu0  ;;  %v4272_v24 = vld [vmem:[#allocation3 + $0x168] sm:$0xff]  ;;  %4109 = vmatpush3.bf16.msra.mxu0 %v4106_v25  ;;  %v2699_v55 = vld [vmem:[#allocation10 + $0x40] sm:$0xff]  ;;  %v2701_v25 = vld [vmem:[#allocation10 + $0x50] sm:$0xff] }
 0x29b   : > { %2287 = vmatprep.mubr.f32.mxu1 %v4271_v12  ;;  %4111 = vmatprep.subr.bf16.mxu0 %v4110_v60  ;;  %v4118_v12 = vpack.c.bf16 %v2700_v41, %v2699_v55  ;;  %v2705_v55 = vld [vmem:[#allocation10 + $0x70] sm:$0xff]  ;;  %v2706_v41 = vld [vmem:[#allocation10 + $0x78] sm:$0xff] }
 0x29d   : > { %v1315_v37 = vpop.f32.mrb[24].mxu1  ;;  %v5510_v21 = vpop.f32.mrb[60].mxu0 }
 0x29e   : > { %v5507_v27 = vadd.f32 %v1540_v36, %v1315_v37  ;;  %v1317_v38 = vpop.f32.mrb[25].mxu1  ;;  %2288 = vmatmul.mubr.f32.gmra.mrb[130].mxu1 %v5243_v20  ;;  %v5512_v19 = vpop.f32.mrb[61].mxu0  ;;  %v4273_v20 = vld [vmem:[#allocation3 + $0x170] sm:$0xff]  ;;  %4113 = vmatpush3.bf16.msra.mxu0 %v4110_v60  ;;  %v4276_v60 = vld [vmem:[#allocation3 + $0x1a8] sm:$0xff] }
 0x29f   : > { %2292 = vmatprep.mubr.f32.mxu1 %v4272_v24  ;;  %4115 = vmatprep.subr.bf16.mxu0 %v4114_v56  ;;  %v2702_v38 = vld [vmem:[#allocation10 + $0x58] sm:$0xff] }
 0x2a0   : > { %v4122_v23 = vpack.c.bf16 %v2702_v38, %v2701_v25  ;;  %v4278_v25 = vld [vmem:[#allocation3 + $0x1c8] sm:$0xff] }
 0x2a1   : > { %v1320_v17 = vpop.f32.mrb[26].mxu1  ;;  %v5518_v26 = vpop.f32.mrb[62].mxu0 }
 0x2a2   : > { %v5515_v1 = vadd.f32 %v5470_v49, %v1320_v17  ;;  %v1322_v36 = vpop.f32.mrb[27].mxu1  ;;  %2293 = vmatmul.mubr.f32.gmra.mrb[132].mxu1 %v5251_v22  ;;  %v5520_v51 = vpop.f32.mrb[63].mxu0  ;;  %v4274_v22 = vld [vmem:[#allocation3 + $0x188] sm:$0xff]  ;;  %4117 = vmatpush3.bf16.msra.mxu0 %v4114_v56 }
 0x2a3   : > { %2297 = vmatprep.mubr.f32.mxu1 %v4273_v20  ;;  %4119 = vmatprep.subr.bf16.mxu0 %v4118_v12  ;;  %v2703_v20 = vld [vmem:[#allocation10 + $0x60] sm:$0xff] }
 0x2a5   : > { %v1325_v61 = vpop.f32.mrb[28].mxu1  ;;  %v5526_v16 = vpop.f32.mrb[64].mxu0 }
 0x2a6   : > { %v5523_v10 = vadd.f32 %v5477_v15, %v1325_v61  ;;  %v1327_v49 = vpop.f32.mrb[29].mxu1  ;;  %2298 = vmatmul.mubr.f32.gmra.mrb[134].mxu1 %v5263_v2  ;;  %v5528_v31 = vpop.f32.mrb[65].mxu0  ;;  %v4275_v2 = vld [vmem:[#allocation3 + $0x190] sm:$0xff]  ;;  %4121 = vmatpush3.bf16.msra.mxu0 %v4118_v12  ;;  %v4126_v61 = vpack.c.bf16 %v2704_v63, %v2703_v20  ;;  %v4130_v12 = vpack.c.bf16 %v2706_v41, %v2705_v55 }
 0x2a7   : > { %2302 = vmatprep.mubr.f32.mxu1 %v4274_v22  ;;  %4123 = vmatprep.subr.bf16.mxu0 %v4122_v23 }
 0x2a9   : > { %v1330_v0 = vpop.f32.mrb[30].mxu1  ;;  %v5534_v50 = vpop.f32.mrb[66].mxu0 }
 0x2aa   : > { %v5531_v28 = vadd.f32 %v5475_v32, %v1330_v0  ;;  %v1332_v15 = vpop.f32.mrb[31].mxu1  ;;  %2303 = vmatmul.mubr.f32.gmra.mrb[136].mxu1 %v5271_v43  ;;  %v5536_v37 = vpop.f32.mrb[67].mxu0  ;;  %4125 = vmatpush3.bf16.msra.mxu0 %v4122_v23 }
 0x2ab   : > { %2307 = vmatprep.mubr.f32.mxu1 %v4275_v2  ;;  %4127 = vmatprep.subr.bf16.mxu0 %v4126_v61 }
 0x2ad   : > { %v1335_v24 = vpop.f32.mrb[32].mxu1 }
 0x2ae   : > { %v5539_v48 = vadd.f32 %v5484_v8, %v1335_v24  ;;  %v1705_v32 = vpop.f32.mrb[68].mxu0  ;;  %v1337_v17 = vpop.f32.mrb[33].mxu1  ;;  %2308 = vmatmul.mubr.f32.gmra.mrb[138].mxu1 %v5283_v7  ;;  %4129 = vmatpush3.bf16.msra.mxu0 %v4126_v61 }
 0x2af   : > { %v5543_v43 = vadd.f32 %v1705_v32, %v5435_v4  ;;  %2312 = vmatprep.mubr.f32.mxu1 %v4276_v60  ;;  %v1707_v36 = vpop.f32.mrb[69].mxu0  ;;  %v4277_v4 = vld [vmem:[#allocation3 + $0x1b0] sm:$0xff]  ;;  %4131 = vmatprep.subr.bf16.mxu0 %v4130_v12 }
 0x2b0   : > { %v4279_v17 = vld [vmem:[#allocation3 + $0x1d0] sm:$0xff] }
 0x2b1   : > { %v1340_v9 = vpop.f32.mrb[34].mxu1 }
 0x2b2   : > { %v5546_v56 = vadd.f32 %v5482_v33, %v1340_v9  ;;  %v1710_v8 = vpop.f32.mrb[70].mxu0  ;;  %v1342_v49 = vpop.f32.mrb[35].mxu1  ;;  %2313 = vmatmul.mubr.f32.gmra.mrb[140].mxu1 %v5289_v14  ;;  %4133 = vmatpush3.bf16.msra.mxu0 %v4130_v12  ;;  %v4280_v9 = vld [vmem:[#allocation3 + $0x1e8] sm:$0xff] }
 0x2b3   : > { %v5550_v7 = vadd.f32 %v1710_v8, %v5440_v59  ;;  %2317 = vmatprep.mubr.f32.mxu1 %v4277_v4  ;;  %v1712_v22 = vpop.f32.mrb[71].mxu0  ;;  %v4281_v4 = vld [vmem:[#allocation3 + $0x1f0] sm:$0xff] }
 0x2b5   : > { %v1345_v0 = vpop.f32.mrb[36].mxu1 }
 0x2b6   : > { %v5553_v15 = vadd.f32 %v5491_v44, %v1345_v0  ;;  %v1715_v33 = vpop.f32.mrb[72].mxu0  ;;  %v1347_v2 = vpop.f32.mrb[37].mxu1  ;;  %2318 = vmatmul.mubr.f32.gmra.mrb[142].mxu1 %v5297_v13  ;;  %v4282_v0 = vld [vmem:[#allocation3 + $0x208] sm:$0xff] }
 0x2b7   : > { %v5557_v14 = vadd.f32 %v1715_v33, %v5447_v58  ;;  %v1717_v59 = vpop.f32.mrb[73].mxu0  ;;  %2322 = vmatprep.mubr.f32.mxu1 %v4278_v25 }
 0x2b8   : > { %v4283_v59 = vld [vmem:[#allocation3 + $0x210] sm:$0xff] }
 0x2b9   : > { %v1350_v38 = vpop.f32.mrb[38].mxu1 }
 0x2ba   : > { %v5560_v24 = vadd.f32 %v5489_v35, %v1350_v38  ;;  %v1720_v23 = vpop.f32.mrb[74].mxu0  ;;  %v1352_v32 = vpop.f32.mrb[39].mxu1  ;;  %2323 = vmatmul.mubr.f32.gmra.mrb[144].mxu1 %v5302_v18 }
 0x2bb   : > { %v5564_v44 = vadd.f32 %v1720_v23, %v5453_v11  ;;  %v1722_v13 = vpop.f32.mrb[75].mxu0  ;;  %2327 = vmatprep.mubr.f32.mxu1 %v4279_v17  ;;  %v4284_v32 = vld [vmem:[#allocation2] sm:$0xff] }
 0x2bd   : > { %v1355_v58 = vpop.f32.mrb[40].mxu1 }
 0x2be   : > { %v5567_v60 = vadd.f32 %v5498_v40, %v1355_v58  ;;  %v1725_v36 = vpop.f32.mrb[76].mxu0  ;;  %v1357_v20 = vpop.f32.mrb[41].mxu1  ;;  %2328 = vmatmul.mubr.f32.gmra.mrb[146].mxu1 %v5309_v29 }
 0x2bf   : > { %v5571_v35 = vadd.f32 %v1725_v36, %v5458_v57  ;;  %v1727_v63 = vpop.f32.mrb[77].mxu0  ;;  %2332 = vmatprep.mubr.f32.mxu1 %v4280_v9 }
 0x2c1   : > { %v1360_v18 = vpop.f32.mrb[42].mxu1 }
 0x2c2   : > { %v5574_v11 = vadd.f32 %v5496_v3, %v1360_v18  ;;  %v1730_v61 = vpop.f32.mrb[78].mxu0  ;;  %v1362_v8 = vpop.f32.mrb[43].mxu1  ;;  %2333 = vmatmul.mubr.f32.gmra.mrb[148].mxu1 %v5314_v30 }
 0x2c3   : > { %v5578_v40 = vadd.f32 %v1730_v61, %v5463_v47  ;;  %v1732_v49 = vpop.f32.mrb[79].mxu0  ;;  %2337 = vmatprep.mubr.f32.mxu1 %v4281_v4  ;;  %v4285_v61 = vld [vmem:[#allocation3 + $0x1a9] sm:$0xff] }
 0x2c5   : > { %v1365_v29 = vpop.f32.mrb[44].mxu1 }
 0x2c6   : > { %v5581_v57 = vadd.f32 %v5505_v6, %v1365_v29  ;;  %v1735_v22 = vpop.f32.mrb[80].mxu0  ;;  %v1367_v55 = vpop.f32.mrb[45].mxu1  ;;  %2338 = vmatmul.mubr.f32.gmra.mrb[150].mxu1 %v5321_v42  ;;  %v4286_v29 = vld [vmem:[#allocation3 + $0x1b1] sm:$0xff] }
 0x2c7   : > { %v5585_v3 = vadd.f32 %v1735_v22, %v5467_v5  ;;  %v1737_v41 = vpop.f32.mrb[81].mxu0  ;;  %2342 = vmatprep.mubr.f32.mxu1 %v4282_v0  ;;  %v4287_v55 = vld [vmem:[#allocation3 + $0x1c9] sm:$0xff] }
 0x2c9   : > { %v1370_v30 = vpop.f32.mrb[46].mxu1 }
 0x2ca   : > { %v5588_v47 = vadd.f32 %v5503_v39, %v1370_v30  ;;  %v1740_v12 = vpop.f32.mrb[82].mxu0  ;;  %v1372_v33 = vpop.f32.mrb[47].mxu1  ;;  %2343 = vmatmul.mubr.f32.gmra.mrb[152].mxu1 %v5327_v46  ;;  %v1018_v46 = vld [vmem:[#allocation3 + $0x227] sm:$0xff] }
 0x2cb   : > { %v5592_v6 = vadd.f32 %v1740_v12, %v5472_v53  ;;  %v1742_v2 = vpop.f32.mrb[83].mxu0  ;;  %2347 = vmatprep.mubr.f32.mxu1 %v4283_v59  ;;  %v4288_v12 = vld [vmem:[#allocation3 + $0x1d1] sm:$0xff] }
 0x2cc   : > { %v4289_v2 = vld [vmem:[#allocation3 + $0x1e9] sm:$0xff] }
 0x2cd   : > { %v1375_v42 = vpop.f32.mrb[48].mxu1 }
 0x2ce   : > { %v5595_v5 = vadd.f32 %v5512_v19, %v1375_v42  ;;  %v1745_v25 = vpop.f32.mrb[84].mxu0  ;;  %v1377_v38 = vpop.f32.mrb[49].mxu1  ;;  %2348 = vmatmul.mubr.f32.gmra.mrb[154].mxu1 %v5335_v54  ;;  %v1019_v54 = vld [vmem:[#allocation3 + $0x22f] sm:$0xff] }
 0x2cf   : > { %v5599_v39 = vadd.f32 %v1745_v25, %v5479_v45  ;;  %v1747_v23 = vpop.f32.mrb[85].mxu0  ;;  %2352 = vmatprep.mubr.f32.mxu1 %v4284_v32  ;;  %v4290_v38 = vld [vmem:[#allocation3 + $0x1f1] sm:$0xff] }
 0x2d1   : > { %v1380_v53 = vpop.f32.mrb[50].mxu1 }
 0x2d2   : > { %v5602_v13 = vadd.f32 %v5510_v21, %v1380_v53  ;;  %v1750_v17 = vpop.f32.mrb[86].mxu0  ;;  %v1382_v58 = vpop.f32.mrb[51].mxu1  ;;  %2353 = vmatmul.mubr.f32.gmra.mrb[156].mxu1 %v1018_v46  ;;  %v1090_v46 = vld [vmem:[#allocation3 + $0x229] sm:$0xff] }
 0x2d3   : > { %v5605_v19 = vadd.f32 %v1750_v17, %v5486_v62  ;;  %v1752_v36 = vpop.f32.mrb[87].mxu0  ;;  %2357 = vmatprep.mubr.f32.mxu1 %v4284_v32  ;;  %v4291_v32 = vld [vmem:[#allocation3 + $0x209] sm:$0xff] }
 0x2d4   : > { %v4292_v36 = vld [vmem:[#allocation3 + $0x211] sm:$0xff] }
 0x2d5   : > { %v1385_v20 = vpop.f32.mrb[52].mxu1 }
 0x2d6   : > { %v5608_v45 = vadd.f32 %v5520_v51, %v1385_v20  ;;  %v1755_v63 = vpop.f32.mrb[88].mxu0  ;;  %v1387_v9 = vpop.f32.mrb[53].mxu1  ;;  %2358 = vmatmul.mubr.f32.gmra.mrb[158].mxu1 %v1019_v54  ;;  %v1091_v20 = vld [vmem:[#allocation3 + $0x231] sm:$0xff] }
 0x2d7   : > { %v5611_v18 = vadd.f32 %v1755_v63, %v5493_v52  ;;  %v1757_v21 = vpop.f32.mrb[89].mxu0  ;;  %3735 = vmatprep.mubr.f32.mxu1 %v4285_v61 }
 0x2d9   : > { %v1390_v8 = vpop.f32.mrb[54].mxu1 }
 0x2da   : > { %v5614_v62 = vadd.f32 %v5518_v26, %v1390_v8  ;;  %v1760_v49 = vpop.f32.mrb[90].mxu0  ;;  %v1392_v4 = vpop.f32.mrb[55].mxu1  ;;  %3736 = vmatmul.mubr.f32.vlgmr.msra.gmra.mrb[160].mxu1 %v4286_v29 }
 0x2db   : > { %v5617_v51 = vadd.f32 %v1760_v49, %v5500_v34  ;;  %v1762_v22 = vpop.f32.mrb[91].mxu0  ;;  %3738 = vmatprep.mubr.f32.mxu1 %v4287_v55 }
 0x2dd   : > { %v1395_v41 = vpop.f32.mrb[56].mxu1 }
 0x2de   : > { %v5620_v52 = vadd.f32 %v5528_v31, %v1395_v41  ;;  %v1765_v0 = vpop.f32.mrb[92].mxu0  ;;  %v1397_v30 = vpop.f32.mrb[57].mxu1  ;;  %3739 = vmatmul.mubr.f32.gmra.mrb[162].mxu1 %v4288_v12 }
 0x2df   : > { %v5623_v26 = vadd.f32 %v1765_v0, %v5507_v27  ;;  %v1767_v33 = vpop.f32.mrb[93].mxu0  ;;  %3741 = vmatprep.mubr.f32.mxu1 %v4289_v2 }
 0x2e1   : > { %v1400_v59 = vpop.f32.mrb[58].mxu1 }
 0x2e2   : > { %v5626_v34 = vadd.f32 %v5526_v16, %v1400_v59  ;;  %v1770_v42 = vpop.f32.mrb[94].mxu0  ;;  %v1402_v25 = vpop.f32.mrb[59].mxu1  ;;  %3742 = vmatmul.mubr.f32.gmra.mrb[164].mxu1 %v4290_v38 }
 0x2e3   : > { %v5629_v31 = vadd.f32 %v1770_v42, %v5515_v1  ;;  %v1772_v23 = vpop.f32.mrb[95].mxu0  ;;  %3744 = vmatprep.mubr.f32.mxu1 %v4291_v32 }
 0x2e5   : > { %v1405_v27 = vpop.f32.mrb[60].mxu1 }
 0x2e6   : > { %v5632_v53 = vadd.f32 %v5536_v37, %v1405_v27  ;;  %v1775_v17 = vpop.f32.mrb[96].mxu0  ;;  %v1407_v58 = vpop.f32.mrb[61].mxu1  ;;  %3745 = vmatmul.mubr.f32.gmra.mrb[166].mxu1 %v4292_v36 }
 0x2e7   : > { %v5635_v16 = vadd.f32 %v1775_v17, %v5523_v10  ;;  %v1777_v54 = vpop.f32.mrb[97].mxu0  ;;  %3747 = vmatprep.mubr.f32.mxu1 %v1090_v46 }
 0x2e9   : > { %v1410_v1 = vpop.f32.mrb[62].mxu1 }
 0x2ea   : > { %v5638_v63 = vadd.f32 %v5534_v50, %v1410_v1  ;;  %v1780_v9 = vpop.f32.mrb[98].mxu0  ;;  %v1412_v21 = vpop.f32.mrb[63].mxu1  ;;  %3748 = vmatmul.mubr.f32.gmra.mrb[168].mxu1 %v1091_v20 }
 0x2eb   : > { %v1781_v37 = vadd.f32 %v1780_v9, %v5531_v28  ;;  %v1782_v61 = vpop.f32.mrb[99].mxu0 }
 0x2ed   : > { %v3624_v8 = vpop.f32.mrb[64].mxu1 }
 0x2ee   : > { %v1785_v49 = vpop.f32.mrb[100].mxu0  ;;  %v5642_v4 = vadd.f32 %v3624_v8, %v5550_v7  ;;  %v1930_v10 = vpop.f32.mrb[65].mxu1 }
 0x2ef   : > { %v1786_v29 = vadd.f32 %v1785_v49, %v5539_v48  ;;  %v1787_v22 = vpop.f32.mrb[101].mxu0  ;;  %v5646_v55 = vadd.f32 %v1930_v10, %v5543_v43 }
 0x2f1   : > { %v3627_v50 = vpop.f32.mrb[66].mxu1 }
 0x2f2   : > { %v1790_v41 = vpop.f32.mrb[102].mxu0  ;;  %v5649_v0 = vadd.f32 %v3627_v50, %v5564_v44  ;;  %v1940_v30 = vpop.f32.mrb[67].mxu1 }
 0x2f3   : > { %v1791_v28 = vadd.f32 %v1790_v41, %v5546_v56  ;;  %v1792_v12 = vpop.f32.mrb[103].mxu0  ;;  %v5653_v33 = vadd.f32 %v1940_v30, %v5557_v14 }
 0x2f5   : > { %v3630_v7 = vpop.f32.mrb[68].mxu1 }
 0x2f6   : > { %v1795_v2 = vpop.f32.mrb[104].mxu0  ;;  %v5656_v48 = vadd.f32 %v3630_v7, %v5578_v40  ;;  %v1950_v59 = vpop.f32.mrb[69].mxu1 }
 0x2f7   : > { %v1796_v43 = vadd.f32 %v1795_v2, %v5553_v15  ;;  %v1797_v42 = vpop.f32.mrb[105].mxu0  ;;  %v5660_v25 = vadd.f32 %v1950_v59, %v5571_v35 }
 0x2f9   : > { %v3633_v44 = vpop.f32.mrb[70].mxu1 }
 0x2fa   : > { %v1800_v38 = vpop.f32.mrb[106].mxu0  ;;  %v5663_v56 = vadd.f32 %v3633_v44, %v5592_v6  ;;  %v1960_v23 = vpop.f32.mrb[71].mxu1 }
 0x2fb   : > { %v1801_v14 = vadd.f32 %v1800_v38, %v5560_v24  ;;  %v1802_v32 = vpop.f32.mrb[107].mxu0  ;;  %v5667_v46 = vadd.f32 %v1960_v23, %v5585_v3 }
 0x2fd   : > { %v3636_v40 = vpop.f32.mrb[72].mxu1 }
 0x2fe   : > { %v1805_v27 = vpop.f32.mrb[108].mxu0  ;;  %v5670_v15 = vadd.f32 %v3636_v40, %v5605_v19  ;;  %v1970_v17 = vpop.f32.mrb[73].mxu1 }
 0x2ff   : > { %v1806_v35 = vadd.f32 %v1805_v27, %v5567_v60  ;;  %v1807_v58 = vpop.f32.mrb[109].mxu0  ;;  %v5674_v36 = vadd.f32 %v1970_v17, %v5599_v39 }
 0x301   : > { %v3639_v6 = vpop.f32.mrb[74].mxu1 }
 0x302   : > { %v1810_v54 = vpop.f32.mrb[110].mxu0  ;;  %v5677_v24 = vadd.f32 %v3639_v6, %v5617_v51  ;;  %v1980_v20 = vpop.f32.mrb[75].mxu1 }
 0x303   : > { %v1811_v3 = vadd.f32 %v1810_v54, %v5574_v11  ;;  %v1812_v1 = vpop.f32.mrb[111].mxu0  ;;  %v5681_v9 = vadd.f32 %v1980_v20, %v5611_v18 }
 0x305   : > { %v3642_v19 = vpop.f32.mrb[76].mxu1 }
 0x306   : > { %v1815_v21 = vpop.f32.mrb[112].mxu0  ;;  %v5684_v60 = vadd.f32 %v3642_v19, %v5629_v31  ;;  %v1990_v61 = vpop.f32.mrb[77].mxu1 }
 0x307   : > { %v1816_v39 = vadd.f32 %v1815_v21, %v5581_v57  ;;  %v1817_v8 = vpop.f32.mrb[113].mxu0  ;;  %v5688_v49 = vadd.f32 %v1990_v61, %v5623_v26 }
 0x309   : > { %v3645_v51 = vpop.f32.mrb[78].mxu1 }
 0x30a   : > { %v1820_v10 = vpop.f32.mrb[114].mxu0  ;;  %v5690_v22 = vadd.f32 %v3645_v51, %v1781_v37  ;;  %v2000_v11 = vpop.f32.mrb[79].mxu1 }
 0x30b   : > { %v1821_v18 = vadd.f32 %v1820_v10, %v5588_v47  ;;  %v1822_v50 = vpop.f32.mrb[115].mxu0  ;;  %v5694_v41 = vadd.f32 %v2000_v11, %v5635_v16 }
 0x30d   : > { %v3648_v31 = vpop.f32.mrb[80].mxu1 }
 0x30e   : > { %v1825_v30 = vpop.f32.mrb[116].mxu0  ;;  %v5696_v12 = vadd.f32 %v3648_v31, %v1791_v28  ;;  %v2010_v57 = vpop.f32.mrb[81].mxu1 }
 0x30f   : > { %v1826_v7 = vadd.f32 %v1825_v30, %v5595_v5  ;;  %v1827_v26 = vpop.f32.mrb[117].mxu0  ;;  %v5699_v2 = vadd.f32 %v2010_v57, %v1786_v29 }
 0x311   : > { %v3651_v59 = vpop.f32.mrb[82].mxu1 }
 0x312   : > { %v1830_v37 = vpop.f32.mrb[118].mxu0  ;;  %v5701_v42 = vadd.f32 %v3651_v59, %v1801_v14  ;;  %v2020_v44 = vpop.f32.mrb[83].mxu1 }
 0x313   : > { %v1831_v47 = vadd.f32 %v1830_v37, %v5602_v13  ;;  %v1832_v38 = vpop.f32.mrb[119].mxu0  ;;  %v5704_v16 = vadd.f32 %v2020_v44, %v1796_v43 }
 0x315   : > { %v3654_v23 = vpop.f32.mrb[84].mxu1 }
 0x316   : > { %v1835_v32 = vpop.f32.mrb[120].mxu0  ;;  %v5706_v28 = vadd.f32 %v3654_v23, %v1811_v3  ;;  %v2030_v40 = vpop.f32.mrb[85].mxu1 }
 0x317   : > { %v1836_v5 = vadd.f32 %v1835_v32, %v5608_v45  ;;  %v1837_v27 = vpop.f32.mrb[121].mxu0  ;;  %v5709_v29 = vadd.f32 %v2030_v40, %v1806_v35 }
 0x319   : > { %v3657_v17 = vpop.f32.mrb[86].mxu1 }
 0x31a   : > { %v1840_v58 = vpop.f32.mrb[122].mxu0  ;;  %v5711_v14 = vadd.f32 %v3657_v17, %v1821_v18  ;;  %v2040_v6 = vpop.f32.mrb[87].mxu1 }
 0x31b   : > { %v1841_v13 = vadd.f32 %v1840_v58, %v5614_v62  ;;  %v1842_v54 = vpop.f32.mrb[123].mxu0  ;;  %v5714_v43 = vadd.f32 %v2040_v6, %v1816_v39 }
 0x31d   : > { %v3660_v20 = vpop.f32.mrb[88].mxu1 }
 0x31e   : > { %v1845_v1 = vpop.f32.mrb[124].mxu0  ;;  %v5716_v3 = vadd.f32 %v3660_v20, %v1831_v47  ;;  %v2050_v19 = vpop.f32.mrb[89].mxu1 }
 0x31f   : > { %v1846_v45 = vadd.f32 %v1845_v1, %v5620_v52  ;;  %v1847_v21 = vpop.f32.mrb[125].mxu0  ;;  %v5719_v35 = vadd.f32 %v2050_v19, %v1826_v7 }
 0x321   : > { %v3663_v61 = vpop.f32.mrb[90].mxu1 }
 0x322   : > { %v1850_v8 = vpop.f32.mrb[126].mxu0  ;;  %v5721_v51 = vadd.f32 %v3663_v61, %v1841_v13  ;;  %v2060_v10 = vpop.f32.mrb[91].mxu1 }
 0x323   : > { %v1851_v62 = vadd.f32 %v1850_v8, %v5626_v34  ;;  %v1852_v11 = vpop.f32.mrb[127].mxu0  ;;  %v5724_v39 = vadd.f32 %v2060_v10, %v1836_v5 }
 0x325   : > { %v3666_v18 = vpop.f32.mrb[92].mxu1 }
 0x326   : > { %v1855_v50 = vpop.f32.mrb[128].mxu0  ;;  %v5726_v31 = vadd.f32 %v3666_v18, %v1851_v62  ;;  %v2070_v30 = vpop.f32.mrb[93].mxu1 }
 0x327   : > { %v1856_v52 = vadd.f32 %v1855_v50, %v5632_v53  ;;  %v1857_v57 = vpop.f32.mrb[129].mxu0  ;;  %v5729_v7 = vadd.f32 %v2070_v30, %v1846_v45  ;;  %v5739_v53 = vld [vmem:[%s5953_s6] ss:$0 sm:$0xff] }
 0x329   : > { %v3669_v26 = vpop.f32.mrb[94].mxu1 }
 0x32a   : > { %v1860_v59 = vpop.f32.mrb[130].mxu0  ;;  %v2080_v37 = vpop.f32.mrb[95].mxu1 }
 0x32b   : > { %v1861_v44 = vadd.f32 %v1860_v59, %v5638_v63  ;;  %v1862_v47 = vpop.f32.mrb[131].mxu0  ;;  %v5732_v34 = vadd.f32 %v2080_v37, %v1856_v52 }
 0x32d   : > { %v5734_v38 = vadd.f32 %v3669_v26, %v1861_v44  ;;  %v2204_v23 = vpop.f32.mrb[96].mxu1 }
 0x32e   : > { %v3704_v32 = vpop.f32.mrb[132].mxu0  ;;  %v2206_v40 = vpop.f32.mrb[97].mxu1 }
 0x32f   : > { %v2429_v5 = vpop.f32.mrb[133].mxu0 }
 0x330   : > { %v2430_v27 = vadd.f32 %v2429_v5, %v2204_v23 }
 0x331   : > { %v2209_v17 = vpop.f32.mrb[98].mxu1 }
 0x332   : > { %v2588_v58 = vadd.f32 %v2430_v27, %v5646_v55  ;;  %v2435_v6 = vadd.f32 %v3704_v32, %v2209_v17  ;;  %v3707_v63 = vpop.f32.mrb[134].mxu0  ;;  %v2211_v13 = vpop.f32.mrb[99].mxu1 }
 0x333   : > { %v2439_v54 = vpop.f32.mrb[135].mxu0 }
 0x334   : > { %v2589_v20 = vadd.f32 %v2435_v6, %v5642_v4  ;;  %v2627_v1 = vadd.f32 %v5739_v53, %v2588_v58 }
 0x335   : > { %v2214_v19 = vpop.f32.mrb[100].mxu1 }
 0x336   : > { %v2628_v45 = vadd.f32 %v5739_v53, %v2589_v20  ;;  %v2440_v21 = vadd.f32 %v2439_v54, %v2214_v19  ;;  %v3710_v61 = vpop.f32.mrb[136].mxu0  ;;  %v2216_v8 = vpop.f32.mrb[101].mxu1  ;;  %v2659_v10 = vmax.f32 %v2627_v1, 0.0 }
 0x337   : > { %v2449_v62 = vpop.f32.mrb[137].mxu0 }
 0x338   : > { %v2660_v11 = vmax.f32 %v2628_v45, 0.0  ;;  %v2590_v18 = vadd.f32 %v2440_v21, %v5653_v33  ;;  %3782 = vmatprep.mubr.f32.mxu0 %v2659_v10 }
 0x339   : > { %v2219_v55 = vpop.f32.mrb[102].mxu1 }
 0x33a   : > { %v2445_v50 = vadd.f32 %v3707_v63, %v2219_v55  ;;  %v3713_v30 = vpop.f32.mrb[138].mxu0  ;;  %v2221_v52 = vpop.f32.mrb[103].mxu1  ;;  %3783 = vmatmul.mubr.f32.vlgmr.msra.gmra.mrb[154].mxu0 %v2660_v11  ;;  %v2629_v4 = vadd.f32 %v5739_v53, %v2590_v18 }
 0x33b   : > { %v2459_v57 = vpop.f32.mrb[139].mxu0 }
 0x33c   : > { %v2591_v26 = vadd.f32 %v2445_v50, %v5649_v0  ;;  %v2661_v59 = vmax.f32 %v2629_v4, 0.0 }
 0x33d   : > { %v2224_v37 = vpop.f32.mrb[104].mxu1 }
 0x33e   : > { %v2450_v44 = vadd.f32 %v2449_v62, %v2224_v37  ;;  %v3716_v47 = vpop.f32.mrb[140].mxu0  ;;  %v2226_v23 = vpop.f32.mrb[105].mxu1  ;;  %3785 = vmatprep.mubr.f32.mxu0 %v2661_v59  ;;  %v2630_v32 = vadd.f32 %v5739_v53, %v2591_v26 }
 0x33f   : > { %v2469_v33 = vpop.f32.mrb[141].mxu0 }
 0x340   : > { %v2592_v40 = vadd.f32 %v2450_v44, %v5660_v25  ;;  %v2662_v5 = vmax.f32 %v2630_v32, 0.0 }
 0x341   : > { %v2229_v27 = vpop.f32.mrb[106].mxu1 }
 0x342   : > { %v2455_v17 = vadd.f32 %v3710_v61, %v2229_v27  ;;  %v3719_v58 = vpop.f32.mrb[142].mxu0  ;;  %v2231_v6 = vpop.f32.mrb[107].mxu1  ;;  %3786 = vmatmul.mubr.f32.gmra.mrb[156].mxu0 %v2662_v5  ;;  %v2631_v63 = vadd.f32 %v5739_v53, %v2592_v40 }
 0x343   : > { %v2479_v0 = vpop.f32.mrb[143].mxu0 }
 0x344   : > { %v2593_v13 = vadd.f32 %v2455_v17, %v5656_v48  ;;  %v2663_v54 = vmax.f32 %v2631_v63, 0.0 }
 0x345   : > { %v2234_v20 = vpop.f32.mrb[108].mxu1 }
 0x346   : > { %v2460_v1 = vadd.f32 %v2459_v57, %v2234_v20  ;;  %v3722_v19 = vpop.f32.mrb[144].mxu0  ;;  %v2236_v45 = vpop.f32.mrb[109].mxu1  ;;  %3788 = vmatprep.mubr.f32.mxu0 %v2663_v54  ;;  %v2632_v21 = vadd.f32 %v5739_v53, %v2593_v13 }
 0x347   : > { %v2489_v25 = vpop.f32.mrb[145].mxu0 }
 0x348   : > { %v2594_v8 = vadd.f32 %v2460_v1, %v5667_v46  ;;  %v2664_v61 = vmax.f32 %v2632_v21, 0.0 }
 0x349   : > { %v2239_v10 = vpop.f32.mrb[110].mxu1 }
 0x34a   : > { %v2465_v62 = vadd.f32 %v3713_v30, %v2239_v10  ;;  %v5754_v11 = vpop.f32.mrb[146].mxu0  ;;  %v2241_v18 = vpop.f32.mrb[111].mxu1  ;;  %3789 = vmatmul.mubr.f32.gmra.mrb[158].mxu0 %v2664_v61  ;;  %v2633_v48 = vadd.f32 %v5739_v53, %v2594_v8 }
 0x34b   : > { %v2499_v55 = vpop.f32.mrb[147].mxu0 }
 0x34c   : > { %v2595_v50 = vadd.f32 %v2465_v62, %v5663_v56  ;;  %v2665_v52 = vmax.f32 %v2633_v48, 0.0 }
 0x34d   : > { %v2244_v4 = vpop.f32.mrb[112].mxu1 }
 0x34e   : > { %v2470_v57 = vadd.f32 %v2469_v33, %v2244_v4  ;;  %v5758_v26 = vpop.f32.mrb[148].mxu0  ;;  %v2246_v59 = vpop.f32.mrb[113].mxu1  ;;  %3791 = vmatprep.mubr.f32.mxu0 %v2665_v52  ;;  %v2634_v46 = vadd.f32 %v5739_v53, %v2595_v50 }
 0x34f   : > { %v2509_v37 = vpop.f32.mrb[149].mxu0 }
 0x350   : > { %v2596_v30 = vadd.f32 %v2470_v57, %v5674_v36  ;;  %v2666_v44 = vmax.f32 %v2634_v46, 0.0 }
 0x351   : > { %v2249_v23 = vpop.f32.mrb[114].mxu1 }
 0x352   : > { %v2475_v32 = vadd.f32 %v3716_v47, %v2249_v23  ;;  %v5762_v40 = vpop.f32.mrb[150].mxu0  ;;  %v2251_v5 = vpop.f32.mrb[115].mxu1  ;;  %3792 = vmatmul.mubr.f32.gmra.mrb[160].mxu0 %v2666_v44  ;;  %v2635_v56 = vadd.f32 %v5739_v53, %v2596_v30 }
 0x353   : > { %v2519_v27 = vpop.f32.mrb[151].mxu0 }
 0x354   : > { %v2597_v33 = vadd.f32 %v2475_v32, %v5670_v15  ;;  %v2667_v17 = vmax.f32 %v2635_v56, 0.0 }
 0x355   : > { %v2254_v6 = vpop.f32.mrb[116].mxu1 }
 0x356   : > { %v2480_v63 = vadd.f32 %v2479_v0, %v2254_v6  ;;  %v5766_v13 = vpop.f32.mrb[152].mxu0  ;;  %v2256_v54 = vpop.f32.mrb[117].mxu1  ;;  %3794 = vmatprep.mubr.f32.mxu0 %v2667_v17  ;;  %v2636_v36 = vadd.f32 %v5739_v53, %v2597_v33 }
 0x357   : > { %v5769_v20 = vpop.f32.mrb[153].mxu0 }
 0x358   : > { %v2598_v47 = vadd.f32 %v2480_v63, %v5681_v9  ;;  %v2668_v1 = vmax.f32 %v2636_v36, 0.0 }
 0x359   : > { %v2259_v45 = vpop.f32.mrb[118].mxu1 }
 0x35a   : > { %v2485_v21 = vadd.f32 %v3719_v58, %v2259_v45  ;;  %v2261_v8 = vpop.f32.mrb[119].mxu1  ;;  %3795 = vmatmul.mubr.f32.gmra.mrb[162].mxu0 %v2668_v1  ;;  %v2637_v15 = vadd.f32 %v5739_v53, %v2598_v47 }
 0x35c   : > { %v2599_v61 = vadd.f32 %v2485_v21, %v5677_v24  ;;  %v2669_v0 = vmax.f32 %v2637_v15, 0.0 }
 0x35d   : > { %v2264_v10 = vpop.f32.mrb[120].mxu1 }
 0x35e   : > { %v2490_v62 = vadd.f32 %v2489_v25, %v2264_v10  ;;  %v2266_v18 = vpop.f32.mrb[121].mxu1  ;;  %3797 = vmatprep.mubr.f32.mxu0 %v2669_v0  ;;  %v2638_v48 = vadd.f32 %v5739_v53, %v2599_v61 }
 0x360   : > { %v2600_v50 = vadd.f32 %v2490_v62, %v5688_v49  ;;  %v2670_v52 = vmax.f32 %v2638_v48, 0.0 }
 0x361   : > { %v2269_v9 = vpop.f32.mrb[122].mxu1 }
 0x362   : > { %v2495_v4 = vadd.f32 %v3722_v19, %v2269_v9  ;;  %v2271_v57 = vpop.f32.mrb[123].mxu1  ;;  %3798 = vmatmul.mubr.f32.gmra.mrb[164].mxu0 %v2670_v52  ;;  %v2639_v58 = vadd.f32 %v5739_v53, %v2600_v50 }
 0x364   : > { %v2601_v59 = vadd.f32 %v2495_v4, %v5684_v60  ;;  %v2671_v46 = vmax.f32 %v2639_v58, 0.0 }
 0x365   : > { %v2274_v24 = vpop.f32.mrb[124].mxu1 }
 0x366   : > { %v2500_v30 = vadd.f32 %v2499_v55, %v2274_v24  ;;  %v2276_v44 = vpop.f32.mrb[125].mxu1  ;;  %3800 = vmatprep.mubr.f32.mxu0 %v2671_v46  ;;  %v2640_v25 = vadd.f32 %v5739_v53, %v2601_v59 }
 0x368   : > { %v2602_v23 = vadd.f32 %v2500_v30, %v5694_v41  ;;  %v2672_v32 = vmax.f32 %v2640_v25, 0.0 }
 0x369   : > { %v2279_v49 = vpop.f32.mrb[126].mxu1 }
 0x36a   : > { %v2505_v5 = vadd.f32 %v5754_v11, %v2279_v49  ;;  %v2281_v19 = vpop.f32.mrb[127].mxu1  ;;  %3801 = vmatmul.mubr.f32.gmra.mrb[166].mxu0 %v2672_v32  ;;  %v2641_v56 = vadd.f32 %v5739_v53, %v2602_v23 }
 0x36c   : > { %v2603_v33 = vadd.f32 %v2505_v5, %v5690_v22  ;;  %v2673_v60 = vmax.f32 %v2641_v56, 0.0 }
 0x36d   : > { %v2284_v17 = vpop.f32.mrb[128].mxu1 }
 0x36e   : > { %v2510_v6 = vadd.f32 %v2509_v37, %v2284_v17  ;;  %v2286_v55 = vpop.f32.mrb[129].mxu1  ;;  %3803 = vmatprep.mubr.f32.mxu0 %v2673_v60  ;;  %v2642_v63 = vadd.f32 %v5739_v53, %v2603_v33 }
 0x370   : > { %v2604_v54 = vadd.f32 %v2510_v6, %v5699_v2  ;;  %v2674_v41 = vmax.f32 %v2642_v63, 0.0 }
 0x371   : > { %v2289_v36 = vpop.f32.mrb[130].mxu1 }
 0x372   : > { %v2515_v47 = vadd.f32 %v5758_v26, %v2289_v36  ;;  %v2291_v11 = vpop.f32.mrb[131].mxu1  ;;  %3804 = vmatmul.mubr.f32.gmra.mrb[168].mxu0 %v2674_v41  ;;  %v2643_v1 = vadd.f32 %v5739_v53, %v2604_v54 }
 0x374   : > { %v2605_v45 = vadd.f32 %v2515_v47, %v5696_v12  ;;  %v2675_v22 = vmax.f32 %v2643_v1, 0.0 }
 0x375   : > { %v2294_v21 = vpop.f32.mrb[132].mxu1 }
 0x376   : > { %v2520_v8 = vadd.f32 %v2519_v27, %v2294_v21  ;;  %v2296_v37 = vpop.f32.mrb[133].mxu1  ;;  %3806 = vmatprep.mubr.f32.mxu0 %v2675_v22  ;;  %v2644_v15 = vadd.f32 %v5739_v53, %v2605_v45 }
 0x378   : > { %v2606_v61 = vadd.f32 %v2520_v8, %v5704_v16  ;;  %v2676_v2 = vmax.f32 %v2644_v15, 0.0 }
 0x379   : > { %v2299_v0 = vpop.f32.mrb[134].mxu1 }
 0x37a   : > { %v2525_v10 = vadd.f32 %v5762_v40, %v2299_v0  ;;  %v2301_v26 = vpop.f32.mrb[135].mxu1  ;;  %3807 = vmatmul.mubr.f32.gmra.mrb[170].mxu0 %v2676_v2  ;;  %v2645_v62 = vadd.f32 %v5739_v53, %v2606_v61 }
 0x37c   : > { %v2607_v18 = vadd.f32 %v2525_v10, %v5701_v42  ;;  %v2677_v12 = vmax.f32 %v2645_v62, 0.0 }
 0x37d   : > { %v2304_v48 = vpop.f32.mrb[136].mxu1 }
 0x37e   : > { %v2530_v27 = vadd.f32 %v5769_v20, %v2304_v48  ;;  %v2306_v50 = vpop.f32.mrb[137].mxu1  ;;  %3809 = vmatprep.mubr.f32.mxu0 %v2677_v12  ;;  %v2646_v52 = vadd.f32 %v5739_v53, %v2607_v18 }
 0x380   : > { %v2608_v16 = vadd.f32 %v2530_v27, %v5709_v29  ;;  %v2678_v9 = vmax.f32 %v2646_v52, 0.0 }
 0x381   : > { %v2309_v4 = vpop.f32.mrb[138].mxu1 }
 0x382   : > { %v2535_v40 = vadd.f32 %v5766_v13, %v2309_v4  ;;  %v2311_v57 = vpop.f32.mrb[139].mxu1  ;;  %3810 = vmatmul.mubr.f32.gmra.mrb[172].mxu0 %v2678_v9  ;;  %v2647_v58 = vadd.f32 %v5739_v53, %v2608_v16 }
 0x384   : > { %v2609_v42 = vadd.f32 %v2535_v40, %v5706_v28  ;;  %v2679_v59 = vmax.f32 %v2647_v58, 0.0 }
 0x385   : > { %v2314_v46 = vpop.f32.mrb[140].mxu1 }
 0x386   : > { %v2316_v24 = vpop.f32.mrb[141].mxu1  ;;  %3812 = vmatprep.mubr.f32.mxu0 %v2679_v59  ;;  %v2648_v20 = vadd.f32 %v5739_v53, %v2609_v42 }
 0x388   : > { %v2680_v30 = vmax.f32 %v2648_v20, 0.0 }
 0x389   : > { %v2319_v44 = vpop.f32.mrb[142].mxu1 }
 0x38a   : > { %v2321_v25 = vpop.f32.mrb[143].mxu1  ;;  %3813 = vmatmul.mubr.f32.gmra.mrb[174].mxu0 %v2680_v30 }
 0x38d   : > { %v2324_v29 = vpop.f32.mrb[144].mxu1 }
 0x38e   : > { %v2326_v23 = vpop.f32.mrb[145].mxu1 }
 0x391   : > { %v2329_v32 = vpop.f32.mrb[146].mxu1 }
 0x392   : > { %v2331_v13 = vpop.f32.mrb[147].mxu1 }
 0x395   : > { %v2334_v49 = vpop.f32.mrb[148].mxu1 }
 0x396   : > { %v2336_v5 = vpop.f32.mrb[149].mxu1 }
 0x399   : > { %v2339_v19 = vpop.f32.mrb[150].mxu1 }
 0x39a   : > { %v2341_v56 = vpop.f32.mrb[151].mxu1 }
 0x39d   : > { %v2344_v33 = vpop.f32.mrb[152].mxu1 }
 0x39e   : > { %v2346_v28 = vpop.f32.mrb[153].mxu1 }
 0x39f   : > { %v4294_v28 = vld [vmem:[#allocation2 + $0x10] sm:$0xff] }
 0x3a1   : > { %v2349_v60 = vpop.f32.mrb[154].mxu1 }
 0x3a2   : > { %v2351_v17 = vpop.f32.mrb[155].mxu1 }
 0x3a5   : > { %v2354_v6 = vpop.f32.mrb[156].mxu1 }
 0x3a6   : > { %v2356_v55 = vpop.f32.mrb[157].mxu1 }
 0x3a9   : > { %v2359_v63 = vpop.f32.mrb[158].mxu1 }
 0x3aa   : > { %v2361_v54 = vpop.f32.mrb[159].mxu1 }
 0x3ab   : > { %v4295_v54 = vld [vmem:[#allocation2 + $0x28] sm:$0xff] }
 0x3ad   : > { %v3737_v41 = vpop.f32.mrb[160].mxu1 }
 0x3ae   : > { %v2545_v36 = vadd.f32 %v3737_v41, %v2319_v44  ;;  %v2539_v47 = vpop.f32.mrb[161].mxu1 }
 0x3af   : > { %v2540_v11 = vadd.f32 %v2539_v47, %v2314_v46 }
 0x3b0   : > { %v2611_v1 = vadd.f32 %v2545_v36, %v5711_v14  ;;  %v4296_v36 = vld [vmem:[#allocation2 + $0x20] sm:$0xff] }
 0x3b1   : > { %v2610_v45 = vadd.f32 %v2540_v11, %v5714_v43  ;;  %v3740_v22 = vpop.f32.mrb[162].mxu1 }
 0x3b2   : > { %v2555_v21 = vadd.f32 %v3740_v22, %v2329_v32  ;;  %v2549_v8 = vpop.f32.mrb[163].mxu1  ;;  %v2650_v37 = vadd.f32 %v5739_v53, %v2611_v1 }
 0x3b3   : > { %v2550_v15 = vadd.f32 %v2549_v8, %v2324_v29  ;;  %v2649_v61 = vadd.f32 %v5739_v53, %v2610_v45 }
 0x3b4   : > { %v2613_v2 = vadd.f32 %v2555_v21, %v5716_v3  ;;  %v2682_v12 = vmax.f32 %v2650_v37, 0.0  ;;  %v4297_v21 = vld [vmem:[#allocation2 + $0x38] sm:$0xff]  ;;  %v4298_v37 = vld [vmem:[#allocation2 + $0x30] sm:$0xff] }
 0x3b5   : > { %v2612_v0 = vadd.f32 %v2550_v15, %v5719_v35  ;;  %v3743_v10 = vpop.f32.mrb[164].mxu1  ;;  %v2681_v26 = vmax.f32 %v2649_v61, 0.0 }
 0x3b6   : > { %v2565_v62 = vadd.f32 %v3743_v10, %v2339_v19  ;;  %v2559_v18 = vpop.f32.mrb[165].mxu1  ;;  %v2652_v14 = vadd.f32 %v5739_v53, %v2613_v2 }
 0x3b7   : > { %v2560_v43 = vadd.f32 %v2559_v18, %v2334_v49  ;;  %3815 = vmatprep.mubr.f32.mxu0 %v2681_v26  ;;  %v2651_v48 = vadd.f32 %v5739_v53, %v2612_v0  ;;  %v4299_v26 = vld [vmem:[#allocation2 + $0x48] sm:$0xff]  ;;  %v4300_v18 = vld [vmem:[#allocation2 + $0x40] sm:$0xff] }
 0x3b8   : > { %v2615_v27 = vadd.f32 %v2565_v62, %v5721_v51  ;;  %3816 = vmatmul.mubr.f32.gmra.mrb[176].mxu0 %v2682_v12  ;;  %v2684_v9 = vmax.f32 %v2652_v14, 0.0 }
 0x3b9   : > { %v2614_v50 = vadd.f32 %v2560_v43, %v5724_v39  ;;  %v3746_v52 = vpop.f32.mrb[166].mxu1  ;;  %v2683_v3 = vmax.f32 %v2651_v48, 0.0 }
 0x3ba   : > { %v2575_v16 = vadd.f32 %v3746_v52, %v2349_v60  ;;  %v2569_v35 = vpop.f32.mrb[167].mxu1  ;;  %v2654_v4 = vadd.f32 %v5739_v53, %v2615_v27 }
 0x3bb   : > { %v2570_v40 = vadd.f32 %v2569_v35, %v2344_v33  ;;  %3818 = vmatprep.mubr.f32.mxu0 %v2683_v3  ;;  %v2653_v57 = vadd.f32 %v5739_v53, %v2614_v50  ;;  %v4301_v50 = vld [vmem:[#allocation2 + $0x58] sm:$0xff]  ;;  %v4302_v3 = vld [vmem:[#allocation2 + $0x50] sm:$0xff] }
 0x3bc   : > { %v2617_v58 = vadd.f32 %v2575_v16, %v5726_v31  ;;  %3819 = vmatmul.mubr.f32.gmra.mrb[178].mxu0 %v2684_v9  ;;  %v2686_v24 = vmax.f32 %v2654_v4, 0.0 }
 0x3bd   : > { %v2616_v42 = vadd.f32 %v2570_v40, %v5729_v7  ;;  %v3749_v51 = vpop.f32.mrb[168].mxu1  ;;  %v2685_v59 = vmax.f32 %v2653_v57, 0.0  ;;  %v4303_v57 = vld [vmem:[#allocation2 + $0x68] sm:$0xff] }
 0x3be   : > { %v2585_v46 = vadd.f32 %v3749_v51, %v2359_v63  ;;  %v2579_v39 = vpop.f32.mrb[169].mxu1  ;;  %v2656_v20 = vadd.f32 %v5739_v53, %v2617_v58 }
 0x3bf   : > { %v2580_v30 = vadd.f32 %v2579_v39, %v2354_v6  ;;  %3821 = vmatprep.mubr.f32.mxu0 %v2685_v59  ;;  %v2655_v44 = vadd.f32 %v5739_v53, %v2616_v42  ;;  %v4304_v42 = vld [vmem:[#allocation2 + $0x60] sm:$0xff] }
 0x3c0   : > { %v2619_v25 = vadd.f32 %v2585_v46, %v5734_v38  ;;  %3822 = vmatmul.mubr.f32.gmra.mrb[180].mxu0 %v2686_v24  ;;  %v2688_v23 = vmax.f32 %v2656_v20, 0.0  ;;  %v5823_v38 = vld [vmem:[%s5955_s8] ss:$0 sm:$0xff]  ;;  %v4305_v20 = vld [vmem:[#allocation2 + $0x78] sm:$0xff] }
 0x3c1   : > { %v2618_v29 = vadd.f32 %v2580_v30, %v5732_v34  ;;  %v2687_v31 = vmax.f32 %v2655_v44, 0.0  ;;  %v4306_v44 = vld [vmem:[#allocation2 + $0x70] sm:$0xff] }
 0x3c2   : > { %v2658_v7 = vadd.f32 %v5739_v53, %v2619_v25 }
 0x3c3   : > { %3824 = vmatprep.mubr.f32.mxu0 %v2687_v31  ;;  %v2657_v32 = vadd.f32 %v5739_v53, %v2618_v29  ;;  %v4293_v53 = vld [vmem:[#allocation2 + $0x18] sm:$0xff] }
 0x3c4   : > { %3825 = vmatmul.mubr.f32.gmra.mrb[182].mxu0 %v2688_v23  ;;  %v2690_v49 = vmax.f32 %v2658_v7, 0.0 }
 0x3c5   : > { %v2689_v13 = vmax.f32 %v2657_v32, 0.0  ;;  %v4307_v32 = vld [vmem:[#allocation2 + $0x88] sm:$0xff] }
 0x3c7   : > { %3827 = vmatprep.mubr.f32.mxu0 %v2689_v13 }
 0x3c8   : > { %3828 = vmatmul.mubr.f32.gmra.mrb[184].mxu0 %v2690_v49  ;;  %v4308_v49 = vld [vmem:[#allocation2 + $0x80] sm:$0xff] }
 0x40d   : > { %v3784_v34 = vpop.f32.mrb[154].mxu0 }
 0x40e   : > { %v2786_v5 = vadd.f32 %v3784_v34, %v5823_v38  ;;  %v2780_v19 = vpop.f32.mrb[155].mxu0 }
 0x40f   : > { %v2781_v56 = vadd.f32 %v5823_v38, %v2780_v19 }
 0x410   : > { %v2940_v33 = vadd.f32 %v4293_v53, %v2786_v5 }
 0x411   : > { %v2939_v60 = vadd.f32 %v4294_v28, %v2781_v56 }
 0x412   : > { %2972 = vst [vmem:[%s4796_s17 + $0x8] sm:$0xff] %v2940_v33  ;;  %v4309_v33 = vld [vmem:[#allocation2 + $0x98] sm:$0xff] }
 0x413   : > { %2971 = vst [vmem:[%s4796_s17] sm:$0xff] %v2939_v60  ;;  %v4310_v60 = vld [vmem:[#allocation2 + $0x90] sm:$0xff] }
 0x415   : > { %v3787_v17 = vpop.f32.mrb[156].mxu0 }
 0x416   : > { %v2796_v6 = vadd.f32 %v3787_v17, %v5823_v38  ;;  %v2790_v55 = vpop.f32.mrb[157].mxu0 }
 0x417   : > { %v2791_v63 = vadd.f32 %v5823_v38, %v2790_v55 }
 0x418   : > { %v2942_v41 = vadd.f32 %v4295_v54, %v2796_v6 }
 0x419   : > { %v2941_v47 = vadd.f32 %v4296_v36, %v2791_v63 }
 0x41a   : > { %2974 = vst [vmem:[%s4796_s17 + $0x18] sm:$0xff] %v2942_v41  ;;  %v4311_v41 = vld [vmem:[#allocation2 + $0xa8] sm:$0xff] }
 0x41b   : > { %2973 = vst [vmem:[%s4796_s17 + $0x10] sm:$0xff] %v2941_v47  ;;  %v4312_v47 = vld [vmem:[#allocation2 + $0xa0] sm:$0xff] }
 0x41d   : > { %v3790_v11 = vpop.f32.mrb[158].mxu0 }
 0x41e   : > { %v2806_v1 = vadd.f32 %v3790_v11, %v5823_v38  ;;  %v2800_v45 = vpop.f32.mrb[159].mxu0 }
 0x41f   : > { %v2801_v22 = vadd.f32 %v5823_v38, %v2800_v45 }
 0x420   : > { %v2944_v8 = vadd.f32 %v4297_v21, %v2806_v1 }
 0x421   : > { %v2943_v15 = vadd.f32 %v4298_v37, %v2801_v22 }
 0x422   : > { %2976 = vst [vmem:[%s4796_s17 + $0x28] sm:$0xff] %v2944_v8  ;;  %v4313_v8 = vld [vmem:[#allocation2 + $0xb8] sm:$0xff] }
 0x423   : > { %2975 = vst [vmem:[%s4796_s17 + $0x20] sm:$0xff] %v2943_v15  ;;  %v4314_v15 = vld [vmem:[#allocation2 + $0xb0] sm:$0xff] }
 0x425   : > { %v3793_v61 = vpop.f32.mrb[160].mxu0 }
 0x426   : > { %v2816_v2 = vadd.f32 %v3793_v61, %v5823_v38  ;;  %v2810_v0 = vpop.f32.mrb[161].mxu0 }
 0x427   : > { %v2811_v10 = vadd.f32 %v5823_v38, %v2810_v0 }
 0x428   : > { %v2946_v62 = vadd.f32 %v4299_v26, %v2816_v2 }
 0x429   : > { %v2945_v12 = vadd.f32 %v4300_v18, %v2811_v10 }
 0x42a   : > { %2978 = vst [vmem:[%s4796_s17 + $0x38] sm:$0xff] %v2946_v62  ;;  %v4315_v62 = vld [vmem:[#allocation2 + $0xc8] sm:$0xff] }
 0x42b   : > { %2977 = vst [vmem:[%s4796_s17 + $0x30] sm:$0xff] %v2945_v12  ;;  %v4316_v12 = vld [vmem:[#allocation2 + $0xc0] sm:$0xff] }
 0x42d   : > { %v3796_v14 = vpop.f32.mrb[162].mxu0 }
 0x42e   : > { %v2826_v43 = vadd.f32 %v3796_v14, %v5823_v38  ;;  %v2820_v48 = vpop.f32.mrb[163].mxu0 }
 0x42f   : > { %v2821_v27 = vadd.f32 %v5823_v38, %v2820_v48 }
 0x430   : > { %v2948_v52 = vadd.f32 %v4301_v50, %v2826_v43 }
 0x431   : > { %v2947_v16 = vadd.f32 %v4302_v3, %v2821_v27 }
 0x432   : > { %2980 = vst [vmem:[%s4796_s17 + $0x48] sm:$0xff] %v2948_v52  ;;  %v4317_v52 = vld [vmem:[#allocation2 + $0xd8] sm:$0xff] }
 0x433   : > { %2979 = vst [vmem:[%s4796_s17 + $0x40] sm:$0xff] %v2947_v16  ;;  %v4318_v16 = vld [vmem:[#allocation2 + $0xd0] sm:$0xff] }
 0x435   : > { %v3799_v35 = vpop.f32.mrb[164].mxu0 }
 0x436   : > { %v2836_v9 = vadd.f32 %v3799_v35, %v5823_v38  ;;  %v2830_v4 = vpop.f32.mrb[165].mxu0 }
 0x437   : > { %v2831_v40 = vadd.f32 %v5823_v38, %v2830_v4 }
 0x438   : > { %v2950_v58 = vadd.f32 %v4303_v57, %v2836_v9 }
 0x439   : > { %v2949_v51 = vadd.f32 %v4304_v42, %v2831_v40 }
 0x43a   : > { %2982 = vst [vmem:[%s4796_s17 + $0x58] sm:$0xff] %v2950_v58  ;;  %v4319_v58 = vld [vmem:[#allocation2 + $0xe8] sm:$0xff] }
 0x43b   : > { %2981 = vst [vmem:[%s4796_s17 + $0x50] sm:$0xff] %v2949_v51  ;;  %v4320_v51 = vld [vmem:[#allocation2 + $0xe0] sm:$0xff] }
 0x43d   : > { %v3802_v59 = vpop.f32.mrb[166].mxu0 }
 0x43e   : > { %v2846_v46 = vadd.f32 %v3802_v59, %v5823_v38  ;;  %v2840_v39 = vpop.f32.mrb[167].mxu0 }
 0x43f   : > { %v2841_v24 = vadd.f32 %v5823_v38, %v2840_v39 }
 0x440   : > { %v2952_v30 = vadd.f32 %v4305_v20, %v2846_v46 }
 0x441   : > { %v2951_v25 = vadd.f32 %v4306_v44, %v2841_v24 }
 0x442   : > { %2984 = vst [vmem:[%s4796_s17 + $0x68] sm:$0xff] %v2952_v30  ;;  %v4321_v30 = vld [vmem:[#allocation2 + $0xf8] sm:$0xff] }
 0x443   : > { %2983 = vst [vmem:[%s4796_s17 + $0x60] sm:$0xff] %v2951_v25  ;;  %v4322_v25 = vld [vmem:[#allocation2 + $0xf0] sm:$0xff] }
 0x445   : > { %v3805_v29 = vpop.f32.mrb[168].mxu0 }
 0x446   : > { %v2856_v31 = vadd.f32 %v3805_v29, %v5823_v38  ;;  %v2850_v23 = vpop.f32.mrb[169].mxu0 }
 0x447   : > { %v2851_v7 = vadd.f32 %v5823_v38, %v2850_v23 }
 0x448   : > { %v2954_v13 = vadd.f32 %v4307_v32, %v2856_v31 }
 0x449   : > { %v2953_v34 = vadd.f32 %v4308_v49, %v2851_v7 }
 0x44a   : > { %2986 = vst [vmem:[%s4796_s17 + $0x78] sm:$0xff] %v2954_v13  ;;  %v4323_v13 = vld [vmem:[#allocation2 + $0x108] sm:$0xff] }
 0x44b   : > { %2985 = vst [vmem:[%s4796_s17 + $0x70] sm:$0xff] %v2953_v34  ;;  %v4324_v34 = vld [vmem:[#allocation2 + $0x100] sm:$0xff] }
 0x44d   : > { %v3808_v5 = vpop.f32.mrb[170].mxu0 }
 0x44e   : > { %v2866_v19 = vadd.f32 %v3808_v5, %v5823_v38  ;;  %v2860_v56 = vpop.f32.mrb[171].mxu0 }
 0x44f   : > { %v2861_v53 = vadd.f32 %v5823_v38, %v2860_v56 }
 0x450   : > { %v2956_v28 = vadd.f32 %v4309_v33, %v2866_v19 }
 0x451   : > { %v2955_v17 = vadd.f32 %v4310_v60, %v2861_v53 }
 0x452   : > { %2988 = vst [vmem:[%s4796_s17 + $0x88] sm:$0xff] %v2956_v28 }
 0x453   : > { %2987 = vst [vmem:[%s4796_s17 + $0x80] sm:$0xff] %v2955_v17 }
 0x455   : > { %v3811_v6 = vpop.f32.mrb[172].mxu0 }
 0x456   : > { %v2876_v55 = vadd.f32 %v3811_v6, %v5823_v38  ;;  %v2870_v63 = vpop.f32.mrb[173].mxu0 }
 0x457   : > { %v2871_v54 = vadd.f32 %v5823_v38, %v2870_v63 }
 0x458   : > { %v2958_v36 = vadd.f32 %v4311_v41, %v2876_v55 }
 0x459   : > { %v2957_v11 = vadd.f32 %v4312_v47, %v2871_v54 }
 0x45a   : > { %2990 = vst [vmem:[%s4796_s17 + $0x98] sm:$0xff] %v2958_v36 }
 0x45b   : > { %2989 = vst [vmem:[%s4796_s17 + $0x90] sm:$0xff] %v2957_v11 }
 0x45d   : > { %v3814_v1 = vpop.f32.mrb[174].mxu0 }
 0x45e   : > { %v2886_v45 = vadd.f32 %v3814_v1, %v5823_v38  ;;  %v2880_v22 = vpop.f32.mrb[175].mxu0 }
 0x45f   : > { %v2881_v21 = vadd.f32 %v5823_v38, %v2880_v22 }
 0x460   : > { %v2960_v37 = vadd.f32 %v4313_v8, %v2886_v45 }
 0x461   : > { %v2959_v61 = vadd.f32 %v4314_v15, %v2881_v21 }
 0x462   : > { %2992 = vst [vmem:[%s4796_s17 + $0xa8] sm:$0xff] %v2960_v37 }
 0x463   : > { %2991 = vst [vmem:[%s4796_s17 + $0xa0] sm:$0xff] %v2959_v61 }
 0x48b   : > { %v3817_v2 = vpop.f32.mrb[176].mxu0 }
 0x48c   : > { %v2896_v0 = vadd.f32 %v3817_v2, %v5823_v38  ;;  %v2890_v10 = vpop.f32.mrb[177].mxu0 }
 0x48d   : > { %v2891_v26 = vadd.f32 %v5823_v38, %v2890_v10 }
 0x48e   : > { %v2962_v18 = vadd.f32 %v4315_v62, %v2896_v0 }
 0x48f   : > { %v2961_v14 = vadd.f32 %v4316_v12, %v2891_v26  ;;  %v3820_v43 = vpop.f32.mrb[178].mxu0 }
 0x490   : > { %2994 = vst [vmem:[%s4796_s17 + $0xb8] sm:$0xff] %v2962_v18  ;;  %v2906_v48 = vadd.f32 %v3820_v43, %v5823_v38  ;;  %v2900_v27 = vpop.f32.mrb[179].mxu0 }
 0x491   : > { %2993 = vst [vmem:[%s4796_s17 + $0xb0] sm:$0xff] %v2961_v14  ;;  %v2901_v50 = vadd.f32 %v5823_v38, %v2900_v27 }
 0x492   : > { %v2964_v3 = vadd.f32 %v4317_v52, %v2906_v48 }
 0x493   : > { %v2963_v35 = vadd.f32 %v4318_v16, %v2901_v50  ;;  %v3823_v9 = vpop.f32.mrb[180].mxu0 }
 0x494   : > { %2996 = vst [vmem:[%s4796_s17 + $0xc8] sm:$0xff] %v2964_v3  ;;  %v2916_v4 = vadd.f32 %v3823_v9, %v5823_v38  ;;  %v2910_v40 = vpop.f32.mrb[181].mxu0 }
 0x495   : > { %2995 = vst [vmem:[%s4796_s17 + $0xc0] sm:$0xff] %v2963_v35  ;;  %v2911_v57 = vadd.f32 %v5823_v38, %v2910_v40 }
 0x496   : > { %v2966_v42 = vadd.f32 %v4319_v58, %v2916_v4 }
 0x497   : > { %v2965_v59 = vadd.f32 %v4320_v51, %v2911_v57  ;;  %v3826_v46 = vpop.f32.mrb[182].mxu0 }
 0x498   : > { %2998 = vst [vmem:[%s4796_s17 + $0xd8] sm:$0xff] %v2966_v42  ;;  %v2926_v39 = vadd.f32 %v3826_v46, %v5823_v38  ;;  %v2920_v24 = vpop.f32.mrb[183].mxu0 }
 0x499   : > { %2997 = vst [vmem:[%s4796_s17 + $0xd0] sm:$0xff] %v2965_v59  ;;  %v2921_v20 = vadd.f32 %v5823_v38, %v2920_v24 }
 0x49a   : > { %v2968_v44 = vadd.f32 %v4321_v30, %v2926_v39 }
 0x49b   : > { %v2967_v29 = vadd.f32 %v4322_v25, %v2921_v20  ;;  %v3829_v31 = vpop.f32.mrb[184].mxu0 }
 0x49c   : > { %3000 = vst [vmem:[%s4796_s17 + $0xe8] sm:$0xff] %v2968_v44  ;;  %v2936_v23 = vadd.f32 %v3829_v31, %v5823_v38  ;;  %v2930_v7 = vpop.f32.mrb[185].mxu0 }
 0x49d   : > { %2999 = vst [vmem:[%s4796_s17 + $0xe0] sm:$0xff] %v2967_v29  ;;  %v2931_v32 = vadd.f32 %v5823_v38, %v2930_v7 }
 0x49e   : > { %v2970_v49 = vadd.f32 %v4323_v13, %v2936_v23 }
 0x49f   : > { %v2969_v5 = vadd.f32 %v4324_v34, %v2931_v32 }
 0x4a0   : > { %3002 = vst [vmem:[%s4796_s17 + $0xf8] sm:$0xff] %v2970_v49 }
 0x4a1   : > { %3001 = vst [vmem:[%s4796_s17 + $0xf0] sm:$0xff] %v2969_v5 }
 0x4a2   : > { %4446 = shalt.err (!%p4443_p2)
}
 0x4a3   : > { %s4447_s27 = scalar_lea.hbm %s5893_s5, 4096  ;;  %s4451_s24 = scalar_lea.hbm %s5956_s9, 8192 }
 0x4a4   : > { %p4448_p3 = scmp.ne.s32.totalorder %s5893_s5, %s4447_s27  ;;  %p4452_p7 = scmp.lt.u32.totalorder %s5893_s5, %s5956_s9 }
 0x4a5   : > { %p4453_p9 = scmp.lt.u32.totalorder %s4451_s24, %s4447_s27  ;;  %p4455_p4 = scmp.lt.u32.totalorder %s4447_s27, %s5893_s5 }
 0x4a6   : > { %p4449_p5 = pnand %p4448_p3, %p6093_p1 }
 0x4a7   : > { %p4454_p12 = por %p4453_p9, %p4452_p7 }
 0x4a8   : > { %p4450_p6 = pneg %p4449_p5 }
 0x4a9   : > { %p4456_p13 = por %p4455_p4, %p4454_p12 }
 0x4ab   : > { %p4457_p8 = pnand %p4456_p13, %p4450_p6 }
 0x4ad   : > { %4460 = shalt.err (!%p4457_p8)
}
 0x4ae   : > { %s4533_s22 = smov 128   ;;  %s4534_s18 = smov 8  }
 0x4af   : > { %4162 = dma.vmem_to_hbm [thread:$0]  (%p6093_p1), %s5895_s28, 4096, %s5893_s5, %s5901_s30, %s4533_s22, %s4533_s22, %s4534_s18  }
 0x4b0 PF: > { %s6094_s15 = sld [smem:[#allocation24_spill]]  ;;  %s6095_s20 = sld [smem:[#allocation28_spill]] }
 0x4b1   : > { %p4184_p10 = scmp.ge.s32.totalorder %s4521_s14, 2 }
 0x4b6   : > { %s3035_s13 = sand.u32 1, %s6094_s15   ;;  %p6096_p11 = scmp.ne.s32.totalorder %s6095_s20, 0 }
 0x4b7   : > { %s3036_s29 = scalar_lea.sflag [#allocation7], %s3035_s13 }
 0x4b8   : > { %p4175_p0 = pnand %p4184_p10, %p6096_p11 }
 0x4ba   : > { %4496 = dma.done.wait (!%p4175_p0), %s3036_s29, 4096  }
 0x4bb   : > { %4498 = vsyncadd (!%p4175_p0), %s3036_s29, 4294963200  ;;  %s24_s14 = sadd.s32 1, %s4521_s14   ;;  %s6097_s23 = sld [smem:[#allocation25_spill]] }
 0x4bc   : > { %p21_p2 = scmp.ge.s32.totalorder %s24_s14, 4   ;;  %s6098_s11 = sld [smem:[#allocation29_spill]] }
 0x4bd   : > { %s6099_s12 = sld [smem:[#allocation26_spill]]  ;;  %s6100_s13 = sld [smem:[#allocation27_spill]] }
 0x4be   : > { %s6101_s30 = smov %s4505_s10  ;;  %23 = sbr.rel (!%p21_p2) target bundleno = 8 (0x8), region = 148 }
 0x4c1   : > { %s6102_s10 = smov %s6097_s23 }
 0x4c5   :  { %3041 = vsyncpa [#allocation6], 1 }
 0x4c6   :  { %3043 = vsyncpa [#allocation6 + $0x1], 1 }
 0x4c7   :  { %3044 = vsyncpa [#allocation9], 1 }
 0x4c8   :  { %3045 = vsyncpa [#allocation7], 1 }
 0x4c9   :  { %3047 = vsyncpa [#allocation7 + $0x1], 1 }
 0x4ca   :  { %3048 = vsyncmov [#allocation4] }
 0x4cd   :  { %s3049_s19 = vpop.sfrf %3048 }
 0x4ce   :  { %p3172_p1 = scmp.ne.s32.totalorder %s3049_s19, 0 }
 0x4d0   :  { %3053 = shalt.err (%p3172_p1)  }
 0x4d1   :  { %3055 = vsyncmov [#allocation4 + $0x1] }
 0x4d4   :  { %s3056_s28 = vpop.sfrf %3055 }
 0x4d5   :  { %p3173_p3 = scmp.ne.s32.totalorder %s3056_s28, 0 }
 0x4d7   :  { %3060 = shalt.err (%p3173_p3)  }
 0x4d8   :  { %3062 = vsyncmov [#allocation4 + $0x2] }
 0x4db   :  { %s3063_s5 = vpop.sfrf %3062 }
 0x4dc   :  { %p3174_p5 = scmp.ne.s32.totalorder %s3063_s5, 0 }
 0x4de   :  { %3067 = shalt.err (%p3174_p5)  }

</bundles_post_ra>
